<compile_context>
chip_gen: v7x
topology: tpu7x:2x2x1
jax: 0.10.0
libtpu: 0.0.40
codegen_flags: <defaults>
</compile_context>

<pallas_src>
import math

import jax
import jax.numpy as jnp
from jax import lax
from jax.experimental import pallas as pl
from jax.experimental.pallas import tpu as pltpu


# ----------------------------------------------------------------------------
# Fused kernel: 2-layer LSTM + last-valid-step select + head + loss
# (one grid step = one batch tile of Bt sequences)
# ----------------------------------------------------------------------------
def policy_net_kernel(x_ref, len_ref,
                      wih0_ref, whh0_ref, b0_ref,
                      wih1_ref, whh1_ref, b1_ref,
                      wlin_ref, blin_ref, vembT_ref,
                      lbl_ref, ltype_ref,
                      scores_ref, loss_ref,
                      xproj_ref, ustack_ref):
    SB, Ep = x_ref.shape                  # x block: (S*Bt, Ep), row = t*Bt + b
    Bt = len_ref.shape[0]
    S = SB // Bt
    Hp = whh0_ref.shape[0]
    U = wlin_ref.shape[1] // Ep
    V = vembT_ref.shape[1]
    L = lbl_ref.shape[1]

    # ---- hoisted layer-0 input projection: ONE matmul with M = S*Bt --------
    xproj_ref[...] = (
        jnp.dot(x_ref[...], wih0_ref[...], preferred_element_type=jnp.float32)
        + b0_ref[...])

    b1 = jnp.broadcast_to(b1_ref[...], (Bt, 4 * Hp))     # hoisted broadcast
    len_m1 = len_ref[...] - 1                             # (Bt, 1) int32

    def gates_to_hc(gates, c):
        # gate blocks land on 128-lane (Hp) boundaries -> aligned full slices
        i_g = jax.nn.sigmoid(gates[:, 0 * Hp:1 * Hp])
        f_g = jax.nn.sigmoid(gates[:, 1 * Hp:2 * Hp])
        g_g = jnp.tanh(gates[:, 2 * Hp:3 * Hp])
        o_g = jax.nn.sigmoid(gates[:, 3 * Hp:4 * Hp])
        c_new = f_g * c + i_g * g_g
        h_new = (o_g * jnp.tanh(c_new)).astype(jnp.bfloat16)
        return h_new, c_new

    def step(t, carry):
        h0, c0, h1, c1, hsel = carry                      # h*, hsel bf16; c* f32
        row = pl.multiple_of(t * Bt, Bt)
        # layer 0: input projection already done; only the recurrent matmul.
        g0 = xproj_ref[pl.ds(row, Bt), :] + jnp.dot(
            h0, whh0_ref[...], preferred_element_type=jnp.float32)
        h0n, c0n = gates_to_hc(g0, c0)
        # TODO(synk): nn.LSTM applies dropout(p=0.2) between layers in train
        # mode; omitted here for determinism.
        # layer 1: two independent dots (h1 dot can start immediately).
        g1 = (jnp.dot(h0n, wih1_ref[...], preferred_element_type=jnp.float32)
              + jnp.dot(h1, whh1_ref[...], preferred_element_type=jnp.float32)
              + b1)
        h1n, c1n = gates_to_hc(g1, c1)
        # out[i][sum(mask[i]) - 1] -> latch layer-2 hidden state at t == len-1
        hsel = jnp.where(len_m1 == t, h1n, hsel)
        return (h0n, c0n, h1n, c1n, hsel)

    zf = jnp.zeros((Bt, Hp), jnp.float32)
    zb = jnp.zeros((Bt, Hp), jnp.bfloat16)
    carry = (zb, zf, zb, zf, zb)
    _, _, _, _, hsel = lax.fori_loop(0, S, step, carry, unroll=min(S, 8))

    # --- head: tanh(linear(h)) -> ONE (U*Bt,Ep)@(Ep,V) matmul -> max over U -
    u_all = jnp.tanh(
        jnp.dot(hsel, wlin_ref[...], preferred_element_type=jnp.float32)
        + blin_ref[...])                                  # (Bt, U*Ep) f32
    for j in range(U):                                    # aligned tile copies
        ustack_ref[j * Bt:(j + 1) * Bt, :] = u_all[:, j * Ep:(j + 1) * Ep]
    all_scores = jnp.dot(ustack_ref[...].astype(jnp.bfloat16), vembT_ref[...],
                         preferred_element_type=jnp.float32)   # (U*Bt, V)
    scores = all_scores[0:Bt, :]
    for j in range(1, U):                                 # VPU max-reduce
        scores = jnp.maximum(scores, all_scores[j * Bt:(j + 1) * Bt, :])
    scores_ref[...] = scores

    # log_softmax over videos
    m = jnp.max(scores, axis=-1, keepdims=True)
    z = scores - m
    lse = jnp.log(jnp.sum(jnp.exp(z), axis=-1, keepdims=True))
    lp = z - lse                                          # (Bt, V)

    # gather(log_softmax, -1, last_label): static L-loop, no (B,L,V) one-hot
    lbl = lbl_ref[...]                                    # (Bt, L) int32
    lt = ltype_ref[...]                                   # (Bt, L) f32
    iota_v = lax.broadcasted_iota(jnp.int32, (Bt, V), 1)
    acc = jnp.zeros((Bt, 1), jnp.float32)
    for j in range(L):
        sel = iota_v == lbl[:, j:j + 1]
        gj = jnp.sum(jnp.where(sel, lp, 0.0), axis=-1, keepdims=True)
        acc = acc + lt[:, j:j + 1] * gj

    # matches torch: (label_type * logits).mean(1)  (divides by L)
    logits = acc * (1.0 / L)
    # lane-dense store; wrapper reads column 0
    loss_ref[...] = jnp.broadcast_to(-0.5 * logits, (Bt, 128))


# ----------------------------------------------------------------------------
# pallas_call wrapper
# ----------------------------------------------------------------------------
def _vmem_limit_bytes(S, Bt, Ep, Hp, U, V, L):
    bf, f4 = 2, 4
    x_blk = S * Bt * Ep * bf
    weights = ((Ep + 3 * Hp) * 4 * Hp + Hp * U * Ep + Ep * V) * bf \
        + (2 * 4 * Hp + U * Ep) * f4
    per_tile_io = Bt * (1 + 2 * L) * f4 + Bt * V * f4 + Bt * 128 * f4
    scratch = S * Bt * 4 * Hp * f4 + U * Bt * Ep * f4
    total = 2 * (x_blk + per_tile_io) + weights + scratch + (4 << 20)
    return int(max(min(total, 100 << 20), 32 << 20))


def run_policy_net(x_tiles, lengths, p, labels, label_type, *, Bt):
    nbt, SB, Ep = x_tiles.shape
    B = nbt * Bt
    S = SB // Bt
    Hp = p["whh0"].shape[0]
    U = p["wlin"].shape[1] // Ep
    V = p["vembT"].shape[1]
    L = labels.shape[1]

    const2 = lambda i: (0, 0)
    in_specs = [
        pl.BlockSpec((None, SB, Ep), lambda i: (i, 0, 0)),   # x tile (squeezed)
        pl.BlockSpec((Bt, 1), lambda i: (i, 0)),             # lengths
        pl.BlockSpec(p["wih0"].shape, const2),
        pl.BlockSpec(p["whh0"].shape, const2),
        pl.BlockSpec(p["b0"].shape, const2),
        pl.BlockSpec(p["wih1"].shape, const2),
        pl.BlockSpec(p["whh1"].shape, const2),
        pl.BlockSpec(p["b1"].shape, const2),
        pl.BlockSpec(p["wlin"].shape, const2),
        pl.BlockSpec(p["blin"].shape, const2),
        pl.BlockSpec(p["vembT"].shape, const2),
        pl.BlockSpec((Bt, L), lambda i: (i, 0)),             # labels
        pl.BlockSpec((Bt, L), lambda i: (i, 0)),             # label_type
    ]
    out_specs = (
        pl.BlockSpec((Bt, V), lambda i: (i, 0)),             # scores
        pl.BlockSpec((Bt, 128), lambda i: (i, 0)),           # loss slab
    )
    scores, loss_slab = pl.pallas_call(
        policy_net_kernel,
        out_shape=(jax.ShapeDtypeStruct((B, V), jnp.float32),
                   jax.ShapeDtypeStruct((B, 128), jnp.float32)),
        grid=(nbt,),
        in_specs=in_specs,
        out_specs=out_specs,
        scratch_shapes=[pltpu.VMEM((SB, 4 * Hp), jnp.float32),   # xproj
                        pltpu.VMEM((U * Bt, Ep), jnp.float32)],  # u-stack
        compiler_params=pltpu.CompilerParams(
            dimension_semantics=("parallel",),
            vmem_limit_bytes=_vmem_limit_bytes(S, Bt, Ep, Hp, U, V, L)),
    )(x_tiles, lengths,
      p["wih0"], p["whh0"], p["b0"],
      p["wih1"], p["whh1"], p["b1"],
      p["wlin"], p["blin"], p["vembT"],
      labels, label_type)
    return scores, loss_slab[:, 0]


# ----------------------------------------------------------------------------
# Parameter construction: PyTorch-layout params -> padded, stacked, bf16
# kernel-facing tensors (padding rows/cols are zero -> results unchanged).
# ----------------------------------------------------------------------------
def _pad_gate_w(w, in_dim, in_pad, H, Hp):
    # w: (4H, in_dim) PyTorch layout -> (in_pad, 4*Hp), gate blocks at Hp
    wt = jnp.transpose(w.reshape(4, H, in_dim), (2, 0, 1))       # (in, 4, H)
    out = jnp.zeros((in_pad, 4, Hp), jnp.float32).at[:in_dim, :, :H].set(wt)
    return out.reshape(in_pad, 4 * Hp).astype(jnp.bfloat16)


def _pad_gate_b(b, H, Hp):
    out = jnp.zeros((4, Hp), jnp.float32).at[:, :H].set(b.reshape(4, H))
    return out.reshape(1, 4 * Hp)


def init_params(key, E, H, U, V, N_ids, Ep, Hp):
    ks = jax.random.split(key, 12)
    s = 1.0 / math.sqrt(H)

    def uni(k, shape):
        return jax.random.uniform(k, shape, jnp.float32, -s, s)

    # raw PyTorch-layout parameters (synthetic, deterministic)
    wih0 = uni(ks[0], (4 * H, E)); whh0 = uni(ks[1], (4 * H, H))
    b0 = uni(ks[2], (4 * H,)) + uni(ks[3], (4 * H,))
    wih1 = uni(ks[4], (4 * H, H)); whh1 = uni(ks[5], (4 * H, H))
    b1 = uni(ks[6], (4 * H,)) + uni(ks[7], (4 * H,))
    wlin = uni(ks[8], (U * E, H)); blin = uni(ks[9], (U * E,))
    graph_emb = 0.1 * jax.random.normal(ks[10], (N_ids, E), jnp.float32)
    video_emb = 0.1 * jax.random.normal(ks[11], (V, E), jnp.float32)

    p = {}
    p["wih0"] = _pad_gate_w(wih0, E, Ep, H, Hp)           # (Ep, 4Hp) bf16
    p["whh0"] = _pad_gate_w(whh0, H, Hp, H, Hp)           # (Hp, 4Hp) bf16
    p["b0"] = _pad_gate_b(b0, H, Hp)                      # (1, 4Hp)  f32
    p["wih1"] = _pad_gate_w(wih1, H, Hp, H, Hp)
    p["whh1"] = _pad_gate_w(whh1, H, Hp, H, Hp)
    p["b1"] = _pad_gate_b(b1, H, Hp)

    wlin_t = jnp.transpose(wlin.reshape(U, E, H), (2, 0, 1))   # (H, U, E)
    p["wlin"] = (jnp.zeros((Hp, U, Ep), jnp.float32)
                 .at[:H, :, :E].set(wlin_t)
                 .reshape(Hp, U * Ep).astype(jnp.bfloat16))    # (Hp, U*Ep)
    p["blin"] = (jnp.zeros((U, Ep), jnp.float32)
                 .at[:, :E].set(blin.reshape(U, E))
                 .reshape(1, U * Ep))                          # (1, U*Ep) f32

    p["graph_emb"] = (jnp.zeros((N_ids, Ep), jnp.float32)
                      .at[:, :E].set(graph_emb)
                      .astype(jnp.bfloat16))                   # (N_ids, Ep)
    p["vembT"] = (jnp.zeros((Ep, V), jnp.float32)
                  .at[:E, :].set(video_emb.T).astype(jnp.bfloat16))  # (Ep, V)

    # padding invariants the kernel relies on (pads must be exactly zero)
    assert float(jnp.max(jnp.abs(p["vembT"][E:, :].astype(jnp.float32)))) == 0.0
    assert float(jnp.max(jnp.abs(p["blin"].reshape(U, Ep)[:, E:]))) == 0.0
    return p


# ----------------------------------------------------------------------------
# Forward wrapper (glue: embedding lookup, batch-tile layout, top-k)
# ----------------------------------------------------------------------------
def policy_net_regression_forward(inputs, label, label_p, label_type, mask,
                                  params, *, batch_tile=8):
    B, S = inputs.shape
    Ep = params["graph_emb"].shape[1]
    Bt = min(batch_tile, B)
    assert B % Bt == 0 and Bt % 8 == 0, "batch tile must be sublane-aligned"
    nbt = B // Bt

    # inputs = inputs * mask ; graph_embeddings lookup (glue, not hot path)
    x_ids = (inputs * mask).astype(jnp.int32)
    emb = params["graph_emb"][x_ids]                       # (B, S, Ep) bf16
    # per-batch-tile layout: x_tiles[i, t*Bt + b, :] = emb[i*Bt + b, t, :]
    x_tiles = (emb.reshape(nbt, Bt, S, Ep)
               .transpose(0, 2, 1, 3)
               .reshape(nbt, S * Bt, Ep))

    lengths = jnp.sum(mask, axis=1).astype(jnp.int32).reshape(B, 1)

    scores, loss = run_policy_net(x_tiles, lengths, params,
                                  label.astype(jnp.int32),
                                  label_type.astype(jnp.float32), Bt=Bt)

    # topk(softmax(outputs)) recommendations (glue; k=100 when topk == -1)
    k = min(100, scores.shape[-1])
    _, rec_outputs = lax.top_k(jax.nn.softmax(scores, axis=-1), k)

    # NOTE: label_p is accepted but (as in the reference loss path) unused.
    # TODO(synk): accuracy bookkeeping (last_acc / last_count / last_acc_ch)
    # relies on external python dicts (video2channel, home_video_id_sorted);
    # no Pallas equivalent — not reproduced.
    return loss, loss, rec_outputs


if __name__ == "__main__":
    B, S = 16, 8           # batch, sequence length (B spans 2 batch tiles)
    E, H = 32, 32          # emb_dim, hidden_dim (logical)
    Ep, Hp = 128, 128      # lane-padded kernel-facing dims
    U = 8                  # num_user_state (small, vs. default 100)
    V = 256                # number of videos
    L = 4                  # number of labels per example
    N_IDS = 64             # graph-embedding vocabulary

    key = jax.random.PRNGKey(0)
    k_in, k_lbl, k_lp, k_lt, k_par = jax.random.split(key, 5)

    inputs = jax.random.randint(k_in, (B, S), 0, N_IDS, dtype=jnp.int32)
    mask = (jnp.ones((B, S), jnp.int32)
            .at[1, 6:].set(0)          # seq 1 has length 6
            .at[9, 3:].set(0))         # seq 9 has length 3
    label = jax.random.randint(k_lbl, (B, L), 0, V, dtype=jnp.int32)
    label_p = jax.random.uniform(k_lp, (B, L), jnp.float32)
    label_type = (jax.random.uniform(k_lt, (B, L)) > 0.3).astype(jnp.float32)

    params = init_params(k_par, E, H, U, V, N_IDS, Ep, Hp)

    loss_a, loss_b, rec = policy_net_regression_forward(
        inputs, label, label_p, label_type, mask, params, batch_tile=8)
    jax.block_until_ready((loss_a, loss_b, rec))
    print("KERNEL_OK")
</pallas_src>

<mosaic_0001>
module attributes {stable_mosaic.version = 11 : i64} {
  func.func @policy_net_kernel(%arg0: i32, %arg1: memref<1x64x128xbf16, #tpu.memory_space<vmem>>, %arg2: memref<8x1xi32, #tpu.memory_space<vmem>>, %arg3: memref<128x512xbf16, #tpu.memory_space<vmem>>, %arg4: memref<128x512xbf16, #tpu.memory_space<vmem>>, %arg5: memref<1x512xf32, #tpu.memory_space<vmem>>, %arg6: memref<128x512xbf16, #tpu.memory_space<vmem>>, %arg7: memref<128x512xbf16, #tpu.memory_space<vmem>>, %arg8: memref<1x512xf32, #tpu.memory_space<vmem>>, %arg9: memref<128x1024xbf16, #tpu.memory_space<vmem>>, %arg10: memref<1x1024xf32, #tpu.memory_space<vmem>>, %arg11: memref<128x256xbf16, #tpu.memory_space<vmem>>, %arg12: memref<8x4xi32, #tpu.memory_space<vmem>>, %arg13: memref<8x4xf32, #tpu.memory_space<vmem>>, %arg14: memref<8x256xf32, #tpu.memory_space<vmem>>, %arg15: memref<8x128xf32, #tpu.memory_space<vmem>>, %arg16: memref<64x512xf32, #tpu.memory_space<vmem>>, %arg17: memref<64x128xf32, #tpu.memory_space<vmem>>) attributes {dimension_semantics = [#tpu.dimension_semantics<parallel>], iteration_bounds = array<i64: 2>, scalar_prefetch = 0 : i64, scratch_operands = 2 : i64, tpu.core_type = #tpu.core_type<tc>, window_params = [{transform_indices = @transform_0, window_bounds = array<i64: 1, 64, 128>}, {transform_indices = @transform_1, window_bounds = array<i64: 8, 1>}, {pipeline_mode = #tpu.pipeline_mode<synchronous>, transform_indices = @transform_2, window_bounds = array<i64: 128, 512>}, {pipeline_mode = #tpu.pipeline_mode<synchronous>, transform_indices = @transform_3, window_bounds = array<i64: 128, 512>}, {pipeline_mode = #tpu.pipeline_mode<synchronous>, transform_indices = @transform_4, window_bounds = array<i64: 1, 512>}, {pipeline_mode = #tpu.pipeline_mode<synchronous>, transform_indices = @transform_5, window_bounds = array<i64: 128, 512>}, {pipeline_mode = #tpu.pipeline_mode<synchronous>, transform_indices = @transform_6, window_bounds = array<i64: 128, 512>}, {pipeline_mode = #tpu.pipeline_mode<synchronous>, transform_indices = @transform_7, window_bounds = array<i64: 1, 512>}, {pipeline_mode = #tpu.pipeline_mode<synchronous>, transform_indices = @transform_8, window_bounds = array<i64: 128, 1024>}, {pipeline_mode = #tpu.pipeline_mode<synchronous>, transform_indices = @transform_9, window_bounds = array<i64: 1, 1024>}, {pipeline_mode = #tpu.pipeline_mode<synchronous>, transform_indices = @transform_10, window_bounds = array<i64: 128, 256>}, {transform_indices = @transform_11, window_bounds = array<i64: 8, 4>}, {transform_indices = @transform_12, window_bounds = array<i64: 8, 4>}, {transform_indices = @transform_13, window_bounds = array<i64: 8, 256>}, {transform_indices = @transform_14, window_bounds = array<i64: 8, 128>}]} {
    %c0 = arith.constant 0 : index
    %c0_0 = arith.constant 0 : index
    %c0_1 = arith.constant 0 : index
    %0 = vector.load %arg1[%c0, %c0_0, %c0_1] : memref<1x64x128xbf16, #tpu.memory_space<vmem>>, vector<1x64x128xbf16>
    %1 = vector.shape_cast %0 : vector<1x64x128xbf16> to vector<64x128xbf16>
    %c0_2 = arith.constant 0 : index
    %c0_3 = arith.constant 0 : index
    %2 = vector.load %arg3[%c0_2, %c0_3] : memref<128x512xbf16, #tpu.memory_space<vmem>>, vector<128x512xbf16>
    %cst = arith.constant dense<0.000000e+00> : vector<64x512xf32>
    %3 = tpu.matmul %1, %2, %cst {dimension_numbers = #tpu.dot_dimension_numbers<[1], [0], [0], [1], [0, 0, 1, 1], [], []>} : vector<64x128xbf16>, vector<128x512xbf16>, vector<64x512xf32> -> vector<64x512xf32>
    %c0_4 = arith.constant 0 : index
    %c0_5 = arith.constant 0 : index
    %4 = vector.load %arg5[%c0_4, %c0_5] : memref<1x512xf32, #tpu.memory_space<vmem>>, vector<1x512xf32>
    %5 = vector.broadcast %4 : vector<1x512xf32> to vector<64x512xf32>
    %6 = arith.addf %3, %5 : vector<64x512xf32>
    %c0_6 = arith.constant 0 : index
    %c0_7 = arith.constant 0 : index
    %7 = vector.load %arg16[%c0_6, %c0_7] : memref<64x512xf32, #tpu.memory_space<vmem>>, vector<64x512xf32>
    tpu.vector_store %arg16[%c0_6, %c0_7], %6 {strides = array<i32>} : memref<64x512xf32, #tpu.memory_space<vmem>>, vector<64x512xf32>,
    %c0_8 = arith.constant 0 : index
    %c0_9 = arith.constant 0 : index
    %8 = vector.load %arg8[%c0_8, %c0_9] : memref<1x512xf32, #tpu.memory_space<vmem>>, vector<1x512xf32>
    %9 = vector.shape_cast %8 : vector<1x512xf32> to vector<1x512xf32>
    %10 = vector.broadcast %9 : vector<1x512xf32> to vector<8x512xf32>
    %c0_10 = arith.constant 0 : index
    %c0_11 = arith.constant 0 : index
    %11 = vector.load %arg2[%c0_10, %c0_11] : memref<8x1xi32, #tpu.memory_space<vmem>>, vector<8x1xi32>
    %c1_i32 = arith.constant 1 : i32
    %12 = vector.broadcast %c1_i32 : i32 to vector<8x1xi32>
    %13 = arith.subi %11, %12 : vector<8x1xi32>
    %cst_12 = arith.constant 0.000000e+00 : f32
    %14 = vector.broadcast %cst_12 : f32 to vector<8x128xf32>
    %cst_13 = arith.constant 0.000000e+00 : bf16
    %15 = vector.broadcast %cst_13 : bf16 to vector<8x128xbf16>
    %c0_i32 = arith.constant 0 : i32
    %c8_i32 = arith.constant 8 : i32
    %16 = arith.muli %c0_i32, %c8_i32 : i32
    %17 = tpu.assume_multiple %16, 8 : i32
    %18 = arith.index_cast %17 : i32 to index
    %c0_14 = arith.constant 0 : index
    %19 = vector.load %arg16[%18, %c0_14] : memref<64x512xf32, #tpu.memory_space<vmem>>, vector<8x512xf32>
    %c0_15 = arith.constant 0 : index
    %c0_16 = arith.constant 0 : index
    %20 = vector.load %arg4[%c0_15, %c0_16] : memref<128x512xbf16, #tpu.memory_space<vmem>>, vector<128x512xbf16>
    %cst_17 = arith.constant dense<0.000000e+00> : vector<8x512xf32>
    %21 = tpu.matmul %15, %20, %cst_17 {dimension_numbers = #tpu.dot_dimension_numbers<[1], [0], [0], [1], [0, 0, 1, 1], [], []>} : vector<8x128xbf16>, vector<128x512xbf16>, vector<8x512xf32> -> vector<8x512xf32>
    %22 = arith.addf %19, %21 : vector<8x512xf32>
    %23 = vector.extract_strided_slice %22 {offsets = [0, 0], sizes = [8, 128], strides = [1, 1]} : vector<8x512xf32> to vector<8x128xf32>
    %24 = arith.negf %23 : vector<8x128xf32>
    %25 = math.exp %24 : vector<8x128xf32>
    %cst_18 = arith.constant 1.000000e+00 : f32
    %26 = vector.broadcast %cst_18 : f32 to vector<8x128xf32>
    %27 = arith.addf %26, %25 : vector<8x128xf32>
    %28 = arith.divf %26, %27 : vector<8x128xf32>
    %29 = vector.extract_strided_slice %22 {offsets = [0, 128], sizes = [8, 128], strides = [1, 1]} : vector<8x512xf32> to vector<8x128xf32>
    %30 = arith.negf %29 : vector<8x128xf32>
    %31 = math.exp %30 : vector<8x128xf32>
    %cst_19 = arith.constant 1.000000e+00 : f32
    %32 = vector.broadcast %cst_19 : f32 to vector<8x128xf32>
    %33 = arith.addf %32, %31 : vector<8x128xf32>
    %34 = arith.divf %32, %33 : vector<8x128xf32>
    %35 = vector.extract_strided_slice %22 {offsets = [0, 256], sizes = [8, 128], strides = [1, 1]} : vector<8x512xf32> to vector<8x128xf32>
    %36 = math.tanh %35 : vector<8x128xf32>
    %37 = vector.extract_strided_slice %22 {offsets = [0, 384], sizes = [8, 128], strides = [1, 1]} : vector<8x512xf32> to vector<8x128xf32>
    %38 = arith.negf %37 : vector<8x128xf32>
    %39 = math.exp %38 : vector<8x128xf32>
    %cst_20 = arith.constant 1.000000e+00 : f32
    %40 = vector.broadcast %cst_20 : f32 to vector<8x128xf32>
    %41 = arith.addf %40, %39 : vector<8x128xf32>
    %42 = arith.divf %40, %41 : vector<8x128xf32>
    %43 = arith.mulf %34, %14 : vector<8x128xf32>
    %44 = arith.mulf %28, %36 : vector<8x128xf32>
    %45 = arith.addf %43, %44 : vector<8x128xf32>
    %46 = math.tanh %45 : vector<8x128xf32>
    %47 = arith.mulf %42, %46 : vector<8x128xf32>
    %48 = arith.truncf %47 : vector<8x128xf32> to vector<8x128xbf16>
    %c0_21 = arith.constant 0 : index
    %c0_22 = arith.constant 0 : index
    %49 = vector.load %arg6[%c0_21, %c0_22] : memref<128x512xbf16, #tpu.memory_space<vmem>>, vector<128x512xbf16>
    %cst_23 = arith.constant dense<0.000000e+00> : vector<8x512xf32>
    %50 = tpu.matmul %48, %49, %cst_23 {dimension_numbers = #tpu.dot_dimension_numbers<[1], [0], [0], [1], [0, 0, 1, 1], [], []>} : vector<8x128xbf16>, vector<128x512xbf16>, vector<8x512xf32> -> vector<8x512xf32>
    %c0_24 = arith.constant 0 : index
    %c0_25 = arith.constant 0 : index
    %51 = vector.load %arg7[%c0_24, %c0_25] : memref<128x512xbf16, #tpu.memory_space<vmem>>, vector<128x512xbf16>
    %cst_26 = arith.constant dense<0.000000e+00> : vector<8x512xf32>
    %52 = tpu.matmul %15, %51, %cst_26 {dimension_numbers = #tpu.dot_dimension_numbers<[1], [0], [0], [1], [0, 0, 1, 1], [], []>} : vector<8x128xbf16>, vector<128x512xbf16>, vector<8x512xf32> -> vector<8x512xf32>
    %53 = arith.addf %50, %52 : vector<8x512xf32>
    %54 = arith.addf %53, %10 : vector<8x512xf32>
    %55 = vector.extract_strided_slice %54 {offsets = [0, 0], sizes = [8, 128], strides = [1, 1]} : vector<8x512xf32> to vector<8x128xf32>
    %56 = arith.negf %55 : vector<8x128xf32>
    %57 = math.exp %56 : vector<8x128xf32>
    %cst_27 = arith.constant 1.000000e+00 : f32
    %58 = vector.broadcast %cst_27 : f32 to vector<8x128xf32>
    %59 = arith.addf %58, %57 : vector<8x128xf32>
    %60 = arith.divf %58, %59 : vector<8x128xf32>
    %61 = vector.extract_strided_slice %54 {offsets = [0, 128], sizes = [8, 128], strides = [1, 1]} : vector<8x512xf32> to vector<8x128xf32>
    %62 = arith.negf %61 : vector<8x128xf32>
    %63 = math.exp %62 : vector<8x128xf32>
    %cst_28 = arith.constant 1.000000e+00 : f32
    %64 = vector.broadcast %cst_28 : f32 to vector<8x128xf32>
    %65 = arith.addf %64, %63 : vector<8x128xf32>
    %66 = arith.divf %64, %65 : vector<8x128xf32>
    %67 = vector.extract_strided_slice %54 {offsets = [0, 256], sizes = [8, 128], strides = [1, 1]} : vector<8x512xf32> to vector<8x128xf32>
    %68 = math.tanh %67 : vector<8x128xf32>
    %69 = vector.extract_strided_slice %54 {offsets = [0, 384], sizes = [8, 128], strides = [1, 1]} : vector<8x512xf32> to vector<8x128xf32>
    %70 = arith.negf %69 : vector<8x128xf32>
    %71 = math.exp %70 : vector<8x128xf32>
    %cst_29 = arith.constant 1.000000e+00 : f32
    %72 = vector.broadcast %cst_29 : f32 to vector<8x128xf32>
    %73 = arith.addf %72, %71 : vector<8x128xf32>
    %74 = arith.divf %72, %73 : vector<8x128xf32>
    %75 = arith.mulf %66, %14 : vector<8x128xf32>
    %76 = arith.mulf %60, %68 : vector<8x128xf32>
    %77 = arith.addf %75, %76 : vector<8x128xf32>
    %78 = math.tanh %77 : vector<8x128xf32>
    %79 = arith.mulf %74, %78 : vector<8x128xf32>
    %80 = arith.truncf %79 : vector<8x128xf32> to vector<8x128xbf16>
    %81 = vector.broadcast %c0_i32 : i32 to vector<8x1xi32>
    %82 = arith.cmpi eq, %13, %81 : vector<8x1xi32>
    %83 = vector.shape_cast %82 : vector<8x1xi1> to vector<8x1xi1>
    %84 = vector.broadcast %83 : vector<8x1xi1> to vector<8x128xi1>
    %85 = arith.select %84, %80, %15 : vector<8x128xi1>, vector<8x128xbf16>
    %c1_i32_30 = arith.constant 1 : i32
    %c8_i32_31 = arith.constant 8 : i32
    %86 = arith.muli %c1_i32_30, %c8_i32_31 : i32
    %87 = tpu.assume_multiple %86, 8 : i32
    %88 = arith.index_cast %87 : i32 to index
    %c0_32 = arith.constant 0 : index
    %89 = vector.load %arg16[%88, %c0_32] : memref<64x512xf32, #tpu.memory_space<vmem>>, vector<8x512xf32>
    %c0_33 = arith.constant 0 : index
    %c0_34 = arith.constant 0 : index
    %90 = vector.load %arg4[%c0_33, %c0_34] : memref<128x512xbf16, #tpu.memory_space<vmem>>, vector<128x512xbf16>
    %cst_35 = arith.constant dense<0.000000e+00> : vector<8x512xf32>
    %91 = tpu.matmul %48, %90, %cst_35 {dimension_numbers = #tpu.dot_dimension_numbers<[1], [0], [0], [1], [0, 0, 1, 1], [], []>} : vector<8x128xbf16>, vector<128x512xbf16>, vector<8x512xf32> -> vector<8x512xf32>
    %92 = arith.addf %89, %91 : vector<8x512xf32>
    %93 = vector.extract_strided_slice %92 {offsets = [0, 0], sizes = [8, 128], strides = [1, 1]} : vector<8x512xf32> to vector<8x128xf32>
    %94 = arith.negf %93 : vector<8x128xf32>
    %95 = math.exp %94 : vector<8x128xf32>
    %cst_36 = arith.constant 1.000000e+00 : f32
    %96 = vector.broadcast %cst_36 : f32 to vector<8x128xf32>
    %97 = arith.addf %96, %95 : vector<8x128xf32>
    %98 = arith.divf %96, %97 : vector<8x128xf32>
    %99 = vector.extract_strided_slice %92 {offsets = [0, 128], sizes = [8, 128], strides = [1, 1]} : vector<8x512xf32> to vector<8x128xf32>
    %100 = arith.negf %99 : vector<8x128xf32>
    %101 = math.exp %100 : vector<8x128xf32>
    %cst_37 = arith.constant 1.000000e+00 : f32
    %102 = vector.broadcast %cst_37 : f32 to vector<8x128xf32>
    %103 = arith.addf %102, %101 : vector<8x128xf32>
    %104 = arith.divf %102, %103 : vector<8x128xf32>
    %105 = vector.extract_strided_slice %92 {offsets = [0, 256], sizes = [8, 128], strides = [1, 1]} : vector<8x512xf32> to vector<8x128xf32>
    %106 = math.tanh %105 : vector<8x128xf32>
    %107 = vector.extract_strided_slice %92 {offsets = [0, 384], sizes = [8, 128], strides = [1, 1]} : vector<8x512xf32> to vector<8x128xf32>
    %108 = arith.negf %107 : vector<8x128xf32>
    %109 = math.exp %108 : vector<8x128xf32>
    %cst_38 = arith.constant 1.000000e+00 : f32
    %110 = vector.broadcast %cst_38 : f32 to vector<8x128xf32>
    %111 = arith.addf %110, %109 : vector<8x128xf32>
    %112 = arith.divf %110, %111 : vector<8x128xf32>
    %113 = arith.mulf %104, %45 : vector<8x128xf32>
    %114 = arith.mulf %98, %106 : vector<8x128xf32>
    %115 = arith.addf %113, %114 : vector<8x128xf32>
    %116 = math.tanh %115 : vector<8x128xf32>
    %117 = arith.mulf %112, %116 : vector<8x128xf32>
    %118 = arith.truncf %117 : vector<8x128xf32> to vector<8x128xbf16>
    %c0_39 = arith.constant 0 : index
    %c0_40 = arith.constant 0 : index
    %119 = vector.load %arg6[%c0_39, %c0_40] : memref<128x512xbf16, #tpu.memory_space<vmem>>, vector<128x512xbf16>
    %cst_41 = arith.constant dense<0.000000e+00> : vector<8x512xf32>
    %120 = tpu.matmul %118, %119, %cst_41 {dimension_numbers = #tpu.dot_dimension_numbers<[1], [0], [0], [1], [0, 0, 1, 1], [], []>} : vector<8x128xbf16>, vector<128x512xbf16>, vector<8x512xf32> -> vector<8x512xf32>
    %c0_42 = arith.constant 0 : index
    %c0_43 = arith.constant 0 : index
    %121 = vector.load %arg7[%c0_42, %c0_43] : memref<128x512xbf16, #tpu.memory_space<vmem>>, vector<128x512xbf16>
    %cst_44 = arith.constant dense<0.000000e+00> : vector<8x512xf32>
    %122 = tpu.matmul %80, %121, %cst_44 {dimension_numbers = #tpu.dot_dimension_numbers<[1], [0], [0], [1], [0, 0, 1, 1], [], []>} : vector<8x128xbf16>, vector<128x512xbf16>, vector<8x512xf32> -> vector<8x512xf32>
    %123 = arith.addf %120, %122 : vector<8x512xf32>
    %124 = arith.addf %123, %10 : vector<8x512xf32>
    %125 = vector.extract_strided_slice %124 {offsets = [0, 0], sizes = [8, 128], strides = [1, 1]} : vector<8x512xf32> to vector<8x128xf32>
    %126 = arith.negf %125 : vector<8x128xf32>
    %127 = math.exp %126 : vector<8x128xf32>
    %cst_45 = arith.constant 1.000000e+00 : f32
    %128 = vector.broadcast %cst_45 : f32 to vector<8x128xf32>
    %129 = arith.addf %128, %127 : vector<8x128xf32>
    %130 = arith.divf %128, %129 : vector<8x128xf32>
    %131 = vector.extract_strided_slice %124 {offsets = [0, 128], sizes = [8, 128], strides = [1, 1]} : vector<8x512xf32> to vector<8x128xf32>
    %132 = arith.negf %131 : vector<8x128xf32>
    %133 = math.exp %132 : vector<8x128xf32>
    %cst_46 = arith.constant 1.000000e+00 : f32
    %134 = vector.broadcast %cst_46 : f32 to vector<8x128xf32>
    %135 = arith.addf %134, %133 : vector<8x128xf32>
    %136 = arith.divf %134, %135 : vector<8x128xf32>
    %137 = vector.extract_strided_slice %124 {offsets = [0, 256], sizes = [8, 128], strides = [1, 1]} : vector<8x512xf32> to vector<8x128xf32>
    %138 = math.tanh %137 : vector<8x128xf32>
    %139 = vector.extract_strided_slice %124 {offsets = [0, 384], sizes = [8, 128], strides = [1, 1]} : vector<8x512xf32> to vector<8x128xf32>
    %140 = arith.negf %139 : vector<8x128xf32>
    %141 = math.exp %140 : vector<8x128xf32>
    %cst_47 = arith.constant 1.000000e+00 : f32
    %142 = vector.broadcast %cst_47 : f32 to vector<8x128xf32>
    %143 = arith.addf %142, %141 : vector<8x128xf32>
    %144 = arith.divf %142, %143 : vector<8x128xf32>
    %145 = arith.mulf %136, %77 : vector<8x128xf32>
    %146 = arith.mulf %130, %138 : vector<8x128xf32>
    %147 = arith.addf %145, %146 : vector<8x128xf32>
    %148 = math.tanh %147 : vector<8x128xf32>
    %149 = arith.mulf %144, %148 : vector<8x128xf32>
    %150 = arith.truncf %149 : vector<8x128xf32> to vector<8x128xbf16>
    %151 = vector.broadcast %c1_i32_30 : i32 to vector<8x1xi32>
    %152 = arith.cmpi eq, %13, %151 : vector<8x1xi32>
    %153 = vector.shape_cast %152 : vector<8x1xi1> to vector<8x1xi1>
    %154 = vector.broadcast %153 : vector<8x1xi1> to vector<8x128xi1>
    %155 = arith.select %154, %150, %85 : vector<8x128xi1>, vector<8x128xbf16>
    %c2_i32 = arith.constant 2 : i32
    %c8_i32_48 = arith.constant 8 : i32
    %156 = arith.muli %c2_i32, %c8_i32_48 : i32
    %157 = tpu.assume_multiple %156, 8 : i32
    %158 = arith.index_cast %157 : i32 to index
    %c0_49 = arith.constant 0 : index
    %159 = vector.load %arg16[%158, %c0_49] : memref<64x512xf32, #tpu.memory_space<vmem>>, vector<8x512xf32>
    %c0_50 = arith.constant 0 : index
    %c0_51 = arith.constant 0 : index
    %160 = vector.load %arg4[%c0_50, %c0_51] : memref<128x512xbf16, #tpu.memory_space<vmem>>, vector<128x512xbf16>
    %cst_52 = arith.constant dense<0.000000e+00> : vector<8x512xf32>
    %161 = tpu.matmul %118, %160, %cst_52 {dimension_numbers = #tpu.dot_dimension_numbers<[1], [0], [0], [1], [0, 0, 1, 1], [], []>} : vector<8x128xbf16>, vector<128x512xbf16>, vector<8x512xf32> -> vector<8x512xf32>
    %162 = arith.addf %159, %161 : vector<8x512xf32>
    %163 = vector.extract_strided_slice %162 {offsets = [0, 0], sizes = [8, 128], strides = [1, 1]} : vector<8x512xf32> to vector<8x128xf32>
    %164 = arith.negf %163 : vector<8x128xf32>
    %165 = math.exp %164 : vector<8x128xf32>
    %cst_53 = arith.constant 1.000000e+00 : f32
    %166 = vector.broadcast %cst_53 : f32 to vector<8x128xf32>
    %167 = arith.addf %166, %165 : vector<8x128xf32>
    %168 = arith.divf %166, %167 : vector<8x128xf32>
    %169 = vector.extract_strided_slice %162 {offsets = [0, 128], sizes = [8, 128], strides = [1, 1]} : vector<8x512xf32> to vector<8x128xf32>
    %170 = arith.negf %169 : vector<8x128xf32>
    %171 = math.exp %170 : vector<8x128xf32>
    %cst_54 = arith.constant 1.000000e+00 : f32
    %172 = vector.broadcast %cst_54 : f32 to vector<8x128xf32>
    %173 = arith.addf %172, %171 : vector<8x128xf32>
    %174 = arith.divf %172, %173 : vector<8x128xf32>
    %175 = vector.extract_strided_slice %162 {offsets = [0, 256], sizes = [8, 128], strides = [1, 1]} : vector<8x512xf32> to vector<8x128xf32>
    %176 = math.tanh %175 : vector<8x128xf32>
    %177 = vector.extract_strided_slice %162 {offsets = [0, 384], sizes = [8, 128], strides = [1, 1]} : vector<8x512xf32> to vector<8x128xf32>
    %178 = arith.negf %177 : vector<8x128xf32>
    %179 = math.exp %178 : vector<8x128xf32>
    %cst_55 = arith.constant 1.000000e+00 : f32
    %180 = vector.broadcast %cst_55 : f32 to vector<8x128xf32>
    %181 = arith.addf %180, %179 : vector<8x128xf32>
    %182 = arith.divf %180, %181 : vector<8x128xf32>
    %183 = arith.mulf %174, %115 : vector<8x128xf32>
    %184 = arith.mulf %168, %176 : vector<8x128xf32>
    %185 = arith.addf %183, %184 : vector<8x128xf32>
    %186 = math.tanh %185 : vector<8x128xf32>
    %187 = arith.mulf %182, %186 : vector<8x128xf32>
    %188 = arith.truncf %187 : vector<8x128xf32> to vector<8x128xbf16>
    %c0_56 = arith.constant 0 : index
    %c0_57 = arith.constant 0 : index
    %189 = vector.load %arg6[%c0_56, %c0_57] : memref<128x512xbf16, #tpu.memory_space<vmem>>, vector<128x512xbf16>
    %cst_58 = arith.constant dense<0.000000e+00> : vector<8x512xf32>
    %190 = tpu.matmul %188, %189, %cst_58 {dimension_numbers = #tpu.dot_dimension_numbers<[1], [0], [0], [1], [0, 0, 1, 1], [], []>} : vector<8x128xbf16>, vector<128x512xbf16>, vector<8x512xf32> -> vector<8x512xf32>
    %c0_59 = arith.constant 0 : index
    %c0_60 = arith.constant 0 : index
    %191 = vector.load %arg7[%c0_59, %c0_60] : memref<128x512xbf16, #tpu.memory_space<vmem>>, vector<128x512xbf16>
    %cst_61 = arith.constant dense<0.000000e+00> : vector<8x512xf32>
    %192 = tpu.matmul %150, %191, %cst_61 {dimension_numbers = #tpu.dot_dimension_numbers<[1], [0], [0], [1], [0, 0, 1, 1], [], []>} : vector<8x128xbf16>, vector<128x512xbf16>, vector<8x512xf32> -> vector<8x512xf32>
    %193 = arith.addf %190, %192 : vector<8x512xf32>
    %194 = arith.addf %193, %10 : vector<8x512xf32>
    %195 = vector.extract_strided_slice %194 {offsets = [0, 0], sizes = [8, 128], strides = [1, 1]} : vector<8x512xf32> to vector<8x128xf32>
    %196 = arith.negf %195 : vector<8x128xf32>
    %197 = math.exp %196 : vector<8x128xf32>
    %cst_62 = arith.constant 1.000000e+00 : f32
    %198 = vector.broadcast %cst_62 : f32 to vector<8x128xf32>
    %199 = arith.addf %198, %197 : vector<8x128xf32>
    %200 = arith.divf %198, %199 : vector<8x128xf32>
    %201 = vector.extract_strided_slice %194 {offsets = [0, 128], sizes = [8, 128], strides = [1, 1]} : vector<8x512xf32> to vector<8x128xf32>
    %202 = arith.negf %201 : vector<8x128xf32>
    %203 = math.exp %202 : vector<8x128xf32>
    %cst_63 = arith.constant 1.000000e+00 : f32
    %204 = vector.broadcast %cst_63 : f32 to vector<8x128xf32>
    %205 = arith.addf %204, %203 : vector<8x128xf32>
    %206 = arith.divf %204, %205 : vector<8x128xf32>
    %207 = vector.extract_strided_slice %194 {offsets = [0, 256], sizes = [8, 128], strides = [1, 1]} : vector<8x512xf32> to vector<8x128xf32>
    %208 = math.tanh %207 : vector<8x128xf32>
    %209 = vector.extract_strided_slice %194 {offsets = [0, 384], sizes = [8, 128], strides = [1, 1]} : vector<8x512xf32> to vector<8x128xf32>
    %210 = arith.negf %209 : vector<8x128xf32>
    %211 = math.exp %210 : vector<8x128xf32>
    %cst_64 = arith.constant 1.000000e+00 : f32
    %212 = vector.broadcast %cst_64 : f32 to vector<8x128xf32>
    %213 = arith.addf %212, %211 : vector<8x128xf32>
    %214 = arith.divf %212, %213 : vector<8x128xf32>
    %215 = arith.mulf %206, %147 : vector<8x128xf32>
    %216 = arith.mulf %200, %208 : vector<8x128xf32>
    %217 = arith.addf %215, %216 : vector<8x128xf32>
    %218 = math.tanh %217 : vector<8x128xf32>
    %219 = arith.mulf %214, %218 : vector<8x128xf32>
    %220 = arith.truncf %219 : vector<8x128xf32> to vector<8x128xbf16>
    %221 = vector.broadcast %c2_i32 : i32 to vector<8x1xi32>
    %222 = arith.cmpi eq, %13, %221 : vector<8x1xi32>
    %223 = vector.shape_cast %222 : vector<8x1xi1> to vector<8x1xi1>
    %224 = vector.broadcast %223 : vector<8x1xi1> to vector<8x128xi1>
    %225 = arith.select %224, %220, %155 : vector<8x128xi1>, vector<8x128xbf16>
    %c3_i32 = arith.constant 3 : i32
    %c8_i32_65 = arith.constant 8 : i32
    %226 = arith.muli %c3_i32, %c8_i32_65 : i32
    %227 = tpu.assume_multiple %226, 8 : i32
    %228 = arith.index_cast %227 : i32 to index
    %c0_66 = arith.constant 0 : index
    %229 = vector.load %arg16[%228, %c0_66] : memref<64x512xf32, #tpu.memory_space<vmem>>, vector<8x512xf32>
    %c0_67 = arith.constant 0 : index
    %c0_68 = arith.constant 0 : index
    %230 = vector.load %arg4[%c0_67, %c0_68] : memref<128x512xbf16, #tpu.memory_space<vmem>>, vector<128x512xbf16>
    %cst_69 = arith.constant dense<0.000000e+00> : vector<8x512xf32>
    %231 = tpu.matmul %188, %230, %cst_69 {dimension_numbers = #tpu.dot_dimension_numbers<[1], [0], [0], [1], [0, 0, 1, 1], [], []>} : vector<8x128xbf16>, vector<128x512xbf16>, vector<8x512xf32> -> vector<8x512xf32>
    %232 = arith.addf %229, %231 : vector<8x512xf32>
    %233 = vector.extract_strided_slice %232 {offsets = [0, 0], sizes = [8, 128], strides = [1, 1]} : vector<8x512xf32> to vector<8x128xf32>
    %234 = arith.negf %233 : vector<8x128xf32>
    %235 = math.exp %234 : vector<8x128xf32>
    %cst_70 = arith.constant 1.000000e+00 : f32
    %236 = vector.broadcast %cst_70 : f32 to vector<8x128xf32>
    %237 = arith.addf %236, %235 : vector<8x128xf32>
    %238 = arith.divf %236, %237 : vector<8x128xf32>
    %239 = vector.extract_strided_slice %232 {offsets = [0, 128], sizes = [8, 128], strides = [1, 1]} : vector<8x512xf32> to vector<8x128xf32>
    %240 = arith.negf %239 : vector<8x128xf32>
    %241 = math.exp %240 : vector<8x128xf32>
    %cst_71 = arith.constant 1.000000e+00 : f32
    %242 = vector.broadcast %cst_71 : f32 to vector<8x128xf32>
    %243 = arith.addf %242, %241 : vector<8x128xf32>
    %244 = arith.divf %242, %243 : vector<8x128xf32>
    %245 = vector.extract_strided_slice %232 {offsets = [0, 256], sizes = [8, 128], strides = [1, 1]} : vector<8x512xf32> to vector<8x128xf32>
    %246 = math.tanh %245 : vector<8x128xf32>
    %247 = vector.extract_strided_slice %232 {offsets = [0, 384], sizes = [8, 128], strides = [1, 1]} : vector<8x512xf32> to vector<8x128xf32>
    %248 = arith.negf %247 : vector<8x128xf32>
    %249 = math.exp %248 : vector<8x128xf32>
    %cst_72 = arith.constant 1.000000e+00 : f32
    %250 = vector.broadcast %cst_72 : f32 to vector<8x128xf32>
    %251 = arith.addf %250, %249 : vector<8x128xf32>
    %252 = arith.divf %250, %251 : vector<8x128xf32>
    %253 = arith.mulf %244, %185 : vector<8x128xf32>
    %254 = arith.mulf %238, %246 : vector<8x128xf32>
    %255 = arith.addf %253, %254 : vector<8x128xf32>
    %256 = math.tanh %255 : vector<8x128xf32>
    %257 = arith.mulf %252, %256 : vector<8x128xf32>
    %258 = arith.truncf %257 : vector<8x128xf32> to vector<8x128xbf16>
    %c0_73 = arith.constant 0 : index
    %c0_74 = arith.constant 0 : index
    %259 = vector.load %arg6[%c0_73, %c0_74] : memref<128x512xbf16, #tpu.memory_space<vmem>>, vector<128x512xbf16>
    %cst_75 = arith.constant dense<0.000000e+00> : vector<8x512xf32>
    %260 = tpu.matmul %258, %259, %cst_75 {dimension_numbers = #tpu.dot_dimension_numbers<[1], [0], [0], [1], [0, 0, 1, 1], [], []>} : vector<8x128xbf16>, vector<128x512xbf16>, vector<8x512xf32> -> vector<8x512xf32>
    %c0_76 = arith.constant 0 : index
    %c0_77 = arith.constant 0 : index
    %261 = vector.load %arg7[%c0_76, %c0_77] : memref<128x512xbf16, #tpu.memory_space<vmem>>, vector<128x512xbf16>
    %cst_78 = arith.constant dense<0.000000e+00> : vector<8x512xf32>
    %262 = tpu.matmul %220, %261, %cst_78 {dimension_numbers = #tpu.dot_dimension_numbers<[1], [0], [0], [1], [0, 0, 1, 1], [], []>} : vector<8x128xbf16>, vector<128x512xbf16>, vector<8x512xf32> -> vector<8x512xf32>
    %263 = arith.addf %260, %262 : vector<8x512xf32>
    %264 = arith.addf %263, %10 : vector<8x512xf32>
    %265 = vector.extract_strided_slice %264 {offsets = [0, 0], sizes = [8, 128], strides = [1, 1]} : vector<8x512xf32> to vector<8x128xf32>
    %266 = arith.negf %265 : vector<8x128xf32>
    %267 = math.exp %266 : vector<8x128xf32>
    %cst_79 = arith.constant 1.000000e+00 : f32
    %268 = vector.broadcast %cst_79 : f32 to vector<8x128xf32>
    %269 = arith.addf %268, %267 : vector<8x128xf32>
    %270 = arith.divf %268, %269 : vector<8x128xf32>
    %271 = vector.extract_strided_slice %264 {offsets = [0, 128], sizes = [8, 128], strides = [1, 1]} : vector<8x512xf32> to vector<8x128xf32>
    %272 = arith.negf %271 : vector<8x128xf32>
    %273 = math.exp %272 : vector<8x128xf32>
    %cst_80 = arith.constant 1.000000e+00 : f32
    %274 = vector.broadcast %cst_80 : f32 to vector<8x128xf32>
    %275 = arith.addf %274, %273 : vector<8x128xf32>
    %276 = arith.divf %274, %275 : vector<8x128xf32>
    %277 = vector.extract_strided_slice %264 {offsets = [0, 256], sizes = [8, 128], strides = [1, 1]} : vector<8x512xf32> to vector<8x128xf32>
    %278 = math.tanh %277 : vector<8x128xf32>
    %279 = vector.extract_strided_slice %264 {offsets = [0, 384], sizes = [8, 128], strides = [1, 1]} : vector<8x512xf32> to vector<8x128xf32>
    %280 = arith.negf %279 : vector<8x128xf32>
    %281 = math.exp %280 : vector<8x128xf32>
    %cst_81 = arith.constant 1.000000e+00 : f32
    %282 = vector.broadcast %cst_81 : f32 to vector<8x128xf32>
    %283 = arith.addf %282, %281 : vector<8x128xf32>
    %284 = arith.divf %282, %283 : vector<8x128xf32>
    %285 = arith.mulf %276, %217 : vector<8x128xf32>
    %286 = arith.mulf %270, %278 : vector<8x128xf32>
    %287 = arith.addf %285, %286 : vector<8x128xf32>
    %288 = math.tanh %287 : vector<8x128xf32>
    %289 = arith.mulf %284, %288 : vector<8x128xf32>
    %290 = arith.truncf %289 : vector<8x128xf32> to vector<8x128xbf16>
    %291 = vector.broadcast %c3_i32 : i32 to vector<8x1xi32>
    %292 = arith.cmpi eq, %13, %291 : vector<8x1xi32>
    %293 = vector.shape_cast %292 : vector<8x1xi1> to vector<8x1xi1>
    %294 = vector.broadcast %293 : vector<8x1xi1> to vector<8x128xi1>
    %295 = arith.select %294, %290, %225 : vector<8x128xi1>, vector<8x128xbf16>
    %c4_i32 = arith.constant 4 : i32
    %c8_i32_82 = arith.constant 8 : i32
    %296 = arith.muli %c4_i32, %c8_i32_82 : i32
    %297 = tpu.assume_multiple %296, 8 : i32
    %298 = arith.index_cast %297 : i32 to index
    %c0_83 = arith.constant 0 : index
    %299 = vector.load %arg16[%298, %c0_83] : memref<64x512xf32, #tpu.memory_space<vmem>>, vector<8x512xf32>
    %c0_84 = arith.constant 0 : index
    %c0_85 = arith.constant 0 : index
    %300 = vector.load %arg4[%c0_84, %c0_85] : memref<128x512xbf16, #tpu.memory_space<vmem>>, vector<128x512xbf16>
    %cst_86 = arith.constant dense<0.000000e+00> : vector<8x512xf32>
    %301 = tpu.matmul %258, %300, %cst_86 {dimension_numbers = #tpu.dot_dimension_numbers<[1], [0], [0], [1], [0, 0, 1, 1], [], []>} : vector<8x128xbf16>, vector<128x512xbf16>, vector<8x512xf32> -> vector<8x512xf32>
    %302 = arith.addf %299, %301 : vector<8x512xf32>
    %303 = vector.extract_strided_slice %302 {offsets = [0, 0], sizes = [8, 128], strides = [1, 1]} : vector<8x512xf32> to vector<8x128xf32>
    %304 = arith.negf %303 : vector<8x128xf32>
    %305 = math.exp %304 : vector<8x128xf32>
    %cst_87 = arith.constant 1.000000e+00 : f32
    %306 = vector.broadcast %cst_87 : f32 to vector<8x128xf32>
    %307 = arith.addf %306, %305 : vector<8x128xf32>
    %308 = arith.divf %306, %307 : vector<8x128xf32>
    %309 = vector.extract_strided_slice %302 {offsets = [0, 128], sizes = [8, 128], strides = [1, 1]} : vector<8x512xf32> to vector<8x128xf32>
    %310 = arith.negf %309 : vector<8x128xf32>
    %311 = math.exp %310 : vector<8x128xf32>
    %cst_88 = arith.constant 1.000000e+00 : f32
    %312 = vector.broadcast %cst_88 : f32 to vector<8x128xf32>
    %313 = arith.addf %312, %311 : vector<8x128xf32>
    %314 = arith.divf %312, %313 : vector<8x128xf32>
    %315 = vector.extract_strided_slice %302 {offsets = [0, 256], sizes = [8, 128], strides = [1, 1]} : vector<8x512xf32> to vector<8x128xf32>
    %316 = math.tanh %315 : vector<8x128xf32>
    %317 = vector.extract_strided_slice %302 {offsets = [0, 384], sizes = [8, 128], strides = [1, 1]} : vector<8x512xf32> to vector<8x128xf32>
    %318 = arith.negf %317 : vector<8x128xf32>
    %319 = math.exp %318 : vector<8x128xf32>
    %cst_89 = arith.constant 1.000000e+00 : f32
    %320 = vector.broadcast %cst_89 : f32 to vector<8x128xf32>
    %321 = arith.addf %320, %319 : vector<8x128xf32>
    %322 = arith.divf %320, %321 : vector<8x128xf32>
    %323 = arith.mulf %314, %255 : vector<8x128xf32>
    %324 = arith.mulf %308, %316 : vector<8x128xf32>
    %325 = arith.addf %323, %324 : vector<8x128xf32>
    %326 = math.tanh %325 : vector<8x128xf32>
    %327 = arith.mulf %322, %326 : vector<8x128xf32>
    %328 = arith.truncf %327 : vector<8x128xf32> to vector<8x128xbf16>
    %c0_90 = arith.constant 0 : index
    %c0_91 = arith.constant 0 : index
    %329 = vector.load %arg6[%c0_90, %c0_91] : memref<128x512xbf16, #tpu.memory_space<vmem>>, vector<128x512xbf16>
    %cst_92 = arith.constant dense<0.000000e+00> : vector<8x512xf32>
    %330 = tpu.matmul %328, %329, %cst_92 {dimension_numbers = #tpu.dot_dimension_numbers<[1], [0], [0], [1], [0, 0, 1, 1], [], []>} : vector<8x128xbf16>, vector<128x512xbf16>, vector<8x512xf32> -> vector<8x512xf32>
    %c0_93 = arith.constant 0 : index
    %c0_94 = arith.constant 0 : index
    %331 = vector.load %arg7[%c0_93, %c0_94] : memref<128x512xbf16, #tpu.memory_space<vmem>>, vector<128x512xbf16>
    %cst_95 = arith.constant dense<0.000000e+00> : vector<8x512xf32>
    %332 = tpu.matmul %290, %331, %cst_95 {dimension_numbers = #tpu.dot_dimension_numbers<[1], [0], [0], [1], [0, 0, 1, 1], [], []>} : vector<8x128xbf16>, vector<128x512xbf16>, vector<8x512xf32> -> vector<8x512xf32>
    %333 = arith.addf %330, %332 : vector<8x512xf32>
    %334 = arith.addf %333, %10 : vector<8x512xf32>
    %335 = vector.extract_strided_slice %334 {offsets = [0, 0], sizes = [8, 128], strides = [1, 1]} : vector<8x512xf32> to vector<8x128xf32>
    %336 = arith.negf %335 : vector<8x128xf32>
    %337 = math.exp %336 : vector<8x128xf32>
    %cst_96 = arith.constant 1.000000e+00 : f32
    %338 = vector.broadcast %cst_96 : f32 to vector<8x128xf32>
    %339 = arith.addf %338, %337 : vector<8x128xf32>
    %340 = arith.divf %338, %339 : vector<8x128xf32>
    %341 = vector.extract_strided_slice %334 {offsets = [0, 128], sizes = [8, 128], strides = [1, 1]} : vector<8x512xf32> to vector<8x128xf32>
    %342 = arith.negf %341 : vector<8x128xf32>
    %343 = math.exp %342 : vector<8x128xf32>
    %cst_97 = arith.constant 1.000000e+00 : f32
    %344 = vector.broadcast %cst_97 : f32 to vector<8x128xf32>
    %345 = arith.addf %344, %343 : vector<8x128xf32>
    %346 = arith.divf %344, %345 : vector<8x128xf32>
    %347 = vector.extract_strided_slice %334 {offsets = [0, 256], sizes = [8, 128], strides = [1, 1]} : vector<8x512xf32> to vector<8x128xf32>
    %348 = math.tanh %347 : vector<8x128xf32>
    %349 = vector.extract_strided_slice %334 {offsets = [0, 384], sizes = [8, 128], strides = [1, 1]} : vector<8x512xf32> to vector<8x128xf32>
    %350 = arith.negf %349 : vector<8x128xf32>
    %351 = math.exp %350 : vector<8x128xf32>
    %cst_98 = arith.constant 1.000000e+00 : f32
    %352 = vector.broadcast %cst_98 : f32 to vector<8x128xf32>
    %353 = arith.addf %352, %351 : vector<8x128xf32>
    %354 = arith.divf %352, %353 : vector<8x128xf32>
    %355 = arith.mulf %346, %287 : vector<8x128xf32>
    %356 = arith.mulf %340, %348 : vector<8x128xf32>
    %357 = arith.addf %355, %356 : vector<8x128xf32>
    %358 = math.tanh %357 : vector<8x128xf32>
    %359 = arith.mulf %354, %358 : vector<8x128xf32>
    %360 = arith.truncf %359 : vector<8x128xf32> to vector<8x128xbf16>
    %361 = vector.broadcast %c4_i32 : i32 to vector<8x1xi32>
    %362 = arith.cmpi eq, %13, %361 : vector<8x1xi32>
    %363 = vector.shape_cast %362 : vector<8x1xi1> to vector<8x1xi1>
    %364 = vector.broadcast %363 : vector<8x1xi1> to vector<8x128xi1>
    %365 = arith.select %364, %360, %295 : vector<8x128xi1>, vector<8x128xbf16>
    %c5_i32 = arith.constant 5 : i32
    %c8_i32_99 = arith.constant 8 : i32
    %366 = arith.muli %c5_i32, %c8_i32_99 : i32
    %367 = tpu.assume_multiple %366, 8 : i32
    %368 = arith.index_cast %367 : i32 to index
    %c0_100 = arith.constant 0 : index
    %369 = vector.load %arg16[%368, %c0_100] : memref<64x512xf32, #tpu.memory_space<vmem>>, vector<8x512xf32>
    %c0_101 = arith.constant 0 : index
    %c0_102 = arith.constant 0 : index
    %370 = vector.load %arg4[%c0_101, %c0_102] : memref<128x512xbf16, #tpu.memory_space<vmem>>, vector<128x512xbf16>
    %cst_103 = arith.constant dense<0.000000e+00> : vector<8x512xf32>
    %371 = tpu.matmul %328, %370, %cst_103 {dimension_numbers = #tpu.dot_dimension_numbers<[1], [0], [0], [1], [0, 0, 1, 1], [], []>} : vector<8x128xbf16>, vector<128x512xbf16>, vector<8x512xf32> -> vector<8x512xf32>
    %372 = arith.addf %369, %371 : vector<8x512xf32>
    %373 = vector.extract_strided_slice %372 {offsets = [0, 0], sizes = [8, 128], strides = [1, 1]} : vector<8x512xf32> to vector<8x128xf32>
    %374 = arith.negf %373 : vector<8x128xf32>
    %375 = math.exp %374 : vector<8x128xf32>
    %cst_104 = arith.constant 1.000000e+00 : f32
    %376 = vector.broadcast %cst_104 : f32 to vector<8x128xf32>
    %377 = arith.addf %376, %375 : vector<8x128xf32>
    %378 = arith.divf %376, %377 : vector<8x128xf32>
    %379 = vector.extract_strided_slice %372 {offsets = [0, 128], sizes = [8, 128], strides = [1, 1]} : vector<8x512xf32> to vector<8x128xf32>
    %380 = arith.negf %379 : vector<8x128xf32>
    %381 = math.exp %380 : vector<8x128xf32>
    %cst_105 = arith.constant 1.000000e+00 : f32
    %382 = vector.broadcast %cst_105 : f32 to vector<8x128xf32>
    %383 = arith.addf %382, %381 : vector<8x128xf32>
    %384 = arith.divf %382, %383 : vector<8x128xf32>
    %385 = vector.extract_strided_slice %372 {offsets = [0, 256], sizes = [8, 128], strides = [1, 1]} : vector<8x512xf32> to vector<8x128xf32>
    %386 = math.tanh %385 : vector<8x128xf32>
    %387 = vector.extract_strided_slice %372 {offsets = [0, 384], sizes = [8, 128], strides = [1, 1]} : vector<8x512xf32> to vector<8x128xf32>
    %388 = arith.negf %387 : vector<8x128xf32>
    %389 = math.exp %388 : vector<8x128xf32>
    %cst_106 = arith.constant 1.000000e+00 : f32
    %390 = vector.broadcast %cst_106 : f32 to vector<8x128xf32>
    %391 = arith.addf %390, %389 : vector<8x128xf32>
    %392 = arith.divf %390, %391 : vector<8x128xf32>
    %393 = arith.mulf %384, %325 : vector<8x128xf32>
    %394 = arith.mulf %378, %386 : vector<8x128xf32>
    %395 = arith.addf %393, %394 : vector<8x128xf32>
    %396 = math.tanh %395 : vector<8x128xf32>
    %397 = arith.mulf %392, %396 : vector<8x128xf32>
    %398 = arith.truncf %397 : vector<8x128xf32> to vector<8x128xbf16>
    %c0_107 = arith.constant 0 : index
    %c0_108 = arith.constant 0 : index
    %399 = vector.load %arg6[%c0_107, %c0_108] : memref<128x512xbf16, #tpu.memory_space<vmem>>, vector<128x512xbf16>
    %cst_109 = arith.constant dense<0.000000e+00> : vector<8x512xf32>
    %400 = tpu.matmul %398, %399, %cst_109 {dimension_numbers = #tpu.dot_dimension_numbers<[1], [0], [0], [1], [0, 0, 1, 1], [], []>} : vector<8x128xbf16>, vector<128x512xbf16>, vector<8x512xf32> -> vector<8x512xf32>
    %c0_110 = arith.constant 0 : index
    %c0_111 = arith.constant 0 : index
    %401 = vector.load %arg7[%c0_110, %c0_111] : memref<128x512xbf16, #tpu.memory_space<vmem>>, vector<128x512xbf16>
    %cst_112 = arith.constant dense<0.000000e+00> : vector<8x512xf32>
    %402 = tpu.matmul %360, %401, %cst_112 {dimension_numbers = #tpu.dot_dimension_numbers<[1], [0], [0], [1], [0, 0, 1, 1], [], []>} : vector<8x128xbf16>, vector<128x512xbf16>, vector<8x512xf32> -> vector<8x512xf32>
    %403 = arith.addf %400, %402 : vector<8x512xf32>
    %404 = arith.addf %403, %10 : vector<8x512xf32>
    %405 = vector.extract_strided_slice %404 {offsets = [0, 0], sizes = [8, 128], strides = [1, 1]} : vector<8x512xf32> to vector<8x128xf32>
    %406 = arith.negf %405 : vector<8x128xf32>
    %407 = math.exp %406 : vector<8x128xf32>
    %cst_113 = arith.constant 1.000000e+00 : f32
    %408 = vector.broadcast %cst_113 : f32 to vector<8x128xf32>
    %409 = arith.addf %408, %407 : vector<8x128xf32>
    %410 = arith.divf %408, %409 : vector<8x128xf32>
    %411 = vector.extract_strided_slice %404 {offsets = [0, 128], sizes = [8, 128], strides = [1, 1]} : vector<8x512xf32> to vector<8x128xf32>
    %412 = arith.negf %411 : vector<8x128xf32>
    %413 = math.exp %412 : vector<8x128xf32>
    %cst_114 = arith.constant 1.000000e+00 : f32
    %414 = vector.broadcast %cst_114 : f32 to vector<8x128xf32>
    %415 = arith.addf %414, %413 : vector<8x128xf32>
    %416 = arith.divf %414, %415 : vector<8x128xf32>
    %417 = vector.extract_strided_slice %404 {offsets = [0, 256], sizes = [8, 128], strides = [1, 1]} : vector<8x512xf32> to vector<8x128xf32>
    %418 = math.tanh %417 : vector<8x128xf32>
    %419 = vector.extract_strided_slice %404 {offsets = [0, 384], sizes = [8, 128], strides = [1, 1]} : vector<8x512xf32> to vector<8x128xf32>
    %420 = arith.negf %419 : vector<8x128xf32>
    %421 = math.exp %420 : vector<8x128xf32>
    %cst_115 = arith.constant 1.000000e+00 : f32
    %422 = vector.broadcast %cst_115 : f32 to vector<8x128xf32>
    %423 = arith.addf %422, %421 : vector<8x128xf32>
    %424 = arith.divf %422, %423 : vector<8x128xf32>
    %425 = arith.mulf %416, %357 : vector<8x128xf32>
    %426 = arith.mulf %410, %418 : vector<8x128xf32>
    %427 = arith.addf %425, %426 : vector<8x128xf32>
    %428 = math.tanh %427 : vector<8x128xf32>
    %429 = arith.mulf %424, %428 : vector<8x128xf32>
    %430 = arith.truncf %429 : vector<8x128xf32> to vector<8x128xbf16>
    %431 = vector.broadcast %c5_i32 : i32 to vector<8x1xi32>
    %432 = arith.cmpi eq, %13, %431 : vector<8x1xi32>
    %433 = vector.shape_cast %432 : vector<8x1xi1> to vector<8x1xi1>
    %434 = vector.broadcast %433 : vector<8x1xi1> to vector<8x128xi1>
    %435 = arith.select %434, %430, %365 : vector<8x128xi1>, vector<8x128xbf16>
    %c6_i32 = arith.constant 6 : i32
    %c8_i32_116 = arith.constant 8 : i32
    %436 = arith.muli %c6_i32, %c8_i32_116 : i32
    %437 = tpu.assume_multiple %436, 8 : i32
    %438 = arith.index_cast %437 : i32 to index
    %c0_117 = arith.constant 0 : index
    %439 = vector.load %arg16[%438, %c0_117] : memref<64x512xf32, #tpu.memory_space<vmem>>, vector<8x512xf32>
    %c0_118 = arith.constant 0 : index
    %c0_119 = arith.constant 0 : index
    %440 = vector.load %arg4[%c0_118, %c0_119] : memref<128x512xbf16, #tpu.memory_space<vmem>>, vector<128x512xbf16>
    %cst_120 = arith.constant dense<0.000000e+00> : vector<8x512xf32>
    %441 = tpu.matmul %398, %440, %cst_120 {dimension_numbers = #tpu.dot_dimension_numbers<[1], [0], [0], [1], [0, 0, 1, 1], [], []>} : vector<8x128xbf16>, vector<128x512xbf16>, vector<8x512xf32> -> vector<8x512xf32>
    %442 = arith.addf %439, %441 : vector<8x512xf32>
    %443 = vector.extract_strided_slice %442 {offsets = [0, 0], sizes = [8, 128], strides = [1, 1]} : vector<8x512xf32> to vector<8x128xf32>
    %444 = arith.negf %443 : vector<8x128xf32>
    %445 = math.exp %444 : vector<8x128xf32>
    %cst_121 = arith.constant 1.000000e+00 : f32
    %446 = vector.broadcast %cst_121 : f32 to vector<8x128xf32>
    %447 = arith.addf %446, %445 : vector<8x128xf32>
    %448 = arith.divf %446, %447 : vector<8x128xf32>
    %449 = vector.extract_strided_slice %442 {offsets = [0, 128], sizes = [8, 128], strides = [1, 1]} : vector<8x512xf32> to vector<8x128xf32>
    %450 = arith.negf %449 : vector<8x128xf32>
    %451 = math.exp %450 : vector<8x128xf32>
    %cst_122 = arith.constant 1.000000e+00 : f32
    %452 = vector.broadcast %cst_122 : f32 to vector<8x128xf32>
    %453 = arith.addf %452, %451 : vector<8x128xf32>
    %454 = arith.divf %452, %453 : vector<8x128xf32>
    %455 = vector.extract_strided_slice %442 {offsets = [0, 256], sizes = [8, 128], strides = [1, 1]} : vector<8x512xf32> to vector<8x128xf32>
    %456 = math.tanh %455 : vector<8x128xf32>
    %457 = vector.extract_strided_slice %442 {offsets = [0, 384], sizes = [8, 128], strides = [1, 1]} : vector<8x512xf32> to vector<8x128xf32>
    %458 = arith.negf %457 : vector<8x128xf32>
    %459 = math.exp %458 : vector<8x128xf32>
    %cst_123 = arith.constant 1.000000e+00 : f32
    %460 = vector.broadcast %cst_123 : f32 to vector<8x128xf32>
    %461 = arith.addf %460, %459 : vector<8x128xf32>
    %462 = arith.divf %460, %461 : vector<8x128xf32>
    %463 = arith.mulf %454, %395 : vector<8x128xf32>
    %464 = arith.mulf %448, %456 : vector<8x128xf32>
    %465 = arith.addf %463, %464 : vector<8x128xf32>
    %466 = math.tanh %465 : vector<8x128xf32>
    %467 = arith.mulf %462, %466 : vector<8x128xf32>
    %468 = arith.truncf %467 : vector<8x128xf32> to vector<8x128xbf16>
    %c0_124 = arith.constant 0 : index
    %c0_125 = arith.constant 0 : index
    %469 = vector.load %arg6[%c0_124, %c0_125] : memref<128x512xbf16, #tpu.memory_space<vmem>>, vector<128x512xbf16>
    %cst_126 = arith.constant dense<0.000000e+00> : vector<8x512xf32>
    %470 = tpu.matmul %468, %469, %cst_126 {dimension_numbers = #tpu.dot_dimension_numbers<[1], [0], [0], [1], [0, 0, 1, 1], [], []>} : vector<8x128xbf16>, vector<128x512xbf16>, vector<8x512xf32> -> vector<8x512xf32>
    %c0_127 = arith.constant 0 : index
    %c0_128 = arith.constant 0 : index
    %471 = vector.load %arg7[%c0_127, %c0_128] : memref<128x512xbf16, #tpu.memory_space<vmem>>, vector<128x512xbf16>
    %cst_129 = arith.constant dense<0.000000e+00> : vector<8x512xf32>
    %472 = tpu.matmul %430, %471, %cst_129 {dimension_numbers = #tpu.dot_dimension_numbers<[1], [0], [0], [1], [0, 0, 1, 1], [], []>} : vector<8x128xbf16>, vector<128x512xbf16>, vector<8x512xf32> -> vector<8x512xf32>
    %473 = arith.addf %470, %472 : vector<8x512xf32>
    %474 = arith.addf %473, %10 : vector<8x512xf32>
    %475 = vector.extract_strided_slice %474 {offsets = [0, 0], sizes = [8, 128], strides = [1, 1]} : vector<8x512xf32> to vector<8x128xf32>
    %476 = arith.negf %475 : vector<8x128xf32>
    %477 = math.exp %476 : vector<8x128xf32>
    %cst_130 = arith.constant 1.000000e+00 : f32
    %478 = vector.broadcast %cst_130 : f32 to vector<8x128xf32>
    %479 = arith.addf %478, %477 : vector<8x128xf32>
    %480 = arith.divf %478, %479 : vector<8x128xf32>
    %481 = vector.extract_strided_slice %474 {offsets = [0, 128], sizes = [8, 128], strides = [1, 1]} : vector<8x512xf32> to vector<8x128xf32>
    %482 = arith.negf %481 : vector<8x128xf32>
    %483 = math.exp %482 : vector<8x128xf32>
    %cst_131 = arith.constant 1.000000e+00 : f32
    %484 = vector.broadcast %cst_131 : f32 to vector<8x128xf32>
    %485 = arith.addf %484, %483 : vector<8x128xf32>
    %486 = arith.divf %484, %485 : vector<8x128xf32>
    %487 = vector.extract_strided_slice %474 {offsets = [0, 256], sizes = [8, 128], strides = [1, 1]} : vector<8x512xf32> to vector<8x128xf32>
    %488 = math.tanh %487 : vector<8x128xf32>
    %489 = vector.extract_strided_slice %474 {offsets = [0, 384], sizes = [8, 128], strides = [1, 1]} : vector<8x512xf32> to vector<8x128xf32>
    %490 = arith.negf %489 : vector<8x128xf32>
    %491 = math.exp %490 : vector<8x128xf32>
    %cst_132 = arith.constant 1.000000e+00 : f32
    %492 = vector.broadcast %cst_132 : f32 to vector<8x128xf32>
    %493 = arith.addf %492, %491 : vector<8x128xf32>
    %494 = arith.divf %492, %493 : vector<8x128xf32>
    %495 = arith.mulf %486, %427 : vector<8x128xf32>
    %496 = arith.mulf %480, %488 : vector<8x128xf32>
    %497 = arith.addf %495, %496 : vector<8x128xf32>
    %498 = math.tanh %497 : vector<8x128xf32>
    %499 = arith.mulf %494, %498 : vector<8x128xf32>
    %500 = arith.truncf %499 : vector<8x128xf32> to vector<8x128xbf16>
    %501 = vector.broadcast %c6_i32 : i32 to vector<8x1xi32>
    %502 = arith.cmpi eq, %13, %501 : vector<8x1xi32>
    %503 = vector.shape_cast %502 : vector<8x1xi1> to vector<8x1xi1>
    %504 = vector.broadcast %503 : vector<8x1xi1> to vector<8x128xi1>
    %505 = arith.select %504, %500, %435 : vector<8x128xi1>, vector<8x128xbf16>
    %c7_i32 = arith.constant 7 : i32
    %c8_i32_133 = arith.constant 8 : i32
    %506 = arith.muli %c7_i32, %c8_i32_133 : i32
    %507 = tpu.assume_multiple %506, 8 : i32
    %508 = arith.index_cast %507 : i32 to index
    %c0_134 = arith.constant 0 : index
    %509 = vector.load %arg16[%508, %c0_134] : memref<64x512xf32, #tpu.memory_space<vmem>>, vector<8x512xf32>
    %c0_135 = arith.constant 0 : index
    %c0_136 = arith.constant 0 : index
    %510 = vector.load %arg4[%c0_135, %c0_136] : memref<128x512xbf16, #tpu.memory_space<vmem>>, vector<128x512xbf16>
    %cst_137 = arith.constant dense<0.000000e+00> : vector<8x512xf32>
    %511 = tpu.matmul %468, %510, %cst_137 {dimension_numbers = #tpu.dot_dimension_numbers<[1], [0], [0], [1], [0, 0, 1, 1], [], []>} : vector<8x128xbf16>, vector<128x512xbf16>, vector<8x512xf32> -> vector<8x512xf32>
    %512 = arith.addf %509, %511 : vector<8x512xf32>
    %513 = vector.extract_strided_slice %512 {offsets = [0, 0], sizes = [8, 128], strides = [1, 1]} : vector<8x512xf32> to vector<8x128xf32>
    %514 = arith.negf %513 : vector<8x128xf32>
    %515 = math.exp %514 : vector<8x128xf32>
    %cst_138 = arith.constant 1.000000e+00 : f32
    %516 = vector.broadcast %cst_138 : f32 to vector<8x128xf32>
    %517 = arith.addf %516, %515 : vector<8x128xf32>
    %518 = arith.divf %516, %517 : vector<8x128xf32>
    %519 = vector.extract_strided_slice %512 {offsets = [0, 128], sizes = [8, 128], strides = [1, 1]} : vector<8x512xf32> to vector<8x128xf32>
    %520 = arith.negf %519 : vector<8x128xf32>
    %521 = math.exp %520 : vector<8x128xf32>
    %cst_139 = arith.constant 1.000000e+00 : f32
    %522 = vector.broadcast %cst_139 : f32 to vector<8x128xf32>
    %523 = arith.addf %522, %521 : vector<8x128xf32>
    %524 = arith.divf %522, %523 : vector<8x128xf32>
    %525 = vector.extract_strided_slice %512 {offsets = [0, 256], sizes = [8, 128], strides = [1, 1]} : vector<8x512xf32> to vector<8x128xf32>
    %526 = math.tanh %525 : vector<8x128xf32>
    %527 = vector.extract_strided_slice %512 {offsets = [0, 384], sizes = [8, 128], strides = [1, 1]} : vector<8x512xf32> to vector<8x128xf32>
    %528 = arith.negf %527 : vector<8x128xf32>
    %529 = math.exp %528 : vector<8x128xf32>
    %cst_140 = arith.constant 1.000000e+00 : f32
    %530 = vector.broadcast %cst_140 : f32 to vector<8x128xf32>
    %531 = arith.addf %530, %529 : vector<8x128xf32>
    %532 = arith.divf %530, %531 : vector<8x128xf32>
    %533 = arith.mulf %524, %465 : vector<8x128xf32>
    %534 = arith.mulf %518, %526 : vector<8x128xf32>
    %535 = arith.addf %533, %534 : vector<8x128xf32>
    %536 = math.tanh %535 : vector<8x128xf32>
    %537 = arith.mulf %532, %536 : vector<8x128xf32>
    %538 = arith.truncf %537 : vector<8x128xf32> to vector<8x128xbf16>
    %c0_141 = arith.constant 0 : index
    %c0_142 = arith.constant 0 : index
    %539 = vector.load %arg6[%c0_141, %c0_142] : memref<128x512xbf16, #tpu.memory_space<vmem>>, vector<128x512xbf16>
    %cst_143 = arith.constant dense<0.000000e+00> : vector<8x512xf32>
    %540 = tpu.matmul %538, %539, %cst_143 {dimension_numbers = #tpu.dot_dimension_numbers<[1], [0], [0], [1], [0, 0, 1, 1], [], []>} : vector<8x128xbf16>, vector<128x512xbf16>, vector<8x512xf32> -> vector<8x512xf32>
    %c0_144 = arith.constant 0 : index
    %c0_145 = arith.constant 0 : index
    %541 = vector.load %arg7[%c0_144, %c0_145] : memref<128x512xbf16, #tpu.memory_space<vmem>>, vector<128x512xbf16>
    %cst_146 = arith.constant dense<0.000000e+00> : vector<8x512xf32>
    %542 = tpu.matmul %500, %541, %cst_146 {dimension_numbers = #tpu.dot_dimension_numbers<[1], [0], [0], [1], [0, 0, 1, 1], [], []>} : vector<8x128xbf16>, vector<128x512xbf16>, vector<8x512xf32> -> vector<8x512xf32>
    %543 = arith.addf %540, %542 : vector<8x512xf32>
    %544 = arith.addf %543, %10 : vector<8x512xf32>
    %545 = vector.extract_strided_slice %544 {offsets = [0, 0], sizes = [8, 128], strides = [1, 1]} : vector<8x512xf32> to vector<8x128xf32>
    %546 = arith.negf %545 : vector<8x128xf32>
    %547 = math.exp %546 : vector<8x128xf32>
    %cst_147 = arith.constant 1.000000e+00 : f32
    %548 = vector.broadcast %cst_147 : f32 to vector<8x128xf32>
    %549 = arith.addf %548, %547 : vector<8x128xf32>
    %550 = arith.divf %548, %549 : vector<8x128xf32>
    %551 = vector.extract_strided_slice %544 {offsets = [0, 128], sizes = [8, 128], strides = [1, 1]} : vector<8x512xf32> to vector<8x128xf32>
    %552 = arith.negf %551 : vector<8x128xf32>
    %553 = math.exp %552 : vector<8x128xf32>
    %cst_148 = arith.constant 1.000000e+00 : f32
    %554 = vector.broadcast %cst_148 : f32 to vector<8x128xf32>
    %555 = arith.addf %554, %553 : vector<8x128xf32>
    %556 = arith.divf %554, %555 : vector<8x128xf32>
    %557 = vector.extract_strided_slice %544 {offsets = [0, 256], sizes = [8, 128], strides = [1, 1]} : vector<8x512xf32> to vector<8x128xf32>
    %558 = math.tanh %557 : vector<8x128xf32>
    %559 = vector.extract_strided_slice %544 {offsets = [0, 384], sizes = [8, 128], strides = [1, 1]} : vector<8x512xf32> to vector<8x128xf32>
    %560 = arith.negf %559 : vector<8x128xf32>
    %561 = math.exp %560 : vector<8x128xf32>
    %cst_149 = arith.constant 1.000000e+00 : f32
    %562 = vector.broadcast %cst_149 : f32 to vector<8x128xf32>
    %563 = arith.addf %562, %561 : vector<8x128xf32>
    %564 = arith.divf %562, %563 : vector<8x128xf32>
    %565 = arith.mulf %556, %497 : vector<8x128xf32>
    %566 = arith.mulf %550, %558 : vector<8x128xf32>
    %567 = arith.addf %565, %566 : vector<8x128xf32>
    %568 = math.tanh %567 : vector<8x128xf32>
    %569 = arith.mulf %564, %568 : vector<8x128xf32>
    %570 = arith.truncf %569 : vector<8x128xf32> to vector<8x128xbf16>
    %571 = vector.broadcast %c7_i32 : i32 to vector<8x1xi32>
    %572 = arith.cmpi eq, %13, %571 : vector<8x1xi32>
    %573 = vector.shape_cast %572 : vector<8x1xi1> to vector<8x1xi1>
    %574 = vector.broadcast %573 : vector<8x1xi1> to vector<8x128xi1>
    %575 = arith.select %574, %570, %505 : vector<8x128xi1>, vector<8x128xbf16>
    %c8_i32_150 = arith.constant 8 : i32
    %c0_151 = arith.constant 0 : index
    %c0_152 = arith.constant 0 : index
    %576 = vector.load %arg9[%c0_151, %c0_152] : memref<128x1024xbf16, #tpu.memory_space<vmem>>, vector<128x1024xbf16>
    %cst_153 = arith.constant dense<0.000000e+00> : vector<8x1024xf32>
    %577 = tpu.matmul %575, %576, %cst_153 {dimension_numbers = #tpu.dot_dimension_numbers<[1], [0], [0], [1], [0, 0, 1, 1], [], []>} : vector<8x128xbf16>, vector<128x1024xbf16>, vector<8x1024xf32> -> vector<8x1024xf32>
    %c0_154 = arith.constant 0 : index
    %c0_155 = arith.constant 0 : index
    %578 = vector.load %arg10[%c0_154, %c0_155] : memref<1x1024xf32, #tpu.memory_space<vmem>>, vector<1x1024xf32>
    %579 = vector.broadcast %578 : vector<1x1024xf32> to vector<8x1024xf32>
    %580 = arith.addf %577, %579 : vector<8x1024xf32>
    %581 = math.tanh %580 : vector<8x1024xf32>
    %582 = vector.extract_strided_slice %581 {offsets = [0, 0], sizes = [8, 128], strides = [1, 1]} : vector<8x1024xf32> to vector<8x128xf32>
    %c0_156 = arith.constant 0 : index
    %c0_157 = arith.constant 0 : index
    %583 = vector.load %arg17[%c0_156, %c0_157] : memref<64x128xf32, #tpu.memory_space<vmem>>, vector<8x128xf32>
    tpu.vector_store %arg17[%c0_156, %c0_157], %582 {strides = array<i32>} : memref<64x128xf32, #tpu.memory_space<vmem>>, vector<8x128xf32>,
    %584 = vector.extract_strided_slice %581 {offsets = [0, 128], sizes = [8, 128], strides = [1, 1]} : vector<8x1024xf32> to vector<8x128xf32>
    %c8 = arith.constant 8 : index
    %c0_158 = arith.constant 0 : index
    %585 = vector.load %arg17[%c8, %c0_158] : memref<64x128xf32, #tpu.memory_space<vmem>>, vector<8x128xf32>
    tpu.vector_store %arg17[%c8, %c0_158], %584 {strides = array<i32>} : memref<64x128xf32, #tpu.memory_space<vmem>>, vector<8x128xf32>,
    %586 = vector.extract_strided_slice %581 {offsets = [0, 256], sizes = [8, 128], strides = [1, 1]} : vector<8x1024xf32> to vector<8x128xf32>
    %c16 = arith.constant 16 : index
    %c0_159 = arith.constant 0 : index
    %587 = vector.load %arg17[%c16, %c0_159] : memref<64x128xf32, #tpu.memory_space<vmem>>, vector<8x128xf32>
    tpu.vector_store %arg17[%c16, %c0_159], %586 {strides = array<i32>} : memref<64x128xf32, #tpu.memory_space<vmem>>, vector<8x128xf32>,
    %588 = vector.extract_strided_slice %581 {offsets = [0, 384], sizes = [8, 128], strides = [1, 1]} : vector<8x1024xf32> to vector<8x128xf32>
    %c24 = arith.constant 24 : index
    %c0_160 = arith.constant 0 : index
    %589 = vector.load %arg17[%c24, %c0_160] : memref<64x128xf32, #tpu.memory_space<vmem>>, vector<8x128xf32>
    tpu.vector_store %arg17[%c24, %c0_160], %588 {strides = array<i32>} : memref<64x128xf32, #tpu.memory_space<vmem>>, vector<8x128xf32>,
    %590 = vector.extract_strided_slice %581 {offsets = [0, 512], sizes = [8, 128], strides = [1, 1]} : vector<8x1024xf32> to vector<8x128xf32>
    %c32 = arith.constant 32 : index
    %c0_161 = arith.constant 0 : index
    %591 = vector.load %arg17[%c32, %c0_161] : memref<64x128xf32, #tpu.memory_space<vmem>>, vector<8x128xf32>
    tpu.vector_store %arg17[%c32, %c0_161], %590 {strides = array<i32>} : memref<64x128xf32, #tpu.memory_space<vmem>>, vector<8x128xf32>,
    %592 = vector.extract_strided_slice %581 {offsets = [0, 640], sizes = [8, 128], strides = [1, 1]} : vector<8x1024xf32> to vector<8x128xf32>
    %c40 = arith.constant 40 : index
    %c0_162 = arith.constant 0 : index
    %593 = vector.load %arg17[%c40, %c0_162] : memref<64x128xf32, #tpu.memory_space<vmem>>, vector<8x128xf32>
    tpu.vector_store %arg17[%c40, %c0_162], %592 {strides = array<i32>} : memref<64x128xf32, #tpu.memory_space<vmem>>, vector<8x128xf32>,
    %594 = vector.extract_strided_slice %581 {offsets = [0, 768], sizes = [8, 128], strides = [1, 1]} : vector<8x1024xf32> to vector<8x128xf32>
    %c48 = arith.constant 48 : index
    %c0_163 = arith.constant 0 : index
    %595 = vector.load %arg17[%c48, %c0_163] : memref<64x128xf32, #tpu.memory_space<vmem>>, vector<8x128xf32>
    tpu.vector_store %arg17[%c48, %c0_163], %594 {strides = array<i32>} : memref<64x128xf32, #tpu.memory_space<vmem>>, vector<8x128xf32>,
    %596 = vector.extract_strided_slice %581 {offsets = [0, 896], sizes = [8, 128], strides = [1, 1]} : vector<8x1024xf32> to vector<8x128xf32>
    %c56 = arith.constant 56 : index
    %c0_164 = arith.constant 0 : index
    %597 = vector.load %arg17[%c56, %c0_164] : memref<64x128xf32, #tpu.memory_space<vmem>>, vector<8x128xf32>
    tpu.vector_store %arg17[%c56, %c0_164], %596 {strides = array<i32>} : memref<64x128xf32, #tpu.memory_space<vmem>>, vector<8x128xf32>,
    %c0_165 = arith.constant 0 : index
    %c0_166 = arith.constant 0 : index
    %598 = vector.load %arg17[%c0_165, %c0_166] : memref<64x128xf32, #tpu.memory_space<vmem>>, vector<64x128xf32>
    %599 = arith.truncf %598 : vector<64x128xf32> to vector<64x128xbf16>
    %c0_167 = arith.constant 0 : index
    %c0_168 = arith.constant 0 : index
    %600 = vector.load %arg11[%c0_167, %c0_168] : memref<128x256xbf16, #tpu.memory_space<vmem>>, vector<128x256xbf16>
    %cst_169 = arith.constant dense<0.000000e+00> : vector<64x256xf32>
    %601 = tpu.matmul %599, %600, %cst_169 {dimension_numbers = #tpu.dot_dimension_numbers<[1], [0], [0], [1], [0, 0, 1, 1], [], []>} : vector<64x128xbf16>, vector<128x256xbf16>, vector<64x256xf32> -> vector<64x256xf32>
    %602 = vector.extract_strided_slice %601 {offsets = [0, 0], sizes = [8, 256], strides = [1, 1]} : vector<64x256xf32> to vector<8x256xf32>
    %603 = vector.extract_strided_slice %601 {offsets = [8, 0], sizes = [8, 256], strides = [1, 1]} : vector<64x256xf32> to vector<8x256xf32>
    %604 = arith.maximumf %602, %603 : vector<8x256xf32>
    %605 = vector.extract_strided_slice %601 {offsets = [16, 0], sizes = [8, 256], strides = [1, 1]} : vector<64x256xf32> to vector<8x256xf32>
    %606 = arith.maximumf %604, %605 : vector<8x256xf32>
    %607 = vector.extract_strided_slice %601 {offsets = [24, 0], sizes = [8, 256], strides = [1, 1]} : vector<64x256xf32> to vector<8x256xf32>
    %608 = arith.maximumf %606, %607 : vector<8x256xf32>
    %609 = vector.extract_strided_slice %601 {offsets = [32, 0], sizes = [8, 256], strides = [1, 1]} : vector<64x256xf32> to vector<8x256xf32>
    %610 = arith.maximumf %608, %609 : vector<8x256xf32>
    %611 = vector.extract_strided_slice %601 {offsets = [40, 0], sizes = [8, 256], strides = [1, 1]} : vector<64x256xf32> to vector<8x256xf32>
    %612 = arith.maximumf %610, %611 : vector<8x256xf32>
    %613 = vector.extract_strided_slice %601 {offsets = [48, 0], sizes = [8, 256], strides = [1, 1]} : vector<64x256xf32> to vector<8x256xf32>
    %614 = arith.maximumf %612, %613 : vector<8x256xf32>
    %615 = vector.extract_strided_slice %601 {offsets = [56, 0], sizes = [8, 256], strides = [1, 1]} : vector<64x256xf32> to vector<8x256xf32>
    %616 = arith.maximumf %614, %615 : vector<8x256xf32>
    %c0_170 = arith.constant 0 : index
    %c0_171 = arith.constant 0 : index
    %617 = vector.load %arg14[%c0_170, %c0_171] : memref<8x256xf32, #tpu.memory_space<vmem>>, vector<8x256xf32>
    tpu.vector_store %arg14[%c0_170, %c0_171], %616 {strides = array<i32>} : memref<8x256xf32, #tpu.memory_space<vmem>>, vector<8x256xf32>,
    %cst_172 = arith.constant dense<0xFF800000> : vector<8xf32>
    %618 = vector.multi_reduction <maximumf>, %616, %cst_172 [1] : vector<8x256xf32> to vector<8xf32>
    %619 = vector.shape_cast %618 : vector<8xf32> to vector<8x1xf32>
    %620 = vector.broadcast %619 : vector<8x1xf32> to vector<8x256xf32>
    %621 = arith.subf %616, %620 : vector<8x256xf32>
    %622 = math.exp %621 : vector<8x256xf32>
    %cst_173 = arith.constant dense<0.000000e+00> : vector<8xf32>
    %623 = vector.multi_reduction <add>, %622, %cst_173 [1] : vector<8x256xf32> to vector<8xf32>
    %624 = vector.shape_cast %623 : vector<8xf32> to vector<8x1xf32>
    %625 = math.log %624 : vector<8x1xf32>
    %626 = vector.broadcast %625 : vector<8x1xf32> to vector<8x256xf32>
    %627 = arith.subf %621, %626 : vector<8x256xf32>
    %c0_174 = arith.constant 0 : index
    %c0_175 = arith.constant 0 : index
    %628 = vector.load %arg12[%c0_174, %c0_175] : memref<8x4xi32, #tpu.memory_space<vmem>>, vector<8x4xi32>
    %c0_176 = arith.constant 0 : index
    %c0_177 = arith.constant 0 : index
    %629 = vector.load %arg13[%c0_176, %c0_177] : memref<8x4xf32, #tpu.memory_space<vmem>>, vector<8x4xf32>
    %630 = tpu.iota {dimensions = array<i32: 1>} : vector<8x256xi32>
    %cst_178 = arith.constant 0.000000e+00 : f32
    %631 = vector.broadcast %cst_178 : f32 to vector<8x1xf32>
    %632 = vector.extract_strided_slice %628 {offsets = [0, 0], sizes = [8, 1], strides = [1, 1]} : vector<8x4xi32> to vector<8x1xi32>
    %633 = vector.broadcast %632 : vector<8x1xi32> to vector<8x256xi32>
    %634 = arith.cmpi eq, %630, %633 : vector<8x256xi32>
    %cst_179 = arith.constant 0.000000e+00 : f32
    %635 = vector.broadcast %cst_179 : f32 to vector<8x256xf32>
    %636 = arith.select %634, %627, %635 : vector<8x256xi1>, vector<8x256xf32>
    %cst_180 = arith.constant dense<0.000000e+00> : vector<8xf32>
    %637 = vector.multi_reduction <add>, %636, %cst_180 [1] : vector<8x256xf32> to vector<8xf32>
    %638 = vector.shape_cast %637 : vector<8xf32> to vector<8x1xf32>
    %639 = vector.extract_strided_slice %629 {offsets = [0, 0], sizes = [8, 1], strides = [1, 1]} : vector<8x4xf32> to vector<8x1xf32>
    %640 = arith.mulf %639, %638 : vector<8x1xf32>
    %641 = arith.addf %631, %640 : vector<8x1xf32>
    %642 = vector.extract_strided_slice %628 {offsets = [0, 1], sizes = [8, 1], strides = [1, 1]} : vector<8x4xi32> to vector<8x1xi32>
    %643 = vector.broadcast %642 : vector<8x1xi32> to vector<8x256xi32>
    %644 = arith.cmpi eq, %630, %643 : vector<8x256xi32>
    %cst_181 = arith.constant 0.000000e+00 : f32
    %645 = vector.broadcast %cst_181 : f32 to vector<8x256xf32>
    %646 = arith.select %644, %627, %645 : vector<8x256xi1>, vector<8x256xf32>
    %cst_182 = arith.constant dense<0.000000e+00> : vector<8xf32>
    %647 = vector.multi_reduction <add>, %646, %cst_182 [1] : vector<8x256xf32> to vector<8xf32>
    %648 = vector.shape_cast %647 : vector<8xf32> to vector<8x1xf32>
    %649 = vector.extract_strided_slice %629 {offsets = [0, 1], sizes = [8, 1], strides = [1, 1]} : vector<8x4xf32> to vector<8x1xf32>
    %650 = arith.mulf %649, %648 : vector<8x1xf32>
    %651 = arith.addf %641, %650 : vector<8x1xf32>
    %652 = vector.extract_strided_slice %628 {offsets = [0, 2], sizes = [8, 1], strides = [1, 1]} : vector<8x4xi32> to vector<8x1xi32>
    %653 = vector.broadcast %652 : vector<8x1xi32> to vector<8x256xi32>
    %654 = arith.cmpi eq, %630, %653 : vector<8x256xi32>
    %cst_183 = arith.constant 0.000000e+00 : f32
    %655 = vector.broadcast %cst_183 : f32 to vector<8x256xf32>
    %656 = arith.select %654, %627, %655 : vector<8x256xi1>, vector<8x256xf32>
    %cst_184 = arith.constant dense<0.000000e+00> : vector<8xf32>
    %657 = vector.multi_reduction <add>, %656, %cst_184 [1] : vector<8x256xf32> to vector<8xf32>
    %658 = vector.shape_cast %657 : vector<8xf32> to vector<8x1xf32>
    %659 = vector.extract_strided_slice %629 {offsets = [0, 2], sizes = [8, 1], strides = [1, 1]} : vector<8x4xf32> to vector<8x1xf32>
    %660 = arith.mulf %659, %658 : vector<8x1xf32>
    %661 = arith.addf %651, %660 : vector<8x1xf32>
    %662 = vector.extract_strided_slice %628 {offsets = [0, 3], sizes = [8, 1], strides = [1, 1]} : vector<8x4xi32> to vector<8x1xi32>
    %663 = vector.broadcast %662 : vector<8x1xi32> to vector<8x256xi32>
    %664 = arith.cmpi eq, %630, %663 : vector<8x256xi32>
    %cst_185 = arith.constant 0.000000e+00 : f32
    %665 = vector.broadcast %cst_185 : f32 to vector<8x256xf32>
    %666 = arith.select %664, %627, %665 : vector<8x256xi1>, vector<8x256xf32>
    %cst_186 = arith.constant dense<0.000000e+00> : vector<8xf32>
    %667 = vector.multi_reduction <add>, %666, %cst_186 [1] : vector<8x256xf32> to vector<8xf32>
    %668 = vector.shape_cast %667 : vector<8xf32> to vector<8x1xf32>
    %669 = vector.extract_strided_slice %629 {offsets = [0, 3], sizes = [8, 1], strides = [1, 1]} : vector<8x4xf32> to vector<8x1xf32>
    %670 = arith.mulf %669, %668 : vector<8x1xf32>
    %671 = arith.addf %661, %670 : vector<8x1xf32>
    %cst_187 = arith.constant 2.500000e-01 : f32
    %672 = vector.broadcast %cst_187 : f32 to vector<8x1xf32>
    %673 = arith.mulf %671, %672 : vector<8x1xf32>
    %cst_188 = arith.constant -5.000000e-01 : f32
    %674 = vector.broadcast %cst_188 : f32 to vector<8x1xf32>
    %675 = arith.mulf %674, %673 : vector<8x1xf32>
    %676 = vector.shape_cast %675 : vector<8x1xf32> to vector<8x1xf32>
    %677 = vector.broadcast %676 : vector<8x1xf32> to vector<8x128xf32>
    %c0_189 = arith.constant 0 : index
    %c0_190 = arith.constant 0 : index
    %678 = vector.load %arg15[%c0_189, %c0_190] : memref<8x128xf32, #tpu.memory_space<vmem>>, vector<8x128xf32>
    tpu.vector_store %arg15[%c0_189, %c0_190], %677 {strides = array<i32>} : memref<8x128xf32, #tpu.memory_space<vmem>>, vector<8x128xf32>,
    return
  }
  func.func @transform_0(%arg0: i32) -> (i32, i32, i32) {
    %c0_i32 = arith.constant 0 : i32
    %c0_i32_0 = arith.constant 0 : i32
    %c0_i32_1 = arith.constant 0 : i32
    return %arg0, %c0_i32, %c0_i32_0 : i32, i32, i32
  }
  func.func @transform_1(%arg0: i32) -> (i32, i32) {
    %c0_i32 = arith.constant 0 : i32
    %c0_i32_0 = arith.constant 0 : i32
    return %arg0, %c0_i32 : i32, i32
  }
  func.func @transform_2(%arg0: i32) -> (i32, i32) {
    %c0_i32 = arith.constant 0 : i32
    %c0_i32_0 = arith.constant 0 : i32
    %c0_i32_1 = arith.constant 0 : i32
    return %c0_i32, %c0_i32_0 : i32, i32
  }
  func.func @transform_3(%arg0: i32) -> (i32, i32) {
    %c0_i32 = arith.constant 0 : i32
    %c0_i32_0 = arith.constant 0 : i32
    %c0_i32_1 = arith.constant 0 : i32
    return %c0_i32, %c0_i32_0 : i32, i32
  }
  func.func @transform_4(%arg0: i32) -> (i32, i32) {
    %c0_i32 = arith.constant 0 : i32
    %c0_i32_0 = arith.constant 0 : i32
    %c0_i32_1 = arith.constant 0 : i32
    return %c0_i32, %c0_i32_0 : i32, i32
  }
  func.func @transform_5(%arg0: i32) -> (i32, i32) {
    %c0_i32 = arith.constant 0 : i32
    %c0_i32_0 = arith.constant 0 : i32
    %c0_i32_1 = arith.constant 0 : i32
    return %c0_i32, %c0_i32_0 : i32, i32
  }
  func.func @transform_6(%arg0: i32) -> (i32, i32) {
    %c0_i32 = arith.constant 0 : i32
    %c0_i32_0 = arith.constant 0 : i32
    %c0_i32_1 = arith.constant 0 : i32
    return %c0_i32, %c0_i32_0 : i32, i32
  }
  func.func @transform_7(%arg0: i32) -> (i32, i32) {
    %c0_i32 = arith.constant 0 : i32
    %c0_i32_0 = arith.constant 0 : i32
    %c0_i32_1 = arith.constant 0 : i32
    return %c0_i32, %c0_i32_0 : i32, i32
  }
  func.func @transform_8(%arg0: i32) -> (i32, i32) {
    %c0_i32 = arith.constant 0 : i32
    %c0_i32_0 = arith.constant 0 : i32
    %c0_i32_1 = arith.constant 0 : i32
    return %c0_i32, %c0_i32_0 : i32, i32
  }
  func.func @transform_9(%arg0: i32) -> (i32, i32) {
    %c0_i32 = arith.constant 0 : i32
    %c0_i32_0 = arith.constant 0 : i32
    %c0_i32_1 = arith.constant 0 : i32
    return %c0_i32, %c0_i32_0 : i32, i32
  }
  func.func @transform_10(%arg0: i32) -> (i32, i32) {
    %c0_i32 = arith.constant 0 : i32
    %c0_i32_0 = arith.constant 0 : i32
    %c0_i32_1 = arith.constant 0 : i32
    return %c0_i32, %c0_i32_0 : i32, i32
  }
  func.func @transform_11(%arg0: i32) -> (i32, i32) {
    %c0_i32 = arith.constant 0 : i32
    %c0_i32_0 = arith.constant 0 : i32
    return %arg0, %c0_i32 : i32, i32
  }
  func.func @transform_12(%arg0: i32) -> (i32, i32) {
    %c0_i32 = arith.constant 0 : i32
    %c0_i32_0 = arith.constant 0 : i32
    return %arg0, %c0_i32 : i32, i32
  }
  func.func @transform_13(%arg0: i32) -> (i32, i32) {
    %c0_i32 = arith.constant 0 : i32
    %c0_i32_0 = arith.constant 0 : i32
    return %arg0, %c0_i32 : i32, i32
  }
  func.func @transform_14(%arg0: i32) -> (i32, i32) {
    %c0_i32 = arith.constant 0 : i32
    %c0_i32_0 = arith.constant 0 : i32
    return %arg0, %c0_i32 : i32, i32
  }
}

</mosaic_0001>

<bundles_post_ra>
// kernel: tpu_custom_call.1
= control target key start
LH: loop header
LB: loop body
LE: loop exit
PB: predicated region body
PF: predicated region fallthrough
CT: control target
= control target key end

     0   :  { %s8970_s0 = inlined_call_operand.hbm [shape: bf16[2,64,128], index: 0, kind: input, shape index: {}]   ;;  %s8971_s1 = inlined_call_operand.vmem [shape: s32[16,1], index: 1, kind: input, shape index: {}]   ;;  %s8972_s2 = inlined_call_operand.hbm [shape: bf16[128,512], index: 2, kind: input, shape index: {}]   ;;  %s8973_s3 = inlined_call_operand.hbm [shape: bf16[128,512], index: 3, kind: input, shape index: {}]   ;;  %s8974_s4 = inlined_call_operand.vmem [shape: f32[1,512], index: 4, kind: input, shape index: {}]   ;;  %s8975_s5 = inlined_call_operand.hbm [shape: bf16[128,512], index: 5, kind: input, shape index: {}]   ;;  %s8976_s6 = inlined_call_operand.hbm [shape: bf16[128,512], index: 6, kind: input, shape index: {}]   ;;  %s8977_s7 = inlined_call_operand.vmem [shape: f32[1,512], index: 7, kind: input, shape index: {}]   ;;  %s8978_s8 = inlined_call_operand.hbm [shape: bf16[128,1024], index: 8, kind: input, shape index: {}]   ;;  %s8979_s9 = inlined_call_operand.vmem [shape: f32[1,1024], index: 9, kind: input, shape index: {}]   ;;  %s8980_s10 = inlined_call_operand.hbm [shape: bf16[128,256], index: 10, kind: input, shape index: {}]   ;;  %s8981_s11 = inlined_call_operand.vmem [shape: s32[16,4], index: 11, kind: input, shape index: {}]   ;;  %s8982_s12 = inlined_call_operand.vmem [shape: f32[16,4], index: 12, kind: input, shape index: {}]   ;;  %s8983_s13 = inlined_call_operand.hbm [shape: f32[16,256], index: 13, kind: output, shape index: {0}]   ;;  %s8984_s14 = inlined_call_operand.hbm [shape: f32[16,128], index: 14, kind: output, shape index: {1}]  }
   0x1   :  { %9241 = sst [smem:[#allocation108_spill]] %s8972_s2 }
   0x2   :  { %9242 = sst [smem:[#allocation109_spill]] %s8975_s5 }
   0x3   :  { %9243 = sst [smem:[#allocation110_spill]] %s8977_s7 }
   0x4   :  { %9244 = sst [smem:[#allocation111_spill]] %s8979_s9 }
   0x5   :  { %9245 = sst [smem:[#allocation112_spill]] %s8981_s11 }
   0x6   :  { %9246 = sst [smem:[#allocation113_spill]] %s8982_s12 }
   0x7   :  { %9247 = sst [smem:[#allocation114_spill]] %s8983_s13 }
   0x8   :  { %9248 = sst [smem:[#allocation115_spill]] %s8984_s14 }
   0x9   :  { %20 = vsyncpa [#allocation5], 0 }
   0xa   :  { %22 = vsyncpa [#allocation5 + $0x1], 0 }
   0xb   :  { %23 = vsyncpa [#allocation8], 0 }
   0xc   :  { %24 = vsyncpa [#allocation11], 0 }
   0xd   :  { %25 = vsyncpa [#allocation14], 0 }
   0xe   :  { %26 = vsyncpa [#allocation6], 0 }
   0xf   :  { %28 = vsyncpa [#allocation6 + $0x1], 0 }
  0x10   :  { %29 = vsyncpa [#allocation18], 0 }
  0x11   :  { %31 = vsyncpa [#allocation18 + $0x1], 0  ;;  %s6877_s29 = smov 0   ;;  %s6879_s30 = smov 0  }
  0x12   :  { %s6881_s15 = smov 0   ;;  %s6883_s16 = smov 0  }
  0x13 LB: > { %s6778_s17 = smov [#allocation7]   ;;  %s6898_s19 = sadd.s32 4294967295, %s6776_s16   ;;  %s6776_s16 = sphi %s6883_s16, %s9743_s16   ;;  %s6772_s15 = sphi %s6881_s15, %s9742_s15   ;;  %s6768_s30 = sphi %s6879_s30, %s9741_s30   ;;  %s6764_s29 = sphi %s6877_s29, %s9740_s29  }
  0x14   : > { %s399_s18 = sshll.u32 %s6778_s17, 4  ;;  %p5340_p0 = scmp.ge.s32.totalorder %s6776_s16, 1  ;;  %s6903_s18 = int_to_ptr.vmem [resolvable:$true] %s399_s18 }
  0x15   : > { %p8991_p1 = scmp.eq.s32.totalorder %s6898_s19, 0  ;;  %p387_p2 = scmp.lt.s32.totalorder %s6776_s16, 3 }
  0x16   : > { %s6779_s21 = smov [#allocation10]   ;;  %s6780_s24 = smov [#allocation13]  }
  0x17   : > { %p6905_p3 = pnand %p5340_p0, %p387_p2  ;;  %s428_s22 = sshll.u32 %s6779_s21, 4  ;;  %s6918_s22 = int_to_ptr.vmem [resolvable:$true] %s428_s22 }
  0x18   : > { %s457_s25 = sshll.u32 %s6780_s24, 4  ;;  %s9251_s2 = sld [smem:[#allocation108_spill]]  ;;  %s6920_s25 = int_to_ptr.vmem [resolvable:$true] %s457_s25 }
  0x19   : > { %s9249_s20 = scalar_select %p6905_p3, 1, 0 }
  0x1a   : > { %p5664_p5 = pneg %p6905_p3 }
  0x1c   : > { %p6914_p6 = pnand %p5664_p5, %p8991_p1 }
  0x1e   : > { %s6468_s28 = scalar_lea.hbm %s9251_s2, 4096  ;;  %p6930_p8 = pneg %p6914_p6 }
  0x1f   : > { %p6469_p7 = scmp.ne.s32.totalorder %s9251_s2, %s6468_s28  ;;  %p6475_p11 = scmp.lt.u32.totalorder %s6468_s28, %s9251_s2 }
  0x21   : > { %p6471_p9 = pnand %p6930_p8, %p6469_p7 }
  0x23   : > { %p6472_p10 = pneg %p6471_p9 }
  0x25   : > { %p6477_p12 = pnand %p6475_p11, %p6472_p10 }
  0x27   : > { %6480 = shalt.err (!%p6477_p12)
}
  0x28   : > { %s6481_s14 = scalar_lea.vmem %s6903_s18, 4096  ;;  %p6489_p5 = scmp.lt.s32.totalorder %s6903_s18, %s6903_s18 }
  0x29   : > { %p6482_p13 = scmp.ne.s32.totalorder %s6903_s18, %s6481_s14  ;;  %p6490_p4 = scmp.lt.s32.totalorder %s6481_s14, %s6481_s14 }
  0x2b   : > { %p6484_p0 = pnand %p6482_p13, %p6930_p8  ;;  %p6491_p7 = por %p6490_p4, %p6489_p5 }
  0x2d   : > { %p6485_p2 = pneg %p6484_p0 }
  0x2f   : > { %p6492_p9 = pnand %p6491_p7, %p6485_p2 }
  0x31   : > { %6495 = shalt.err (!%p6492_p9)
}
  0x32   : > { %s8987_s26 = smov 256   ;;  %s8989_s13 = smov 16  }
  0x33   : > { %5667 = dma.hbm_to_vmem [thread:$0]  (!%p6914_p6), %s9251_s2, 4096, %s6903_s18, [#allocation8], %s8987_s26, %s8987_s26, %s8989_s13  }
  0x34   : > { %s9253_s5 = sld [smem:[#allocation109_spill]] }
  0x3a   : > { %s6496_s14 = scalar_lea.hbm %s9253_s5, 4096 }
  0x3b   : > { %p6497_p4 = scmp.ne.s32.totalorder %s9253_s5, %s6496_s14  ;;  %p6503_p12 = scmp.lt.u32.totalorder %s6496_s14, %s9253_s5 }
  0x3d   : > { %p6499_p10 = pnand %p6497_p4, %p6930_p8 }
  0x3f   : > { %p6500_p11 = pneg %p6499_p10 }
  0x41   : > { %p6505_p13 = pnand %p6503_p12, %p6500_p11 }
  0x43   : > { %6508 = shalt.err (!%p6505_p13)
}
  0x44   : > { %s6509_s18 = scalar_lea.vmem %s6918_s22, 4096  ;;  %p6517_p7 = scmp.lt.s32.totalorder %s6918_s22, %s6918_s22 }
  0x45   : > { %p6510_p0 = scmp.ne.s32.totalorder %s6918_s22, %s6509_s18  ;;  %p6518_p9 = scmp.lt.s32.totalorder %s6509_s18, %s6509_s18 }
  0x47   : > { %p6512_p2 = pnand %p6510_p0, %p6930_p8  ;;  %p6519_p4 = por %p6518_p9, %p6517_p7 }
  0x49   : > { %p6513_p5 = pneg %p6512_p2 }
  0x4b   : > { %p6520_p10 = pnand %p6519_p4, %p6513_p5 }
  0x4d   : > { %6523 = shalt.err (!%p6520_p10)
}
  0x4e   : > { %5673 = dma.hbm_to_vmem [thread:$0]  (!%p6914_p6), %s9253_s5, 4096, %s6918_s22, [#allocation11], %s8987_s26, %s8987_s26, %s8989_s13  }
  0x4f   : > { %s6524_s27 = scalar_lea.hbm %s8978_s8, 8192 }
  0x50   : > { %p6525_p11 = scmp.ne.s32.totalorder %s8978_s8, %s6524_s27  ;;  %p6531_p0 = scmp.lt.u32.totalorder %s6524_s27, %s8978_s8 }
  0x52   : > { %p6527_p12 = pnand %p6525_p11, %p6930_p8 }
  0x54   : > { %p6528_p13 = pneg %p6527_p12 }
  0x56   : > { %p6533_p2 = pnand %p6531_p0, %p6528_p13 }
  0x58   : > { %6536 = shalt.err (!%p6533_p2)
}
  0x59   : > { %s6537_s22 = scalar_lea.vmem %s6920_s25, 8192  ;;  %p6545_p4 = scmp.lt.s32.totalorder %s6920_s25, %s6920_s25 }
  0x5a   : > { %p6538_p5 = scmp.ne.s32.totalorder %s6920_s25, %s6537_s22  ;;  %p6546_p10 = scmp.lt.s32.totalorder %s6537_s22, %s6537_s22 }
  0x5c   : > { %p6540_p7 = pnand %p6538_p5, %p6930_p8  ;;  %p6547_p11 = por %p6546_p10, %p6545_p4 }
  0x5e   : > { %p6541_p9 = pneg %p6540_p7 }
  0x60   : > { %p6548_p12 = pnand %p6547_p11, %p6541_p9 }
  0x62   : > { %6551 = shalt.err (!%p6548_p12)
}
  0x63   : > { %s6783_s18 = smov 512   ;;  %s6784_s7 = smov 32  }
  0x64   : > { %5679 = dma.hbm_to_vmem [thread:$0]  (!%p6914_p6), %s8978_s8, 8192, %s6920_s25, [#allocation14], %s6783_s18, %s6783_s18, %s6784_s7  }
  0x65   : > { %s6785_s12 = smov [#allocation9]   ;;  %s6786_s28 = smov [#allocation12]  }
  0x66   : > { %s412_s27 = sshll.u32 %s6785_s12, 4  ;;  %s441_s17 = sshll.u32 %s6786_s28, 4  ;;  %s413_s27 = int_to_ptr.vmem [resolvable:$true] %s412_s27  ;;  %s442_s17 = int_to_ptr.vmem [resolvable:$true] %s441_s17 }
  0x67   : > { %s6552_s22 = scalar_lea.hbm %s8973_s3, 4096 }
  0x68   : > { %p6553_p13 = scmp.ne.s32.totalorder %s8973_s3, %s6552_s22  ;;  %p6559_p5 = scmp.lt.u32.totalorder %s6552_s22, %s8973_s3 }
  0x6a   : > { %p6555_p0 = pnand %p6553_p13, %p6930_p8 }
  0x6c   : > { %p6556_p2 = pneg %p6555_p0 }
  0x6e   : > { %p6561_p7 = pnand %p6559_p5, %p6556_p2 }
  0x70   : > { %6564 = shalt.err (!%p6561_p7)
}
  0x71   : > { %s6565_s25 = scalar_lea.vmem %s413_s27, 4096  ;;  %p6573_p11 = scmp.lt.s32.totalorder %s413_s27, %s413_s27 }
  0x72   : > { %p6566_p9 = scmp.ne.s32.totalorder %s413_s27, %s6565_s25  ;;  %p6574_p12 = scmp.lt.s32.totalorder %s6565_s25, %s6565_s25 }
  0x74   : > { %p6568_p4 = pnand %p6566_p9, %p6930_p8  ;;  %p6575_p1 = por %p6574_p12, %p6573_p11 }
  0x76   : > { %p6569_p10 = pneg %p6568_p4 }
  0x78   : > { %p6576_p3 = pnand %p6575_p1, %p6569_p10 }
  0x7a   : > { %6579 = shalt.err (!%p6576_p3)
}
  0x7b   : > { %s9254_s26 = smov 16   ;;  %s9255_s13 = smov 256  }
  0x7c   : > { %5670 = dma.hbm_to_vmem [thread:$0]  (!%p6914_p6), %s8973_s3, 4096, %s413_s27, [#allocation8], %s9255_s13, %s9255_s13, %s9254_s26  }
  0x7d   : > { %s6580_s9 = scalar_lea.hbm %s8976_s6, 4096 }
  0x7e   : > { %p6581_p1 = scmp.ne.s32.totalorder %s8976_s6, %s6580_s9  ;;  %p6587_p0 = scmp.lt.u32.totalorder %s6580_s9, %s8976_s6 }
  0x80   : > { %p6583_p3 = pnand %p6581_p1, %p6930_p8 }
  0x82   : > { %p6584_p13 = pneg %p6583_p3 }
  0x84   : > { %p6589_p2 = pnand %p6587_p0, %p6584_p13 }
  0x86   : > { %6592 = shalt.err (!%p6589_p2)
}
  0x87   : > { %s6593_s14 = scalar_lea.vmem %s442_s17, 4096  ;;  %p6601_p4 = scmp.lt.s32.totalorder %s442_s17, %s442_s17 }
  0x88   : > { %p6594_p5 = scmp.ne.s32.totalorder %s442_s17, %s6593_s14  ;;  %p6602_p10 = scmp.lt.s32.totalorder %s6593_s14, %s6593_s14 }
  0x8a   : > { %p6596_p7 = pnand %p6594_p5, %p6930_p8  ;;  %p6603_p11 = por %p6602_p10, %p6601_p4 }
  0x8c   : > { %p6597_p9 = pneg %p6596_p7 }
  0x8e   : > { %p6604_p12 = pnand %p6603_p11, %p6597_p9 }
  0x90   : > { %6607 = shalt.err (!%p6604_p12)
}
  0x91   : > { %5676 = dma.hbm_to_vmem [thread:$0]  (!%p6914_p6), %s8976_s6, 4096, %s442_s17, [#allocation11], %s9255_s13, %s9255_s13, %s9254_s26  }
  0x92   : > { %s6787_s25 = smov [#allocation15]   ;;  %s6608_s7 = scalar_lea.hbm %s8980_s10, 2048 }
  0x93   : > { %s473_s2 = sshll.u32 %s6787_s25, 4  ;;  %p6609_p1 = scmp.ne.s32.totalorder %s8980_s10, %s6608_s7  ;;  %s474_s2 = int_to_ptr.vmem [resolvable:$true] %s473_s2 }
  0x94   : > { %p6615_p0 = scmp.lt.u32.totalorder %s6608_s7, %s8980_s10 }
  0x95   : > { %p6611_p3 = pnand %p6609_p1, %p6930_p8 }
  0x97   : > { %p6612_p13 = pneg %p6611_p3 }
  0x99   : > { %p6617_p2 = pnand %p6615_p0, %p6612_p13 }
  0x9b   : > { %6620 = shalt.err (!%p6617_p2)
}
  0x9c   : > { %s6621_s17 = scalar_lea.vmem %s474_s2, 2048  ;;  %p6629_p4 = scmp.lt.s32.totalorder %s474_s2, %s474_s2 }
  0x9d   : > { %p6622_p5 = scmp.ne.s32.totalorder %s474_s2, %s6621_s17  ;;  %p6630_p10 = scmp.lt.s32.totalorder %s6621_s17, %s6621_s17 }
  0x9f   : > { %p6624_p7 = pnand %p6622_p5, %p6930_p8  ;;  %p6631_p11 = por %p6630_p10, %p6629_p4 }
  0xa1   : > { %p6625_p9 = pneg %p6624_p7 }
  0xa3   : > { %p6632_p12 = pnand %p6631_p11, %p6625_p9 }
  0xa5   : > { %6635 = shalt.err (!%p6632_p12)
}
  0xa6   : > { %s6788_s26 = smov 128   ;;  %s6789_s21 = smov 8  }
  0xa7   : > { %5682 = dma.hbm_to_vmem [thread:$0]  (!%p6914_p6), %s8980_s10, 2048, %s474_s2, [#allocation14], %s6788_s26, %s6788_s26, %s6789_s21  }
  0xa8   : > { %s5339_s14 = sadd.s32 4294967294, %s6776_s16   ;;  %s7065_s27 = sadd.s32 1, %s6776_s16  }
  0xa9   : > { %s41_s22 = ssub.s32 %s6776_s16, %s7065_s27  ;;  %s44_s25 = sadd.s32 1, %s6772_s15 }
  0xaa   : > { %p42_p8 = scmp.eq.s32.totalorder %s41_s22, 0  ;;  %p51_p1 = scmp.ne.s32.totalorder %s6772_s15, %s6768_s30 }
  0xab   : > { %p52_p3 = scmp.eq.s32.totalorder %s6776_s16, 0  ;;  %p57_p13 = scmp.ne.s32.totalorder %s6768_s30, %s6764_s29 }
  0xac   : > { %s7076_s5 = scalar_select %p42_p8, %s6772_s15, %s44_s25  }
  0xad   : > { %p7078_p0 = por %p52_p3, %p51_p1  ;;  %p9257_p2 = scmp.eq.s32.totalorder %s6898_s19, 0 }
  0xae   : > { %p348_p5 = scmp.eq.s32.totalorder %s6898_s19, 1  ;;  %p354_p7 = scmp.eq.s32.totalorder %s5339_s14, 1 }
  0xaf   : > { %p7084_p6 = por %p9257_p2, %p57_p13  ;;  %p5700_p9 = scmp.lt.s32.totalorder %s6776_s16, 2 }
  0xb0   : > { %s487_s18 = sand.u32 1, %s6772_s15   ;;  %p7091_p4 = por %p348_p5, %p51_p1 }
  0xb1   : > { %p7095_p10 = por %p354_p7, %p57_p13  ;;  %s5348_s11 = sshll.u32 %s487_s18, 5 }
  0xb2   : > { %s9259_s7 = scalar_select %p7091_p4, 1, 0 }
  0xb3   : > { %s9260_s9 = scalar_select %p7095_p10, 1, 0 }
  0xb4   : > { %s5632_s12 = sshll.u32 %s6776_s16, 9  ;;  %s491_s21 = scalar_lea.vmem [#allocation4], %s5348_s11 }
  0xb5   : > { %s7103_s26 = scalar_lea.hbm %s8970_s0, %s5632_s12  ;;  %s498_s13 = sshll.u32 %s491_s21, 4  ;;  %s7105_s13 = int_to_ptr.vmem [resolvable:$true] %s498_s13 }
  0xb6   : > { %p7109_p11 = pnand %p5700_p9, %p7078_p0  ;;  %s7113_s14 = scalar_lea.sflag [#allocation5], %s487_s18 }
  0xb7   : > { %s6636_s22 = scalar_lea.hbm %s7103_s26, 512  ;;  %s6641_s23 = scalar_lea.hbm %s8970_s0, 1024 }
  0xb8   : > { %p6637_p12 = scmp.ne.s32.totalorder %s7103_s26, %s6636_s22  ;;  %p6638_p8 = pneg %p7109_p11 }
  0xb9   : > { %p6642_p13 = scmp.lt.u32.totalorder %s7103_s26, %s8970_s0  ;;  %p6643_p0 = scmp.lt.u32.totalorder %s6641_s23, %s6636_s22 }
  0xba   : > { %p6639_p1 = pnand %p6638_p8, %p6637_p12  ;;  %p6645_p5 = scmp.lt.u32.totalorder %s6636_s22, %s7103_s26 }
  0xbb   : > { %p6644_p2 = por %p6643_p0, %p6642_p13 }
  0xbc   : > { %p6640_p3 = pneg %p6639_p1 }
  0xbd   : > { %p6646_p7 = por %p6645_p5, %p6644_p2 }
  0xbf   : > { %p6647_p9 = pnand %p6646_p7, %p6640_p3 }
  0xc1   : > { %6650 = shalt.err (!%p6647_p9)
}
  0xc2   : > { %s6651_s18 = scalar_lea.vmem %s7105_s13, 512  ;;  %s6790_s17 = smov [#allocation4]  }
  0xc3   : > { %p6652_p12 = scmp.ne.s32.totalorder %s7105_s13, %s6651_s18  ;;  %s6656_s21 = sshll.u32 %s6790_s17, 4  ;;  %s6657_s21 = int_to_ptr.vmem [resolvable:$false] %s6656_s21 }
  0xc4   : > { %s6658_s25 = scalar_lea.vmem %s6657_s21, 1024  ;;  %p6659_p4 = scmp.lt.s32.totalorder %s7105_s13, %s6657_s21 }
  0xc5   : > { %p6654_p1 = pnand %p6652_p12, %p6638_p8  ;;  %p6660_p13 = scmp.lt.s32.totalorder %s6658_s25, %s6651_s18 }
  0xc7   : > { %p6655_p10 = pneg %p6654_p1  ;;  %p6661_p0 = por %p6660_p13, %p6659_p4 }
  0xc9   : > { %p6662_p2 = pnand %p6661_p0, %p6655_p10 }
  0xcb   : > { %6665 = shalt.err (!%p6662_p2)
}
  0xcc   : > { %s6791_s22 = smov 64   ;;  %s6792_s11 = smov 4  }
  0xcd   : > { %5686 = dma.hbm_to_vmem [thread:$0]  (!%p7109_p11), %s7103_s26, 512, %s7105_s13, %s7113_s14, %s6791_s22, %s6791_s22, %s6792_s11  }
  0xce   : > { %p9262_p8 = scmp.ne.s32.totalorder %s9249_s20, 0 }
  0xd0   : > { %531 = sbr.rel (%p9262_p8) target bundleno = 4113 (0x1011), region = 72 }
  0xd7   : > { %s7144_s23 = sand.u32 1, %s6768_s30  }
  0xd8   : > { %s5352_s12 = sshll.u32 %s7144_s23, 5  ;;  %s534_s28 = scalar_lea.sflag [#allocation5], %s7144_s23 }
  0xd9   : > { %s7148_s18 = scalar_lea.vmem [#allocation4], %s5352_s12 }
  0xda   : > { %6739 = dma.done.wait (%p7084_p6), %s534_s28, 512  }
  0xdb   : > { %6741 = vsyncadd (%p7084_p6), %s534_s28, 4294966784  ;;  %p9263_p4 = scmp.eq.s32.totalorder %s6898_s19, 0 }
  0xdd   : > { %6743 = dma.done.wait (%p9263_p4), [#allocation8], 8192   ;;  %p9264_p10 = pmov %p9263_p4 }
  0xde   : > { %p9265_p11 = pmov %p9263_p4 }
  0xdf   : > { %6745 = vsyncadd (%p9264_p10), [#allocation8], 4294959104 }
  0xe0   : > { %6747 = dma.done.wait (%p9265_p11), [#allocation11], 8192   ;;  %p9266_p3 = pmov %p9263_p4 }
  0xe2   : > { %6749 = vsyncadd (%p9266_p3), [#allocation11], 4294959104  ;;  %p9267_p5 = pmov %p9266_p3 }
  0xe3   : > { %p9268_p7 = pmov %p9266_p3 }
  0xe4   : > { %6751 = dma.done.wait (%p9267_p5), [#allocation14], 10240  }
  0xe5   : > { %6753 = vsyncadd (%p9268_p7), [#allocation14], 4294957056  ;;  %v8998_v0 = vmov 0   ;;  %v5768_v1 = vld [vmem:[#allocation7 + $0x4] ss:$16 sps:$4 sm:$0xff]   ;;  %v5823_v39 = vld [vmem:[%s7148_s18 + $0x8] sm:$0xff]  }
  0xe6   : > { %914 = vmatprep.mubr.bf16.mxu1 %v8998_v0  ;;  %1315 = vmatprep.mubr.bf16.mxu0 %v8998_v0  ;;  %v5770_v2 = vld [vmem:[#allocation7] ss:$16 sps:$4 sm:$0xff]   ;;  %v7170_v3 = vld [vmem:[#allocation9 + $0x4] ss:$16 sps:$4 sm:$0xff]   ;;  %v5819_v32 = vld [vmem:[#allocation7 + $0xc] ss:$16 sps:$4 sm:$0xff]  }
  0xe7   : > { %5761 = vset.pattern.permute.xlu0 %v8998_v0  ;;  %5762 = vset.pattern.permute.xlu1 %v8998_v0  ;;  %v5773_v4 = vld [vmem:[#allocation9] ss:$16 sps:$4 sm:$0xff]   ;;  %v5774_v5 = vld [vmem:[#allocation7 + $0x24] ss:$16 sps:$4 sm:$0xff]   ;;  %v5817_v35 = vld [vmem:[#allocation7 + $0x8] ss:$16 sps:$4 sm:$0xff]  }
  0xe8   : > { %882 = vmatprep.subr.bf16.mxu1 %v5768_v1  ;;  %v5776_v6 = vld [vmem:[#allocation7 + $0x20] ss:$16 sps:$4 sm:$0xff]   ;;  %1283 = vmatprep.subr.bf16.mxu0 %v7170_v3  ;;  %v5777_v7 = vld [vmem:[#allocation9 + $0x24] ss:$16 sps:$4 sm:$0xff]   ;;  %v5822_v36 = vld [vmem:[#allocation7 + $0x2c] ss:$16 sps:$4 sm:$0xff]  }
  0xe9   : > { %883 = vmatpush1.bf16.msra.mxu1 %v5770_v2  ;;  %1284 = vmatpush1.bf16.msra.mxu0 %v5773_v4  ;;  %v5779_v8 = vld [vmem:[#allocation9 + $0x20] ss:$16 sps:$4 sm:$0xff]   ;;  %v5780_v9 = vld [vmem:[#allocation7 + $0x44] ss:$16 sps:$4 sm:$0xff]   ;;  %v5820_v37 = vld [vmem:[#allocation7 + $0x28] ss:$16 sps:$4 sm:$0xff]  }
  0xea   : > { %884 = vmatprep.subr.bf16.mxu1 %v5774_v5  ;;  %1285 = vmatprep.subr.bf16.mxu0 %v5777_v7  ;;  %v5782_v10 = vld [vmem:[#allocation7 + $0x40] ss:$16 sps:$4 sm:$0xff]   ;;  %v5783_v11 = vld [vmem:[#allocation9 + $0x44] ss:$16 sps:$4 sm:$0xff]   ;;  %v5826_v38 = vld [vmem:[#allocation7 + $0x4c] ss:$16 sps:$4 sm:$0xff]  }
  0xeb   : > { %v5786_v12 = vld [vmem:[#allocation7 + $0x64] ss:$16 sps:$4 sm:$0xff]   ;;  %v5785_v13 = vld [vmem:[#allocation9 + $0x40] ss:$16 sps:$4 sm:$0xff]   ;;  %v5824_v40 = vld [vmem:[#allocation7 + $0x48] ss:$16 sps:$4 sm:$0xff]  }
  0xec   : > { %v5789_v14 = vld [vmem:[#allocation9 + $0x64] ss:$16 sps:$4 sm:$0xff]   ;;  %v5788_v15 = vld [vmem:[#allocation7 + $0x60] ss:$16 sps:$4 sm:$0xff]   ;;  %v5829_v41 = vld [vmem:[#allocation7 + $0x6c] ss:$16 sps:$4 sm:$0xff]  }
  0xed   : > { %885 = vmatpush1.bf16.msra.mxu1 %v5776_v6  ;;  %1286 = vmatpush1.bf16.msra.mxu0 %v5779_v8  ;;  %v5792_v16 = vld [vmem:[#allocation7 + $0x84] ss:$16 sps:$4 sm:$0xff]   ;;  %v5791_v17 = vld [vmem:[#allocation9 + $0x60] ss:$16 sps:$4 sm:$0xff]   ;;  %v5827_v42 = vld [vmem:[#allocation7 + $0x68] ss:$16 sps:$4 sm:$0xff]  }
  0xee   : > { %886 = vmatprep.subr.bf16.mxu1 %v5780_v9  ;;  %1287 = vmatprep.subr.bf16.mxu0 %v5783_v11  ;;  %v5795_v18 = vld [vmem:[#allocation9 + $0x84] ss:$16 sps:$4 sm:$0xff]   ;;  %v5794_v19 = vld [vmem:[#allocation7 + $0x80] ss:$16 sps:$4 sm:$0xff]   ;;  %v5833_v43 = vld [vmem:[#allocation7 + $0x8c] ss:$16 sps:$4 sm:$0xff]  }
  0xef   : > { %v5798_v20 = vld [vmem:[#allocation7 + $0xa4] ss:$16 sps:$4 sm:$0xff]   ;;  %v5797_v21 = vld [vmem:[#allocation9 + $0x80] ss:$16 sps:$4 sm:$0xff]   ;;  %v5831_v45 = vld [vmem:[#allocation7 + $0x88] ss:$16 sps:$4 sm:$0xff]  }
  0xf0   : > { %v5801_v22 = vld [vmem:[#allocation9 + $0xa4] ss:$16 sps:$4 sm:$0xff]   ;;  %v5800_v23 = vld [vmem:[#allocation7 + $0xa0] ss:$16 sps:$4 sm:$0xff]   ;;  %v5836_v46 = vld [vmem:[#allocation7 + $0xac] ss:$16 sps:$4 sm:$0xff]  }
  0xf1   : > { %887 = vmatpush1.bf16.msra.mxu1 %v5782_v10  ;;  %1288 = vmatpush1.bf16.msra.mxu0 %v5785_v13  ;;  %v5804_v24 = vld [vmem:[#allocation7 + $0xc4] ss:$16 sps:$4 sm:$0xff]   ;;  %v7173_v25 = vld [vmem:[#allocation9 + $0xa0] ss:$16 sps:$4 sm:$0xff]   ;;  %v5834_v47 = vld [vmem:[#allocation7 + $0xa8] ss:$16 sps:$4 sm:$0xff]  }
  0xf2   : > { %888 = vmatprep.subr.bf16.mxu1 %v5786_v12  ;;  %1289 = vmatprep.subr.bf16.mxu0 %v5789_v14  ;;  %v7175_v26 = vld [vmem:[#allocation9 + $0xc4] ss:$16 sps:$4 sm:$0xff]   ;;  %v5806_v27 = vld [vmem:[#allocation7 + $0xc0] ss:$16 sps:$4 sm:$0xff]   ;;  %v5840_v48 = vld [vmem:[#allocation7 + $0xcc] ss:$16 sps:$4 sm:$0xff]  }
  0xf3   : > { %v5810_v28 = vld [vmem:[#allocation7 + $0xe4] ss:$16 sps:$4 sm:$0xff]   ;;  %v7178_v29 = vld [vmem:[#allocation9 + $0xc0] ss:$16 sps:$4 sm:$0xff]   ;;  %v5837_v49 = vld [vmem:[%s7148_s18 + $0x18] sm:$0xff]   ;;  %p623_p6 = scmp.lt.s32.totalorder %s6898_s19, 1 }
  0xf4   : > { %v7181_v30 = vld [vmem:[#allocation9 + $0xe4] ss:$16 sps:$4 sm:$0xff]   ;;  %v5812_v31 = vld [vmem:[#allocation7 + $0xe0] ss:$16 sps:$4 sm:$0xff]   ;;  %v5838_v50 = vld [vmem:[#allocation7 + $0xc8] ss:$16 sps:$4 sm:$0xff]  }
  0xf5   : > { %889 = vmatpush1.bf16.msra.mxu1 %v5788_v15  ;;  %1290 = vmatpush1.bf16.msra.mxu0 %v5791_v17  ;;  %v7184_v33 = vld [vmem:[#allocation9 + $0xe0] ss:$16 sps:$4 sm:$0xff]   ;;  %v5843_v51 = vld [vmem:[#allocation7 + $0xec] ss:$16 sps:$4 sm:$0xff]   ;;  %v5841_v52 = vld [vmem:[#allocation7 + $0xe8] ss:$16 sps:$4 sm:$0xff]  }
  0xf6   : > { %890 = vmatprep.subr.bf16.mxu1 %v5792_v16  ;;  %1291 = vmatprep.subr.bf16.mxu0 %v5795_v18  ;;  %v5816_v34 = vld [vmem:[%s7148_s18] sm:$0xff]   ;;  %v5830_v44 = vld [vmem:[%s7148_s18 + $0x10] sm:$0xff]   ;;  %v7197_v53 = vld [vmem:[#allocation9 + $0xc] ss:$16 sps:$4 sm:$0xff]   ;;  %s624_s26 = scalar_select %p623_p6, %s6898_s19, 1 }
  0xf7   : > { %v7200_v54 = vld [vmem:[#allocation9 + $0x8] ss:$16 sps:$4 sm:$0xff]   ;;  %v7202_v55 = vld [vmem:[#allocation9 + $0x2c] ss:$16 sps:$4 sm:$0xff]   ;;  %v7252_v7 = vld [vmem:[#allocation12 + $0x4] ss:$16 sps:$4 sm:$0xff]  }
  0xf8   : > { %v7205_v56 = vld [vmem:[#allocation9 + $0x28] ss:$16 sps:$4 sm:$0xff]   ;;  %v7207_v57 = vld [vmem:[#allocation9 + $0x4c] ss:$16 sps:$4 sm:$0xff]   ;;  %v7256_v9 = vld [vmem:[#allocation12] ss:$16 sps:$4 sm:$0xff]  }
  0xf9   : > { %891 = vmatpush1.bf16.msra.mxu1 %v5794_v19  ;;  %1292 = vmatpush1.bf16.msra.mxu0 %v5797_v21  ;;  %v7212_v58 = vld [vmem:[#allocation9 + $0x48] ss:$16 sps:$4 sm:$0xff]   ;;  %v7214_v59 = vld [vmem:[#allocation9 + $0x6c] ss:$16 sps:$4 sm:$0xff]   ;;  %v7264_v11 = vld [vmem:[#allocation12 + $0x24] ss:$16 sps:$4 sm:$0xff]  }
  0xfa   : > { %892 = vmatprep.subr.bf16.mxu1 %v5798_v20  ;;  %1293 = vmatprep.subr.bf16.mxu0 %v5801_v22  ;;  %v7219_v60 = vld [vmem:[#allocation9 + $0x68] ss:$16 sps:$4 sm:$0xff]   ;;  %v7223_v61 = vld [vmem:[#allocation9 + $0x8c] ss:$16 sps:$4 sm:$0xff]   ;;  %v7268_v13 = vld [vmem:[#allocation12 + $0x20] ss:$16 sps:$4 sm:$0xff]  }
  0xfb   : > { %v7226_v62 = vld [vmem:[#allocation9 + $0x88] ss:$16 sps:$4 sm:$0xff]   ;;  %v7229_v63 = vld [vmem:[#allocation9 + $0xac] ss:$16 sps:$4 sm:$0xff]   ;;  %v7276_v15 = vld [vmem:[#allocation12 + $0x44] ss:$16 sps:$4 sm:$0xff]  }
  0xfc   : > { %v7232_v1 = vld [vmem:[#allocation9 + $0xa8] ss:$16 sps:$4 sm:$0xff]   ;;  %v7236_v2 = vld [vmem:[#allocation9 + $0xcc] ss:$16 sps:$4 sm:$0xff]   ;;  %v7280_v17 = vld [vmem:[#allocation12 + $0x40] ss:$16 sps:$4 sm:$0xff]  }
  0xfd   : > { %893 = vmatpush1.bf16.msra.mxu1 %v5800_v23  ;;  %1294 = vmatpush1.bf16.msra.mxu0 %v7173_v25  ;;  %v7239_v4 = vld [vmem:[#allocation9 + $0xc8] ss:$16 sps:$4 sm:$0xff]   ;;  %v7242_v5 = vld [vmem:[#allocation9 + $0xec] ss:$16 sps:$4 sm:$0xff]   ;;  %v7288_v19 = vld [vmem:[#allocation12 + $0x64] ss:$16 sps:$4 sm:$0xff]  }
  0xfe   : > { %894 = vmatprep.subr.bf16.mxu1 %v5804_v24  ;;  %1295 = vmatprep.subr.bf16.mxu0 %v7175_v26  ;;  %v7245_v6 = vld [vmem:[#allocation9 + $0xe8] ss:$16 sps:$4 sm:$0xff]   ;;  %v7254_v8 = vld [vmem:[#allocation12 + $0xc] ss:$16 sps:$4 sm:$0xff]   ;;  %v7292_v21 = vld [vmem:[#allocation12 + $0x60] ss:$16 sps:$4 sm:$0xff]  }
  0xff   : > { %v7259_v10 = vld [vmem:[#allocation12 + $0x8] ss:$16 sps:$4 sm:$0xff]   ;;  %v7266_v12 = vld [vmem:[#allocation12 + $0x2c] ss:$16 sps:$4 sm:$0xff]   ;;  %v7300_v23 = vld [vmem:[#allocation12 + $0x84] ss:$16 sps:$4 sm:$0xff]  }
 0x100   : > { %v7271_v14 = vld [vmem:[#allocation12 + $0x28] ss:$16 sps:$4 sm:$0xff]   ;;  %v7278_v16 = vld [vmem:[#allocation12 + $0x4c] ss:$16 sps:$4 sm:$0xff]   ;;  %s7470_s13 = sshll.u32 %s624_s26, 3  ;;  %s9365_s22 = sld [smem:[#allocation110_spill]] }
 0x101   : > { %895 = vmatpush1.bf16.msra.mxu1 %v5806_v27  ;;  %1296 = vmatpush1.bf16.msra.mxu0 %v7178_v29  ;;  %v7283_v18 = vld [vmem:[#allocation12 + $0x48] ss:$16 sps:$4 sm:$0xff]   ;;  %v7290_v20 = vld [vmem:[#allocation12 + $0x6c] ss:$16 sps:$4 sm:$0xff]   ;;  %v7304_v27 = vld [vmem:[#allocation12 + $0x80] ss:$16 sps:$4 sm:$0xff]   ;;  %s626_s17 = scalar_lea.vmem %s8971_s1, %s7470_s13 }
 0x102   : > { %896 = vmatprep.subr.bf16.mxu1 %v5810_v28  ;;  %1297 = vmatprep.subr.bf16.mxu0 %v7181_v30  ;;  %v7295_v22 = vld [vmem:[#allocation12 + $0x68] ss:$16 sps:$4 sm:$0xff]   ;;  %v7302_v24 = vld [vmem:[#allocation12 + $0x8c] ss:$16 sps:$4 sm:$0xff]   ;;  %9270 = vst [vmem:[#allocation26_spill] sm:$0xff] %v7304_v27  ;;  %s9726_s28 = sld [smem:[#allocation111_spill]] }
 0x103   : > { %9269 = vst [vmem:[#allocation25_spill] sm:$0xff] %v7302_v24  ;;  %v7307_v28 = vld [vmem:[#allocation12 + $0x88] ss:$16 sps:$4 sm:$0xff]   ;;  %s9732_s2 = sld [smem:[#allocation112_spill]]  ;;  %s5359_s24 = sshll.u32 %s7144_s23, 4 }
 0x104   : > { %9271 = vst [vmem:[#allocation27_spill] sm:$0xff] %v7307_v28  ;;  %s8885_s14 = scalar_lea.vmem [#allocation16], %s5359_s24  ;;  %s9734_s25 = sld [smem:[#allocation113_spill]] }
 0x105   : > { %897 = vmatpush1.bf16.msra.mxu1 %v5812_v31  ;;  %1298 = vmatpush1.bf16.msra.mxu0 %v7184_v33  ;;  %v7312_v31 = vld [vmem:[#allocation12 + $0xa4] ss:$16 sps:$4 sm:$0xff]   ;;  %s6797_s11 = smov 127   ;;  %s6798_s12 = smov 126  }
 0x106   : > { %955 = vmatprep.subr.bf16.mxu1 %v5819_v32  ;;  %1618 = vmatprep.subr.bf16.mxu0 %v7252_v7  ;;  %9272 = vst [vmem:[#allocation28_spill] sm:$0xff] %v7312_v31  ;;  %v7314_v32 = vld [vmem:[#allocation12 + $0xac] ss:$16 sps:$4 sm:$0xff]   ;;  %s5124_s24 = sshll.u32 %s8885_s14, 4  ;;  %p9736_p12 = scmp.ne.s32.totalorder %s9259_s7, 0  ;;  %s5125_s24 = int_to_ptr.vmem [resolvable:$true] %s5124_s24 }
 0x107   : > { %9273 = vst [vmem:[#allocation29_spill] sm:$0xff] %v7314_v32  ;;  %s6666_s21 = scalar_lea.vmem %s5125_s24, 256 }
 0x108   : > { %915 = vmatmul.mubr.bf16.vlgmr.msra.gmra.mrb[0].mxu1 %v5816_v34  ;;  %1316 = vmatmul.mubr.bf16.vlgmr.msra.gmra.mrb[0].mxu0 %v8998_v0  ;;  %p6667_p9 = scmp.ne.s32.totalorder %s5125_s24, %s6666_s21 }
 0x109   : > { %956 = vmatpush1.bf16.msra.mxu1 %v5817_v35  ;;  %924 = vmatprep.mubr.bf16.mxu1 %v8998_v0  ;;  %v7319_v35 = vld [vmem:[#allocation12 + $0xa8] ss:$16 sps:$4 sm:$0xff]   ;;  %s630_s26 = scalar_lea.vmem %s9732_s2, %s7470_s13  ;;  %s9735_s2 = sld [smem:[#allocation114_spill]] }
 0x10a   : > { %957 = vmatprep.subr.bf16.mxu1 %v5822_v36  ;;  %1650 = vmatprep.mubr.bf16.mxu0 %v8998_v0  ;;  %9275 = vst [vmem:[#allocation31_spill] sm:$0xff] %v7319_v35  ;;  %v7324_v36 = vld [vmem:[#allocation12 + $0xc4] ss:$16 sps:$4 sm:$0xff]   ;;  %p6668_p1 = pnand %p6667_p9, %p9736_p12 }
 0x10b   : > { %1619 = vmatpush1.bf16.msra.mxu0 %v7256_v9  ;;  %9276 = vst [vmem:[#allocation32_spill] sm:$0xff] %v7324_v36 }
 0x10c   : > { %1620 = vmatprep.subr.bf16.mxu0 %v7264_v11  ;;  %p6669_p13 = pneg %p6668_p1 }
 0x10d   : > { %958 = vmatpush1.bf16.msra.mxu1 %v5820_v37  ;;  %v7326_v37 = vld [vmem:[#allocation12 + $0xcc] ss:$16 sps:$4 sm:$0xff]  }
 0x10e   : > { %959 = vmatprep.subr.bf16.mxu1 %v5826_v38  ;;  %9277 = vst [vmem:[#allocation33_spill] sm:$0xff] %v7326_v37  ;;  %v7328_v38 = vld [vmem:[#allocation12 + $0xc0] ss:$16 sps:$4 sm:$0xff]  }
 0x10f   : > { %1621 = vmatpush1.bf16.msra.mxu0 %v7268_v13  ;;  %9278 = vst [vmem:[#allocation34_spill] sm:$0xff] %v7328_v38 }
 0x110   : > { %925 = vmatmul.mubr.bf16.gmra.mrb[4].mxu1 %v5823_v39  ;;  %1622 = vmatprep.subr.bf16.mxu0 %v7276_v15 }
 0x111   : > { %960 = vmatpush1.bf16.msra.mxu1 %v5824_v40  ;;  %934 = vmatprep.mubr.bf16.mxu1 %v8998_v0  ;;  %v7336_v40 = vld [vmem:[#allocation12 + $0xe4] ss:$16 sps:$4 sm:$0xff]  }
 0x112   : > { %961 = vmatprep.subr.bf16.mxu1 %v5829_v41  ;;  %9280 = vst [vmem:[#allocation36_spill] sm:$0xff] %v7336_v40  ;;  %v7338_v41 = vld [vmem:[#allocation12 + $0xec] ss:$16 sps:$4 sm:$0xff]  }
 0x113   : > { %1623 = vmatpush1.bf16.msra.mxu0 %v7280_v17  ;;  %9281 = vst [vmem:[#allocation37_spill] sm:$0xff] %v7338_v41 }
 0x114   : > { %1624 = vmatprep.subr.bf16.mxu0 %v7288_v19 }
 0x115   : > { %962 = vmatpush1.bf16.msra.mxu1 %v5827_v42  ;;  %v7340_v42 = vld [vmem:[#allocation12 + $0xe0] ss:$16 sps:$4 sm:$0xff]  }
 0x116   : > { %963 = vmatprep.subr.bf16.mxu1 %v5833_v43  ;;  %9282 = vst [vmem:[#allocation38_spill] sm:$0xff] %v7340_v42  ;;  %v7343_v43 = vld [vmem:[#allocation12 + $0xe8] ss:$16 sps:$4 sm:$0xff]  }
 0x117   : > { %1625 = vmatpush1.bf16.msra.mxu0 %v7292_v21  ;;  %9283 = vst [vmem:[#allocation39_spill] sm:$0xff] %v7343_v43 }
 0x118   : > { %935 = vmatmul.mubr.bf16.gmra.mrb[8].mxu1 %v5830_v44  ;;  %1626 = vmatprep.subr.bf16.mxu0 %v7300_v23 }
 0x119   : > { %964 = vmatpush1.bf16.msra.mxu1 %v5831_v45  ;;  %944 = vmatprep.mubr.bf16.mxu1 %v8998_v0  ;;  %v7350_v45 = vld [vmem:[#allocation10 + $0xc] ss:$16 sps:$4 sm:$0xff]  }
 0x11a   : > { %965 = vmatprep.subr.bf16.mxu1 %v5836_v46  ;;  %9285 = vst [vmem:[#allocation41_spill] sm:$0xff] %v7350_v45  ;;  %v7353_v46 = vld [vmem:[#allocation10] ss:$16 sps:$4 sm:$0xff]  }
 0x11b   : > { %1627 = vmatpush1.bf16.msra.mxu0 %v7304_v27  ;;  %9286 = vst [vmem:[#allocation42_spill] sm:$0xff] %v7353_v46 }
 0x11c   : > { %1628 = vmatprep.subr.bf16.mxu0 %v7312_v31 }
 0x11d   : > { %966 = vmatpush1.bf16.msra.mxu1 %v5834_v47  ;;  %v7355_v47 = vld [vmem:[#allocation10 + $0x8] ss:$16 sps:$4 sm:$0xff]  }
 0x11e   : > { %967 = vmatprep.subr.bf16.mxu1 %v5840_v48  ;;  %9287 = vst [vmem:[#allocation43_spill] sm:$0xff] %v7355_v47  ;;  %v7362_v48 = vld [vmem:[#allocation10 + $0x24] ss:$16 sps:$4 sm:$0xff]  }
 0x11f   : > { %9288 = vst [vmem:[#allocation44_spill] sm:$0xff] %v7362_v48 }
 0x120   : > { %945 = vmatmul.mubr.bf16.gmra.mrb[12].mxu1 %v5837_v49 }
 0x121   : > { %968 = vmatpush1.bf16.msra.mxu1 %v5838_v50  ;;  %987 = vmatprep.mubr.bf16.mxu1 %v8998_v0  ;;  %v7367_v50 = vld [vmem:[#allocation10 + $0x20] ss:$16 sps:$4 sm:$0xff]  }
 0x122   : > { %969 = vmatprep.subr.bf16.mxu1 %v5843_v51  ;;  %9290 = vst [vmem:[#allocation46_spill] sm:$0xff] %v7367_v50  ;;  %v7369_v51 = vld [vmem:[#allocation10 + $0x28] ss:$16 sps:$4 sm:$0xff]  }
 0x123   : > { %9291 = vst [vmem:[#allocation47_spill] sm:$0xff] %v7369_v51 }
 0x125   : > { %970 = vmatpush1.bf16.msra.mxu1 %v5841_v52  ;;  %v7376_v52 = vld [vmem:[#allocation10 + $0x44] ss:$16 sps:$4 sm:$0xff]  }
 0x126   : > { %1324 = vmatprep.subr.bf16.mxu1 %v7197_v53  ;;  %9292 = vst [vmem:[#allocation48_spill] sm:$0xff] %v7376_v52 }
 0x128   : > { %988 = vmatmul.mubr.bf16.vlgmr.msra.gmra.mrb[16].mxu1 %v5816_v34  ;;  %v7316_v34 = vld [vmem:[#allocation12 + $0xa0] ss:$16 sps:$4 sm:$0xff]  }
 0x129   : > { %1325 = vmatpush1.bf16.msra.mxu1 %v7200_v54  ;;  %997 = vmatprep.mubr.bf16.mxu1 %v8998_v0  ;;  %9274 = vst [vmem:[#allocation30_spill] sm:$0xff] %v7316_v34 }
 0x12a   : > { %1326 = vmatprep.subr.bf16.mxu1 %v7202_v55  ;;  %1629 = vmatpush1.bf16.msra.mxu0 %v7316_v34 }
 0x12b   : > { %1630 = vmatprep.subr.bf16.mxu0 %v7324_v36 }
 0x12d   : > { %1327 = vmatpush1.bf16.msra.mxu1 %v7205_v56 }
 0x12e   : > { %1328 = vmatprep.subr.bf16.mxu1 %v7207_v57  ;;  %1631 = vmatpush1.bf16.msra.mxu0 %v7328_v38 }
 0x12f   : > { %1632 = vmatprep.subr.bf16.mxu0 %v7336_v40 }
 0x130   : > { %998 = vmatmul.mubr.bf16.gmra.mrb[20].mxu1 %v5823_v39  ;;  %v7331_v39 = vld [vmem:[#allocation12 + $0xc8] ss:$16 sps:$4 sm:$0xff]  }
 0x131   : > { %1329 = vmatpush1.bf16.msra.mxu1 %v7212_v58  ;;  %1007 = vmatprep.mubr.bf16.mxu1 %v8998_v0  ;;  %9279 = vst [vmem:[#allocation35_spill] sm:$0xff] %v7331_v39 }
 0x132   : > { %1330 = vmatprep.subr.bf16.mxu1 %v7214_v59  ;;  %1633 = vmatpush1.bf16.msra.mxu0 %v7340_v42 }
 0x135   : > { %1331 = vmatpush1.bf16.msra.mxu1 %v7219_v60  ;;  %1651 = vmatmul.mubr.bf16.vlgmr.msra.gmra.mrb[4].mxu0 %v8998_v0 }
 0x136   : > { %1332 = vmatprep.subr.bf16.mxu1 %v7223_v61  ;;  %1892 = vmatprep.mubr.bf16.mxu0 %v8998_v0 }
 0x138   : > { %1008 = vmatmul.mubr.bf16.gmra.mrb[24].mxu1 %v5830_v44  ;;  %v7348_v44 = vld [vmem:[#allocation10 + $0x4] ss:$16 sps:$4 sm:$0xff]  }
 0x139   : > { %1333 = vmatpush1.bf16.msra.mxu1 %v7226_v62  ;;  %1017 = vmatprep.mubr.bf16.mxu1 %v8998_v0  ;;  %9284 = vst [vmem:[#allocation40_spill] sm:$0xff] %v7348_v44 }
 0x13a   : > { %1334 = vmatprep.subr.bf16.mxu1 %v7229_v63  ;;  %1860 = vmatprep.subr.bf16.mxu0 %v7348_v44  ;;  %v7422_v44 = vld [vmem:[#allocation10 + $0xcc] ss:$16 sps:$4 sm:$0xff]  }
 0x13b   : > { %1861 = vmatpush1.bf16.msra.mxu0 %v7353_v46  ;;  %v7380_v46 = vld [vmem:[#allocation10 + $0x40] ss:$16 sps:$4 sm:$0xff]   ;;  %9309 = vst [vmem:[#allocation65_spill] sm:$0xff] %v7422_v44 }
 0x13c   : > { %1862 = vmatprep.subr.bf16.mxu0 %v7362_v48  ;;  %9294 = vst [vmem:[#allocation50_spill] sm:$0xff] %v7380_v46  ;;  %v7420_v48 = vld [vmem:[#allocation10 + $0xc4] ss:$16 sps:$4 sm:$0xff]  }
 0x13d   : > { %1335 = vmatpush1.bf16.msra.mxu1 %v7232_v1  ;;  %9308 = vst [vmem:[#allocation64_spill] sm:$0xff] %v7420_v48 }
 0x13e   : > { %1336 = vmatprep.subr.bf16.mxu1 %v7236_v2 }
 0x13f   : > { %1863 = vmatpush1.bf16.msra.mxu0 %v7367_v50  ;;  %v7390_v50 = vld [vmem:[#allocation10 + $0x6c] ss:$16 sps:$4 sm:$0xff]  }
 0x140   : > { %1018 = vmatmul.mubr.bf16.gmra.mrb[28].mxu1 %v5837_v49  ;;  %v7364_v49 = vld [vmem:[#allocation10 + $0x2c] ss:$16 sps:$4 sm:$0xff]   ;;  %1864 = vmatprep.subr.bf16.mxu0 %v7376_v52  ;;  %9297 = vst [vmem:[#allocation53_spill] sm:$0xff] %v7390_v50  ;;  %v7406_v52 = vld [vmem:[#allocation10 + $0x88] ss:$16 sps:$4 sm:$0xff]  }
 0x141   : > { %1337 = vmatpush1.bf16.msra.mxu1 %v7239_v4  ;;  %1356 = vmatprep.mubr.bf16.mxu1 %v8998_v0  ;;  %9289 = vst [vmem:[#allocation45_spill] sm:$0xff] %v7364_v49  ;;  %9303 = vst [vmem:[#allocation59_spill] sm:$0xff] %v7406_v52 }
 0x142   : > { %1338 = vmatprep.subr.bf16.mxu1 %v7242_v5 }
 0x143   : > { %1865 = vmatpush1.bf16.msra.mxu0 %v7380_v46  ;;  %v7402_v46 = vld [vmem:[#allocation10 + $0x8c] ss:$16 sps:$4 sm:$0xff]  }
 0x144   : > { %9301 = vst [vmem:[#allocation57_spill] sm:$0xff] %v7402_v46 }
 0x145   : > { %1339 = vmatpush1.bf16.msra.mxu1 %v7245_v6 }
 0x146   : > { %1659 = vmatprep.subr.bf16.mxu1 %v7254_v8 }
 0x148   : > { %1357 = vmatmul.mubr.bf16.vlgmr.msra.gmra.mrb[32].mxu1 %v8998_v0 }
 0x149   : > { %1691 = vmatprep.mubr.bf16.mxu1 %v8998_v0  ;;  %1660 = vmatpush1.bf16.msra.mxu1 %v7259_v10 }
 0x14a   : > { %1661 = vmatprep.subr.bf16.mxu1 %v7266_v12 }
 0x14d   : > { %1662 = vmatpush1.bf16.msra.mxu1 %v7271_v14 }
 0x14e   : > { %1663 = vmatprep.subr.bf16.mxu1 %v7278_v16 }
 0x151   : > { %1664 = vmatpush1.bf16.msra.mxu1 %v7283_v18 }
 0x152   : > { %1665 = vmatprep.subr.bf16.mxu1 %v7290_v20 }
 0x155   : > { %1666 = vmatpush1.bf16.msra.mxu1 %v7295_v22 }
 0x156   : > { %1667 = vmatprep.subr.bf16.mxu1 %v7302_v24 }
 0x159   : > { %1668 = vmatpush1.bf16.msra.mxu1 %v7307_v28 }
 0x15a   : > { %1669 = vmatprep.subr.bf16.mxu1 %v7314_v32 }
 0x15d   : > { %1670 = vmatpush1.bf16.msra.mxu1 %v7319_v35 }
 0x15e   : > { %1671 = vmatprep.subr.bf16.mxu1 %v7326_v37 }
 0x161   : > { %1672 = vmatpush1.bf16.msra.mxu1 %v7331_v39 }
 0x162   : > { %1673 = vmatprep.subr.bf16.mxu1 %v7338_v41 }
 0x165   : > { %1674 = vmatpush1.bf16.msra.mxu1 %v7343_v43 }
 0x166   : > { %1901 = vmatprep.subr.bf16.mxu1 %v7350_v45  ;;  %v7382_v45 = vld [vmem:[#allocation10 + $0x48] ss:$16 sps:$4 sm:$0xff]  }
 0x167   : > { %9295 = vst [vmem:[#allocation51_spill] sm:$0xff] %v7382_v45 }
 0x168   : > { %1692 = vmatmul.mubr.bf16.vlgmr.msra.gmra.mrb[36].mxu1 %v8998_v0 }
 0x169   : > { %1902 = vmatpush1.bf16.msra.mxu1 %v7355_v47  ;;  %1933 = vmatprep.mubr.bf16.mxu1 %v8998_v0  ;;  %v7378_v47 = vld [vmem:[#allocation10 + $0x4c] ss:$16 sps:$4 sm:$0xff]   ;;  %v7388_v0 = vld [vmem:[#allocation10 + $0x64] ss:$16 sps:$4 sm:$0xff]  }
 0x16a   : > { %1903 = vmatprep.subr.bf16.mxu1 %v7364_v49  ;;  %9293 = vst [vmem:[#allocation49_spill] sm:$0xff] %v7378_v47  ;;  %9296 = vst [vmem:[#allocation52_spill] sm:$0xff] %v7388_v0  ;;  %v7394_v49 = vld [vmem:[#allocation10 + $0x68] ss:$16 sps:$4 sm:$0xff]   ;;  %1866 = vmatprep.subr.bf16.mxu0 %v7388_v0 }
 0x16b   : > { %9299 = vst [vmem:[#allocation55_spill] sm:$0xff] %v7394_v49  ;;  %v7418_v0 = vld [vmem:[#allocation10 + $0xa8] ss:$16 sps:$4 sm:$0xff]  }
 0x16c   : > { %9307 = vst [vmem:[#allocation63_spill] sm:$0xff] %v7418_v0 }
 0x16d   : > { %1904 = vmatpush1.bf16.msra.mxu1 %v7369_v51  ;;  %v7392_v51 = vld [vmem:[#allocation10 + $0x60] ss:$16 sps:$4 sm:$0xff]  }
 0x16e   : > { %1905 = vmatprep.subr.bf16.mxu1 %v7378_v47  ;;  %9298 = vst [vmem:[#allocation54_spill] sm:$0xff] %v7392_v51  ;;  %1867 = vmatpush1.bf16.msra.mxu0 %v7392_v51  ;;  %v7400_v47 = vld [vmem:[#allocation10 + $0x84] ss:$16 sps:$4 sm:$0xff]   ;;  %v7414_v51 = vld [vmem:[#allocation10 + $0xac] ss:$16 sps:$4 sm:$0xff]  }
 0x16f   : > { %9300 = vst [vmem:[#allocation56_spill] sm:$0xff] %v7400_v47  ;;  %1868 = vmatprep.subr.bf16.mxu0 %v7400_v47  ;;  %9305 = vst [vmem:[#allocation61_spill] sm:$0xff] %v7414_v51  ;;  %v7436_v47 = vld [vmem:[#allocation10 + $0xec] ss:$16 sps:$4 sm:$0xff]  }
 0x170   : > { %9313 = vst [vmem:[#allocation69_spill] sm:$0xff] %v7436_v47 }
 0x171   : > { %1906 = vmatpush1.bf16.msra.mxu1 %v7382_v45  ;;  %v7404_v45 = vld [vmem:[#allocation10 + $0x80] ss:$16 sps:$4 sm:$0xff]  }
 0x172   : > { %1907 = vmatprep.subr.bf16.mxu1 %v7390_v50  ;;  %9302 = vst [vmem:[#allocation58_spill] sm:$0xff] %v7404_v45  ;;  %1869 = vmatpush1.bf16.msra.mxu0 %v7404_v45  ;;  %v7412_v50 = vld [vmem:[#allocation10 + $0xa4] ss:$16 sps:$4 sm:$0xff]   ;;  %v7427_v45 = vld [vmem:[#allocation10 + $0xc0] ss:$16 sps:$4 sm:$0xff]  }
 0x173   : > { %9304 = vst [vmem:[#allocation60_spill] sm:$0xff] %v7412_v50  ;;  %1870 = vmatprep.subr.bf16.mxu0 %v7412_v50  ;;  %9310 = vst [vmem:[#allocation66_spill] sm:$0xff] %v7427_v45  ;;  %v7439_v50 = vld [vmem:[#allocation10 + $0xe0] ss:$16 sps:$4 sm:$0xff]  }
 0x174   : > { %9314 = vst [vmem:[#allocation70_spill] sm:$0xff] %v7439_v50 }
 0x175   : > { %1908 = vmatpush1.bf16.msra.mxu1 %v7394_v49  ;;  %v7416_v49 = vld [vmem:[#allocation10 + $0xa0] ss:$16 sps:$4 sm:$0xff]  }
 0x176   : > { %1909 = vmatprep.subr.bf16.mxu1 %v7402_v46  ;;  %9306 = vst [vmem:[#allocation62_spill] sm:$0xff] %v7416_v49  ;;  %1871 = vmatpush1.bf16.msra.mxu0 %v7416_v49  ;;  %v7433_v46 = vld [vmem:[#allocation10 + $0xe4] ss:$16 sps:$4 sm:$0xff]   ;;  %v7443_v49 = vld [vmem:[#allocation10 + $0xe8] ss:$16 sps:$4 sm:$0xff]  }
 0x177   : > { %1872 = vmatprep.subr.bf16.mxu0 %v7420_v48  ;;  %9312 = vst [vmem:[#allocation68_spill] sm:$0xff] %v7433_v46  ;;  %9315 = vst [vmem:[#allocation71_spill] sm:$0xff] %v7443_v49 }
 0x179   : > { %1910 = vmatpush1.bf16.msra.mxu1 %v7406_v52  ;;  %v7431_v52 = vld [vmem:[#allocation10 + $0xc8] ss:$16 sps:$4 sm:$0xff]  }
 0x17a   : > { %1911 = vmatprep.subr.bf16.mxu1 %v7414_v51  ;;  %9311 = vst [vmem:[#allocation67_spill] sm:$0xff] %v7431_v52  ;;  %1873 = vmatpush1.bf16.msra.mxu0 %v7427_v45  ;;  %v9028_v45 = vlaneseq }
 0x17b   : > { %1874 = vmatprep.subr.bf16.mxu0 %v7433_v46 }
 0x17d   : > { %1912 = vmatpush1.bf16.msra.mxu1 %v7418_v0 }
 0x17e   : > { %1913 = vmatprep.subr.bf16.mxu1 %v7422_v44  ;;  %1875 = vmatpush1.bf16.msra.mxu0 %v7439_v50  ;;  %v7451_v44 = vshrl.u32 %v9028_v45, 7 }
 0x17f   : > { %1986 = vmatprep.subr.bf16.mxu0 %v7170_v3 }
 0x180   : > { %9316 = vst [vmem:[#allocation72_spill] sm:$0xff] %v7451_v44  ;;  %v7460_v50 = vsub.s32 1, %v7451_v44 }
 0x181   : > { %1914 = vmatpush1.bf16.msra.mxu1 %v7431_v52  ;;  %v7454_v52 = vsub.s32 0, %v7451_v44 }
 0x182   : > { %1915 = vmatprep.subr.bf16.mxu1 %v7436_v47  ;;  %v676_v47 = vld [vmem:[%s8974_s4] sm:$0xf]  ;;  %9318 = vst [vmem:[#allocation74_spill] sm:$0xff] %v7460_v50 }
 0x183   : > { %9317 = vst [vmem:[#allocation73_spill] sm:$0xff] %v7454_v52  ;;  %v685_v3 = vrot.slane %v676_v47, %v7460_v50 }
 0x185   : > { %1916 = vmatpush1.bf16.msra.mxu1 %v7443_v49  ;;  %v681_v49 = vrot.slane %v676_v47, %v7454_v52 }
 0x186   : > { %2027 = vmatprep.subr.bf16.mxu1 %v7197_v53 }
 0x1db   : > { %v916_v53 = vpop.f32.mrb[0].mxu1  ;;  %v1317_v51 = vpop.f32.mrb[0].mxu0 }
 0x1dc   : > { %v917_v46 = vadd.f32 %v916_v53, %v681_v49  ;;  %v918_v48 = vpop.f32.mrb[1].mxu1  ;;  %v1319_v40 = vpop.f32.mrb[1].mxu0  ;;  %v1082_v53 = vld [vmem:[%s626_s17] sm:$0xff]  ;;  %s5105_s17 = scalar_lea.sflag [#allocation6], %s7144_s23 }
 0x1dd   : > { %v919_v45 = vadd.f32 %v918_v48, %v685_v3  ;;  %v920_v0 = vpop.f32.mrb[2].mxu1  ;;  %v1321_v37 = vpop.f32.mrb[2].mxu0 }
 0x1de   : > { %v7465_v43 = vadd.f32 %v920_v0, %v681_v49  ;;  %v1365_v42 = vadd.f32 %v1317_v51, %v917_v46  ;;  %v922_v41 = vpop.f32.mrb[3].mxu1  ;;  %v1322_v52 = vpop.f32.mrb[3].mxu0  ;;  %v7478_v51 = vadd.s32 4294967295, %v1082_v53 }
 0x1df   : > { %v7467_v39 = vadd.f32 %v922_v41, %v685_v3  ;;  %v1366_v38 = vadd.f32 %v1319_v40, %v919_v45 }
 0x1e0   : > { %9319 = vst [vmem:[#allocation75_spill] sm:$0xff] %v7465_v43  ;;  %9322 = vst [vmem:[#allocation78_spill] sm:$0xff] %v7478_v51  ;;  %vm1971_vm0 = vcmp.eq.s32.totalorder %v7478_v51, 0 }
 0x1e1   : > { %9320 = vst [vmem:[#allocation76_spill] sm:$0xff] %v7467_v39  ;;  %v9326_v39 = vmov 0  }
 0x1e2   : > { %v1972_v43 = vsel %vm1971_vm0, 1, %v9326_v39 }
 0x1e3   : > { %v926_v48 = vpop.f32.mrb[4].mxu1  ;;  %1974 = vperm.xlu0 %5761, %v1972_v43  }
 0x1e4   : > { %v7476_v0 = vadd.f32 %v926_v48, %v681_v49  ;;  %v928_v46 = vpop.f32.mrb[5].mxu1 }
 0x1e5   : > { %v7480_v41 = vadd.f32 %v928_v46, %v685_v3  ;;  %v930_v40 = vpop.f32.mrb[6].mxu1 }
 0x1e6   : > { %9321 = vst [vmem:[#allocation77_spill] sm:$0xff] %v7476_v0  ;;  %v7482_v37 = vadd.f32 %v930_v40, %v681_v49  ;;  %v932_v45 = vpop.f32.mrb[7].mxu1 }
 0x1e7   : > { %9323 = vst [vmem:[#allocation79_spill] sm:$0xff] %v7480_v41  ;;  %v7485_v52 = vadd.f32 %v932_v45, %v685_v3 }
 0x1e8   : > { %9324 = vst [vmem:[#allocation80_spill] sm:$0xff] %v7482_v37 }
 0x1e9   : > { %9325 = vst [vmem:[#allocation81_spill] sm:$0xff] %v7485_v52 }
 0x1eb   : > { %v936_v50 = vpop.f32.mrb[8].mxu1 }
 0x1ec   : > { %v7488_v36 = vadd.f32 %v936_v50, %v681_v49  ;;  %v938_v48 = vpop.f32.mrb[9].mxu1 }
 0x1ed   : > { %v7490_v0 = vadd.f32 %v938_v48, %v685_v3  ;;  %v940_v53 = vpop.f32.mrb[10].mxu1  ;;  %v7505_v48 = vsub.s32 2, %v7451_v44 }
 0x1ee   : > { %9327 = vst [vmem:[#allocation82_spill] sm:$0xff] %v7488_v36  ;;  %v7492_v46 = vadd.f32 %v940_v53, %v681_v49  ;;  %v942_v41 = vpop.f32.mrb[11].mxu1  ;;  %v7508_v53 = vsub.s32 3, %v7451_v44 }
 0x1ef   : > { %9328 = vst [vmem:[#allocation83_spill] sm:$0xff] %v7490_v0  ;;  %v7494_v40 = vadd.f32 %v942_v41, %v685_v3  ;;  %9335 = vst [vmem:[#allocation90_spill] sm:$0xff] %v7505_v48 }
 0x1f0   : > { %9329 = vst [vmem:[#allocation84_spill] sm:$0xff] %v7492_v46  ;;  %9336 = vst [vmem:[#allocation91_spill] sm:$0xff] %v7508_v53 }
 0x1f1   : > { %9330 = vst [vmem:[#allocation85_spill] sm:$0xff] %v7494_v40  ;;  %v689_v40 = vrot.slane %v676_v47, %v7505_v48  ;;  %v5434_v48 = vmul.f32 -1.442695, %v1366_v38 }
 0x1f3   : > { %v946_v37 = vpop.f32.mrb[12].mxu1  ;;  %5988 = vpow2.f32 %v5434_v48 }
 0x1f4   : > { %v7496_v35 = vadd.f32 %v946_v37, %v681_v49  ;;  %v948_v45 = vpop.f32.mrb[13].mxu1 }
 0x1f5   : > { %v7498_v52 = vadd.f32 %v948_v45, %v685_v3  ;;  %v950_v51 = vpop.f32.mrb[14].mxu1 }
 0x1f6   : > { %9331 = vst [vmem:[#allocation86_spill] sm:$0xff] %v7496_v35  ;;  %v7500_v43 = vadd.f32 %v950_v51, %v681_v49  ;;  %v952_v50 = vpop.f32.mrb[15].mxu1  ;;  %v693_v35 = vrot.slane %v676_v47, %v7508_v53  ;;  %v5433_v47 = vmul.f32 -1.442695, %v1365_v42 }
 0x1f7   : > { %9332 = vst [vmem:[#allocation87_spill] sm:$0xff] %v7498_v52  ;;  %v7502_v36 = vadd.f32 %v952_v50, %v685_v3 }
 0x1f8   : > { %9333 = vst [vmem:[#allocation88_spill] sm:$0xff] %v7500_v43  ;;  %5990 = vpow2.f32 %v5433_v47 }
 0x1f9   : > { %9334 = vst [vmem:[#allocation89_spill] sm:$0xff] %v7502_v36 }
 0x1fb   : > { %v989_v41 = vpop.f32.mrb[16].mxu1 }
 0x1fc   : > { %v991_v37 = vpop.f32.mrb[17].mxu1 }
 0x1fd   : > { %v993_v45 = vpop.f32.mrb[18].mxu1 }
 0x1fe   : > { %v7512_v52 = vadd.f32 %v993_v45, %v689_v40  ;;  %v995_v49 = vpop.f32.mrb[19].mxu1 }
 0x1ff   : > { %v7514_v51 = vadd.f32 %v995_v49, %v693_v35 }
 0x200   : > { %9337 = vst [vmem:[#allocation92_spill] sm:$0xff] %v7512_v52 }
 0x201   : > { %9338 = vst [vmem:[#allocation93_spill] sm:$0xff] %v7514_v51 }
 0x203   : > { %v999_v3 = vpop.f32.mrb[20].mxu1 }
 0x204   : > { %v7516_v50 = vadd.f32 %v999_v3, %v689_v40  ;;  %v1001_v36 = vpop.f32.mrb[21].mxu1 }
 0x205   : > { %v7518_v43 = vadd.f32 %v1001_v36, %v693_v35  ;;  %v1003_v44 = vpop.f32.mrb[22].mxu1 }
 0x206   : > { %9339 = vst [vmem:[#allocation94_spill] sm:$0xff] %v7516_v50  ;;  %v7520_v46 = vadd.f32 %v1003_v44, %v689_v40  ;;  %v1005_v0 = vpop.f32.mrb[23].mxu1 }
 0x207   : > { %9340 = vst [vmem:[#allocation95_spill] sm:$0xff] %v7518_v43  ;;  %v7522_v34 = vadd.f32 %v1005_v0, %v693_v35  ;;  %v5989_v0 = vpop.eup %5988 }
 0x208   : > { %9341 = vst [vmem:[#allocation96_spill] sm:$0xff] %v7520_v46  ;;  %v5991_v47 = vpop.eup %5990 }
 0x209   : > { %9342 = vst [vmem:[#allocation97_spill] sm:$0xff] %v7522_v34  ;;  %v992_v34 = vadd.f32 %v991_v37, %v693_v35  ;;  %v7557_v37 = vld [vmem:[#allocation9 + $0x44] ss:$16 sps:$4 sm:$0xff]  }
 0x20b   : > { %v1009_v45 = vpop.f32.mrb[24].mxu1 }
 0x20c   : > { %v7524_v52 = vadd.f32 %v1009_v45, %v689_v40  ;;  %v1011_v49 = vpop.f32.mrb[25].mxu1 }
 0x20d   : > { %v7526_v51 = vadd.f32 %v1011_v49, %v693_v35  ;;  %v1013_v3 = vpop.f32.mrb[26].mxu1 }
 0x20e   : > { %9343 = vst [vmem:[#allocation98_spill] sm:$0xff] %v7524_v52  ;;  %v7528_v50 = vadd.f32 %v1013_v3, %v689_v40  ;;  %v1015_v36 = vpop.f32.mrb[27].mxu1  ;;  %v1372_v3 = vadd.f32 1.0, %v5991_v47 }
 0x20f   : > { %9344 = vst [vmem:[#allocation99_spill] sm:$0xff] %v7526_v51  ;;  %v7530_v43 = vadd.f32 %v1015_v36, %v693_v35  ;;  %v1378_v51 = vadd.f32 1.0, %v5989_v0 }
 0x210   : > { %9345 = vst [vmem:[#allocation100_spill] sm:$0xff] %v7528_v50  ;;  %v990_v50 = vadd.f32 %v989_v41, %v689_v40 }
 0x211   : > { %9346 = vst [vmem:[#allocation101_spill] sm:$0xff] %v7530_v43  ;;  %5992 = vrcp.f32 %v1378_v51  ;;  %v7569_v51 = vld [vmem:[#allocation9 + $0x60] ss:$16 sps:$4 sm:$0xff]  }
 0x212   : > { %5994 = vrcp.f32 %v1372_v3 }
 0x213   : > { %v1019_v44 = vpop.f32.mrb[28].mxu1 }
 0x214   : > { %v7532_v46 = vadd.f32 %v1019_v44, %v689_v40  ;;  %v1021_v38 = vpop.f32.mrb[29].mxu1 }
 0x215   : > { %v7534_v42 = vadd.f32 %v1021_v38, %v693_v35  ;;  %v1023_v48 = vpop.f32.mrb[30].mxu1 }
 0x216   : > { %9347 = vst [vmem:[#allocation102_spill] sm:$0xff] %v7532_v46  ;;  %v7536_v45 = vadd.f32 %v1023_v48, %v689_v40  ;;  %v1025_v52 = vpop.f32.mrb[31].mxu1 }
 0x217   : > { %9348 = vst [vmem:[#allocation103_spill] sm:$0xff] %v7534_v42  ;;  %v7538_v49 = vadd.f32 %v1025_v52, %v693_v35 }
 0x218   : > { %9349 = vst [vmem:[#allocation104_spill] sm:$0xff] %v7536_v45 }
 0x219   : > { %9350 = vst [vmem:[#allocation105_spill] sm:$0xff] %v7538_v49 }
 0x21b   : > { %v1358_v36 = vpop.f32.mrb[32].mxu1  ;;  %v5993_v48 = vpop.eup %5992 }
 0x21c   : > { %v1367_v43 = vadd.f32 %v1358_v36, %v990_v50  ;;  %v1360_v44 = vpop.f32.mrb[33].mxu1  ;;  %v5995_v45 = vpop.eup %5994  ;;  %v1388_v52 = vmul.f32 0.0, %v5993_v48  ;;  %v9354_v36 = vld [vmem:[#allocation32_spill] sm:$0xff]  ;;  %v9357_v48 = vld [vmem:[#allocation35_spill] sm:$0xff] }
 0x21d   : > { %v1368_v46 = vadd.f32 %v1360_v44, %v992_v34  ;;  %v1362_v53 = vpop.f32.mrb[34].mxu1  ;;  %v9355_v44 = vld [vmem:[#allocation33_spill] sm:$0xff] }
 0x21e   : > { %5996 = vtanh.f32 %v1367_v43  ;;  %v1363_v38 = vpop.f32.mrb[35].mxu1  ;;  %v7553_v43 = vld [vmem:[#allocation9 + $0x20] ss:$16 sps:$4 sm:$0xff]  }
 0x21f   : > { %v5435_v42 = vmul.f32 -1.442695, %v1368_v46  ;;  %v7543_v46 = vld [vmem:[#allocation9] ss:$16 sps:$4 sm:$0xff]   ;;  %v9356_v38 = vld [vmem:[#allocation34_spill] sm:$0xff] }
 0x221   : > { %5998 = vpow2.f32 %v5435_v42 }
 0x228   : > { %v5997_v32 = vpop.eup %5996 }
 0x229   : > { %v1389_v49 = vmul.f32 %v5997_v32, %v5995_v45  ;;  %v7547_v32 = vld [vmem:[#allocation9 + $0x24] ss:$16 sps:$4 sm:$0xff]   ;;  %v9352_v45 = vld [vmem:[#allocation30_spill] sm:$0xff] }
 0x22b   : > { %v5999_v0 = vpop.eup %5998  ;;  %v7540_v47 = vadd.f32 %v1389_v49, %v1388_v52  ;;  %v9353_v49 = vld [vmem:[#allocation31_spill] sm:$0xff]  ;;  %v9358_v52 = vld [vmem:[#allocation36_spill] sm:$0xff] }
 0x22c   : > { %v1385_v35 = vadd.f32 1.0, %v5999_v0  ;;  %v9359_v0 = vld [vmem:[#allocation37_spill] sm:$0xff] }
 0x22d   : > { %6000 = vtanh.f32 %v7540_v47 }
 0x22e   : > { %6002 = vrcp.f32 %v1385_v35  ;;  %v9360_v35 = vld [vmem:[#allocation38_spill] sm:$0xff] }
 0x237   : > { %v6001_v40 = vpop.eup %6000 }
 0x238   : > { %v6003_v41 = vpop.eup %6002 }
 0x239   : > { %v1392_v34 = vmul.f32 %v6003_v41, %v6001_v40  ;;  %v9361_v40 = vld [vmem:[#allocation39_spill] sm:$0xff]  ;;  %v9362_v41 = vld [vmem:[#allocation40_spill] sm:$0xff] }
 0x23b   : > { %v1393_v53 = vpack.c.bf16 %v1392_v34, %v1392_v34  ;;  %v9363_v34 = vld [vmem:[#allocation41_spill] sm:$0xff] }
 0x23d   : > { %1893 = vmatmul.mubr.bf16.vlgmr.msra.gmra.mrb[8].mxu0 %v1393_v53  ;;  %1934 = vmatmul.mubr.bf16.vlgmr.msra.gmra.mrb[40].mxu1 %v1393_v53 }
 0x23e   : > { %1987 = vmatpush1.bf16.msra.mxu0 %v7543_v46  ;;  %2028 = vmatpush1.bf16.msra.mxu1 %v7200_v54  ;;  %v7561_v54 = vld [vmem:[#allocation9 + $0x40] ss:$16 sps:$4 sm:$0xff]  }
 0x23f   : > { %1988 = vmatprep.subr.bf16.mxu0 %v7547_v32  ;;  %2029 = vmatprep.subr.bf16.mxu1 %v7202_v55  ;;  %v7565_v55 = vld [vmem:[#allocation9 + $0x64] ss:$16 sps:$4 sm:$0xff]  }
 0x240   : > { %2018 = vmatprep.mubr.bf16.mxu0 %v9326_v39  ;;  %2059 = vmatprep.mubr.bf16.mxu1 %v9326_v39 }
 0x242   : > { %1989 = vmatpush1.bf16.msra.mxu0 %v7553_v43  ;;  %2030 = vmatpush1.bf16.msra.mxu1 %v7205_v56  ;;  %v7573_v56 = vld [vmem:[#allocation9 + $0x84] ss:$16 sps:$4 sm:$0xff]  }
 0x243   : > { %1990 = vmatprep.subr.bf16.mxu0 %v7557_v37  ;;  %2031 = vmatprep.subr.bf16.mxu1 %v7207_v57  ;;  %v7577_v57 = vld [vmem:[#allocation9 + $0x80] ss:$16 sps:$4 sm:$0xff]  }
 0x246   : > { %1991 = vmatpush1.bf16.msra.mxu0 %v7561_v54  ;;  %2032 = vmatpush1.bf16.msra.mxu1 %v7212_v58  ;;  %v7581_v58 = vld [vmem:[#allocation9 + $0xa4] ss:$16 sps:$4 sm:$0xff]  }
 0x247   : > { %1992 = vmatprep.subr.bf16.mxu0 %v7565_v55  ;;  %2033 = vmatprep.subr.bf16.mxu1 %v7214_v59 }
 0x24a   : > { %1993 = vmatpush1.bf16.msra.mxu0 %v7569_v51  ;;  %2034 = vmatpush1.bf16.msra.mxu1 %v7219_v60 }
 0x24b   : > { %1994 = vmatprep.subr.bf16.mxu0 %v7573_v56  ;;  %2035 = vmatprep.subr.bf16.mxu1 %v7223_v61 }
 0x24e   : > { %1995 = vmatpush1.bf16.msra.mxu0 %v7577_v57  ;;  %2036 = vmatpush1.bf16.msra.mxu1 %v7226_v62 }
 0x24f   : > { %1996 = vmatprep.subr.bf16.mxu0 %v7581_v58  ;;  %2037 = vmatprep.subr.bf16.mxu1 %v7229_v63 }
 0x252   : > { %1997 = vmatpush1.bf16.msra.mxu0 %v7173_v25  ;;  %2038 = vmatpush1.bf16.msra.mxu1 %v7232_v1  ;;  %v1652_v25 = vpop.f32.mrb[4].mxu0 }
 0x253   : > { %1998 = vmatprep.subr.bf16.mxu0 %v7175_v26  ;;  %2039 = vmatprep.subr.bf16.mxu1 %v7236_v2  ;;  %v1654_v26 = vpop.f32.mrb[5].mxu0 }
 0x256   : > { %1999 = vmatpush1.bf16.msra.mxu0 %v7178_v29  ;;  %2040 = vmatpush1.bf16.msra.mxu1 %v7239_v4  ;;  %v9351_v29 = vld [vmem:[#allocation29_spill] sm:$0xff] }
 0x257   : > { %2000 = vmatprep.subr.bf16.mxu0 %v7181_v30  ;;  %2041 = vmatprep.subr.bf16.mxu1 %v7242_v5  ;;  %v1656_v30 = vpop.f32.mrb[6].mxu0 }
 0x258   : > { %v1657_v59 = vpop.f32.mrb[7].mxu0 }
 0x259   : > { %v1060_v59 = vld [vmem:[%s9365_s22] sm:$0xf]  ;;  %s634_s22 = scalar_lea.vmem %s9734_s25, %s7470_s13  ;;  %s5633_s13 = sshll.u32 %s6898_s19, 8 }
 0x25a   : > { %2001 = vmatpush1.bf16.msra.mxu0 %v7184_v33  ;;  %2042 = vmatpush1.bf16.msra.mxu1 %v7245_v6  ;;  %v1693_v33 = vpop.f32.mrb[36].mxu1  ;;  %s6800_s25 = smov [#allocation16]  }
 0x25b   : > { %2097 = vmatprep.subr.bf16.mxu0 %v7252_v7  ;;  %2138 = vmatprep.subr.bf16.mxu1 %v7254_v8  ;;  %v1695_v50 = vpop.f32.mrb[37].mxu1 }
 0x25c   : > { %v1697_v42 = vpop.f32.mrb[38].mxu1 }
 0x25d   : > { %2019 = vmatmul.mubr.bf16.vlgmr.msra.gmra.mrb[12].mxu0 %v1393_v53  ;;  %2060 = vmatmul.mubr.bf16.vlgmr.msra.gmra.mrb[44].mxu1 %v1393_v53  ;;  %v1698_v3 = vpop.f32.mrb[39].mxu1  ;;  %v9364_v53 = vld [vmem:[#allocation78_spill] sm:$0xff]  ;;  %v9366_v42 = vld [vmem:[#allocation73_spill] sm:$0xff] }
 0x25e   : > { %2098 = vmatpush1.bf16.msra.mxu0 %v7256_v9  ;;  %2139 = vmatpush1.bf16.msra.mxu1 %v7259_v10  ;;  %vm2290_vm1 = vcmp.eq.s32.totalorder %v9364_v53, 1  ;;  %v7637_v3 = vrot.slane %v1060_v59, %v9366_v42 }
 0x25f   : > { %2099 = vmatprep.subr.bf16.mxu0 %v7264_v11  ;;  %2140 = vmatprep.subr.bf16.mxu1 %v7266_v12  ;;  %v2291_v30 = vsel %vm2290_vm1, 1, %v9326_v39 }
 0x260   : > { %2129 = vmatprep.mubr.bf16.mxu0 %v9326_v39  ;;  %2170 = vmatprep.mubr.bf16.mxu1 %v9326_v39 }
 0x261   : > { %2293 = vperm.xlu0 %5761, %v2291_v30  }
 0x262   : > { %2100 = vmatpush1.bf16.msra.mxu0 %v7268_v13  ;;  %2141 = vmatpush1.bf16.msra.mxu1 %v7271_v14 }
 0x263   : > { %2101 = vmatprep.subr.bf16.mxu0 %v7276_v15  ;;  %2142 = vmatprep.subr.bf16.mxu1 %v7278_v16 }
 0x266   : > { %2102 = vmatpush1.bf16.msra.mxu0 %v7280_v17  ;;  %2143 = vmatpush1.bf16.msra.mxu1 %v7283_v18 }
 0x267   : > { %2103 = vmatprep.subr.bf16.mxu0 %v7288_v19  ;;  %2144 = vmatprep.subr.bf16.mxu1 %v7290_v20 }
 0x26a   : > { %2104 = vmatpush1.bf16.msra.mxu0 %v7292_v21  ;;  %2145 = vmatpush1.bf16.msra.mxu1 %v7295_v22 }
 0x26b   : > { %2105 = vmatprep.subr.bf16.mxu0 %v7300_v23  ;;  %2146 = vmatprep.subr.bf16.mxu1 %v7302_v24 }
 0x26e   : > { %2106 = vmatpush1.bf16.msra.mxu0 %v7304_v27  ;;  %2147 = vmatpush1.bf16.msra.mxu1 %v7307_v28  ;;  %v9368_v27 = vld [vmem:[#allocation91_spill] sm:$0xff] }
 0x26f   : > { %2107 = vmatprep.subr.bf16.mxu0 %v7312_v31  ;;  %2148 = vmatprep.subr.bf16.mxu1 %v9351_v29  ;;  %v7645_v24 = vrot.slane %v1060_v59, %v9368_v27 }
 0x271   : > { %9369 = vst [vmem:[#allocation106_spill] sm:$0xff] %v7645_v24 }
 0x272   : > { %2108 = vmatpush1.bf16.msra.mxu0 %v9352_v45  ;;  %2149 = vmatpush1.bf16.msra.mxu1 %v9353_v49 }
 0x273   : > { %2109 = vmatprep.subr.bf16.mxu0 %v9354_v36  ;;  %2150 = vmatprep.subr.bf16.mxu1 %v9355_v44 }
 0x276   : > { %2110 = vmatpush1.bf16.msra.mxu0 %v9356_v38  ;;  %2151 = vmatpush1.bf16.msra.mxu1 %v9357_v48 }
 0x277   : > { %2111 = vmatprep.subr.bf16.mxu0 %v9358_v52  ;;  %2152 = vmatprep.subr.bf16.mxu1 %v9359_v0  ;;  %v9367_v52 = vld [vmem:[#allocation74_spill] sm:$0xff] }
 0x27a   : > { %2112 = vmatpush1.bf16.msra.mxu0 %v9360_v35  ;;  %2153 = vmatpush1.bf16.msra.mxu1 %v9361_v40  ;;  %v7640_v40 = vrot.slane %v1060_v59, %v9367_v52 }
 0x27b   : > { %2179 = vmatprep.subr.bf16.mxu0 %v9362_v41  ;;  %2220 = vmatprep.subr.bf16.mxu1 %v9363_v34 }
 0x310   : > { %v1894_v0 = vpop.f32.mrb[8].mxu0  ;;  %v1935_v35 = vpop.f32.mrb[40].mxu1 }
 0x311   : > { %v1895_v41 = vadd.f32 %v1894_v0, %v1652_v25  ;;  %v1936_v48 = vadd.f32 %v1935_v35, %v1693_v33  ;;  %v1896_v34 = vpop.f32.mrb[9].mxu0  ;;  %v1937_v38 = vpop.f32.mrb[41].mxu1  ;;  %v9370_v33 = vld [vmem:[#allocation90_spill] sm:$0xff] }
 0x312   : > { %v1897_v53 = vadd.f32 %v1896_v34, %v1654_v26  ;;  %v1938_v44 = vadd.f32 %v1937_v38, %v1695_v50  ;;  %v1898_v36 = vpop.f32.mrb[10].mxu0  ;;  %v1939_v30 = vpop.f32.mrb[42].mxu1  ;;  %v7649_v26 = vrot.slane %v1060_v59, %v9370_v33 }
 0x313   : > { %v1942_v49 = vadd.f32 %v1895_v41, %v7637_v3  ;;  %v1899_v45 = vpop.f32.mrb[11].mxu0  ;;  %v1940_v29 = vpop.f32.mrb[43].mxu1 }
 0x314   : > { %v1943_v42 = vadd.f32 %v1897_v53, %v7640_v40  ;;  %v1945_v25 = vadd.f32 %v1938_v44, %v7645_v24  ;;  %9371 = vst [vmem:[#allocation107_spill] sm:$0xff] %v7649_v26  ;;  %v1944_v36 = vadd.f32 %v1936_v48, %v7649_v26  ;;  %v9373_v48 = vld [vmem:[#allocation92_spill] sm:$0xff] }
 0x315   : > { %v5500_v31 = vmul.f32 -1.442695, %v1942_v49 }
 0x316   : > { %v5501_v28 = vmul.f32 -1.442695, %v1943_v42  ;;  %v5502_v50 = vmul.f32 -1.442695, %v1945_v25  ;;  %v9372_v42 = vld [vmem:[#allocation75_spill] sm:$0xff] }
 0x317   : > { %6004 = vpow2.f32 %v5500_v31 }
 0x318   : > { %6006 = vpow2.f32 %v5501_v28 }
 0x319   : > { %6008 = vpow2.f32 %v5502_v50 }
 0x31a   : > { %6010 = vtanh.f32 %v1944_v36  ;;  %v9374_v36 = vld [vmem:[#allocation76_spill] sm:$0xff] }
 0x321   : > { %v6005_v38 = vpop.eup %6004 }
 0x322   : > { %v6007_v45 = vpop.eup %6006  ;;  %v1949_v29 = vadd.f32 1.0, %v6005_v38 }
 0x323   : > { %v1955_v49 = vadd.f32 1.0, %v6007_v45  ;;  %v6009_v0 = vpop.eup %6008 }
 0x324   : > { %6012 = vrcp.f32 %v1949_v29  ;;  %v6011_v35 = vpop.eup %6010  ;;  %v1962_v44 = vadd.f32 1.0, %v6009_v0  ;;  %v9375_v29 = vld [vmem:[#allocation93_spill] sm:$0xff] }
 0x325   : > { %6014 = vrcp.f32 %v1955_v49 }
 0x326   : > { %6016 = vrcp.f32 %v1962_v44  ;;  %v9376_v44 = vld [vmem:[#allocation42_spill] sm:$0xff] }
 0x32e   : > { %v6013_v31 = vpop.eup %6012 }
 0x32f   : > { %v6015_v28 = vpop.eup %6014  ;;  %v1966_v41 = vmul.f32 %v6013_v31, %v6011_v35 }
 0x330   : > { %v1965_v34 = vmul.f32 0.0, %v6015_v28  ;;  %v2020_v53 = vpop.f32.mrb[12].mxu0  ;;  %v2061_v59 = vpop.f32.mrb[44].mxu1 }
 0x331   : > { %v2068_v30 = vadd.f32 %v2020_v53, %v9372_v42  ;;  %v2070_v25 = vadd.f32 %v2061_v59, %v9373_v48  ;;  %v2022_v27 = vpop.f32.mrb[13].mxu0  ;;  %v2063_v38 = vpop.f32.mrb[45].mxu1 }
 0x332   : > { %v7654_v50 = vadd.f32 %v1966_v41, %v1965_v34  ;;  %v2069_v45 = vadd.f32 %v2022_v27, %v9374_v36  ;;  %v2071_v49 = vadd.f32 %v2063_v38, %v9375_v29  ;;  %v2024_v52 = vpop.f32.mrb[14].mxu0  ;;  %v2065_v33 = vpop.f32.mrb[46].mxu1  ;;  %v9378_v38 = vld [vmem:[#allocation44_spill] sm:$0xff]  ;;  %v9379_v36 = vld [vmem:[#allocation45_spill] sm:$0xff] }
 0x333   : > { %v5503_v35 = vmul.f32 -1.442695, %v2068_v30  ;;  %v2025_v0 = vpop.f32.mrb[15].mxu0  ;;  %v2066_v31 = vpop.f32.mrb[47].mxu1  ;;  %v9377_v30 = vld [vmem:[#allocation43_spill] sm:$0xff]  ;;  %v9382_v29 = vld [vmem:[#allocation48_spill] sm:$0xff] }
 0x334   : > { %6018 = vtanh.f32 %v7654_v50  ;;  %v5504_v28 = vmul.f32 -1.442695, %v2069_v45  ;;  %v5505_v53 = vmul.f32 -1.442695, %v2071_v49  ;;  %v6017_v59 = vpop.eup %6016  ;;  %v9381_v45 = vld [vmem:[#allocation47_spill] sm:$0xff]  ;;  %v9383_v49 = vld [vmem:[#allocation49_spill] sm:$0xff] }
 0x335   : > { %6020 = vpow2.f32 %v5503_v35 }
 0x336   : > { %6022 = vpow2.f32 %v5504_v28  ;;  %v9384_v28 = vld [vmem:[#allocation50_spill] sm:$0xff] }
 0x337   : > { %6024 = vpow2.f32 %v5505_v53  ;;  %v9385_v53 = vld [vmem:[#allocation51_spill] sm:$0xff] }
 0x338   : > { %6026 = vtanh.f32 %v2070_v25  ;;  %v9380_v25 = vld [vmem:[#allocation46_spill] sm:$0xff] }
 0x33e   : > { %v6019_v42 = vpop.eup %6018 }
 0x33f   : > { %v6021_v41 = vpop.eup %6020  ;;  %v1969_v34 = vmul.f32 %v6019_v42, %v6017_v59 }
 0x340   : > { %v6023_v48 = vpop.eup %6022  ;;  %v2075_v27 = vadd.f32 1.0, %v6021_v41 }
 0x341   : > { %v2081_v52 = vadd.f32 1.0, %v6023_v48  ;;  %v7659_v33 = vpack.c.bf16 %v1969_v34, %v1969_v34  ;;  %v6025_v35 = vpop.eup %6024  ;;  %v9386_v34 = vld [vmem:[#allocation52_spill] sm:$0xff]  ;;  %v9387_v48 = vld [vmem:[#allocation53_spill] sm:$0xff] }
 0x342   : > { %6028 = vrcp.f32 %v2075_v27  ;;  %v6027_v0 = vpop.eup %6026  ;;  %v2088_v41 = vadd.f32 1.0, %v6025_v35  ;;  %v9397_v35 = vld [vmem:[#allocation63_spill] sm:$0xff] }
 0x343   : > { %6030 = vrcp.f32 %v2081_v52  ;;  %2130 = vmatmul.mubr.bf16.vlgmr.msra.gmra.mrb[16].mxu0 %v7659_v33  ;;  %2171 = vmatmul.mubr.bf16.vlgmr.msra.gmra.mrb[48].mxu1 %v7659_v33 }
 0x344   : > { %2180 = vmatpush1.bf16.msra.mxu0 %v9376_v44  ;;  %2221 = vmatpush1.bf16.msra.mxu1 %v9377_v30  ;;  %v9388_v44 = vld [vmem:[#allocation54_spill] sm:$0xff]  ;;  %v9389_v30 = vld [vmem:[#allocation55_spill] sm:$0xff]  ;;  %6032 = vrcp.f32 %v2088_v41  ;;  %v9402_v41 = vld [vmem:[#allocation68_spill] sm:$0xff] }
 0x345   : > { %2181 = vmatprep.subr.bf16.mxu0 %v9378_v38  ;;  %2222 = vmatprep.subr.bf16.mxu1 %v9379_v36  ;;  %v9390_v38 = vld [vmem:[#allocation56_spill] sm:$0xff]  ;;  %v9391_v36 = vld [vmem:[#allocation57_spill] sm:$0xff] }
 0x346   : > { %2211 = vmatprep.mubr.bf16.mxu0 %v9326_v39  ;;  %2252 = vmatprep.mubr.bf16.mxu1 %v9326_v39 }
 0x348   : > { %2182 = vmatpush1.bf16.msra.mxu0 %v9380_v25  ;;  %2223 = vmatpush1.bf16.msra.mxu1 %v9381_v45  ;;  %v9392_v25 = vld [vmem:[#allocation58_spill] sm:$0xff]  ;;  %v9393_v45 = vld [vmem:[#allocation59_spill] sm:$0xff] }
 0x349   : > { %2183 = vmatprep.subr.bf16.mxu0 %v9382_v29  ;;  %2224 = vmatprep.subr.bf16.mxu1 %v9383_v49  ;;  %v9394_v29 = vld [vmem:[#allocation60_spill] sm:$0xff]  ;;  %v9396_v49 = vld [vmem:[#allocation62_spill] sm:$0xff] }
 0x34c   : > { %v6029_v31 = vpop.eup %6028  ;;  %2184 = vmatpush1.bf16.msra.mxu0 %v9384_v28  ;;  %2225 = vmatpush1.bf16.msra.mxu1 %v9385_v53 }
 0x34d   : > { %v6031_v59 = vpop.eup %6030  ;;  %v2092_v42 = vmul.f32 %v6029_v31, %v6027_v0  ;;  %2185 = vmatprep.subr.bf16.mxu0 %v9386_v34  ;;  %2226 = vmatprep.subr.bf16.mxu1 %v9387_v48  ;;  %v9398_v0 = vld [vmem:[#allocation64_spill] sm:$0xff]  ;;  %v9399_v31 = vld [vmem:[#allocation65_spill] sm:$0xff] }
 0x34e   : > { %v2091_v27 = vmul.f32 %v6031_v59, %v7540_v47  ;;  %v9395_v47 = vld [vmem:[#allocation61_spill] sm:$0xff]  ;;  %v6033_v28 = vpop.eup %6032  ;;  %v9400_v59 = vld [vmem:[#allocation66_spill] sm:$0xff] }
 0x34f   : > { %v9403_v34 = vld [vmem:[#allocation69_spill] sm:$0xff] }
 0x350   : > { %v7678_v52 = vadd.f32 %v2092_v42, %v2091_v27  ;;  %2186 = vmatpush1.bf16.msra.mxu0 %v9388_v44  ;;  %2227 = vmatpush1.bf16.msra.mxu1 %v9389_v30  ;;  %v9401_v42 = vld [vmem:[#allocation67_spill] sm:$0xff]  ;;  %v9404_v27 = vld [vmem:[#allocation70_spill] sm:$0xff] }
 0x351   : > { %2187 = vmatprep.subr.bf16.mxu0 %v9390_v38  ;;  %2228 = vmatprep.subr.bf16.mxu1 %v9391_v36  ;;  %v9405_v44 = vld [vmem:[#allocation71_spill] sm:$0xff]  ;;  %v7702_v36 = vld [vmem:[#allocation9 + $0xc] ss:$16 sps:$4 sm:$0xff]  }
 0x352   : > { %6034 = vtanh.f32 %v7678_v52  ;;  %v7699_v38 = vld [vmem:[#allocation9 + $0x4] ss:$16 sps:$4 sm:$0xff]  }
 0x354   : > { %2188 = vmatpush1.bf16.msra.mxu0 %v9392_v25  ;;  %2229 = vmatpush1.bf16.msra.mxu1 %v9393_v45  ;;  %v7706_v25 = vld [vmem:[#allocation9 + $0x8] ss:$16 sps:$4 sm:$0xff]   ;;  %v7710_v45 = vld [vmem:[#allocation9 + $0x2c] ss:$16 sps:$4 sm:$0xff]  }
 0x355   : > { %2189 = vmatprep.subr.bf16.mxu0 %v9394_v29  ;;  %2230 = vmatprep.subr.bf16.mxu1 %v9395_v47  ;;  %v7716_v29 = vld [vmem:[#allocation9 + $0x28] ss:$16 sps:$4 sm:$0xff]   ;;  %v7720_v47 = vld [vmem:[#allocation9 + $0x4c] ss:$16 sps:$4 sm:$0xff]  }
 0x358   : > { %2190 = vmatpush1.bf16.msra.mxu0 %v9396_v49  ;;  %2231 = vmatpush1.bf16.msra.mxu1 %v9397_v35  ;;  %v7724_v49 = vld [vmem:[#allocation9 + $0x48] ss:$16 sps:$4 sm:$0xff]   ;;  %v7728_v35 = vld [vmem:[#allocation9 + $0x6c] ss:$16 sps:$4 sm:$0xff]  }
 0x359   : > { %2191 = vmatprep.subr.bf16.mxu0 %v9398_v0  ;;  %2232 = vmatprep.subr.bf16.mxu1 %v9399_v31  ;;  %9406 = vst [vmem:[#allocation75_spill] sm:$0xff] %v7728_v35  ;;  %v7739_v0 = vld [vmem:[#allocation9 + $0xa0] ss:$16 sps:$4 sm:$0xff]   ;;  %v7743_v31 = vld [vmem:[#allocation9 + $0xc4] ss:$16 sps:$4 sm:$0xff]  }
 0x35a   : > { %9407 = vst [vmem:[#allocation92_spill] sm:$0xff] %v7739_v0  ;;  %9408 = vst [vmem:[#allocation76_spill] sm:$0xff] %v7743_v31 }
 0x35c   : > { %v6035_v53 = vpop.eup %6034  ;;  %2192 = vmatpush1.bf16.msra.mxu0 %v9400_v59  ;;  %2233 = vmatpush1.bf16.msra.mxu1 %v9401_v42  ;;  %v9429_v59 = vld [vmem:[#allocation78_spill] sm:$0xff] }
 0x35d   : > { %2193 = vmatprep.subr.bf16.mxu0 %v9402_v41  ;;  %2234 = vmatprep.subr.bf16.mxu1 %v9403_v34  ;;  %v2095_v48 = vmul.f32 %v6035_v53, %v6033_v28  ;;  %vm2609_vm2 = vcmp.eq.s32.totalorder %v9429_v59, 2  ;;  %vm2928_vm7 = vcmp.eq.s32.totalorder %v9429_v59, 3 }
 0x35e   : > { %v2610_v42 = vsel %vm2609_vm2, 1, %v9326_v39 }
 0x35f   : > { %v2096_v30 = vpack.c.bf16 %v2095_v48, %v2095_v48  ;;  %2612 = vperm.xlu1 %5762, %v2610_v42  }
 0x360   : > { %2194 = vmatpush1.bf16.msra.mxu0 %v9404_v27  ;;  %2235 = vmatpush1.bf16.msra.mxu1 %v9405_v44 }
 0x361   : > { %2305 = vmatprep.subr.bf16.mxu0 %v7699_v38  ;;  %2346 = vmatprep.subr.bf16.mxu1 %v7702_v36 }
 0x363   : > { %2212 = vmatmul.mubr.bf16.vlgmr.msra.gmra.mrb[20].mxu0 %v2096_v30  ;;  %2253 = vmatmul.mubr.bf16.vlgmr.msra.gmra.mrb[52].mxu1 %v2096_v30 }
 0x364   : > { %2306 = vmatpush1.bf16.msra.mxu0 %v7543_v46  ;;  %2347 = vmatpush1.bf16.msra.mxu1 %v7706_v25 }
 0x365   : > { %2307 = vmatprep.subr.bf16.mxu0 %v7547_v32  ;;  %2348 = vmatprep.subr.bf16.mxu1 %v7710_v45 }
 0x366   : > { %2337 = vmatprep.mubr.bf16.mxu0 %v9326_v39  ;;  %2378 = vmatprep.mubr.bf16.mxu1 %v9326_v39 }
 0x368   : > { %2308 = vmatpush1.bf16.msra.mxu0 %v7553_v43  ;;  %2349 = vmatpush1.bf16.msra.mxu1 %v7716_v29 }
 0x369   : > { %2309 = vmatprep.subr.bf16.mxu0 %v7557_v37  ;;  %2350 = vmatprep.subr.bf16.mxu1 %v7720_v47 }
 0x36c   : > { %2310 = vmatpush1.bf16.msra.mxu0 %v7561_v54  ;;  %2351 = vmatpush1.bf16.msra.mxu1 %v7724_v49 }
 0x36d   : > { %2311 = vmatprep.subr.bf16.mxu0 %v7565_v55  ;;  %2352 = vmatprep.subr.bf16.mxu1 %v7728_v35 }
 0x370   : > { %2312 = vmatpush1.bf16.msra.mxu0 %v7569_v51  ;;  %2353 = vmatpush1.bf16.msra.mxu1 %v7219_v60  ;;  %v7747_v60 = vld [vmem:[#allocation9 + $0xc0] ss:$16 sps:$4 sm:$0xff]  }
 0x371   : > { %2313 = vmatprep.subr.bf16.mxu0 %v7573_v56  ;;  %2354 = vmatprep.subr.bf16.mxu1 %v7223_v61  ;;  %9409 = vst [vmem:[#allocation93_spill] sm:$0xff] %v7747_v60  ;;  %v7751_v61 = vld [vmem:[#allocation9 + $0xe4] ss:$16 sps:$4 sm:$0xff]  }
 0x372   : > { %9410 = vst [vmem:[#allocation42_spill] sm:$0xff] %v7751_v61 }
 0x374   : > { %2314 = vmatpush1.bf16.msra.mxu0 %v7577_v57  ;;  %2355 = vmatpush1.bf16.msra.mxu1 %v7226_v62  ;;  %v7755_v62 = vld [vmem:[#allocation9 + $0xe0] ss:$16 sps:$4 sm:$0xff]  }
 0x375   : > { %2315 = vmatprep.subr.bf16.mxu0 %v7581_v58  ;;  %2356 = vmatprep.subr.bf16.mxu1 %v7229_v63  ;;  %9411 = vst [vmem:[#allocation43_spill] sm:$0xff] %v7755_v62  ;;  %v9412_v63 = vld [vmem:[#allocation25_spill] sm:$0xff] }
 0x378   : > { %2316 = vmatpush1.bf16.msra.mxu0 %v7739_v0  ;;  %2357 = vmatpush1.bf16.msra.mxu1 %v7232_v1  ;;  %v9413_v1 = vld [vmem:[#allocation26_spill] sm:$0xff] }
 0x379   : > { %2317 = vmatprep.subr.bf16.mxu0 %v7743_v31  ;;  %2358 = vmatprep.subr.bf16.mxu1 %v7236_v2  ;;  %v9414_v2 = vld [vmem:[#allocation27_spill] sm:$0xff] }
 0x37c   : > { %2318 = vmatpush1.bf16.msra.mxu0 %v7747_v60  ;;  %2359 = vmatpush1.bf16.msra.mxu1 %v7239_v4  ;;  %v9415_v4 = vld [vmem:[#allocation28_spill] sm:$0xff] }
 0x37d   : > { %2319 = vmatprep.subr.bf16.mxu0 %v7751_v61  ;;  %2360 = vmatprep.subr.bf16.mxu1 %v7242_v5  ;;  %v9416_v5 = vld [vmem:[#allocation29_spill] sm:$0xff] }
 0x380   : > { %2320 = vmatpush1.bf16.msra.mxu0 %v7755_v62  ;;  %2361 = vmatpush1.bf16.msra.mxu1 %v7245_v6  ;;  %v9417_v6 = vld [vmem:[#allocation30_spill] sm:$0xff] }
 0x381   : > { %2416 = vmatprep.subr.bf16.mxu0 %v7252_v7  ;;  %2457 = vmatprep.subr.bf16.mxu1 %v7254_v8  ;;  %v9418_v7 = vld [vmem:[#allocation31_spill] sm:$0xff]  ;;  %v9419_v8 = vld [vmem:[#allocation32_spill] sm:$0xff] }
 0x383   : > { %2338 = vmatmul.mubr.bf16.vlgmr.msra.gmra.mrb[24].mxu0 %v2096_v30  ;;  %2379 = vmatmul.mubr.bf16.vlgmr.msra.gmra.mrb[56].mxu1 %v2096_v30 }
 0x384   : > { %2417 = vmatpush1.bf16.msra.mxu0 %v7256_v9  ;;  %2458 = vmatpush1.bf16.msra.mxu1 %v7259_v10  ;;  %v9420_v9 = vld [vmem:[#allocation33_spill] sm:$0xff]  ;;  %v9421_v10 = vld [vmem:[#allocation34_spill] sm:$0xff] }
 0x385   : > { %2418 = vmatprep.subr.bf16.mxu0 %v7264_v11  ;;  %2459 = vmatprep.subr.bf16.mxu1 %v7266_v12  ;;  %v9422_v11 = vld [vmem:[#allocation35_spill] sm:$0xff]  ;;  %v9423_v12 = vld [vmem:[#allocation36_spill] sm:$0xff] }
 0x386   : > { %2448 = vmatprep.mubr.bf16.mxu0 %v9326_v39  ;;  %2489 = vmatprep.mubr.bf16.mxu1 %v9326_v39 }
 0x388   : > { %2419 = vmatpush1.bf16.msra.mxu0 %v7268_v13  ;;  %2460 = vmatpush1.bf16.msra.mxu1 %v7271_v14  ;;  %v9424_v13 = vld [vmem:[#allocation37_spill] sm:$0xff]  ;;  %v9425_v14 = vld [vmem:[#allocation38_spill] sm:$0xff] }
 0x389   : > { %2420 = vmatprep.subr.bf16.mxu0 %v7276_v15  ;;  %2461 = vmatprep.subr.bf16.mxu1 %v7278_v16  ;;  %v9426_v15 = vld [vmem:[#allocation39_spill] sm:$0xff]  ;;  %v9427_v16 = vld [vmem:[#allocation40_spill] sm:$0xff] }
 0x38c   : > { %2421 = vmatpush1.bf16.msra.mxu0 %v7280_v17  ;;  %2462 = vmatpush1.bf16.msra.mxu1 %v7283_v18  ;;  %v9428_v17 = vld [vmem:[#allocation41_spill] sm:$0xff] }
 0x38d   : > { %2422 = vmatprep.subr.bf16.mxu0 %v7288_v19  ;;  %2463 = vmatprep.subr.bf16.mxu1 %v7290_v20 }
 0x390   : > { %2423 = vmatpush1.bf16.msra.mxu0 %v7292_v21  ;;  %2464 = vmatpush1.bf16.msra.mxu1 %v7295_v22 }
 0x391   : > { %2424 = vmatprep.subr.bf16.mxu0 %v7300_v23  ;;  %2465 = vmatprep.subr.bf16.mxu1 %v9412_v63 }
 0x394   : > { %2425 = vmatpush1.bf16.msra.mxu0 %v9413_v1  ;;  %2466 = vmatpush1.bf16.msra.mxu1 %v9414_v2 }
 0x395   : > { %2426 = vmatprep.subr.bf16.mxu0 %v9415_v4  ;;  %2467 = vmatprep.subr.bf16.mxu1 %v9416_v5 }
 0x398   : > { %2427 = vmatpush1.bf16.msra.mxu0 %v9417_v6  ;;  %2468 = vmatpush1.bf16.msra.mxu1 %v9418_v7 }
 0x399   : > { %2428 = vmatprep.subr.bf16.mxu0 %v9419_v8  ;;  %2469 = vmatprep.subr.bf16.mxu1 %v9420_v9 }
 0x39c   : > { %2429 = vmatpush1.bf16.msra.mxu0 %v9421_v10  ;;  %2470 = vmatpush1.bf16.msra.mxu1 %v9422_v11 }
 0x39d   : > { %2430 = vmatprep.subr.bf16.mxu0 %v9423_v12  ;;  %2471 = vmatprep.subr.bf16.mxu1 %v9424_v13 }
 0x3a0   : > { %2431 = vmatpush1.bf16.msra.mxu0 %v9425_v14  ;;  %2472 = vmatpush1.bf16.msra.mxu1 %v9426_v15 }
 0x3a1   : > { %2498 = vmatprep.subr.bf16.mxu0 %v9427_v16  ;;  %2539 = vmatprep.subr.bf16.mxu1 %v9428_v17 }
 0x416   : > { %v2131_v18 = vpop.f32.mrb[16].mxu0  ;;  %v2172_v19 = vpop.f32.mrb[48].mxu1 }
 0x417   : > { %v2133_v20 = vpop.f32.mrb[17].mxu0  ;;  %v2174_v21 = vpop.f32.mrb[49].mxu1 }
 0x418   : > { %v2135_v22 = vpop.f32.mrb[18].mxu0  ;;  %v2176_v23 = vpop.f32.mrb[50].mxu1 }
 0x419   : > { %v2136_v28 = vpop.f32.mrb[19].mxu0  ;;  %v2177_v53 = vpop.f32.mrb[51].mxu1 }
 0x436   : > { %v2213_v41 = vpop.f32.mrb[20].mxu0  ;;  %v2254_v34 = vpop.f32.mrb[52].mxu1 }
 0x437   : > { %v2214_v48 = vadd.f32 %v2213_v41, %v2131_v18  ;;  %v2255_v27 = vadd.f32 %v2254_v34, %v2172_v19  ;;  %v2215_v44 = vpop.f32.mrb[21].mxu0  ;;  %v2256_v30 = vpop.f32.mrb[53].mxu1  ;;  %v9430_v41 = vld [vmem:[#allocation77_spill] sm:$0xff] }
 0x438   : > { %v2216_v63 = vadd.f32 %v2215_v44, %v2133_v20  ;;  %v2257_v1 = vadd.f32 %v2256_v30, %v2174_v21  ;;  %v2217_v2 = vpop.f32.mrb[22].mxu0  ;;  %v2258_v4 = vpop.f32.mrb[54].mxu1 }
 0x439   : > { %v2261_v5 = vadd.f32 %v2214_v48, %v7637_v3  ;;  %v2218_v6 = vpop.f32.mrb[23].mxu0  ;;  %v2259_v7 = vpop.f32.mrb[55].mxu1  ;;  %v2263_v13 = vadd.f32 %v2255_v27, %v7649_v26  ;;  %v9431_v48 = vld [vmem:[#allocation94_spill] sm:$0xff]  ;;  %v9433_v4 = vld [vmem:[#allocation95_spill] sm:$0xff] }
 0x43a   : > { %v2262_v8 = vadd.f32 %v2216_v63, %v7640_v40  ;;  %v2264_v11 = vadd.f32 %v2257_v1, %v7645_v24  ;;  %v9432_v1 = vld [vmem:[#allocation79_spill] sm:$0xff] }
 0x43b   : > { %v5506_v9 = vmul.f32 -1.442695, %v2261_v5 }
 0x43c   : > { %v5507_v10 = vmul.f32 -1.442695, %v2262_v8  ;;  %v5508_v12 = vmul.f32 -1.442695, %v2264_v11  ;;  %v1975_v11 = vpop.permute.xlu0 %1974 }
 0x43d   : > { %6036 = vpow2.f32 %v5506_v9  ;;  %vm1976_vm3 = vcmp.eq.s32.totalorder %v1975_v11, 1  ;;  %v7853_v11 = vld [vmem:[#allocation10 + $0x60] ss:$16 sps:$4 sm:$0xff]  }
 0x43e   : > { %6038 = vpow2.f32 %v5507_v10  ;;  %vm1977_vm5 = vmpackc.low %vm1976_vm3, %vm1976_vm3 }
 0x43f   : > { %6040 = vpow2.f32 %v5508_v12 }
 0x440   : > { %6042 = vtanh.f32 %v2263_v13  ;;  %v2294_v12 = vpop.permute.xlu0 %2293 }
 0x441   : > { %vm2295_vm4 = vcmp.eq.s32.totalorder %v2294_v12, 1  ;;  %v7856_v12 = vld [vmem:[#allocation10 + $0x68] ss:$16 sps:$4 sm:$0xff]  }
 0x442   : > { %vm2296_vm6 = vmpackc.low %vm2295_vm4, %vm2295_vm4 }
 0x447   : > { %v6037_v14 = vpop.eup %6036 }
 0x448   : > { %v6039_v15 = vpop.eup %6038  ;;  %v2268_v16 = vadd.f32 1.0, %v6037_v14 }
 0x449   : > { %v2274_v17 = vadd.f32 1.0, %v6039_v15  ;;  %v6041_v18 = vpop.eup %6040 }
 0x44a   : > { %6044 = vrcp.f32 %v2268_v16  ;;  %v6043_v19 = vpop.eup %6042  ;;  %v2281_v23 = vadd.f32 1.0, %v6041_v18 }
 0x44b   : > { %6046 = vrcp.f32 %v2274_v17 }
 0x44c   : > { %6048 = vrcp.f32 %v2281_v23 }
 0x454   : > { %v6045_v20 = vpop.eup %6044 }
 0x455   : > { %v6047_v21 = vpop.eup %6046  ;;  %v2285_v22 = vmul.f32 %v6045_v20, %v6043_v19 }
 0x456   : > { %v2284_v28 = vmul.f32 %v6047_v21, %v7654_v50  ;;  %v2339_v53 = vpop.f32.mrb[24].mxu0  ;;  %v2380_v42 = vpop.f32.mrb[56].mxu1 }
 0x457   : > { %v2387_v34 = vadd.f32 %v2339_v53, %v9430_v41  ;;  %v2389_v27 = vadd.f32 %v2380_v42, %v9431_v48  ;;  %v2341_v44 = vpop.f32.mrb[25].mxu0  ;;  %v2382_v30 = vpop.f32.mrb[57].mxu1  ;;  %v7815_v53 = vld [vmem:[#allocation10 + $0x8] ss:$16 sps:$4 sm:$0xff]   ;;  %v7818_v42 = vld [vmem:[#allocation10 + $0x24] ss:$16 sps:$4 sm:$0xff]  }
 0x458   : > { %v7804_v63 = vadd.f32 %v2285_v22, %v2284_v28  ;;  %v2388_v2 = vadd.f32 %v2341_v44, %v9432_v1  ;;  %v2390_v5 = vadd.f32 %v2382_v30, %v9433_v4  ;;  %v2343_v6 = vpop.f32.mrb[26].mxu0  ;;  %v2384_v7 = vpop.f32.mrb[58].mxu1  ;;  %v1978_v22 = vsel %vm1977_vm5, %v7659_v33, 0  ;;  %v7812_v28 = vld [vmem:[#allocation10] ss:$16 sps:$4 sm:$0xff]  }
 0x459   : > { %v5509_v8 = vmul.f32 -1.442695, %v2387_v34  ;;  %v2344_v9 = vpop.f32.mrb[27].mxu0  ;;  %v2385_v50 = vpop.f32.mrb[59].mxu1  ;;  %v7821_v41 = vld [vmem:[#allocation10 + $0x2c] ss:$16 sps:$4 sm:$0xff]  }
 0x45a   : > { %v5510_v10 = vmul.f32 -1.442695, %v2388_v2  ;;  %6050 = vtanh.f32 %v7804_v63  ;;  %v5511_v13 = vmul.f32 -1.442695, %v2390_v5  ;;  %v6049_v14 = vpop.eup %6048  ;;  %v7826_v33 = vld [vmem:[#allocation10 + $0x20] ss:$16 sps:$4 sm:$0xff]  }
 0x45b   : > { %6052 = vpow2.f32 %v5509_v8  ;;  %v7829_v34 = vld [vmem:[#allocation10 + $0x28] ss:$16 sps:$4 sm:$0xff]   ;;  %v7832_v48 = vld [vmem:[#allocation10 + $0x44] ss:$16 sps:$4 sm:$0xff]   ;;  %v7838_v2 = vld [vmem:[#allocation10 + $0x40] ss:$16 sps:$4 sm:$0xff]  }
 0x45c   : > { %6054 = vpow2.f32 %v5510_v10  ;;  %v7841_v4 = vld [vmem:[#allocation10 + $0x48] ss:$16 sps:$4 sm:$0xff]   ;;  %v7844_v8 = vld [vmem:[#allocation10 + $0x64] ss:$16 sps:$4 sm:$0xff]   ;;  %v7847_v9 = vld [vmem:[#allocation10 + $0x6c] ss:$16 sps:$4 sm:$0xff]  }
 0x45d   : > { %6056 = vpow2.f32 %v5511_v13  ;;  %v7859_v13 = vld [vmem:[#allocation10 + $0x84] ss:$16 sps:$4 sm:$0xff]  }
 0x45e   : > { %6058 = vtanh.f32 %v2389_v27  ;;  %v7835_v27 = vld [vmem:[#allocation10 + $0x4c] ss:$16 sps:$4 sm:$0xff]  }
 0x464   : > { %v6051_v15 = vpop.eup %6050 }
 0x465   : > { %v6053_v16 = vpop.eup %6052  ;;  %v2288_v17 = vmul.f32 %v6051_v15, %v6049_v14  ;;  %v7862_v14 = vld [vmem:[#allocation10 + $0x8c] ss:$16 sps:$4 sm:$0xff]   ;;  %v7869_v15 = vld [vmem:[#allocation10 + $0x88] ss:$16 sps:$4 sm:$0xff]  }
 0x466   : > { %v6055_v18 = vpop.eup %6054  ;;  %v2394_v19 = vadd.f32 1.0, %v6053_v16  ;;  %v7872_v16 = vld [vmem:[#allocation10 + $0xa4] ss:$16 sps:$4 sm:$0xff]  }
 0x467   : > { %v2400_v20 = vadd.f32 1.0, %v6055_v18  ;;  %v2289_v21 = vpack.c.bf16 %v2288_v17, %v2288_v17  ;;  %v6057_v44 = vpop.eup %6056  ;;  %v7875_v17 = vld [vmem:[#allocation10 + $0xac] ss:$16 sps:$4 sm:$0xff]   ;;  %v7878_v18 = vld [vmem:[#allocation10 + $0xa0] ss:$16 sps:$4 sm:$0xff]  }
 0x468   : > { %6060 = vrcp.f32 %v2394_v19  ;;  %v6059_v30 = vpop.eup %6058  ;;  %v2407_v7 = vadd.f32 1.0, %v6057_v44  ;;  %v7881_v19 = vld [vmem:[#allocation10 + $0xa8] ss:$16 sps:$4 sm:$0xff]  }
 0x469   : > { %6062 = vrcp.f32 %v2400_v20  ;;  %v7810_v23 = vsel %vm2296_vm6, %v2289_v21, %v1978_v22  ;;  %2449 = vmatmul.mubr.bf16.vlgmr.msra.gmra.mrb[28].mxu0 %v2289_v21  ;;  %2490 = vmatmul.mubr.bf16.vlgmr.msra.gmra.mrb[60].mxu1 %v2289_v21  ;;  %v7884_v20 = vld [vmem:[#allocation10 + $0xc4] ss:$16 sps:$4 sm:$0xff]   ;;  %v7887_v21 = vld [vmem:[#allocation10 + $0xcc] ss:$16 sps:$4 sm:$0xff]  }
 0x46a   : > { %2499 = vmatpush1.bf16.msra.mxu0 %v7812_v28  ;;  %2540 = vmatpush1.bf16.msra.mxu1 %v7815_v53  ;;  %6064 = vrcp.f32 %v2407_v7  ;;  %9434 = vst [vmem:[#allocation44_spill] sm:$0xff] %v7884_v20  ;;  %9435 = vst [vmem:[#allocation45_spill] sm:$0xff] %v7887_v21 }
 0x46b   : > { %2500 = vmatprep.subr.bf16.mxu0 %v7818_v42  ;;  %2541 = vmatprep.subr.bf16.mxu1 %v7821_v41 }
 0x46c   : > { %2530 = vmatprep.mubr.bf16.mxu0 %v9326_v39  ;;  %2571 = vmatprep.mubr.bf16.mxu1 %v9326_v39 }
 0x46e   : > { %2501 = vmatpush1.bf16.msra.mxu0 %v7826_v33  ;;  %2542 = vmatpush1.bf16.msra.mxu1 %v7829_v34 }
 0x46f   : > { %2502 = vmatprep.subr.bf16.mxu0 %v7832_v48  ;;  %2543 = vmatprep.subr.bf16.mxu1 %v7835_v27 }
 0x472   : > { %v6061_v1 = vpop.eup %6060  ;;  %2503 = vmatpush1.bf16.msra.mxu0 %v7838_v2  ;;  %2544 = vmatpush1.bf16.msra.mxu1 %v7841_v4 }
 0x473   : > { %v6063_v5 = vpop.eup %6062  ;;  %v2411_v6 = vmul.f32 %v6061_v1, %v6059_v30  ;;  %2504 = vmatprep.subr.bf16.mxu0 %v7844_v8  ;;  %2545 = vmatprep.subr.bf16.mxu1 %v7847_v9  ;;  %v7890_v30 = vld [vmem:[#allocation10 + $0xc0] ss:$16 sps:$4 sm:$0xff]   ;;  %v7893_v1 = vld [vmem:[#allocation10 + $0xc8] ss:$16 sps:$4 sm:$0xff]  }
 0x474   : > { %v2410_v50 = vmul.f32 %v6063_v5, %v7678_v52  ;;  %v7866_v52 = vld [vmem:[#allocation10 + $0x80] ss:$16 sps:$4 sm:$0xff]   ;;  %v6065_v22 = vpop.eup %6064  ;;  %v7896_v5 = vld [vmem:[#allocation10 + $0xe4] ss:$16 sps:$4 sm:$0xff]  }
 0x476   : > { %v7851_v10 = vadd.f32 %v2411_v6, %v2410_v50  ;;  %2505 = vmatpush1.bf16.msra.mxu0 %v7853_v11  ;;  %2546 = vmatpush1.bf16.msra.mxu1 %v7856_v12  ;;  %v7899_v6 = vld [vmem:[#allocation10 + $0xec] ss:$16 sps:$4 sm:$0xff]  }
 0x477   : > { %2506 = vmatprep.subr.bf16.mxu0 %v7859_v13  ;;  %2547 = vmatprep.subr.bf16.mxu1 %v7862_v14 }
 0x478   : > { %6066 = vtanh.f32 %v7851_v10 }
 0x47a   : > { %2507 = vmatpush1.bf16.msra.mxu0 %v7866_v52  ;;  %2548 = vmatpush1.bf16.msra.mxu1 %v7869_v15 }
 0x47b   : > { %2508 = vmatprep.subr.bf16.mxu0 %v7872_v16  ;;  %2549 = vmatprep.subr.bf16.mxu1 %v7875_v17 }
 0x47e   : > { %2509 = vmatpush1.bf16.msra.mxu0 %v7878_v18  ;;  %2550 = vmatpush1.bf16.msra.mxu1 %v7881_v19 }
 0x47f   : > { %2510 = vmatprep.subr.bf16.mxu0 %v7884_v20  ;;  %2551 = vmatprep.subr.bf16.mxu1 %v7887_v21  ;;  %v7902_v21 = vld [vmem:[#allocation10 + $0xe0] ss:$16 sps:$4 sm:$0xff]   ;;  %v7905_v20 = vld [vmem:[#allocation10 + $0xe8] ss:$16 sps:$4 sm:$0xff]  }
 0x482   : > { %v6067_v44 = vpop.eup %6066  ;;  %2511 = vmatpush1.bf16.msra.mxu0 %v7890_v30  ;;  %2552 = vmatpush1.bf16.msra.mxu1 %v7893_v1 }
 0x483   : > { %2512 = vmatprep.subr.bf16.mxu0 %v7896_v5  ;;  %2553 = vmatprep.subr.bf16.mxu1 %v7899_v6  ;;  %v2414_v7 = vmul.f32 %v6067_v44, %v6065_v22  ;;  %v7963_v22 = vld [vmem:[#allocation12 + $0xc] ss:$16 sps:$4 sm:$0xff]   ;;  %v7966_v44 = vld [vmem:[#allocation12] ss:$16 sps:$4 sm:$0xff]  }
 0x484   : > { %9446 = vst [vmem:[#allocation56_spill] sm:$0xff] %v7963_v22  ;;  %9447 = vst [vmem:[#allocation57_spill] sm:$0xff] %v7966_v44 }
 0x485   : > { %v2415_v50 = vpack.c.bf16 %v2414_v7, %v2414_v7  ;;  %v7969_v7 = vld [vmem:[#allocation12 + $0x8] ss:$16 sps:$4 sm:$0xff]  }
 0x486   : > { %2513 = vmatpush1.bf16.msra.mxu0 %v7902_v21  ;;  %2554 = vmatpush1.bf16.msra.mxu1 %v7905_v20  ;;  %9448 = vst [vmem:[#allocation58_spill] sm:$0xff] %v7969_v7 }
 0x487   : > { %2624 = vmatprep.subr.bf16.mxu0 %v7699_v38  ;;  %2665 = vmatprep.subr.bf16.mxu1 %v7702_v36 }
 0x489   : > { %2531 = vmatmul.mubr.bf16.vlgmr.msra.gmra.mrb[32].mxu0 %v2415_v50  ;;  %2572 = vmatmul.mubr.bf16.vlgmr.msra.gmra.mrb[64].mxu1 %v2415_v50 }
 0x48a   : > { %2625 = vmatpush1.bf16.msra.mxu0 %v7543_v46  ;;  %2666 = vmatpush1.bf16.msra.mxu1 %v7706_v25  ;;  %v7925_v46 = vld [vmem:[#allocation9 + $0x68] ss:$16 sps:$4 sm:$0xff]  }
 0x48b   : > { %2626 = vmatprep.subr.bf16.mxu0 %v7547_v32  ;;  %2667 = vmatprep.subr.bf16.mxu1 %v7710_v45  ;;  %9436 = vst [vmem:[#allocation46_spill] sm:$0xff] %v7925_v46  ;;  %v7929_v32 = vld [vmem:[#allocation9 + $0x8c] ss:$16 sps:$4 sm:$0xff]  }
 0x48c   : > { %2656 = vmatprep.mubr.bf16.mxu0 %v9326_v39  ;;  %2697 = vmatprep.mubr.bf16.mxu1 %v9326_v39  ;;  %9437 = vst [vmem:[#allocation47_spill] sm:$0xff] %v7929_v32 }
 0x48e   : > { %2627 = vmatpush1.bf16.msra.mxu0 %v7553_v43  ;;  %2668 = vmatpush1.bf16.msra.mxu1 %v7716_v29  ;;  %v7933_v43 = vld [vmem:[#allocation9 + $0x88] ss:$16 sps:$4 sm:$0xff]  }
 0x48f   : > { %2628 = vmatprep.subr.bf16.mxu0 %v7557_v37  ;;  %2669 = vmatprep.subr.bf16.mxu1 %v7720_v47  ;;  %9438 = vst [vmem:[#allocation48_spill] sm:$0xff] %v7933_v43  ;;  %v7937_v37 = vld [vmem:[#allocation9 + $0xac] ss:$16 sps:$4 sm:$0xff]  }
 0x490   : > { %9439 = vst [vmem:[#allocation49_spill] sm:$0xff] %v7937_v37 }
 0x492   : > { %2629 = vmatpush1.bf16.msra.mxu0 %v7561_v54  ;;  %2670 = vmatpush1.bf16.msra.mxu1 %v7724_v49  ;;  %v7941_v54 = vld [vmem:[#allocation9 + $0xa8] ss:$16 sps:$4 sm:$0xff]  }
 0x493   : > { %2630 = vmatprep.subr.bf16.mxu0 %v7565_v55  ;;  %2671 = vmatprep.subr.bf16.mxu1 %v7728_v35  ;;  %9440 = vst [vmem:[#allocation50_spill] sm:$0xff] %v7941_v54  ;;  %v7945_v55 = vld [vmem:[#allocation9 + $0xcc] ss:$16 sps:$4 sm:$0xff]  }
 0x494   : > { %9441 = vst [vmem:[#allocation51_spill] sm:$0xff] %v7945_v55 }
 0x496   : > { %2631 = vmatpush1.bf16.msra.mxu0 %v7569_v51  ;;  %2672 = vmatpush1.bf16.msra.mxu1 %v7925_v46  ;;  %v7949_v51 = vld [vmem:[#allocation9 + $0xc8] ss:$16 sps:$4 sm:$0xff]  }
 0x497   : > { %2632 = vmatprep.subr.bf16.mxu0 %v7573_v56  ;;  %2673 = vmatprep.subr.bf16.mxu1 %v7929_v32  ;;  %9442 = vst [vmem:[#allocation52_spill] sm:$0xff] %v7949_v51  ;;  %v7953_v56 = vld [vmem:[#allocation9 + $0xec] ss:$16 sps:$4 sm:$0xff]  }
 0x498   : > { %9443 = vst [vmem:[#allocation53_spill] sm:$0xff] %v7953_v56 }
 0x49a   : > { %2633 = vmatpush1.bf16.msra.mxu0 %v7577_v57  ;;  %2674 = vmatpush1.bf16.msra.mxu1 %v7933_v43  ;;  %v7957_v57 = vld [vmem:[#allocation9 + $0xe8] ss:$16 sps:$4 sm:$0xff]  }
 0x49b   : > { %2634 = vmatprep.subr.bf16.mxu0 %v7581_v58  ;;  %2675 = vmatprep.subr.bf16.mxu1 %v7937_v37  ;;  %9444 = vst [vmem:[#allocation54_spill] sm:$0xff] %v7957_v57  ;;  %v7960_v58 = vld [vmem:[#allocation12 + $0x4] ss:$16 sps:$4 sm:$0xff]  }
 0x49c   : > { %9445 = vst [vmem:[#allocation55_spill] sm:$0xff] %v7960_v58 }
 0x49e   : > { %2635 = vmatpush1.bf16.msra.mxu0 %v7739_v0  ;;  %2676 = vmatpush1.bf16.msra.mxu1 %v7941_v54 }
 0x49f   : > { %2636 = vmatprep.subr.bf16.mxu0 %v7743_v31  ;;  %2677 = vmatprep.subr.bf16.mxu1 %v7945_v55 }
 0x4a2   : > { %2637 = vmatpush1.bf16.msra.mxu0 %v7747_v60  ;;  %2678 = vmatpush1.bf16.msra.mxu1 %v7949_v51 }
 0x4a3   : > { %2638 = vmatprep.subr.bf16.mxu0 %v7751_v61  ;;  %2679 = vmatprep.subr.bf16.mxu1 %v7953_v56 }
 0x4a6   : > { %2639 = vmatpush1.bf16.msra.mxu0 %v7755_v62  ;;  %2680 = vmatpush1.bf16.msra.mxu1 %v7957_v57  ;;  %v7972_v62 = vld [vmem:[#allocation12 + $0x24] ss:$16 sps:$4 sm:$0xff]   ;;  %v7975_v57 = vld [vmem:[#allocation12 + $0x2c] ss:$16 sps:$4 sm:$0xff]  }
 0x4a7   : > { %2735 = vmatprep.subr.bf16.mxu0 %v7960_v58  ;;  %2776 = vmatprep.subr.bf16.mxu1 %v7963_v22  ;;  %9449 = vst [vmem:[#allocation59_spill] sm:$0xff] %v7972_v62  ;;  %9450 = vst [vmem:[#allocation60_spill] sm:$0xff] %v7975_v57  ;;  %v7995_v22 = vld [vmem:[#allocation12 + $0x48] ss:$16 sps:$4 sm:$0xff]  }
 0x4a8   : > { %9456 = vst [vmem:[#allocation66_spill] sm:$0xff] %v7995_v22 }
 0x4a9   : > { %2657 = vmatmul.mubr.bf16.vlgmr.msra.gmra.mrb[36].mxu0 %v2415_v50  ;;  %2698 = vmatmul.mubr.bf16.vlgmr.msra.gmra.mrb[68].mxu1 %v2415_v50  ;;  %v7980_v50 = vld [vmem:[#allocation12 + $0x20] ss:$16 sps:$4 sm:$0xff]  }
 0x4aa   : > { %2736 = vmatpush1.bf16.msra.mxu0 %v7966_v44  ;;  %2777 = vmatpush1.bf16.msra.mxu1 %v7969_v7  ;;  %9451 = vst [vmem:[#allocation61_spill] sm:$0xff] %v7980_v50  ;;  %v7983_v44 = vld [vmem:[#allocation12 + $0x28] ss:$16 sps:$4 sm:$0xff]   ;;  %v7986_v7 = vld [vmem:[#allocation12 + $0x44] ss:$16 sps:$4 sm:$0xff]  }
 0x4ab   : > { %2737 = vmatprep.subr.bf16.mxu0 %v7972_v62  ;;  %2778 = vmatprep.subr.bf16.mxu1 %v7975_v57  ;;  %9452 = vst [vmem:[#allocation62_spill] sm:$0xff] %v7983_v44  ;;  %9453 = vst [vmem:[#allocation63_spill] sm:$0xff] %v7986_v7  ;;  %v7989_v62 = vld [vmem:[#allocation12 + $0x4c] ss:$16 sps:$4 sm:$0xff]   ;;  %v7992_v57 = vld [vmem:[#allocation12 + $0x40] ss:$16 sps:$4 sm:$0xff]  }
 0x4ac   : > { %2767 = vmatprep.mubr.bf16.mxu0 %v9326_v39  ;;  %2808 = vmatprep.mubr.bf16.mxu1 %v9326_v39  ;;  %9454 = vst [vmem:[#allocation64_spill] sm:$0xff] %v7989_v62  ;;  %9455 = vst [vmem:[#allocation65_spill] sm:$0xff] %v7992_v57 }
 0x4ae   : > { %2738 = vmatpush1.bf16.msra.mxu0 %v7980_v50  ;;  %2779 = vmatpush1.bf16.msra.mxu1 %v7983_v44  ;;  %v7998_v50 = vld [vmem:[#allocation12 + $0x64] ss:$16 sps:$4 sm:$0xff]   ;;  %v8001_v44 = vld [vmem:[#allocation12 + $0x6c] ss:$16 sps:$4 sm:$0xff]  }
 0x4af   : > { %2739 = vmatprep.subr.bf16.mxu0 %v7986_v7  ;;  %2780 = vmatprep.subr.bf16.mxu1 %v7989_v62  ;;  %9457 = vst [vmem:[#allocation67_spill] sm:$0xff] %v7998_v50  ;;  %9458 = vst [vmem:[#allocation68_spill] sm:$0xff] %v8001_v44  ;;  %v8004_v7 = vld [vmem:[#allocation12 + $0x60] ss:$16 sps:$4 sm:$0xff]   ;;  %v8007_v62 = vld [vmem:[#allocation12 + $0x68] ss:$16 sps:$4 sm:$0xff]  }
 0x4b0   : > { %9459 = vst [vmem:[#allocation69_spill] sm:$0xff] %v8004_v7  ;;  %9460 = vst [vmem:[#allocation70_spill] sm:$0xff] %v8007_v62 }
 0x4b2   : > { %2740 = vmatpush1.bf16.msra.mxu0 %v7992_v57  ;;  %2781 = vmatpush1.bf16.msra.mxu1 %v7995_v22  ;;  %v8010_v57 = vld [vmem:[#allocation12 + $0x84] ss:$16 sps:$4 sm:$0xff]   ;;  %v8013_v22 = vld [vmem:[#allocation12 + $0x8c] ss:$16 sps:$4 sm:$0xff]  }
 0x4b3   : > { %2741 = vmatprep.subr.bf16.mxu0 %v7998_v50  ;;  %2782 = vmatprep.subr.bf16.mxu1 %v8001_v44  ;;  %9461 = vst [vmem:[#allocation71_spill] sm:$0xff] %v8010_v57  ;;  %9462 = vst [vmem:[#allocation25_spill] sm:$0xff] %v8013_v22  ;;  %v8016_v50 = vld [vmem:[#allocation12 + $0x80] ss:$16 sps:$4 sm:$0xff]   ;;  %v8019_v44 = vld [vmem:[#allocation12 + $0x88] ss:$16 sps:$4 sm:$0xff]  }
 0x4b4   : > { %9463 = vst [vmem:[#allocation26_spill] sm:$0xff] %v8016_v50  ;;  %9464 = vst [vmem:[#allocation27_spill] sm:$0xff] %v8019_v44 }
 0x4b6   : > { %2742 = vmatpush1.bf16.msra.mxu0 %v8004_v7  ;;  %2783 = vmatpush1.bf16.msra.mxu1 %v8007_v62  ;;  %v8022_v7 = vld [vmem:[#allocation12 + $0xa4] ss:$16 sps:$4 sm:$0xff]   ;;  %v8025_v62 = vld [vmem:[#allocation12 + $0xac] ss:$16 sps:$4 sm:$0xff]  }
 0x4b7   : > { %2743 = vmatprep.subr.bf16.mxu0 %v8010_v57  ;;  %2784 = vmatprep.subr.bf16.mxu1 %v8013_v22  ;;  %9465 = vst [vmem:[#allocation28_spill] sm:$0xff] %v8022_v7  ;;  %9466 = vst [vmem:[#allocation29_spill] sm:$0xff] %v8025_v62  ;;  %v8028_v57 = vld [vmem:[#allocation12 + $0xa0] ss:$16 sps:$4 sm:$0xff]   ;;  %v8031_v22 = vld [vmem:[#allocation12 + $0xa8] ss:$16 sps:$4 sm:$0xff]  }
 0x4b8   : > { %9467 = vst [vmem:[#allocation30_spill] sm:$0xff] %v8028_v57  ;;  %9468 = vst [vmem:[#allocation31_spill] sm:$0xff] %v8031_v22 }
 0x4ba   : > { %2744 = vmatpush1.bf16.msra.mxu0 %v8016_v50  ;;  %2785 = vmatpush1.bf16.msra.mxu1 %v8019_v44  ;;  %v8034_v50 = vld [vmem:[#allocation12 + $0xc4] ss:$16 sps:$4 sm:$0xff]   ;;  %v8037_v44 = vld [vmem:[#allocation12 + $0xcc] ss:$16 sps:$4 sm:$0xff]  }
 0x4bb   : > { %2745 = vmatprep.subr.bf16.mxu0 %v8022_v7  ;;  %2786 = vmatprep.subr.bf16.mxu1 %v8025_v62  ;;  %9469 = vst [vmem:[#allocation32_spill] sm:$0xff] %v8034_v50  ;;  %9470 = vst [vmem:[#allocation33_spill] sm:$0xff] %v8037_v44  ;;  %v8040_v7 = vld [vmem:[#allocation12 + $0xc0] ss:$16 sps:$4 sm:$0xff]   ;;  %v8043_v62 = vld [vmem:[#allocation12 + $0xc8] ss:$16 sps:$4 sm:$0xff]  }
 0x4bc   : > { %9471 = vst [vmem:[#allocation34_spill] sm:$0xff] %v8040_v7  ;;  %9472 = vst [vmem:[#allocation35_spill] sm:$0xff] %v8043_v62 }
 0x4be   : > { %2746 = vmatpush1.bf16.msra.mxu0 %v8028_v57  ;;  %2787 = vmatpush1.bf16.msra.mxu1 %v8031_v22  ;;  %v8046_v57 = vld [vmem:[#allocation12 + $0xe4] ss:$16 sps:$4 sm:$0xff]   ;;  %v8049_v22 = vld [vmem:[#allocation12 + $0xec] ss:$16 sps:$4 sm:$0xff]  }
 0x4bf   : > { %2747 = vmatprep.subr.bf16.mxu0 %v8034_v50  ;;  %2788 = vmatprep.subr.bf16.mxu1 %v8037_v44  ;;  %9473 = vst [vmem:[#allocation36_spill] sm:$0xff] %v8046_v57  ;;  %9474 = vst [vmem:[#allocation37_spill] sm:$0xff] %v8049_v22  ;;  %v8052_v50 = vld [vmem:[#allocation12 + $0xe0] ss:$16 sps:$4 sm:$0xff]   ;;  %v8055_v44 = vld [vmem:[#allocation12 + $0xe8] ss:$16 sps:$4 sm:$0xff]  }
 0x4c0   : > { %9475 = vst [vmem:[#allocation38_spill] sm:$0xff] %v8052_v50  ;;  %9476 = vst [vmem:[#allocation39_spill] sm:$0xff] %v8055_v44 }
 0x4c2   : > { %2748 = vmatpush1.bf16.msra.mxu0 %v8040_v7  ;;  %2789 = vmatpush1.bf16.msra.mxu1 %v8043_v62  ;;  %v8058_v7 = vld [vmem:[#allocation10 + $0x4] ss:$16 sps:$4 sm:$0xff]   ;;  %v8061_v62 = vld [vmem:[#allocation10 + $0xc] ss:$16 sps:$4 sm:$0xff]  }
 0x4c3   : > { %2749 = vmatprep.subr.bf16.mxu0 %v8046_v57  ;;  %2790 = vmatprep.subr.bf16.mxu1 %v8049_v22  ;;  %9477 = vst [vmem:[#allocation40_spill] sm:$0xff] %v8058_v7  ;;  %9478 = vst [vmem:[#allocation41_spill] sm:$0xff] %v8061_v62 }
 0x4c6   : > { %2750 = vmatpush1.bf16.msra.mxu0 %v8052_v50  ;;  %2791 = vmatpush1.bf16.msra.mxu1 %v8055_v44  ;;  %v2929_v44 = vsel %vm2928_vm7, 1, %v9326_v39 }
 0x4c7   : > { %2817 = vmatprep.subr.bf16.mxu0 %v8058_v7  ;;  %2858 = vmatprep.subr.bf16.mxu1 %v8061_v62 }
 0x4c8   : > { %2931 = vperm.xlu1 %5762, %v2929_v44  }
 0x53c   : > { %v2450_v57 = vpop.f32.mrb[28].mxu0  ;;  %v2491_v58 = vpop.f32.mrb[60].mxu1 }
 0x53d   : > { %v2452_v56 = vpop.f32.mrb[29].mxu0  ;;  %v2493_v22 = vpop.f32.mrb[61].mxu1 }
 0x53e   : > { %v2454_v61 = vpop.f32.mrb[30].mxu0  ;;  %v2495_v51 = vpop.f32.mrb[62].mxu1 }
 0x53f   : > { %v2455_v60 = vpop.f32.mrb[31].mxu0  ;;  %v2496_v50 = vpop.f32.mrb[63].mxu1 }
 0x55c   : > { %v2532_v55 = vpop.f32.mrb[32].mxu0  ;;  %v2573_v31 = vpop.f32.mrb[64].mxu1 }
 0x55d   : > { %v2533_v7 = vadd.f32 %v2532_v55, %v2450_v57  ;;  %v2574_v54 = vadd.f32 %v2573_v31, %v2491_v58  ;;  %v2534_v0 = vpop.f32.mrb[33].mxu0  ;;  %v2575_v37 = vpop.f32.mrb[65].mxu1 }
 0x55e   : > { %v2535_v62 = vadd.f32 %v2534_v0, %v2452_v56  ;;  %v2576_v43 = vadd.f32 %v2575_v37, %v2493_v22  ;;  %v2536_v32 = vpop.f32.mrb[34].mxu0  ;;  %v2577_v46 = vpop.f32.mrb[66].mxu1 }
 0x55f   : > { %v2580_v61 = vadd.f32 %v2533_v7, %v7637_v3  ;;  %v2537_v51 = vpop.f32.mrb[35].mxu0  ;;  %v2578_v60 = vpop.f32.mrb[67].mxu1  ;;  %v2582_v31 = vadd.f32 %v2574_v54, %v7649_v26 }
 0x560   : > { %v2581_v50 = vadd.f32 %v2535_v62, %v7640_v40  ;;  %v2583_v44 = vadd.f32 %v2576_v43, %v7645_v24  ;;  %v9480_v51 = vld [vmem:[#allocation96_spill] sm:$0xff] }
 0x561   : > { %v5512_v59 = vmul.f32 -1.442695, %v2580_v61  ;;  %v9479_v61 = vld [vmem:[#allocation80_spill] sm:$0xff] }
 0x562   : > { %v5513_v35 = vmul.f32 -1.442695, %v2581_v50  ;;  %v5514_v55 = vmul.f32 -1.442695, %v2583_v44 }
 0x563   : > { %6068 = vpow2.f32 %v5512_v59 }
 0x564   : > { %6070 = vpow2.f32 %v5513_v35 }
 0x565   : > { %6072 = vpow2.f32 %v5514_v55 }
 0x566   : > { %6074 = vtanh.f32 %v2582_v31  ;;  %v9481_v31 = vld [vmem:[#allocation81_spill] sm:$0xff] }
 0x56d   : > { %v6069_v57 = vpop.eup %6068 }
 0x56e   : > { %v6071_v0 = vpop.eup %6070  ;;  %v2587_v37 = vadd.f32 1.0, %v6069_v57 }
 0x56f   : > { %v2593_v46 = vadd.f32 1.0, %v6071_v0  ;;  %v6073_v32 = vpop.eup %6072  ;;  %v9482_v0 = vld [vmem:[#allocation97_spill] sm:$0xff] }
 0x570   : > { %6076 = vrcp.f32 %v2587_v37  ;;  %v6075_v56 = vpop.eup %6074  ;;  %v2600_v59 = vadd.f32 1.0, %v6073_v32 }
 0x571   : > { %6078 = vrcp.f32 %v2593_v46 }
 0x572   : > { %6080 = vrcp.f32 %v2600_v59 }
 0x57a   : > { %v6077_v62 = vpop.eup %6076 }
 0x57b   : > { %v6079_v58 = vpop.eup %6078  ;;  %v2604_v22 = vmul.f32 %v6077_v62, %v6075_v56 }
 0x57c   : > { %v2603_v35 = vmul.f32 %v6079_v58, %v7804_v63  ;;  %v2658_v43 = vpop.f32.mrb[36].mxu0  ;;  %v2699_v7 = vpop.f32.mrb[68].mxu1 }
 0x57d   : > { %v2706_v54 = vadd.f32 %v2658_v43, %v9479_v61  ;;  %v2708_v60 = vadd.f32 %v2699_v7, %v9480_v51  ;;  %v2660_v50 = vpop.f32.mrb[37].mxu0  ;;  %v2701_v44 = vpop.f32.mrb[69].mxu1 }
 0x57e   : > { %v8073_v55 = vadd.f32 %v2604_v22, %v2603_v35  ;;  %v2707_v57 = vadd.f32 %v2660_v50, %v9481_v31  ;;  %v2709_v37 = vadd.f32 %v2701_v44, %v9482_v0  ;;  %v2662_v46 = vpop.f32.mrb[38].mxu0  ;;  %v2703_v26 = vpop.f32.mrb[70].mxu1  ;;  %v9507_v44 = vld [vmem:[#allocation54_spill] sm:$0xff] }
 0x57f   : > { %v5515_v32 = vmul.f32 -1.442695, %v2706_v54  ;;  %v2663_v56 = vpop.f32.mrb[39].mxu0  ;;  %v2704_v63 = vpop.f32.mrb[71].mxu1 }
 0x580   : > { %v5516_v62 = vmul.f32 -1.442695, %v2707_v57  ;;  %6082 = vtanh.f32 %v8073_v55  ;;  %v2613_v58 = vpop.permute.xlu1 %2612  ;;  %v5517_v43 = vmul.f32 -1.442695, %v2709_v37  ;;  %v6081_v7 = vpop.eup %6080  ;;  %v9486_v63 = vld [vmem:[#allocation45_spill] sm:$0xff] }
 0x581   : > { %6084 = vpow2.f32 %v5515_v32  ;;  %vm2614_vm8 = vcmp.eq.s32.totalorder %v2613_v58, 1 }
 0x582   : > { %6086 = vpow2.f32 %v5516_v62  ;;  %vm8078_vm9 = vmpackc.low %vm2614_vm8, %vm2614_vm8 }
 0x583   : > { %6088 = vpow2.f32 %v5517_v43 }
 0x584   : > { %6090 = vtanh.f32 %v2708_v60 }
 0x58a   : > { %v6083_v22 = vpop.eup %6082 }
 0x58b   : > { %v6085_v35 = vpop.eup %6084  ;;  %v2607_v61 = vmul.f32 %v6083_v22, %v6081_v7  ;;  %v8128_v22 = vld [vmem:[#allocation9] ss:$16 sps:$4 sm:$0xff]  }
 0x58c   : > { %v6087_v51 = vpop.eup %6086  ;;  %v2713_v50 = vadd.f32 1.0, %v6085_v35  ;;  %v8132_v35 = vld [vmem:[#allocation9 + $0x24] ss:$16 sps:$4 sm:$0xff]  }
 0x58d   : > { %v2719_v59 = vadd.f32 1.0, %v6087_v51  ;;  %v8082_v54 = vpack.c.bf16 %v2607_v61, %v2607_v61  ;;  %v6089_v60 = vpop.eup %6088  ;;  %v9489_v61 = vld [vmem:[#allocation75_spill] sm:$0xff] }
 0x58e   : > { %6092 = vrcp.f32 %v2713_v50  ;;  %v6091_v31 = vpop.eup %6090  ;;  %v2726_v46 = vadd.f32 1.0, %v6089_v60  ;;  %v8154_v51 = vld [vmem:[#allocation9 + $0x60] ss:$16 sps:$4 sm:$0xff]   ;;  %v8158_v50 = vld [vmem:[#allocation9 + $0x84] ss:$16 sps:$4 sm:$0xff]  }
 0x58f   : > { %6094 = vrcp.f32 %v2719_v59  ;;  %2768 = vmatmul.mubr.bf16.vlgmr.msra.gmra.mrb[40].mxu0 %v8082_v54  ;;  %2809 = vmatmul.mubr.bf16.vlgmr.msra.gmra.mrb[72].mxu1 %v8082_v54  ;;  %9490 = vst [vmem:[#allocation79_spill] sm:$0xff] %v8154_v51  ;;  %9492 = vst [vmem:[#allocation95_spill] sm:$0xff] %v8158_v50  ;;  %v8162_v59 = vld [vmem:[#allocation9 + $0x80] ss:$16 sps:$4 sm:$0xff]   ;;  %v8166_v60 = vld [vmem:[#allocation9 + $0xa4] ss:$16 sps:$4 sm:$0xff]  }
 0x590   : > { %2818 = vmatpush1.bf16.msra.mxu0 %v7812_v28  ;;  %2859 = vmatpush1.bf16.msra.mxu1 %v7815_v53  ;;  %6096 = vrcp.f32 %v2726_v46  ;;  %9494 = vst [vmem:[#allocation80_spill] sm:$0xff] %v8162_v59  ;;  %9496 = vst [vmem:[#allocation96_spill] sm:$0xff] %v8166_v60  ;;  %v9501_v46 = vld [vmem:[#allocation51_spill] sm:$0xff] }
 0x591   : > { %2819 = vmatprep.subr.bf16.mxu0 %v7818_v42  ;;  %2860 = vmatprep.subr.bf16.mxu1 %v7821_v41 }
 0x592   : > { %2849 = vmatprep.mubr.bf16.mxu0 %v9326_v39  ;;  %2890 = vmatprep.mubr.bf16.mxu1 %v9326_v39 }
 0x594   : > { %2820 = vmatpush1.bf16.msra.mxu0 %v7826_v33  ;;  %2861 = vmatpush1.bf16.msra.mxu1 %v7829_v34 }
 0x595   : > { %2821 = vmatprep.subr.bf16.mxu0 %v7832_v48  ;;  %2862 = vmatprep.subr.bf16.mxu1 %v7835_v27 }
 0x598   : > { %v6093_v57 = vpop.eup %6092  ;;  %2822 = vmatpush1.bf16.msra.mxu0 %v7838_v2  ;;  %2863 = vmatpush1.bf16.msra.mxu1 %v7841_v4 }
 0x599   : > { %v6095_v0 = vpop.eup %6094  ;;  %v2730_v37 = vmul.f32 %v6093_v57, %v6091_v31  ;;  %2823 = vmatprep.subr.bf16.mxu0 %v7844_v8  ;;  %2864 = vmatprep.subr.bf16.mxu1 %v7847_v9  ;;  %v9497_v31 = vld [vmem:[#allocation49_spill] sm:$0xff]  ;;  %v9498_v57 = vld [vmem:[#allocation92_spill] sm:$0xff] }
 0x59a   : > { %v2729_v32 = vmul.f32 %v6095_v0, %v7851_v10  ;;  %v9485_v10 = vld [vmem:[#allocation44_spill] sm:$0xff]  ;;  %v6097_v62 = vpop.eup %6096  ;;  %v9499_v0 = vld [vmem:[#allocation50_spill] sm:$0xff] }
 0x59c   : > { %v8105_v56 = vadd.f32 %v2730_v37, %v2729_v32  ;;  %2824 = vmatpush1.bf16.msra.mxu0 %v7853_v11  ;;  %2865 = vmatpush1.bf16.msra.mxu1 %v7856_v12  ;;  %v9500_v37 = vld [vmem:[#allocation76_spill] sm:$0xff]  ;;  %v9502_v32 = vld [vmem:[#allocation93_spill] sm:$0xff] }
 0x59d   : > { %2825 = vmatprep.subr.bf16.mxu0 %v7859_v13  ;;  %2866 = vmatprep.subr.bf16.mxu1 %v7862_v14 }
 0x59e   : > { %6098 = vtanh.f32 %v8105_v56 }
 0x5a0   : > { %2826 = vmatpush1.bf16.msra.mxu0 %v7866_v52  ;;  %2867 = vmatpush1.bf16.msra.mxu1 %v7869_v15 }
 0x5a1   : > { %2827 = vmatprep.subr.bf16.mxu0 %v7872_v16  ;;  %2868 = vmatprep.subr.bf16.mxu1 %v7875_v17 }
 0x5a4   : > { %2828 = vmatpush1.bf16.msra.mxu0 %v7878_v18  ;;  %2869 = vmatpush1.bf16.msra.mxu1 %v7881_v19 }
 0x5a5   : > { %2829 = vmatprep.subr.bf16.mxu0 %v9485_v10  ;;  %2870 = vmatprep.subr.bf16.mxu1 %v9486_v63 }
 0x5a8   : > { %v6099_v58 = vpop.eup %6098  ;;  %2830 = vmatpush1.bf16.msra.mxu0 %v7890_v30  ;;  %2871 = vmatpush1.bf16.msra.mxu1 %v7893_v1 }
 0x5a9   : > { %2831 = vmatprep.subr.bf16.mxu0 %v7896_v5  ;;  %2872 = vmatprep.subr.bf16.mxu1 %v7899_v6  ;;  %v2733_v43 = vmul.f32 %v6099_v58, %v6097_v62  ;;  %v9503_v62 = vld [vmem:[#allocation52_spill] sm:$0xff]  ;;  %v9504_v58 = vld [vmem:[#allocation42_spill] sm:$0xff] }
 0x5ab   : > { %v2734_v7 = vpack.c.bf16 %v2733_v43, %v2733_v43  ;;  %v9505_v43 = vld [vmem:[#allocation53_spill] sm:$0xff] }
 0x5ac   : > { %2832 = vmatpush1.bf16.msra.mxu0 %v7902_v21  ;;  %2873 = vmatpush1.bf16.msra.mxu1 %v7905_v20 }
 0x5ad   : > { %2943 = vmatprep.subr.bf16.mxu0 %v7699_v38  ;;  %2984 = vmatprep.subr.bf16.mxu1 %v7702_v36  ;;  %v8138_v38 = vld [vmem:[#allocation9 + $0x20] ss:$16 sps:$4 sm:$0xff]   ;;  %v8142_v36 = vld [vmem:[#allocation9 + $0x44] ss:$16 sps:$4 sm:$0xff]  }
 0x5af   : > { %2850 = vmatmul.mubr.bf16.vlgmr.msra.gmra.mrb[44].mxu0 %v2734_v7  ;;  %2891 = vmatmul.mubr.bf16.vlgmr.msra.gmra.mrb[76].mxu1 %v2734_v7 }
 0x5b0   : > { %2944 = vmatpush1.bf16.msra.mxu0 %v8128_v22  ;;  %2985 = vmatpush1.bf16.msra.mxu1 %v7706_v25  ;;  %v8146_v25 = vld [vmem:[#allocation9 + $0x40] ss:$16 sps:$4 sm:$0xff]  }
 0x5b1   : > { %2945 = vmatprep.subr.bf16.mxu0 %v8132_v35  ;;  %2986 = vmatprep.subr.bf16.mxu1 %v7710_v45  ;;  %9487 = vst [vmem:[#allocation77_spill] sm:$0xff] %v8146_v25  ;;  %v8150_v45 = vld [vmem:[#allocation9 + $0x64] ss:$16 sps:$4 sm:$0xff]  }
 0x5b2   : > { %2975 = vmatprep.mubr.bf16.mxu0 %v9326_v39  ;;  %3016 = vmatprep.mubr.bf16.mxu1 %v9326_v39  ;;  %9488 = vst [vmem:[#allocation94_spill] sm:$0xff] %v8150_v45 }
 0x5b4   : > { %2946 = vmatpush1.bf16.msra.mxu0 %v8138_v38  ;;  %2987 = vmatpush1.bf16.msra.mxu1 %v7716_v29  ;;  %v9491_v29 = vld [vmem:[#allocation46_spill] sm:$0xff] }
 0x5b5   : > { %2947 = vmatprep.subr.bf16.mxu0 %v8142_v36  ;;  %2988 = vmatprep.subr.bf16.mxu1 %v7720_v47  ;;  %v9493_v47 = vld [vmem:[#allocation47_spill] sm:$0xff] }
 0x5b8   : > { %2948 = vmatpush1.bf16.msra.mxu0 %v8146_v25  ;;  %2989 = vmatpush1.bf16.msra.mxu1 %v7724_v49  ;;  %v9495_v49 = vld [vmem:[#allocation48_spill] sm:$0xff] }
 0x5b9   : > { %2949 = vmatprep.subr.bf16.mxu0 %v8150_v45  ;;  %2990 = vmatprep.subr.bf16.mxu1 %v9489_v61  ;;  %v9506_v61 = vld [vmem:[#allocation43_spill] sm:$0xff] }
 0x5bc   : > { %2950 = vmatpush1.bf16.msra.mxu0 %v8154_v51  ;;  %2991 = vmatpush1.bf16.msra.mxu1 %v9491_v29 }
 0x5bd   : > { %2951 = vmatprep.subr.bf16.mxu0 %v8158_v50  ;;  %2992 = vmatprep.subr.bf16.mxu1 %v9493_v47 }
 0x5c0   : > { %2952 = vmatpush1.bf16.msra.mxu0 %v8162_v59  ;;  %2993 = vmatpush1.bf16.msra.mxu1 %v9495_v49  ;;  %v9542_v59 = vld [vmem:[#allocation78_spill] sm:$0xff] }
 0x5c1   : > { %2953 = vmatprep.subr.bf16.mxu0 %v8166_v60  ;;  %2994 = vmatprep.subr.bf16.mxu1 %v9497_v31  ;;  %v9508_v31 = vld [vmem:[#allocation55_spill] sm:$0xff]  ;;  %vm3247_vm10 = vcmp.eq.s32.totalorder %v9542_v59, 4 }
 0x5c4   : > { %2954 = vmatpush1.bf16.msra.mxu0 %v9498_v57  ;;  %2995 = vmatpush1.bf16.msra.mxu1 %v9499_v0  ;;  %v9509_v57 = vld [vmem:[#allocation56_spill] sm:$0xff] }
 0x5c5   : > { %2955 = vmatprep.subr.bf16.mxu0 %v9500_v37  ;;  %2996 = vmatprep.subr.bf16.mxu1 %v9501_v46  ;;  %v9510_v37 = vld [vmem:[#allocation57_spill] sm:$0xff]  ;;  %v9511_v46 = vld [vmem:[#allocation58_spill] sm:$0xff] }
 0x5c8   : > { %2956 = vmatpush1.bf16.msra.mxu0 %v9502_v32  ;;  %2997 = vmatpush1.bf16.msra.mxu1 %v9503_v62  ;;  %v9512_v32 = vld [vmem:[#allocation59_spill] sm:$0xff]  ;;  %v9513_v62 = vld [vmem:[#allocation60_spill] sm:$0xff] }
 0x5c9   : > { %2957 = vmatprep.subr.bf16.mxu0 %v9504_v58  ;;  %2998 = vmatprep.subr.bf16.mxu1 %v9505_v43  ;;  %v9514_v58 = vld [vmem:[#allocation61_spill] sm:$0xff]  ;;  %v9524_v43 = vld [vmem:[#allocation71_spill] sm:$0xff] }
 0x5cc   : > { %2958 = vmatpush1.bf16.msra.mxu0 %v9506_v61  ;;  %2999 = vmatpush1.bf16.msra.mxu1 %v9507_v44  ;;  %v9515_v61 = vld [vmem:[#allocation62_spill] sm:$0xff] }
 0x5cd   : > { %3054 = vmatprep.subr.bf16.mxu0 %v9508_v31  ;;  %3095 = vmatprep.subr.bf16.mxu1 %v9509_v57  ;;  %v9516_v31 = vld [vmem:[#allocation63_spill] sm:$0xff]  ;;  %v9517_v57 = vld [vmem:[#allocation64_spill] sm:$0xff]  ;;  %v9523_v44 = vld [vmem:[#allocation70_spill] sm:$0xff] }
 0x5cf   : > { %2976 = vmatmul.mubr.bf16.vlgmr.msra.gmra.mrb[48].mxu0 %v2734_v7  ;;  %3017 = vmatmul.mubr.bf16.vlgmr.msra.gmra.mrb[80].mxu1 %v2734_v7  ;;  %v9518_v7 = vld [vmem:[#allocation65_spill] sm:$0xff] }
 0x5d0   : > { %3055 = vmatpush1.bf16.msra.mxu0 %v9510_v37  ;;  %3096 = vmatpush1.bf16.msra.mxu1 %v9511_v46  ;;  %v9519_v37 = vld [vmem:[#allocation66_spill] sm:$0xff]  ;;  %v9520_v46 = vld [vmem:[#allocation67_spill] sm:$0xff] }
 0x5d1   : > { %3056 = vmatprep.subr.bf16.mxu0 %v9512_v32  ;;  %3097 = vmatprep.subr.bf16.mxu1 %v9513_v62  ;;  %v9521_v32 = vld [vmem:[#allocation68_spill] sm:$0xff]  ;;  %v9522_v62 = vld [vmem:[#allocation69_spill] sm:$0xff] }
 0x5d2   : > { %3086 = vmatprep.mubr.bf16.mxu0 %v9326_v39  ;;  %3127 = vmatprep.mubr.bf16.mxu1 %v9326_v39 }
 0x5d4   : > { %3057 = vmatpush1.bf16.msra.mxu0 %v9514_v58  ;;  %3098 = vmatpush1.bf16.msra.mxu1 %v9515_v61  ;;  %v9525_v58 = vld [vmem:[#allocation25_spill] sm:$0xff]  ;;  %v9526_v61 = vld [vmem:[#allocation26_spill] sm:$0xff] }
 0x5d5   : > { %3058 = vmatprep.subr.bf16.mxu0 %v9516_v31  ;;  %3099 = vmatprep.subr.bf16.mxu1 %v9517_v57  ;;  %v9527_v31 = vld [vmem:[#allocation27_spill] sm:$0xff]  ;;  %v9528_v57 = vld [vmem:[#allocation28_spill] sm:$0xff] }
 0x5d8   : > { %3059 = vmatpush1.bf16.msra.mxu0 %v9518_v7  ;;  %3100 = vmatpush1.bf16.msra.mxu1 %v9519_v37  ;;  %v9529_v7 = vld [vmem:[#allocation29_spill] sm:$0xff]  ;;  %v9530_v37 = vld [vmem:[#allocation30_spill] sm:$0xff] }
 0x5d9   : > { %3060 = vmatprep.subr.bf16.mxu0 %v9520_v46  ;;  %3101 = vmatprep.subr.bf16.mxu1 %v9521_v32  ;;  %v9531_v46 = vld [vmem:[#allocation31_spill] sm:$0xff]  ;;  %v9532_v32 = vld [vmem:[#allocation32_spill] sm:$0xff] }
 0x5dc   : > { %3061 = vmatpush1.bf16.msra.mxu0 %v9522_v62  ;;  %3102 = vmatpush1.bf16.msra.mxu1 %v9523_v44  ;;  %v9533_v62 = vld [vmem:[#allocation33_spill] sm:$0xff]  ;;  %v9534_v44 = vld [vmem:[#allocation34_spill] sm:$0xff] }
 0x5dd   : > { %3062 = vmatprep.subr.bf16.mxu0 %v9524_v43  ;;  %3103 = vmatprep.subr.bf16.mxu1 %v9525_v58  ;;  %v9535_v43 = vld [vmem:[#allocation35_spill] sm:$0xff]  ;;  %v9536_v58 = vld [vmem:[#allocation36_spill] sm:$0xff] }
 0x5e0   : > { %3063 = vmatpush1.bf16.msra.mxu0 %v9526_v61  ;;  %3104 = vmatpush1.bf16.msra.mxu1 %v9527_v31  ;;  %v9537_v61 = vld [vmem:[#allocation37_spill] sm:$0xff]  ;;  %v9538_v31 = vld [vmem:[#allocation38_spill] sm:$0xff] }
 0x5e1   : > { %3064 = vmatprep.subr.bf16.mxu0 %v9528_v57  ;;  %3105 = vmatprep.subr.bf16.mxu1 %v9529_v7  ;;  %v9539_v57 = vld [vmem:[#allocation39_spill] sm:$0xff]  ;;  %v9540_v7 = vld [vmem:[#allocation40_spill] sm:$0xff] }
 0x5e4   : > { %3065 = vmatpush1.bf16.msra.mxu0 %v9530_v37  ;;  %3106 = vmatpush1.bf16.msra.mxu1 %v9531_v46  ;;  %v9541_v37 = vld [vmem:[#allocation41_spill] sm:$0xff] }
 0x5e5   : > { %3066 = vmatprep.subr.bf16.mxu0 %v9532_v32  ;;  %3107 = vmatprep.subr.bf16.mxu1 %v9533_v62 }
 0x5e8   : > { %3067 = vmatpush1.bf16.msra.mxu0 %v9534_v44  ;;  %3108 = vmatpush1.bf16.msra.mxu1 %v9535_v43 }
 0x5e9   : > { %3068 = vmatprep.subr.bf16.mxu0 %v9536_v58  ;;  %3109 = vmatprep.subr.bf16.mxu1 %v9537_v61  ;;  %v3248_v61 = vsel %vm3247_vm10, 1, %v9326_v39 }
 0x5ea   : > { %3250 = vperm.xlu0 %5761, %v3248_v61  }
 0x5ec   : > { %3069 = vmatpush1.bf16.msra.mxu0 %v9538_v31  ;;  %3110 = vmatpush1.bf16.msra.mxu1 %v9539_v57 }
 0x5ed   : > { %3136 = vmatprep.subr.bf16.mxu0 %v9540_v7  ;;  %3177 = vmatprep.subr.bf16.mxu1 %v9541_v37 }
 0x662   : > { %v2769_v46 = vpop.f32.mrb[40].mxu0  ;;  %v2810_v32 = vpop.f32.mrb[72].mxu1 }
 0x663   : > { %v2771_v0 = vpop.f32.mrb[41].mxu0  ;;  %v2812_v62 = vpop.f32.mrb[73].mxu1 }
 0x664   : > { %v2773_v60 = vpop.f32.mrb[42].mxu0  ;;  %v2814_v44 = vpop.f32.mrb[74].mxu1 }
 0x665   : > { %v2774_v49 = vpop.f32.mrb[43].mxu0  ;;  %v2815_v43 = vpop.f32.mrb[75].mxu1 }
 0x682   : > { %v2851_v31 = vpop.f32.mrb[44].mxu0  ;;  %v2892_v58 = vpop.f32.mrb[76].mxu1 }
 0x683   : > { %v2852_v57 = vadd.f32 %v2851_v31, %v2769_v46  ;;  %v2893_v47 = vadd.f32 %v2892_v58, %v2810_v32  ;;  %v2853_v7 = vpop.f32.mrb[45].mxu0  ;;  %v2894_v50 = vpop.f32.mrb[77].mxu1  ;;  %v9543_v46 = vld [vmem:[#allocation107_spill] sm:$0xff] }
 0x684   : > { %v2854_v37 = vadd.f32 %v2853_v7, %v2771_v0  ;;  %v2895_v29 = vadd.f32 %v2894_v50, %v2812_v62  ;;  %v2855_v51 = vpop.f32.mrb[46].mxu0  ;;  %v2896_v45 = vpop.f32.mrb[78].mxu1 }
 0x685   : > { %v2899_v60 = vadd.f32 %v2852_v57, %v7637_v3  ;;  %v2856_v44 = vpop.f32.mrb[47].mxu0  ;;  %v2897_v49 = vpop.f32.mrb[79].mxu1  ;;  %v2901_v32 = vadd.f32 %v2893_v47, %v9543_v46 }
 0x686   : > { %v2900_v43 = vadd.f32 %v2854_v37, %v7640_v40  ;;  %v2902_v61 = vadd.f32 %v2895_v29, %v7645_v24  ;;  %v9544_v44 = vld [vmem:[#allocation82_spill] sm:$0xff] }
 0x687   : > { %v5518_v59 = vmul.f32 -1.442695, %v2899_v60  ;;  %v9545_v49 = vld [vmem:[#allocation98_spill] sm:$0xff] }
 0x688   : > { %v5519_v25 = vmul.f32 -1.442695, %v2900_v43  ;;  %v5520_v31 = vmul.f32 -1.442695, %v2902_v61 }
 0x689   : > { %6100 = vpow2.f32 %v5518_v59 }
 0x68a   : > { %6102 = vpow2.f32 %v5519_v25 }
 0x68b   : > { %6104 = vpow2.f32 %v5520_v31 }
 0x68c   : > { %6106 = vtanh.f32 %v2901_v32 }
 0x693   : > { %v6101_v58 = vpop.eup %6100 }
 0x694   : > { %v6103_v0 = vpop.eup %6102  ;;  %v2906_v50 = vadd.f32 1.0, %v6101_v58  ;;  %v9546_v58 = vld [vmem:[#allocation83_spill] sm:$0xff] }
 0x695   : > { %v2912_v45 = vadd.f32 1.0, %v6103_v0  ;;  %v6105_v51 = vpop.eup %6104 }
 0x696   : > { %6108 = vrcp.f32 %v2906_v50  ;;  %v6107_v62 = vpop.eup %6106  ;;  %v2919_v59 = vadd.f32 1.0, %v6105_v51  ;;  %v9547_v50 = vld [vmem:[#allocation99_spill] sm:$0xff] }
 0x697   : > { %6110 = vrcp.f32 %v2912_v45 }
 0x698   : > { %6112 = vrcp.f32 %v2919_v59  ;;  %v9548_v59 = vsel %vm8078_vm9, %v8082_v54, %v7810_v23  ;;  %v8313_v54 = vld [vmem:[#allocation9 + $0xa0] ss:$16 sps:$4 sm:$0xff]  }
 0x699   : > { %9560 = vst [vmem:[#allocation97_spill] sm:$0xff] %v8313_v54 }
 0x6a0   : > { %v6109_v57 = vpop.eup %6108 }
 0x6a1   : > { %v6111_v37 = vpop.eup %6110  ;;  %v2923_v7 = vmul.f32 %v6109_v57, %v6107_v62 }
 0x6a2   : > { %v2922_v25 = vmul.f32 %v6111_v37, %v8073_v55  ;;  %v2977_v29 = vpop.f32.mrb[48].mxu0  ;;  %v3018_v60 = vpop.f32.mrb[80].mxu1 }
 0x6a3   : > { %v3025_v47 = vadd.f32 %v2977_v29, %v9544_v44  ;;  %v3027_v43 = vadd.f32 %v3018_v60, %v9545_v49  ;;  %v2979_v61 = vpop.f32.mrb[49].mxu0  ;;  %v3020_v31 = vpop.f32.mrb[81].mxu1 }
 0x6a4   : > { %v8225_v32 = vadd.f32 %v2923_v7, %v2922_v25  ;;  %v3026_v0 = vadd.f32 %v2979_v61, %v9546_v58  ;;  %v3028_v45 = vadd.f32 %v3020_v31, %v9547_v50  ;;  %v2981_v46 = vpop.f32.mrb[50].mxu0  ;;  %v3022_v24 = vpop.f32.mrb[82].mxu1  ;;  %v9565_v31 = vld [vmem:[#allocation52_spill] sm:$0xff]  ;;  %v8325_v58 = vld [vmem:[#allocation9 + $0xe4] ss:$16 sps:$4 sm:$0xff]  }
 0x6a5   : > { %v5521_v51 = vmul.f32 -1.442695, %v3025_v47  ;;  %v2982_v62 = vpop.f32.mrb[51].mxu0  ;;  %v3023_v55 = vpop.f32.mrb[83].mxu1  ;;  %9566 = vst [vmem:[#allocation75_spill] sm:$0xff] %v8325_v58 }
 0x6a6   : > { %v5522_v57 = vmul.f32 -1.442695, %v3026_v0  ;;  %6114 = vtanh.f32 %v8225_v32  ;;  %v2932_v37 = vpop.permute.xlu1 %2931  ;;  %v5523_v29 = vmul.f32 -1.442695, %v3028_v45  ;;  %v6113_v60 = vpop.eup %6112  ;;  %v9567_v0 = vld [vmem:[#allocation53_spill] sm:$0xff]  ;;  %v9569_v45 = vld [vmem:[#allocation54_spill] sm:$0xff] }
 0x6a7   : > { %6116 = vpow2.f32 %v5521_v51  ;;  %vm2933_vm11 = vcmp.eq.s32.totalorder %v2932_v37, 1  ;;  %v8329_v50 = vld [vmem:[#allocation9 + $0xe0] ss:$16 sps:$4 sm:$0xff]   ;;  %v9571_v62 = vld [vmem:[#allocation56_spill] sm:$0xff] }
 0x6a8   : > { %6118 = vpow2.f32 %v5522_v57  ;;  %vm2934_vm12 = vmpackc.low %vm2933_vm11, %vm2933_vm11  ;;  %9568 = vst [vmem:[#allocation92_spill] sm:$0xff] %v8329_v50  ;;  %v9570_v51 = vld [vmem:[#allocation55_spill] sm:$0xff]  ;;  %v9572_v55 = vld [vmem:[#allocation57_spill] sm:$0xff] }
 0x6a9   : > { %6120 = vpow2.f32 %v5523_v29  ;;  %v9573_v57 = vld [vmem:[#allocation58_spill] sm:$0xff]  ;;  %v9574_v37 = vld [vmem:[#allocation59_spill] sm:$0xff]  ;;  %v9575_v29 = vld [vmem:[#allocation60_spill] sm:$0xff] }
 0x6aa   : > { %6122 = vtanh.f32 %v3027_v43  ;;  %v8321_v43 = vld [vmem:[#allocation9 + $0xc0] ss:$16 sps:$4 sm:$0xff]  }
 0x6ab   : > { %9564 = vst [vmem:[#allocation45_spill] sm:$0xff] %v8321_v43 }
 0x6b0   : > { %v6115_v7 = vpop.eup %6114 }
 0x6b1   : > { %v6117_v25 = vpop.eup %6116  ;;  %v2926_v44 = vmul.f32 %v6115_v7, %v6113_v60  ;;  %v9576_v60 = vld [vmem:[#allocation61_spill] sm:$0xff]  ;;  %v9577_v7 = vld [vmem:[#allocation62_spill] sm:$0xff] }
 0x6b2   : > { %v6119_v49 = vpop.eup %6118  ;;  %v3032_v61 = vadd.f32 1.0, %v6117_v25  ;;  %v9578_v25 = vld [vmem:[#allocation63_spill] sm:$0xff] }
 0x6b3   : > { %v3038_v24 = vadd.f32 1.0, %v6119_v49  ;;  %v2927_v46 = vpack.c.bf16 %v2926_v44, %v2926_v44  ;;  %v6121_v23 = vpop.eup %6120  ;;  %v9579_v44 = vld [vmem:[#allocation64_spill] sm:$0xff]  ;;  %v9580_v49 = vld [vmem:[#allocation65_spill] sm:$0xff] }
 0x6b4   : > { %6124 = vrcp.f32 %v3032_v61  ;;  %v9581_v61 = vld [vmem:[#allocation66_spill] sm:$0xff] }
 0x6b5   : > { %6126 = vrcp.f32 %v3038_v24  ;;  %v8235_v47 = vsel %vm2934_vm12, %v2927_v46, %v9548_v59  ;;  %3087 = vmatmul.mubr.bf16.vlgmr.msra.gmra.mrb[52].mxu0 %v2927_v46  ;;  %3128 = vmatmul.mubr.bf16.vlgmr.msra.gmra.mrb[84].mxu1 %v2927_v46  ;;  %v9582_v24 = vld [vmem:[#allocation67_spill] sm:$0xff]  ;;  %v9583_v46 = vld [vmem:[#allocation68_spill] sm:$0xff]  ;;  %v9584_v59 = vld [vmem:[#allocation69_spill] sm:$0xff] }
 0x6b6   : > { %3137 = vmatpush1.bf16.msra.mxu0 %v7812_v28  ;;  %3178 = vmatpush1.bf16.msra.mxu1 %v7815_v53  ;;  %v6123_v28 = vpop.eup %6122 }
 0x6b7   : > { %3138 = vmatprep.subr.bf16.mxu0 %v7818_v42  ;;  %3179 = vmatprep.subr.bf16.mxu1 %v7821_v41  ;;  %v3045_v41 = vadd.f32 1.0, %v6121_v23  ;;  %v9585_v23 = vld [vmem:[#allocation70_spill] sm:$0xff] }
 0x6b8   : > { %3168 = vmatprep.mubr.bf16.mxu0 %v9326_v39  ;;  %3209 = vmatprep.mubr.bf16.mxu1 %v9326_v39 }
 0x6b9   : > { %6128 = vrcp.f32 %v3045_v41  ;;  %v9590_v41 = vld [vmem:[#allocation28_spill] sm:$0xff] }
 0x6ba   : > { %3139 = vmatpush1.bf16.msra.mxu0 %v7826_v33  ;;  %3180 = vmatpush1.bf16.msra.mxu1 %v7829_v34 }
 0x6bb   : > { %3140 = vmatprep.subr.bf16.mxu0 %v7832_v48  ;;  %3181 = vmatprep.subr.bf16.mxu1 %v7835_v27 }
 0x6be   : > { %v6125_v26 = vpop.eup %6124  ;;  %3141 = vmatpush1.bf16.msra.mxu0 %v7838_v2  ;;  %3182 = vmatpush1.bf16.msra.mxu1 %v7841_v4 }
 0x6bf   : > { %v6127_v53 = vpop.eup %6126  ;;  %v3049_v42 = vmul.f32 %v6125_v26, %v6123_v28  ;;  %3142 = vmatprep.subr.bf16.mxu0 %v7844_v8  ;;  %3183 = vmatprep.subr.bf16.mxu1 %v7847_v9  ;;  %v8273_v8 = vld [vmem:[#allocation9 + $0x4] ss:$16 sps:$4 sm:$0xff]   ;;  %v8276_v9 = vld [vmem:[#allocation9 + $0xc] ss:$16 sps:$4 sm:$0xff]  }
 0x6c0   : > { %v3048_v33 = vmul.f32 %v6127_v53, %v8105_v56  ;;  %v9561_v56 = vld [vmem:[#allocation50_spill] sm:$0xff]  ;;  %v9586_v28 = vld [vmem:[#allocation71_spill] sm:$0xff]  ;;  %v9587_v26 = vld [vmem:[#allocation25_spill] sm:$0xff] }
 0x6c1   : > { %v9588_v53 = vld [vmem:[#allocation26_spill] sm:$0xff] }
 0x6c2   : > { %v8252_v34 = vadd.f32 %v3049_v42, %v3048_v33  ;;  %3143 = vmatpush1.bf16.msra.mxu0 %v7853_v11  ;;  %3184 = vmatpush1.bf16.msra.mxu1 %v7856_v12  ;;  %v8280_v11 = vld [vmem:[#allocation9 + $0x8] ss:$16 sps:$4 sm:$0xff]   ;;  %v8284_v12 = vld [vmem:[#allocation9 + $0x2c] ss:$16 sps:$4 sm:$0xff]   ;;  %v9589_v42 = vld [vmem:[#allocation27_spill] sm:$0xff] }
 0x6c3   : > { %3144 = vmatprep.subr.bf16.mxu0 %v7859_v13  ;;  %3185 = vmatprep.subr.bf16.mxu1 %v7862_v14  ;;  %v6129_v48 = vpop.eup %6128  ;;  %v8290_v13 = vld [vmem:[#allocation9 + $0x28] ss:$16 sps:$4 sm:$0xff]   ;;  %v8294_v14 = vld [vmem:[#allocation9 + $0x4c] ss:$16 sps:$4 sm:$0xff]   ;;  %v9591_v33 = vld [vmem:[#allocation29_spill] sm:$0xff] }
 0x6c4   : > { %6130 = vtanh.f32 %v8252_v34 }
 0x6c6   : > { %3145 = vmatpush1.bf16.msra.mxu0 %v7866_v52  ;;  %3186 = vmatpush1.bf16.msra.mxu1 %v7869_v15  ;;  %v9549_v52 = vld [vmem:[#allocation77_spill] sm:$0xff]  ;;  %v8298_v15 = vld [vmem:[#allocation9 + $0x48] ss:$16 sps:$4 sm:$0xff]  }
 0x6c7   : > { %3146 = vmatprep.subr.bf16.mxu0 %v7872_v16  ;;  %3187 = vmatprep.subr.bf16.mxu1 %v7875_v17  ;;  %v9550_v16 = vld [vmem:[#allocation94_spill] sm:$0xff] }
 0x6c8   : > { %v8302_v17 = vld [vmem:[#allocation9 + $0x6c] ss:$16 sps:$4 sm:$0xff]  }
 0x6c9   : > { %9551 = vst [vmem:[#allocation81_spill] sm:$0xff] %v8302_v17 }
 0x6ca   : > { %3147 = vmatpush1.bf16.msra.mxu0 %v7878_v18  ;;  %3188 = vmatpush1.bf16.msra.mxu1 %v7881_v19  ;;  %v9552_v18 = vld [vmem:[#allocation79_spill] sm:$0xff]  ;;  %v9553_v19 = vld [vmem:[#allocation46_spill] sm:$0xff] }
 0x6cb   : > { %3148 = vmatprep.subr.bf16.mxu0 %v9485_v10  ;;  %3189 = vmatprep.subr.bf16.mxu1 %v9486_v63  ;;  %v8317_v10 = vld [vmem:[#allocation9 + $0xc4] ss:$16 sps:$4 sm:$0xff]  }
 0x6cc   : > { %9562 = vst [vmem:[#allocation44_spill] sm:$0xff] %v8317_v10  ;;  %v9563_v63 = vld [vmem:[#allocation51_spill] sm:$0xff] }
 0x6ce   : > { %v6131_v27 = vpop.eup %6130  ;;  %3149 = vmatpush1.bf16.msra.mxu0 %v7890_v30  ;;  %3190 = vmatpush1.bf16.msra.mxu1 %v7893_v1  ;;  %v9556_v30 = vld [vmem:[#allocation80_spill] sm:$0xff] }
 0x6cf   : > { %3150 = vmatprep.subr.bf16.mxu0 %v7896_v5  ;;  %3191 = vmatprep.subr.bf16.mxu1 %v7899_v6  ;;  %v3052_v2 = vmul.f32 %v6131_v27, %v6129_v48  ;;  %v9557_v1 = vld [vmem:[#allocation48_spill] sm:$0xff]  ;;  %v9559_v6 = vld [vmem:[#allocation49_spill] sm:$0xff]  ;;  %v9592_v48 = vld [vmem:[#allocation30_spill] sm:$0xff] }
 0x6d0   : > { %v9558_v5 = vld [vmem:[#allocation96_spill] sm:$0xff]  ;;  %v9593_v27 = vld [vmem:[#allocation31_spill] sm:$0xff] }
 0x6d1   : > { %v3053_v4 = vpack.c.bf16 %v3052_v2, %v3052_v2  ;;  %v9594_v2 = vld [vmem:[#allocation32_spill] sm:$0xff] }
 0x6d2   : > { %3151 = vmatpush1.bf16.msra.mxu0 %v7902_v21  ;;  %3192 = vmatpush1.bf16.msra.mxu1 %v7905_v20  ;;  %v9554_v20 = vld [vmem:[#allocation95_spill] sm:$0xff] }
 0x6d3   : > { %3262 = vmatprep.subr.bf16.mxu0 %v8273_v8  ;;  %3303 = vmatprep.subr.bf16.mxu1 %v8276_v9  ;;  %v9555_v21 = vld [vmem:[#allocation47_spill] sm:$0xff] }
 0x6d5   : > { %3169 = vmatmul.mubr.bf16.vlgmr.msra.gmra.mrb[56].mxu0 %v3053_v4  ;;  %3210 = vmatmul.mubr.bf16.vlgmr.msra.gmra.mrb[88].mxu1 %v3053_v4 }
 0x6d6   : > { %3263 = vmatpush1.bf16.msra.mxu0 %v8128_v22  ;;  %3304 = vmatpush1.bf16.msra.mxu1 %v8280_v11 }
 0x6d7   : > { %3264 = vmatprep.subr.bf16.mxu0 %v8132_v35  ;;  %3305 = vmatprep.subr.bf16.mxu1 %v8284_v12 }
 0x6d8   : > { %3294 = vmatprep.mubr.bf16.mxu0 %v9326_v39  ;;  %3335 = vmatprep.mubr.bf16.mxu1 %v9326_v39 }
 0x6da   : > { %3265 = vmatpush1.bf16.msra.mxu0 %v8138_v38  ;;  %3306 = vmatpush1.bf16.msra.mxu1 %v8290_v13 }
 0x6db   : > { %3266 = vmatprep.subr.bf16.mxu0 %v8142_v36  ;;  %3307 = vmatprep.subr.bf16.mxu1 %v8294_v14 }
 0x6de   : > { %3267 = vmatpush1.bf16.msra.mxu0 %v9549_v52  ;;  %3308 = vmatpush1.bf16.msra.mxu1 %v8298_v15 }
 0x6df   : > { %3268 = vmatprep.subr.bf16.mxu0 %v9550_v16  ;;  %3309 = vmatprep.subr.bf16.mxu1 %v8302_v17 }
 0x6e2   : > { %3269 = vmatpush1.bf16.msra.mxu0 %v9552_v18  ;;  %3310 = vmatpush1.bf16.msra.mxu1 %v9553_v19  ;;  %v9596_v19 = vld [vmem:[#allocation34_spill] sm:$0xff] }
 0x6e3   : > { %3270 = vmatprep.subr.bf16.mxu0 %v9554_v20  ;;  %3311 = vmatprep.subr.bf16.mxu1 %v9555_v21  ;;  %v9597_v21 = vld [vmem:[#allocation35_spill] sm:$0xff] }
 0x6e6   : > { %3271 = vmatpush1.bf16.msra.mxu0 %v9556_v30  ;;  %3312 = vmatpush1.bf16.msra.mxu1 %v9557_v1  ;;  %v9598_v1 = vld [vmem:[#allocation36_spill] sm:$0xff] }
 0x6e7   : > { %3272 = vmatprep.subr.bf16.mxu0 %v9558_v5  ;;  %3313 = vmatprep.subr.bf16.mxu1 %v9559_v6  ;;  %v9599_v6 = vld [vmem:[#allocation37_spill] sm:$0xff] }
 0x6ea   : > { %3273 = vmatpush1.bf16.msra.mxu0 %v8313_v54  ;;  %3314 = vmatpush1.bf16.msra.mxu1 %v9561_v56  ;;  %v9600_v56 = vld [vmem:[#allocation38_spill] sm:$0xff] }
 0x6eb   : > { %3274 = vmatprep.subr.bf16.mxu0 %v8317_v10  ;;  %3315 = vmatprep.subr.bf16.mxu1 %v9563_v63  ;;  %v9601_v63 = vld [vmem:[#allocation39_spill] sm:$0xff] }
 0x6ee   : > { %3275 = vmatpush1.bf16.msra.mxu0 %v8321_v43  ;;  %3316 = vmatpush1.bf16.msra.mxu1 %v9565_v31  ;;  %v9602_v31 = vld [vmem:[#allocation40_spill] sm:$0xff] }
 0x6ef   : > { %3276 = vmatprep.subr.bf16.mxu0 %v8325_v58  ;;  %3317 = vmatprep.subr.bf16.mxu1 %v9567_v0  ;;  %v9603_v0 = vld [vmem:[#allocation41_spill] sm:$0xff] }
 0x6f2   : > { %3277 = vmatpush1.bf16.msra.mxu0 %v8329_v50  ;;  %3318 = vmatpush1.bf16.msra.mxu1 %v9569_v45 }
 0x6f3   : > { %3373 = vmatprep.subr.bf16.mxu0 %v9570_v51  ;;  %3414 = vmatprep.subr.bf16.mxu1 %v9571_v62 }
 0x6f5   : > { %3295 = vmatmul.mubr.bf16.vlgmr.msra.gmra.mrb[60].mxu0 %v3053_v4  ;;  %3336 = vmatmul.mubr.bf16.vlgmr.msra.gmra.mrb[92].mxu1 %v3053_v4  ;;  %v9595_v4 = vld [vmem:[#allocation33_spill] sm:$0xff] }
 0x6f6   : > { %3374 = vmatpush1.bf16.msra.mxu0 %v9572_v55  ;;  %3415 = vmatpush1.bf16.msra.mxu1 %v9573_v57 }
 0x6f7   : > { %3375 = vmatprep.subr.bf16.mxu0 %v9574_v37  ;;  %3416 = vmatprep.subr.bf16.mxu1 %v9575_v29 }
 0x6f8   : > { %3405 = vmatprep.mubr.bf16.mxu0 %v9326_v39  ;;  %3446 = vmatprep.mubr.bf16.mxu1 %v9326_v39 }
 0x6fa   : > { %3376 = vmatpush1.bf16.msra.mxu0 %v9576_v60  ;;  %3417 = vmatpush1.bf16.msra.mxu1 %v9577_v7  ;;  %v9604_v7 = vld [vmem:[#allocation78_spill] sm:$0xff] }
 0x6fb   : > { %3377 = vmatprep.subr.bf16.mxu0 %v9578_v25  ;;  %3418 = vmatprep.subr.bf16.mxu1 %v9579_v44  ;;  %vm3566_vm13 = vcmp.eq.s32.totalorder %v9604_v7, 5  ;;  %vm3885_vm0 = vcmp.eq.s32.totalorder %v9604_v7, 6 }
 0x6fc   : > { %v3567_v25 = vsel %vm3566_vm13, 1, %v9326_v39 }
 0x6fd   : > { %3569 = vperm.xlu1 %5762, %v3567_v25  }
 0x6fe   : > { %3378 = vmatpush1.bf16.msra.mxu0 %v9580_v49  ;;  %3419 = vmatpush1.bf16.msra.mxu1 %v9581_v61 }
 0x6ff   : > { %3379 = vmatprep.subr.bf16.mxu0 %v9582_v24  ;;  %3420 = vmatprep.subr.bf16.mxu1 %v9583_v46 }
 0x702   : > { %3380 = vmatpush1.bf16.msra.mxu0 %v9584_v59  ;;  %3421 = vmatpush1.bf16.msra.mxu1 %v9585_v23 }
 0x703   : > { %3381 = vmatprep.subr.bf16.mxu0 %v9586_v28  ;;  %3422 = vmatprep.subr.bf16.mxu1 %v9587_v26 }
 0x706   : > { %3382 = vmatpush1.bf16.msra.mxu0 %v9588_v53  ;;  %3423 = vmatpush1.bf16.msra.mxu1 %v9589_v42 }
 0x707   : > { %3383 = vmatprep.subr.bf16.mxu0 %v9590_v41  ;;  %3424 = vmatprep.subr.bf16.mxu1 %v9591_v33 }
 0x70a   : > { %3384 = vmatpush1.bf16.msra.mxu0 %v9592_v48  ;;  %3425 = vmatpush1.bf16.msra.mxu1 %v9593_v27 }
 0x70b   : > { %3385 = vmatprep.subr.bf16.mxu0 %v9594_v2  ;;  %3426 = vmatprep.subr.bf16.mxu1 %v9595_v4  ;;  %v9605_v4 = vld [vmem:[#allocation106_spill] sm:$0xff] }
 0x70e   : > { %3386 = vmatpush1.bf16.msra.mxu0 %v9596_v19  ;;  %3427 = vmatpush1.bf16.msra.mxu1 %v9597_v21 }
 0x70f   : > { %3387 = vmatprep.subr.bf16.mxu0 %v9598_v1  ;;  %3428 = vmatprep.subr.bf16.mxu1 %v9599_v6  ;;  %v9606_v1 = vld [vmem:[#allocation107_spill] sm:$0xff] }
 0x712   : > { %3388 = vmatpush1.bf16.msra.mxu0 %v9600_v56  ;;  %3429 = vmatpush1.bf16.msra.mxu1 %v9601_v63 }
 0x713   : > { %3455 = vmatprep.subr.bf16.mxu0 %v9602_v31  ;;  %3496 = vmatprep.subr.bf16.mxu1 %v9603_v0 }
 0x788   : > { %v3088_v45 = vpop.f32.mrb[52].mxu0  ;;  %v3129_v51 = vpop.f32.mrb[84].mxu1 }
 0x789   : > { %v3090_v62 = vpop.f32.mrb[53].mxu0  ;;  %v3131_v55 = vpop.f32.mrb[85].mxu1 }
 0x78a   : > { %v3092_v57 = vpop.f32.mrb[54].mxu0  ;;  %v3133_v37 = vpop.f32.mrb[86].mxu1 }
 0x78b   : > { %v3093_v29 = vpop.f32.mrb[55].mxu0  ;;  %v3134_v60 = vpop.f32.mrb[87].mxu1 }
 0x7a8   : > { %v3170_v44 = vpop.f32.mrb[56].mxu0  ;;  %v3211_v49 = vpop.f32.mrb[88].mxu1 }
 0x7a9   : > { %v3171_v61 = vadd.f32 %v3170_v44, %v3088_v45  ;;  %v3212_v24 = vadd.f32 %v3211_v49, %v3129_v51  ;;  %v3172_v46 = vpop.f32.mrb[57].mxu0  ;;  %v3213_v59 = vpop.f32.mrb[89].mxu1  ;;  %v9607_v44 = vld [vmem:[#allocation84_spill] sm:$0xff] }
 0x7aa   : > { %v3173_v23 = vadd.f32 %v3172_v46, %v3090_v62  ;;  %v3214_v28 = vadd.f32 %v3213_v59, %v3131_v55  ;;  %v3174_v26 = vpop.f32.mrb[58].mxu0  ;;  %v3215_v53 = vpop.f32.mrb[90].mxu1 }
 0x7ab   : > { %v3218_v42 = vadd.f32 %v3171_v61, %v7637_v3  ;;  %v3175_v41 = vpop.f32.mrb[59].mxu0  ;;  %v3216_v33 = vpop.f32.mrb[91].mxu1  ;;  %v3220_v6 = vadd.f32 %v3212_v24, %v9606_v1  ;;  %v9608_v61 = vld [vmem:[#allocation100_spill] sm:$0xff]  ;;  %v9610_v53 = vld [vmem:[#allocation101_spill] sm:$0xff] }
 0x7ac   : > { %v3219_v48 = vadd.f32 %v3173_v23, %v7640_v40  ;;  %v3221_v19 = vadd.f32 %v3214_v28, %v9605_v4  ;;  %v9609_v28 = vld [vmem:[#allocation85_spill] sm:$0xff] }
 0x7ad   : > { %v5524_v27 = vmul.f32 -1.442695, %v3218_v42 }
 0x7ae   : > { %v5525_v2 = vmul.f32 -1.442695, %v3219_v48  ;;  %v5526_v21 = vmul.f32 -1.442695, %v3221_v19  ;;  %v3251_v19 = vpop.permute.xlu0 %3250 }
 0x7af   : > { %6132 = vpow2.f32 %v5524_v27  ;;  %vm3252_vm14 = vcmp.eq.s32.totalorder %v3251_v19, 1  ;;  %v8436_v19 = vld [vmem:[#allocation10 + $0x60] ss:$16 sps:$4 sm:$0xff]  }
 0x7b0   : > { %6134 = vpow2.f32 %v5525_v2  ;;  %vm8383_vm15 = vmpackc.low %vm3252_vm14, %vm3252_vm14 }
 0x7b1   : > { %6136 = vpow2.f32 %v5526_v21 }
 0x7b2   : > { %6138 = vtanh.f32 %v3220_v6 }
 0x7b9   : > { %v6133_v56 = vpop.eup %6132 }
 0x7ba   : > { %v6135_v63 = vpop.eup %6134  ;;  %v3225_v31 = vadd.f32 1.0, %v6133_v56 }
 0x7bb   : > { %v3231_v0 = vadd.f32 1.0, %v6135_v63  ;;  %v6137_v45 = vpop.eup %6136 }
 0x7bc   : > { %6140 = vrcp.f32 %v3225_v31  ;;  %v6139_v51 = vpop.eup %6138  ;;  %v3238_v37 = vadd.f32 1.0, %v6137_v45 }
 0x7bd   : > { %6142 = vrcp.f32 %v3231_v0 }
 0x7be   : > { %6144 = vrcp.f32 %v3238_v37  ;;  %v8395_v37 = vld [vmem:[#allocation10] ss:$16 sps:$4 sm:$0xff]  }
 0x7c6   : > { %v6141_v62 = vpop.eup %6140 }
 0x7c7   : > { %v6143_v55 = vpop.eup %6142  ;;  %v3242_v57 = vmul.f32 %v6141_v62, %v6139_v51 }
 0x7c8   : > { %v3241_v29 = vmul.f32 %v6143_v55, %v8225_v32  ;;  %v3296_v60 = vpop.f32.mrb[60].mxu0  ;;  %v3337_v25 = vpop.f32.mrb[92].mxu1 }
 0x7c9   : > { %v3344_v49 = vadd.f32 %v3296_v60, %v9607_v44  ;;  %v3346_v24 = vadd.f32 %v3337_v25, %v9608_v61  ;;  %v3298_v46 = vpop.f32.mrb[61].mxu0  ;;  %v3339_v59 = vpop.f32.mrb[93].mxu1  ;;  %v8401_v60 = vld [vmem:[#allocation10 + $0x24] ss:$16 sps:$4 sm:$0xff]   ;;  %v8404_v25 = vld [vmem:[#allocation10 + $0x2c] ss:$16 sps:$4 sm:$0xff]  }
 0x7ca   : > { %v8378_v23 = vadd.f32 %v3242_v57, %v3241_v29  ;;  %v3345_v26 = vadd.f32 %v3298_v46, %v9609_v28  ;;  %v3347_v42 = vadd.f32 %v3339_v59, %v9610_v53  ;;  %v3300_v41 = vpop.f32.mrb[62].mxu0  ;;  %v3341_v33 = vpop.f32.mrb[94].mxu1  ;;  %v8398_v29 = vld [vmem:[#allocation10 + $0x8] ss:$16 sps:$4 sm:$0xff]   ;;  %v8409_v44 = vld [vmem:[#allocation10 + $0x20] ss:$16 sps:$4 sm:$0xff]  }
 0x7cb   : > { %v5527_v48 = vmul.f32 -1.442695, %v3344_v49  ;;  %v3301_v27 = vpop.f32.mrb[63].mxu0  ;;  %v3342_v32 = vpop.f32.mrb[95].mxu1  ;;  %v8412_v49 = vld [vmem:[#allocation10 + $0x28] ss:$16 sps:$4 sm:$0xff]  }
 0x7cc   : > { %v5528_v2 = vmul.f32 -1.442695, %v3345_v26  ;;  %6146 = vtanh.f32 %v8378_v23  ;;  %v5529_v21 = vmul.f32 -1.442695, %v3347_v42  ;;  %v6145_v6 = vpop.eup %6144  ;;  %v8415_v61 = vld [vmem:[#allocation10 + $0x44] ss:$16 sps:$4 sm:$0xff]  }
 0x7cd   : > { %6148 = vpow2.f32 %v5527_v48  ;;  %v8421_v26 = vld [vmem:[#allocation10 + $0x40] ss:$16 sps:$4 sm:$0xff]   ;;  %v8424_v53 = vld [vmem:[#allocation10 + $0x48] ss:$16 sps:$4 sm:$0xff]   ;;  %v8427_v48 = vld [vmem:[#allocation10 + $0x64] ss:$16 sps:$4 sm:$0xff]  }
 0x7ce   : > { %6150 = vpow2.f32 %v5528_v2  ;;  %v8430_v27 = vld [vmem:[#allocation10 + $0x6c] ss:$16 sps:$4 sm:$0xff]  }
 0x7cf   : > { %6152 = vpow2.f32 %v5529_v21  ;;  %v8439_v21 = vld [vmem:[#allocation10 + $0x68] ss:$16 sps:$4 sm:$0xff]   ;;  %v8482_v57 = vld [vmem:[#allocation10 + $0xec] ss:$16 sps:$4 sm:$0xff]  }
 0x7d0   : > { %6154 = vtanh.f32 %v3346_v24  ;;  %v8418_v24 = vld [vmem:[#allocation10 + $0x4c] ss:$16 sps:$4 sm:$0xff]  }
 0x7d6   : > { %v6147_v56 = vpop.eup %6146 }
 0x7d7   : > { %v6149_v63 = vpop.eup %6148  ;;  %v3245_v31 = vmul.f32 %v6147_v56, %v6145_v6  ;;  %v8442_v6 = vld [vmem:[#allocation10 + $0x84] ss:$16 sps:$4 sm:$0xff]   ;;  %v8445_v56 = vld [vmem:[#allocation10 + $0x8c] ss:$16 sps:$4 sm:$0xff]  }
 0x7d8   : > { %v6151_v0 = vpop.eup %6150  ;;  %v3351_v45 = vadd.f32 1.0, %v6149_v63  ;;  %v8452_v63 = vld [vmem:[#allocation10 + $0x88] ss:$16 sps:$4 sm:$0xff]  }
 0x7d9   : > { %v3357_v62 = vadd.f32 1.0, %v6151_v0  ;;  %v8387_v55 = vpack.c.bf16 %v3245_v31, %v3245_v31  ;;  %v6153_v46 = vpop.eup %6152  ;;  %v8455_v31 = vld [vmem:[#allocation10 + $0xa4] ss:$16 sps:$4 sm:$0xff]   ;;  %v8458_v0 = vld [vmem:[#allocation10 + $0xac] ss:$16 sps:$4 sm:$0xff]  }
 0x7da   : > { %6156 = vrcp.f32 %v3351_v45  ;;  %v6155_v59 = vpop.eup %6154  ;;  %v3364_v33 = vadd.f32 1.0, %v6153_v46  ;;  %v8461_v45 = vld [vmem:[#allocation10 + $0xa0] ss:$16 sps:$4 sm:$0xff]   ;;  %v8467_v46 = vld [vmem:[#allocation10 + $0xc4] ss:$16 sps:$4 sm:$0xff]  }
 0x7db   : > { %6158 = vrcp.f32 %v3357_v62  ;;  %3406 = vmatmul.mubr.bf16.vlgmr.msra.gmra.mrb[64].mxu0 %v8387_v55  ;;  %3447 = vmatmul.mubr.bf16.vlgmr.msra.gmra.mrb[96].mxu1 %v8387_v55  ;;  %9613 = vst [vmem:[#allocation76_spill] sm:$0xff] %v8461_v45  ;;  %v8464_v62 = vld [vmem:[#allocation10 + $0xa8] ss:$16 sps:$4 sm:$0xff]   ;;  %9615 = vst [vmem:[#allocation42_spill] sm:$0xff] %v8467_v46 }
 0x7dc   : > { %3456 = vmatpush1.bf16.msra.mxu0 %v8395_v37  ;;  %3497 = vmatpush1.bf16.msra.mxu1 %v8398_v29  ;;  %6160 = vrcp.f32 %v3364_v33  ;;  %9614 = vst [vmem:[#allocation93_spill] sm:$0xff] %v8464_v62  ;;  %v8476_v33 = vld [vmem:[#allocation10 + $0xc8] ss:$16 sps:$4 sm:$0xff]  }
 0x7dd   : > { %3457 = vmatprep.subr.bf16.mxu0 %v8401_v60  ;;  %3498 = vmatprep.subr.bf16.mxu1 %v8404_v25 }
 0x7de   : > { %3487 = vmatprep.mubr.bf16.mxu0 %v9326_v39  ;;  %3528 = vmatprep.mubr.bf16.mxu1 %v9326_v39 }
 0x7e0   : > { %3458 = vmatpush1.bf16.msra.mxu0 %v8409_v44  ;;  %3499 = vmatpush1.bf16.msra.mxu1 %v8412_v49 }
 0x7e1   : > { %3459 = vmatprep.subr.bf16.mxu0 %v8415_v61  ;;  %3500 = vmatprep.subr.bf16.mxu1 %v8418_v24 }
 0x7e4   : > { %v6157_v28 = vpop.eup %6156  ;;  %3460 = vmatpush1.bf16.msra.mxu0 %v8421_v26  ;;  %3501 = vmatpush1.bf16.msra.mxu1 %v8424_v53 }
 0x7e5   : > { %v6159_v42 = vpop.eup %6158  ;;  %v3368_v41 = vmul.f32 %v6157_v28, %v6155_v59  ;;  %3461 = vmatprep.subr.bf16.mxu0 %v8427_v48  ;;  %3502 = vmatprep.subr.bf16.mxu1 %v8430_v27  ;;  %v8470_v59 = vld [vmem:[#allocation10 + $0xcc] ss:$16 sps:$4 sm:$0xff]  }
 0x7e6   : > { %v3367_v32 = vmul.f32 %v6159_v42, %v8252_v34  ;;  %v8449_v34 = vld [vmem:[#allocation10 + $0x80] ss:$16 sps:$4 sm:$0xff]   ;;  %9616 = vst [vmem:[#allocation43_spill] sm:$0xff] %v8470_v59  ;;  %v6161_v28 = vpop.eup %6160 }
 0x7e8   : > { %v8434_v2 = vadd.f32 %v3368_v41, %v3367_v32  ;;  %3462 = vmatpush1.bf16.msra.mxu0 %v8436_v19  ;;  %3503 = vmatpush1.bf16.msra.mxu1 %v8439_v21  ;;  %v8473_v41 = vld [vmem:[#allocation10 + $0xc0] ss:$16 sps:$4 sm:$0xff]   ;;  %v8479_v32 = vld [vmem:[#allocation10 + $0xe4] ss:$16 sps:$4 sm:$0xff]  }
 0x7e9   : > { %3463 = vmatprep.subr.bf16.mxu0 %v8442_v6  ;;  %3504 = vmatprep.subr.bf16.mxu1 %v8445_v56 }
 0x7ea   : > { %6162 = vtanh.f32 %v8434_v2 }
 0x7ec   : > { %3464 = vmatpush1.bf16.msra.mxu0 %v8449_v34  ;;  %3505 = vmatpush1.bf16.msra.mxu1 %v8452_v63 }
 0x7ed   : > { %3465 = vmatprep.subr.bf16.mxu0 %v8455_v31  ;;  %3506 = vmatprep.subr.bf16.mxu1 %v8458_v0 }
 0x7f0   : > { %3466 = vmatpush1.bf16.msra.mxu0 %v8461_v45  ;;  %3507 = vmatpush1.bf16.msra.mxu1 %v8464_v62  ;;  %v8485_v62 = vld [vmem:[#allocation10 + $0xe0] ss:$16 sps:$4 sm:$0xff]   ;;  %v8488_v45 = vld [vmem:[#allocation10 + $0xe8] ss:$16 sps:$4 sm:$0xff]  }
 0x7f1   : > { %3467 = vmatprep.subr.bf16.mxu0 %v8467_v46  ;;  %3508 = vmatprep.subr.bf16.mxu1 %v8470_v59 }
 0x7f4   : > { %v6163_v42 = vpop.eup %6162  ;;  %3468 = vmatpush1.bf16.msra.mxu0 %v8473_v41  ;;  %3509 = vmatpush1.bf16.msra.mxu1 %v8476_v33 }
 0x7f5   : > { %3469 = vmatprep.subr.bf16.mxu0 %v8479_v32  ;;  %3510 = vmatprep.subr.bf16.mxu1 %v8482_v57  ;;  %v3371_v46 = vmul.f32 %v6163_v42, %v6161_v28  ;;  %v8549_v28 = vld [vmem:[#allocation12] ss:$16 sps:$4 sm:$0xff]   ;;  %v8552_v42 = vld [vmem:[#allocation12 + $0x8] ss:$16 sps:$4 sm:$0xff]  }
 0x7f6   : > { %9628 = vst [vmem:[#allocation48_spill] sm:$0xff] %v8549_v28  ;;  %9629 = vst [vmem:[#allocation96_spill] sm:$0xff] %v8552_v42 }
 0x7f7   : > { %v3372_v59 = vpack.c.bf16 %v3371_v46, %v3371_v46  ;;  %v8546_v46 = vld [vmem:[#allocation12 + $0xc] ss:$16 sps:$4 sm:$0xff]  }
 0x7f8   : > { %3470 = vmatpush1.bf16.msra.mxu0 %v8485_v62  ;;  %3511 = vmatpush1.bf16.msra.mxu1 %v8488_v45  ;;  %9627 = vst [vmem:[#allocation80_spill] sm:$0xff] %v8546_v46 }
 0x7f9   : > { %3581 = vmatprep.subr.bf16.mxu0 %v8273_v8  ;;  %3622 = vmatprep.subr.bf16.mxu1 %v8276_v9 }
 0x7fb   : > { %3488 = vmatmul.mubr.bf16.vlgmr.msra.gmra.mrb[68].mxu0 %v3372_v59  ;;  %3529 = vmatmul.mubr.bf16.vlgmr.msra.gmra.mrb[100].mxu1 %v3372_v59 }
 0x7fc   : > { %3582 = vmatpush1.bf16.msra.mxu0 %v8128_v22  ;;  %3623 = vmatpush1.bf16.msra.mxu1 %v8280_v11  ;;  %v8508_v22 = vld [vmem:[#allocation9 + $0x68] ss:$16 sps:$4 sm:$0xff]  }
 0x7fd   : > { %3583 = vmatprep.subr.bf16.mxu0 %v8132_v35  ;;  %3624 = vmatprep.subr.bf16.mxu1 %v8284_v12  ;;  %9617 = vst [vmem:[#allocation82_spill] sm:$0xff] %v8508_v22  ;;  %v8512_v35 = vld [vmem:[#allocation9 + $0x8c] ss:$16 sps:$4 sm:$0xff]  }
 0x7fe   : > { %3613 = vmatprep.mubr.bf16.mxu0 %v9326_v39  ;;  %3654 = vmatprep.mubr.bf16.mxu1 %v9326_v39  ;;  %9618 = vst [vmem:[#allocation98_spill] sm:$0xff] %v8512_v35 }
 0x800   : > { %3584 = vmatpush1.bf16.msra.mxu0 %v8138_v38  ;;  %3625 = vmatpush1.bf16.msra.mxu1 %v8290_v13  ;;  %v8516_v38 = vld [vmem:[#allocation9 + $0x88] ss:$16 sps:$4 sm:$0xff]  }
 0x801   : > { %3585 = vmatprep.subr.bf16.mxu0 %v8142_v36  ;;  %3626 = vmatprep.subr.bf16.mxu1 %v8294_v14  ;;  %9619 = vst [vmem:[#allocation83_spill] sm:$0xff] %v8516_v38  ;;  %v8520_v36 = vld [vmem:[#allocation9 + $0xac] ss:$16 sps:$4 sm:$0xff]  }
 0x802   : > { %9620 = vst [vmem:[#allocation99_spill] sm:$0xff] %v8520_v36 }
 0x804   : > { %3586 = vmatpush1.bf16.msra.mxu0 %v9549_v52  ;;  %3627 = vmatpush1.bf16.msra.mxu1 %v8298_v15  ;;  %v8524_v52 = vld [vmem:[#allocation9 + $0xa8] ss:$16 sps:$4 sm:$0xff]  }
 0x805   : > { %3587 = vmatprep.subr.bf16.mxu0 %v9550_v16  ;;  %3628 = vmatprep.subr.bf16.mxu1 %v8302_v17  ;;  %9621 = vst [vmem:[#allocation77_spill] sm:$0xff] %v8524_v52  ;;  %v8528_v16 = vld [vmem:[#allocation9 + $0xcc] ss:$16 sps:$4 sm:$0xff]  }
 0x806   : > { %9622 = vst [vmem:[#allocation94_spill] sm:$0xff] %v8528_v16 }
 0x808   : > { %3588 = vmatpush1.bf16.msra.mxu0 %v9552_v18  ;;  %3629 = vmatpush1.bf16.msra.mxu1 %v8508_v22  ;;  %v8532_v18 = vld [vmem:[#allocation9 + $0xc8] ss:$16 sps:$4 sm:$0xff]  }
 0x809   : > { %3589 = vmatprep.subr.bf16.mxu0 %v9554_v20  ;;  %3630 = vmatprep.subr.bf16.mxu1 %v8512_v35  ;;  %9623 = vst [vmem:[#allocation79_spill] sm:$0xff] %v8532_v18  ;;  %v8536_v20 = vld [vmem:[#allocation9 + $0xec] ss:$16 sps:$4 sm:$0xff]  }
 0x80a   : > { %9624 = vst [vmem:[#allocation46_spill] sm:$0xff] %v8536_v20 }
 0x80c   : > { %3590 = vmatpush1.bf16.msra.mxu0 %v9556_v30  ;;  %3631 = vmatpush1.bf16.msra.mxu1 %v8516_v38  ;;  %v8540_v30 = vld [vmem:[#allocation9 + $0xe8] ss:$16 sps:$4 sm:$0xff]  }
 0x80d   : > { %3591 = vmatprep.subr.bf16.mxu0 %v9558_v5  ;;  %3632 = vmatprep.subr.bf16.mxu1 %v8520_v36  ;;  %9625 = vst [vmem:[#allocation95_spill] sm:$0xff] %v8540_v30  ;;  %v8543_v5 = vld [vmem:[#allocation12 + $0x4] ss:$16 sps:$4 sm:$0xff]  }
 0x80e   : > { %9626 = vst [vmem:[#allocation47_spill] sm:$0xff] %v8543_v5 }
 0x810   : > { %3592 = vmatpush1.bf16.msra.mxu0 %v8313_v54  ;;  %3633 = vmatpush1.bf16.msra.mxu1 %v8524_v52 }
 0x811   : > { %3593 = vmatprep.subr.bf16.mxu0 %v8317_v10  ;;  %3634 = vmatprep.subr.bf16.mxu1 %v8528_v16 }
 0x814   : > { %3594 = vmatpush1.bf16.msra.mxu0 %v8321_v43  ;;  %3635 = vmatpush1.bf16.msra.mxu1 %v8532_v18 }
 0x815   : > { %3595 = vmatprep.subr.bf16.mxu0 %v8325_v58  ;;  %3636 = vmatprep.subr.bf16.mxu1 %v8536_v20 }
 0x818   : > { %3596 = vmatpush1.bf16.msra.mxu0 %v8329_v50  ;;  %3637 = vmatpush1.bf16.msra.mxu1 %v8540_v30  ;;  %v8555_v50 = vld [vmem:[#allocation12 + $0x24] ss:$16 sps:$4 sm:$0xff]   ;;  %v8558_v30 = vld [vmem:[#allocation12 + $0x2c] ss:$16 sps:$4 sm:$0xff]  }
 0x819   : > { %3692 = vmatprep.subr.bf16.mxu0 %v8543_v5  ;;  %3733 = vmatprep.subr.bf16.mxu1 %v8546_v46  ;;  %9630 = vst [vmem:[#allocation49_spill] sm:$0xff] %v8555_v50  ;;  %9631 = vst [vmem:[#allocation50_spill] sm:$0xff] %v8558_v30  ;;  %v8578_v46 = vld [vmem:[#allocation12 + $0x48] ss:$16 sps:$4 sm:$0xff]  }
 0x81a   : > { %9637 = vst [vmem:[#allocation56_spill] sm:$0xff] %v8578_v46 }
 0x81b   : > { %3614 = vmatmul.mubr.bf16.vlgmr.msra.gmra.mrb[72].mxu0 %v3372_v59  ;;  %3655 = vmatmul.mubr.bf16.vlgmr.msra.gmra.mrb[104].mxu1 %v3372_v59  ;;  %v8563_v59 = vld [vmem:[#allocation12 + $0x20] ss:$16 sps:$4 sm:$0xff]  }
 0x81c   : > { %3693 = vmatpush1.bf16.msra.mxu0 %v8549_v28  ;;  %3734 = vmatpush1.bf16.msra.mxu1 %v8552_v42  ;;  %9632 = vst [vmem:[#allocation51_spill] sm:$0xff] %v8563_v59  ;;  %v8566_v28 = vld [vmem:[#allocation12 + $0x28] ss:$16 sps:$4 sm:$0xff]   ;;  %v8569_v42 = vld [vmem:[#allocation12 + $0x44] ss:$16 sps:$4 sm:$0xff]  }
 0x81d   : > { %3694 = vmatprep.subr.bf16.mxu0 %v8555_v50  ;;  %3735 = vmatprep.subr.bf16.mxu1 %v8558_v30  ;;  %9633 = vst [vmem:[#allocation52_spill] sm:$0xff] %v8566_v28  ;;  %9634 = vst [vmem:[#allocation53_spill] sm:$0xff] %v8569_v42  ;;  %v8572_v50 = vld [vmem:[#allocation12 + $0x4c] ss:$16 sps:$4 sm:$0xff]   ;;  %v8575_v30 = vld [vmem:[#allocation12 + $0x40] ss:$16 sps:$4 sm:$0xff]  }
 0x81e   : > { %3724 = vmatprep.mubr.bf16.mxu0 %v9326_v39  ;;  %3765 = vmatprep.mubr.bf16.mxu1 %v9326_v39  ;;  %9635 = vst [vmem:[#allocation54_spill] sm:$0xff] %v8572_v50  ;;  %9636 = vst [vmem:[#allocation55_spill] sm:$0xff] %v8575_v30 }
 0x820   : > { %3695 = vmatpush1.bf16.msra.mxu0 %v8563_v59  ;;  %3736 = vmatpush1.bf16.msra.mxu1 %v8566_v28  ;;  %v8581_v59 = vld [vmem:[#allocation12 + $0x64] ss:$16 sps:$4 sm:$0xff]   ;;  %v8584_v28 = vld [vmem:[#allocation12 + $0x6c] ss:$16 sps:$4 sm:$0xff]  }
 0x821   : > { %3696 = vmatprep.subr.bf16.mxu0 %v8569_v42  ;;  %3737 = vmatprep.subr.bf16.mxu1 %v8572_v50  ;;  %9638 = vst [vmem:[#allocation57_spill] sm:$0xff] %v8581_v59  ;;  %9639 = vst [vmem:[#allocation58_spill] sm:$0xff] %v8584_v28  ;;  %v8587_v42 = vld [vmem:[#allocation12 + $0x60] ss:$16 sps:$4 sm:$0xff]   ;;  %v8590_v50 = vld [vmem:[#allocation12 + $0x68] ss:$16 sps:$4 sm:$0xff]  }
 0x822   : > { %9640 = vst [vmem:[#allocation59_spill] sm:$0xff] %v8587_v42  ;;  %9641 = vst [vmem:[#allocation60_spill] sm:$0xff] %v8590_v50 }
 0x824   : > { %3697 = vmatpush1.bf16.msra.mxu0 %v8575_v30  ;;  %3738 = vmatpush1.bf16.msra.mxu1 %v8578_v46  ;;  %v8593_v30 = vld [vmem:[#allocation12 + $0x84] ss:$16 sps:$4 sm:$0xff]   ;;  %v8596_v46 = vld [vmem:[#allocation12 + $0x8c] ss:$16 sps:$4 sm:$0xff]  }
 0x825   : > { %3698 = vmatprep.subr.bf16.mxu0 %v8581_v59  ;;  %3739 = vmatprep.subr.bf16.mxu1 %v8584_v28  ;;  %9642 = vst [vmem:[#allocation61_spill] sm:$0xff] %v8593_v30  ;;  %9643 = vst [vmem:[#allocation62_spill] sm:$0xff] %v8596_v46  ;;  %v8599_v59 = vld [vmem:[#allocation12 + $0x80] ss:$16 sps:$4 sm:$0xff]   ;;  %v8602_v28 = vld [vmem:[#allocation12 + $0x88] ss:$16 sps:$4 sm:$0xff]  }
 0x826   : > { %9644 = vst [vmem:[#allocation63_spill] sm:$0xff] %v8599_v59  ;;  %9645 = vst [vmem:[#allocation64_spill] sm:$0xff] %v8602_v28 }
 0x828   : > { %3699 = vmatpush1.bf16.msra.mxu0 %v8587_v42  ;;  %3740 = vmatpush1.bf16.msra.mxu1 %v8590_v50  ;;  %v8605_v42 = vld [vmem:[#allocation12 + $0xa4] ss:$16 sps:$4 sm:$0xff]   ;;  %v8608_v50 = vld [vmem:[#allocation12 + $0xac] ss:$16 sps:$4 sm:$0xff]  }
 0x829   : > { %3700 = vmatprep.subr.bf16.mxu0 %v8593_v30  ;;  %3741 = vmatprep.subr.bf16.mxu1 %v8596_v46  ;;  %9646 = vst [vmem:[#allocation65_spill] sm:$0xff] %v8605_v42  ;;  %9647 = vst [vmem:[#allocation66_spill] sm:$0xff] %v8608_v50  ;;  %v8611_v30 = vld [vmem:[#allocation12 + $0xa0] ss:$16 sps:$4 sm:$0xff]   ;;  %v8614_v46 = vld [vmem:[#allocation12 + $0xa8] ss:$16 sps:$4 sm:$0xff]  }
 0x82a   : > { %9648 = vst [vmem:[#allocation67_spill] sm:$0xff] %v8611_v30  ;;  %9649 = vst [vmem:[#allocation68_spill] sm:$0xff] %v8614_v46 }
 0x82c   : > { %3701 = vmatpush1.bf16.msra.mxu0 %v8599_v59  ;;  %3742 = vmatpush1.bf16.msra.mxu1 %v8602_v28  ;;  %v8617_v59 = vld [vmem:[#allocation12 + $0xc4] ss:$16 sps:$4 sm:$0xff]   ;;  %v8620_v28 = vld [vmem:[#allocation12 + $0xcc] ss:$16 sps:$4 sm:$0xff]  }
 0x82d   : > { %3702 = vmatprep.subr.bf16.mxu0 %v8605_v42  ;;  %3743 = vmatprep.subr.bf16.mxu1 %v8608_v50  ;;  %9650 = vst [vmem:[#allocation69_spill] sm:$0xff] %v8617_v59  ;;  %9651 = vst [vmem:[#allocation70_spill] sm:$0xff] %v8620_v28  ;;  %v8623_v42 = vld [vmem:[#allocation12 + $0xc0] ss:$16 sps:$4 sm:$0xff]   ;;  %v8626_v50 = vld [vmem:[#allocation12 + $0xc8] ss:$16 sps:$4 sm:$0xff]  }
 0x82e   : > { %9652 = vst [vmem:[#allocation71_spill] sm:$0xff] %v8623_v42  ;;  %9653 = vst [vmem:[#allocation25_spill] sm:$0xff] %v8626_v50 }
 0x830   : > { %3703 = vmatpush1.bf16.msra.mxu0 %v8611_v30  ;;  %3744 = vmatpush1.bf16.msra.mxu1 %v8614_v46  ;;  %v8629_v30 = vld [vmem:[#allocation12 + $0xe4] ss:$16 sps:$4 sm:$0xff]   ;;  %v8632_v46 = vld [vmem:[#allocation12 + $0xec] ss:$16 sps:$4 sm:$0xff]  }
 0x831   : > { %3704 = vmatprep.subr.bf16.mxu0 %v8617_v59  ;;  %3745 = vmatprep.subr.bf16.mxu1 %v8620_v28  ;;  %9654 = vst [vmem:[#allocation26_spill] sm:$0xff] %v8629_v30  ;;  %9655 = vst [vmem:[#allocation27_spill] sm:$0xff] %v8632_v46  ;;  %v8635_v59 = vld [vmem:[#allocation12 + $0xe0] ss:$16 sps:$4 sm:$0xff]   ;;  %v8638_v28 = vld [vmem:[#allocation12 + $0xe8] ss:$16 sps:$4 sm:$0xff]  }
 0x832   : > { %9656 = vst [vmem:[#allocation28_spill] sm:$0xff] %v8635_v59  ;;  %9657 = vst [vmem:[#allocation29_spill] sm:$0xff] %v8638_v28 }
 0x834   : > { %3705 = vmatpush1.bf16.msra.mxu0 %v8623_v42  ;;  %3746 = vmatpush1.bf16.msra.mxu1 %v8626_v50  ;;  %v8641_v42 = vld [vmem:[#allocation10 + $0x4] ss:$16 sps:$4 sm:$0xff]   ;;  %v8644_v50 = vld [vmem:[#allocation10 + $0xc] ss:$16 sps:$4 sm:$0xff]  }
 0x835   : > { %3706 = vmatprep.subr.bf16.mxu0 %v8629_v30  ;;  %3747 = vmatprep.subr.bf16.mxu1 %v8632_v46  ;;  %9658 = vst [vmem:[#allocation30_spill] sm:$0xff] %v8641_v42  ;;  %9659 = vst [vmem:[#allocation31_spill] sm:$0xff] %v8644_v50 }
 0x838   : > { %3707 = vmatpush1.bf16.msra.mxu0 %v8635_v59  ;;  %3748 = vmatpush1.bf16.msra.mxu1 %v8638_v28  ;;  %v3886_v28 = vsel %vm3885_vm0, 1, %v9326_v39 }
 0x839   : > { %3774 = vmatprep.subr.bf16.mxu0 %v8641_v42  ;;  %3815 = vmatprep.subr.bf16.mxu1 %v8644_v50 }
 0x83a   : > { %3888 = vperm.xlu0 %5761, %v3886_v28  }
 0x8ae   : > { %v3407_v30 = vpop.f32.mrb[64].mxu0  ;;  %v3448_v5 = vpop.f32.mrb[96].mxu1 }
 0x8af   : > { %v3409_v20 = vpop.f32.mrb[65].mxu0  ;;  %v3450_v46 = vpop.f32.mrb[97].mxu1 }
 0x8b0   : > { %v3411_v58 = vpop.f32.mrb[66].mxu0  ;;  %v3452_v18 = vpop.f32.mrb[98].mxu1 }
 0x8b1   : > { %v3412_v43 = vpop.f32.mrb[67].mxu0  ;;  %v3453_v59 = vpop.f32.mrb[99].mxu1 }
 0x8ce   : > { %v3489_v16 = vpop.f32.mrb[68].mxu0  ;;  %v3530_v10 = vpop.f32.mrb[100].mxu1 }
 0x8cf   : > { %v3490_v42 = vadd.f32 %v3489_v16, %v3407_v30  ;;  %v3531_v52 = vadd.f32 %v3530_v10, %v3448_v5  ;;  %v3491_v54 = vpop.f32.mrb[69].mxu0  ;;  %v3532_v36 = vpop.f32.mrb[101].mxu1 }
 0x8d0   : > { %v3492_v50 = vadd.f32 %v3491_v54, %v3409_v20  ;;  %v3533_v38 = vadd.f32 %v3532_v36, %v3450_v46  ;;  %v3493_v35 = vpop.f32.mrb[70].mxu0  ;;  %v3534_v22 = vpop.f32.mrb[102].mxu1 }
 0x8d1   : > { %v3537_v58 = vadd.f32 %v3490_v42, %v7637_v3  ;;  %v3494_v18 = vpop.f32.mrb[71].mxu0  ;;  %v3535_v43 = vpop.f32.mrb[103].mxu1  ;;  %v3539_v10 = vadd.f32 %v3531_v52, %v9606_v1 }
 0x8d2   : > { %v3538_v59 = vadd.f32 %v3492_v50, %v7640_v40  ;;  %v3540_v28 = vadd.f32 %v3533_v38, %v9605_v4  ;;  %v9661_v18 = vld [vmem:[#allocation102_spill] sm:$0xff] }
 0x8d3   : > { %v5530_v7 = vmul.f32 -1.442695, %v3537_v58  ;;  %v9660_v58 = vld [vmem:[#allocation86_spill] sm:$0xff] }
 0x8d4   : > { %v5531_v17 = vmul.f32 -1.442695, %v3538_v59  ;;  %v5532_v16 = vmul.f32 -1.442695, %v3540_v28 }
 0x8d5   : > { %6164 = vpow2.f32 %v5530_v7 }
 0x8d6   : > { %6166 = vpow2.f32 %v5531_v17 }
 0x8d7   : > { %6168 = vpow2.f32 %v5532_v16 }
 0x8d8   : > { %6170 = vtanh.f32 %v3539_v10  ;;  %v9662_v10 = vld [vmem:[#allocation87_spill] sm:$0xff] }
 0x8df   : > { %v6165_v30 = vpop.eup %6164 }
 0x8e0   : > { %v6167_v54 = vpop.eup %6166  ;;  %v3544_v36 = vadd.f32 1.0, %v6165_v30 }
 0x8e1   : > { %v3550_v22 = vadd.f32 1.0, %v6167_v54  ;;  %v6169_v35 = vpop.eup %6168  ;;  %v9663_v54 = vld [vmem:[#allocation103_spill] sm:$0xff] }
 0x8e2   : > { %6172 = vrcp.f32 %v3544_v36  ;;  %v6171_v20 = vpop.eup %6170  ;;  %v3557_v7 = vadd.f32 1.0, %v6169_v35 }
 0x8e3   : > { %6174 = vrcp.f32 %v3550_v22 }
 0x8e4   : > { %6176 = vrcp.f32 %v3557_v7 }
 0x8ec   : > { %v6173_v50 = vpop.eup %6172 }
 0x8ed   : > { %v6175_v5 = vpop.eup %6174  ;;  %v3561_v46 = vmul.f32 %v6173_v50, %v6171_v20 }
 0x8ee   : > { %v3560_v17 = vmul.f32 %v6175_v5, %v8378_v23  ;;  %v3615_v38 = vpop.f32.mrb[72].mxu0  ;;  %v3656_v42 = vpop.f32.mrb[104].mxu1 }
 0x8ef   : > { %v3663_v52 = vadd.f32 %v3615_v38, %v9660_v58  ;;  %v3665_v43 = vadd.f32 %v3656_v42, %v9661_v18  ;;  %v3617_v59 = vpop.f32.mrb[73].mxu0  ;;  %v3658_v28 = vpop.f32.mrb[105].mxu1 }
 0x8f0   : > { %v8656_v16 = vadd.f32 %v3561_v46, %v3560_v17  ;;  %v3664_v30 = vadd.f32 %v3617_v59, %v9662_v10  ;;  %v3666_v36 = vadd.f32 %v3658_v28, %v9663_v54  ;;  %v3619_v22 = vpop.f32.mrb[74].mxu0  ;;  %v3660_v1 = vpop.f32.mrb[106].mxu1 }
 0x8f1   : > { %v5533_v35 = vmul.f32 -1.442695, %v3663_v52  ;;  %v3620_v20 = vpop.f32.mrb[75].mxu0  ;;  %v3661_v23 = vpop.f32.mrb[107].mxu1  ;;  %v9664_v52 = vsel %vm8383_vm15, %v8387_v55, %v8235_v47  ;;  %v9666_v22 = vld [vmem:[#allocation93_spill] sm:$0xff] }
 0x8f2   : > { %v5534_v50 = vmul.f32 -1.442695, %v3664_v30  ;;  %6178 = vtanh.f32 %v8656_v16  ;;  %v3570_v5 = vpop.permute.xlu1 %3569  ;;  %v5535_v38 = vmul.f32 -1.442695, %v3666_v36  ;;  %v6177_v42 = vpop.eup %6176  ;;  %v9668_v20 = vld [vmem:[#allocation43_spill] sm:$0xff] }
 0x8f3   : > { %6180 = vpow2.f32 %v5533_v35  ;;  %vm3571_vm1 = vcmp.eq.s32.totalorder %v3570_v5, 1  ;;  %v9667_v35 = vld [vmem:[#allocation42_spill] sm:$0xff] }
 0x8f4   : > { %6182 = vpow2.f32 %v5534_v50  ;;  %vm3572_vm2 = vmpackc.low %vm3571_vm1, %vm3571_vm1 }
 0x8f5   : > { %6184 = vpow2.f32 %v5535_v38 }
 0x8f6   : > { %6186 = vtanh.f32 %v3665_v43 }
 0x8fc   : > { %v6179_v46 = vpop.eup %6178 }
 0x8fd   : > { %v6181_v17 = vpop.eup %6180  ;;  %v3564_v58 = vmul.f32 %v6179_v46, %v6177_v42  ;;  %v6458_v42 = vld [vmem:[#allocation9] ss:$16 sps:$4 sm:$0xff]   ;;  %v6459_v46 = vld [vmem:[#allocation9 + $0x24] ss:$16 sps:$4 sm:$0xff]  }
 0x8fe   : > { %v6183_v18 = vpop.eup %6182  ;;  %v3670_v59 = vadd.f32 1.0, %v6181_v17  ;;  %v6460_v17 = vld [vmem:[#allocation9 + $0x20] ss:$16 sps:$4 sm:$0xff]  }
 0x8ff   : > { %v3676_v1 = vadd.f32 1.0, %v6183_v18  ;;  %v3565_v7 = vpack.c.bf16 %v3564_v58, %v3564_v58  ;;  %v6185_v47 = vpop.eup %6184  ;;  %v9669_v58 = vld [vmem:[#allocation81_spill] sm:$0xff]  ;;  %v9670_v18 = vld [vmem:[#allocation82_spill] sm:$0xff] }
 0x900   : > { %6188 = vrcp.f32 %v3670_v59  ;;  %v6187_v51 = vpop.eup %6186  ;;  %v3683_v30 = vadd.f32 1.0, %v6185_v47  ;;  %v6465_v59 = vld [vmem:[#allocation9 + $0x84] ss:$16 sps:$4 sm:$0xff]  }
 0x901   : > { %6190 = vrcp.f32 %v3676_v1  ;;  %v8666_v28 = vsel %vm3572_vm2, %v3565_v7, %v9664_v52  ;;  %3725 = vmatmul.mubr.bf16.vlgmr.msra.gmra.mrb[76].mxu0 %v3565_v7  ;;  %3766 = vmatmul.mubr.bf16.vlgmr.msra.gmra.mrb[108].mxu1 %v3565_v7  ;;  %v9671_v1 = vld [vmem:[#allocation98_spill] sm:$0xff]  ;;  %v9672_v7 = vld [vmem:[#allocation83_spill] sm:$0xff]  ;;  %v9675_v47 = vld [vmem:[#allocation77_spill] sm:$0xff] }
 0x902   : > { %3775 = vmatpush1.bf16.msra.mxu0 %v8395_v37  ;;  %3816 = vmatpush1.bf16.msra.mxu1 %v8398_v29  ;;  %6192 = vrcp.f32 %v3683_v30  ;;  %v9673_v52 = vld [vmem:[#allocation99_spill] sm:$0xff] }
 0x903   : > { %3776 = vmatprep.subr.bf16.mxu0 %v8401_v60  ;;  %3817 = vmatprep.subr.bf16.mxu1 %v8404_v25  ;;  %v9680_v30 = vld [vmem:[#allocation75_spill] sm:$0xff] }
 0x904   : > { %3806 = vmatprep.mubr.bf16.mxu0 %v9326_v39  ;;  %3847 = vmatprep.mubr.bf16.mxu1 %v9326_v39 }
 0x906   : > { %3777 = vmatpush1.bf16.msra.mxu0 %v8409_v44  ;;  %3818 = vmatpush1.bf16.msra.mxu1 %v8412_v49 }
 0x907   : > { %3778 = vmatprep.subr.bf16.mxu0 %v8415_v61  ;;  %3819 = vmatprep.subr.bf16.mxu1 %v8418_v24 }
 0x90a   : > { %v6189_v55 = vpop.eup %6188  ;;  %3779 = vmatpush1.bf16.msra.mxu0 %v8421_v26  ;;  %3820 = vmatpush1.bf16.msra.mxu1 %v8424_v53 }
 0x90b   : > { %v6191_v43 = vpop.eup %6190  ;;  %v3687_v10 = vmul.f32 %v6189_v55, %v6187_v51  ;;  %3780 = vmatprep.subr.bf16.mxu0 %v8427_v48  ;;  %3821 = vmatprep.subr.bf16.mxu1 %v8430_v27  ;;  %v9676_v51 = vld [vmem:[#allocation44_spill] sm:$0xff]  ;;  %v9677_v55 = vld [vmem:[#allocation94_spill] sm:$0xff] }
 0x90c   : > { %v3686_v54 = vmul.f32 %v6191_v43, %v8434_v2  ;;  %v9665_v2 = vld [vmem:[#allocation76_spill] sm:$0xff]  ;;  %v6193_v23 = vpop.eup %6192  ;;  %v9678_v43 = vld [vmem:[#allocation45_spill] sm:$0xff] }
 0x90e   : > { %v8683_v36 = vadd.f32 %v3687_v10, %v3686_v54  ;;  %3781 = vmatpush1.bf16.msra.mxu0 %v8436_v19  ;;  %3822 = vmatpush1.bf16.msra.mxu1 %v8439_v21  ;;  %v9679_v10 = vld [vmem:[#allocation79_spill] sm:$0xff]  ;;  %v9681_v54 = vld [vmem:[#allocation46_spill] sm:$0xff] }
 0x90f   : > { %3782 = vmatprep.subr.bf16.mxu0 %v8442_v6  ;;  %3823 = vmatprep.subr.bf16.mxu1 %v8445_v56 }
 0x910   : > { %6194 = vtanh.f32 %v8683_v36 }
 0x912   : > { %3783 = vmatpush1.bf16.msra.mxu0 %v8449_v34  ;;  %3824 = vmatpush1.bf16.msra.mxu1 %v8452_v63 }
 0x913   : > { %3784 = vmatprep.subr.bf16.mxu0 %v8455_v31  ;;  %3825 = vmatprep.subr.bf16.mxu1 %v8458_v0 }
 0x916   : > { %3785 = vmatpush1.bf16.msra.mxu0 %v9665_v2  ;;  %3826 = vmatpush1.bf16.msra.mxu1 %v9666_v22 }
 0x917   : > { %3786 = vmatprep.subr.bf16.mxu0 %v9667_v35  ;;  %3827 = vmatprep.subr.bf16.mxu1 %v9668_v20 }
 0x91a   : > { %v6195_v50 = vpop.eup %6194  ;;  %3787 = vmatpush1.bf16.msra.mxu0 %v8473_v41  ;;  %3828 = vmatpush1.bf16.msra.mxu1 %v8476_v33 }
 0x91b   : > { %3788 = vmatprep.subr.bf16.mxu0 %v8479_v32  ;;  %3829 = vmatprep.subr.bf16.mxu1 %v8482_v57  ;;  %v3690_v5 = vmul.f32 %v6195_v50, %v6193_v23  ;;  %v9682_v23 = vld [vmem:[#allocation92_spill] sm:$0xff]  ;;  %v9683_v50 = vld [vmem:[#allocation95_spill] sm:$0xff] }
 0x91d   : > { %v3691_v38 = vpack.c.bf16 %v3690_v5, %v3690_v5  ;;  %v9684_v5 = vld [vmem:[#allocation47_spill] sm:$0xff] }
 0x91e   : > { %3789 = vmatpush1.bf16.msra.mxu0 %v8485_v62  ;;  %3830 = vmatpush1.bf16.msra.mxu1 %v8488_v45 }
 0x91f   : > { %3900 = vmatprep.subr.bf16.mxu0 %v8273_v8  ;;  %3941 = vmatprep.subr.bf16.mxu1 %v8276_v9  ;;  %v6461_v8 = vld [vmem:[#allocation9 + $0x44] ss:$16 sps:$4 sm:$0xff]   ;;  %v6462_v9 = vld [vmem:[#allocation9 + $0x40] ss:$16 sps:$4 sm:$0xff]  }
 0x921   : > { %3807 = vmatmul.mubr.bf16.vlgmr.msra.gmra.mrb[80].mxu0 %v3691_v38  ;;  %3848 = vmatmul.mubr.bf16.vlgmr.msra.gmra.mrb[112].mxu1 %v3691_v38 }
 0x922   : > { %3901 = vmatpush1.bf16.msra.mxu0 %v6458_v42  ;;  %3942 = vmatpush1.bf16.msra.mxu1 %v8280_v11  ;;  %v6463_v11 = vld [vmem:[#allocation9 + $0x64] ss:$16 sps:$4 sm:$0xff]   ;;  %v9685_v42 = vld [vmem:[#allocation80_spill] sm:$0xff] }
 0x923   : > { %3902 = vmatprep.subr.bf16.mxu0 %v6459_v46  ;;  %3943 = vmatprep.subr.bf16.mxu1 %v8284_v12  ;;  %v6464_v12 = vld [vmem:[#allocation9 + $0x60] ss:$16 sps:$4 sm:$0xff]   ;;  %v9686_v46 = vld [vmem:[#allocation48_spill] sm:$0xff] }
 0x924   : > { %3932 = vmatprep.mubr.bf16.mxu0 %v9326_v39  ;;  %3973 = vmatprep.mubr.bf16.mxu1 %v9326_v39 }
 0x926   : > { %3903 = vmatpush1.bf16.msra.mxu0 %v6460_v17  ;;  %3944 = vmatpush1.bf16.msra.mxu1 %v8290_v13  ;;  %v6466_v13 = vld [vmem:[#allocation9 + $0x80] ss:$16 sps:$4 sm:$0xff]   ;;  %v9687_v17 = vld [vmem:[#allocation96_spill] sm:$0xff] }
 0x927   : > { %3904 = vmatprep.subr.bf16.mxu0 %v6461_v8  ;;  %3945 = vmatprep.subr.bf16.mxu1 %v8294_v14  ;;  %v6467_v14 = vld [vmem:[#allocation9 + $0xa4] ss:$16 sps:$4 sm:$0xff]  }
 0x928   : > { %v9688_v8 = vld [vmem:[#allocation49_spill] sm:$0xff] }
 0x92a   : > { %3905 = vmatpush1.bf16.msra.mxu0 %v6462_v9  ;;  %3946 = vmatpush1.bf16.msra.mxu1 %v8298_v15  ;;  %v9674_v15 = vld [vmem:[#allocation97_spill] sm:$0xff]  ;;  %v9689_v9 = vld [vmem:[#allocation50_spill] sm:$0xff] }
 0x92b   : > { %3906 = vmatprep.subr.bf16.mxu0 %v6463_v11  ;;  %3947 = vmatprep.subr.bf16.mxu1 %v9669_v58  ;;  %v9690_v11 = vld [vmem:[#allocation51_spill] sm:$0xff]  ;;  %v9691_v58 = vld [vmem:[#allocation52_spill] sm:$0xff] }
 0x92e   : > { %3907 = vmatpush1.bf16.msra.mxu0 %v6464_v12  ;;  %3948 = vmatpush1.bf16.msra.mxu1 %v9670_v18  ;;  %v9692_v12 = vld [vmem:[#allocation53_spill] sm:$0xff]  ;;  %v9693_v18 = vld [vmem:[#allocation54_spill] sm:$0xff] }
 0x92f   : > { %3908 = vmatprep.subr.bf16.mxu0 %v6465_v59  ;;  %3949 = vmatprep.subr.bf16.mxu1 %v9671_v1  ;;  %v9695_v59 = vld [vmem:[#allocation56_spill] sm:$0xff]  ;;  %v9696_v1 = vld [vmem:[#allocation57_spill] sm:$0xff] }
 0x932   : > { %3909 = vmatpush1.bf16.msra.mxu0 %v6466_v13  ;;  %3950 = vmatpush1.bf16.msra.mxu1 %v9672_v7  ;;  %v9697_v13 = vld [vmem:[#allocation58_spill] sm:$0xff]  ;;  %v9698_v7 = vld [vmem:[#allocation59_spill] sm:$0xff] }
 0x933   : > { %3910 = vmatprep.subr.bf16.mxu0 %v6467_v14  ;;  %3951 = vmatprep.subr.bf16.mxu1 %v9673_v52  ;;  %v9699_v14 = vld [vmem:[#allocation60_spill] sm:$0xff]  ;;  %v9700_v52 = vld [vmem:[#allocation61_spill] sm:$0xff] }
 0x936   : > { %3911 = vmatpush1.bf16.msra.mxu0 %v9674_v15  ;;  %3952 = vmatpush1.bf16.msra.mxu1 %v9675_v47  ;;  %v9701_v15 = vld [vmem:[#allocation62_spill] sm:$0xff]  ;;  %v9702_v47 = vld [vmem:[#allocation63_spill] sm:$0xff] }
 0x937   : > { %3912 = vmatprep.subr.bf16.mxu0 %v9676_v51  ;;  %3953 = vmatprep.subr.bf16.mxu1 %v9677_v55  ;;  %v9703_v51 = vld [vmem:[#allocation64_spill] sm:$0xff]  ;;  %v9704_v55 = vld [vmem:[#allocation65_spill] sm:$0xff] }
 0x93a   : > { %3913 = vmatpush1.bf16.msra.mxu0 %v9678_v43  ;;  %3954 = vmatpush1.bf16.msra.mxu1 %v9679_v10  ;;  %v9705_v43 = vld [vmem:[#allocation66_spill] sm:$0xff]  ;;  %v9706_v10 = vld [vmem:[#allocation67_spill] sm:$0xff] }
 0x93b   : > { %3914 = vmatprep.subr.bf16.mxu0 %v9680_v30  ;;  %3955 = vmatprep.subr.bf16.mxu1 %v9681_v54  ;;  %v9707_v30 = vld [vmem:[#allocation68_spill] sm:$0xff]  ;;  %v9708_v54 = vld [vmem:[#allocation69_spill] sm:$0xff] }
 0x93e   : > { %3915 = vmatpush1.bf16.msra.mxu0 %v9682_v23  ;;  %3956 = vmatpush1.bf16.msra.mxu1 %v9683_v50  ;;  %v9709_v23 = vld [vmem:[#allocation70_spill] sm:$0xff]  ;;  %v9710_v50 = vld [vmem:[#allocation71_spill] sm:$0xff] }
 0x93f   : > { %4011 = vmatprep.subr.bf16.mxu0 %v9684_v5  ;;  %4052 = vmatprep.subr.bf16.mxu1 %v9685_v42  ;;  %v9711_v5 = vld [vmem:[#allocation25_spill] sm:$0xff]  ;;  %v9712_v42 = vld [vmem:[#allocation26_spill] sm:$0xff] }
 0x941   : > { %3933 = vmatmul.mubr.bf16.vlgmr.msra.gmra.mrb[84].mxu0 %v3691_v38  ;;  %3974 = vmatmul.mubr.bf16.vlgmr.msra.gmra.mrb[116].mxu1 %v3691_v38  ;;  %v9694_v38 = vld [vmem:[#allocation55_spill] sm:$0xff] }
 0x942   : > { %4012 = vmatpush1.bf16.msra.mxu0 %v9686_v46  ;;  %4053 = vmatpush1.bf16.msra.mxu1 %v9687_v17  ;;  %v9713_v46 = vld [vmem:[#allocation27_spill] sm:$0xff]  ;;  %v9714_v17 = vld [vmem:[#allocation28_spill] sm:$0xff] }
 0x943   : > { %4013 = vmatprep.subr.bf16.mxu0 %v9688_v8  ;;  %4054 = vmatprep.subr.bf16.mxu1 %v9689_v9  ;;  %v9715_v8 = vld [vmem:[#allocation29_spill] sm:$0xff]  ;;  %v9716_v9 = vld [vmem:[#allocation30_spill] sm:$0xff] }
 0x944   : > { %4043 = vmatprep.mubr.bf16.mxu0 %v9326_v39  ;;  %4084 = vmatprep.mubr.bf16.mxu1 %v9326_v39 }
 0x946   : > { %4014 = vmatpush1.bf16.msra.mxu0 %v9690_v11  ;;  %4055 = vmatpush1.bf16.msra.mxu1 %v9691_v58  ;;  %v9717_v11 = vld [vmem:[#allocation31_spill] sm:$0xff]  ;;  %v9718_v58 = vld [vmem:[#allocation78_spill] sm:$0xff] }
 0x947   : > { %4015 = vmatprep.subr.bf16.mxu0 %v9692_v12  ;;  %4056 = vmatprep.subr.bf16.mxu1 %v9693_v18  ;;  %vm4204_vm3 = vcmp.eq.s32.totalorder %v9718_v58, 7 }
 0x948   : > { %v4205_v12 = vsel %vm4204_vm3, 1, %v9326_v39 }
 0x949   : > { %4207 = vperm.xlu1 %5762, %v4205_v12   ;;  %v9719_v12 = vld [vmem:[#allocation107_spill] sm:$0xff] }
 0x94a   : > { %4016 = vmatpush1.bf16.msra.mxu0 %v9694_v38  ;;  %4057 = vmatpush1.bf16.msra.mxu1 %v9695_v59 }
 0x94b   : > { %4017 = vmatprep.subr.bf16.mxu0 %v9696_v1  ;;  %4058 = vmatprep.subr.bf16.mxu1 %v9697_v13 }
 0x94e   : > { %4018 = vmatpush1.bf16.msra.mxu0 %v9698_v7  ;;  %4059 = vmatpush1.bf16.msra.mxu1 %v9699_v14 }
 0x94f   : > { %4019 = vmatprep.subr.bf16.mxu0 %v9700_v52  ;;  %4060 = vmatprep.subr.bf16.mxu1 %v9701_v15 }
 0x952   : > { %4020 = vmatpush1.bf16.msra.mxu0 %v9702_v47  ;;  %4061 = vmatpush1.bf16.msra.mxu1 %v9703_v51 }
 0x953   : > { %4021 = vmatprep.subr.bf16.mxu0 %v9704_v55  ;;  %4062 = vmatprep.subr.bf16.mxu1 %v9705_v43 }
 0x956   : > { %4022 = vmatpush1.bf16.msra.mxu0 %v9706_v10  ;;  %4063 = vmatpush1.bf16.msra.mxu1 %v9707_v30 }
 0x957   : > { %4023 = vmatprep.subr.bf16.mxu0 %v9708_v54  ;;  %4064 = vmatprep.subr.bf16.mxu1 %v9709_v23 }
 0x95a   : > { %4024 = vmatpush1.bf16.msra.mxu0 %v9710_v50  ;;  %4065 = vmatpush1.bf16.msra.mxu1 %v9711_v5 }
 0x95b   : > { %4025 = vmatprep.subr.bf16.mxu0 %v9712_v42  ;;  %4066 = vmatprep.subr.bf16.mxu1 %v9713_v46 }
 0x95e   : > { %4026 = vmatpush1.bf16.msra.mxu0 %v9714_v17  ;;  %4067 = vmatpush1.bf16.msra.mxu1 %v9715_v8 }
 0x95f   : > { %4093 = vmatprep.subr.bf16.mxu0 %v9716_v9  ;;  %4134 = vmatprep.subr.bf16.mxu1 %v9717_v11 }
 0x9d4   : > { %v3726_v18 = vpop.f32.mrb[76].mxu0  ;;  %v3767_v38 = vpop.f32.mrb[108].mxu1 }
 0x9d5   : > { %v3728_v59 = vpop.f32.mrb[77].mxu0  ;;  %v3769_v1 = vpop.f32.mrb[109].mxu1 }
 0x9d6   : > { %v3730_v13 = vpop.f32.mrb[78].mxu0  ;;  %v3771_v7 = vpop.f32.mrb[110].mxu1 }
 0x9d7   : > { %v3731_v14 = vpop.f32.mrb[79].mxu0  ;;  %v3772_v52 = vpop.f32.mrb[111].mxu1 }
 0x9f4   : > { %v3808_v15 = vpop.f32.mrb[80].mxu0  ;;  %v3849_v47 = vpop.f32.mrb[112].mxu1 }
 0x9f5   : > { %v3809_v51 = vadd.f32 %v3808_v15, %v3726_v18  ;;  %v3850_v55 = vadd.f32 %v3849_v47, %v3767_v38  ;;  %v3810_v43 = vpop.f32.mrb[81].mxu0  ;;  %v3851_v10 = vpop.f32.mrb[113].mxu1 }
 0x9f6   : > { %v3811_v30 = vadd.f32 %v3810_v43, %v3728_v59  ;;  %v3852_v54 = vadd.f32 %v3851_v10, %v3769_v1  ;;  %v3812_v23 = vpop.f32.mrb[82].mxu0  ;;  %v3853_v50 = vpop.f32.mrb[114].mxu1 }
 0x9f7   : > { %v3856_v5 = vadd.f32 %v3809_v51, %v7637_v3  ;;  %v3813_v42 = vpop.f32.mrb[83].mxu0  ;;  %v3854_v46 = vpop.f32.mrb[115].mxu1  ;;  %v3858_v18 = vadd.f32 %v3850_v55, %v9719_v12  ;;  %v9721_v23 = vld [vmem:[#allocation104_spill] sm:$0xff] }
 0x9f8   : > { %v3857_v17 = vadd.f32 %v3811_v30, %v7640_v40  ;;  %v3859_v11 = vadd.f32 %v3852_v54, %v9605_v4  ;;  %v9720_v54 = vld [vmem:[#allocation88_spill] sm:$0xff] }
 0x9f9   : > { %v5536_v8 = vmul.f32 -1.442695, %v3856_v5 }
 0x9fa   : > { %v5537_v9 = vmul.f32 -1.442695, %v3857_v17  ;;  %v5538_v58 = vmul.f32 -1.442695, %v3859_v11  ;;  %v9722_v17 = vld [vmem:[#allocation89_spill] sm:$0xff] }
 0x9fb   : > { %6196 = vpow2.f32 %v5536_v8 }
 0x9fc   : > { %6198 = vpow2.f32 %v5537_v9  ;;  %v9723_v9 = vld [vmem:[#allocation105_spill] sm:$0xff] }
 0x9fd   : > { %6200 = vpow2.f32 %v5538_v58 }
 0x9fe   : > { %6202 = vtanh.f32 %v3858_v18 }
 0xa05   : > { %v6197_v38 = vpop.eup %6196 }
 0xa06   : > { %v6199_v59 = vpop.eup %6198  ;;  %v3863_v1 = vadd.f32 1.0, %v6197_v38 }
 0xa07   : > { %v3869_v13 = vadd.f32 1.0, %v6199_v59  ;;  %v6201_v7 = vpop.eup %6200 }
 0xa08   : > { %6204 = vrcp.f32 %v3863_v1  ;;  %v6203_v14 = vpop.eup %6202  ;;  %v3876_v51 = vadd.f32 1.0, %v6201_v7 }
 0xa09   : > { %6206 = vrcp.f32 %v3869_v13  ;;  %v3889_v13 = vpop.permute.xlu0 %3888 }
 0xa0a   : > { %6208 = vrcp.f32 %v3876_v51  ;;  %vm3890_vm4 = vcmp.eq.s32.totalorder %v3889_v13, 1  ;;  %v4248_v13 = vld [vmem:[#allocation13 + $0x120] sm:$0xff] }
 0xa0b   : > { %vm8778_vm5 = vmpackc.low %vm3890_vm4, %vm3890_vm4 }
 0xa12   : > { %v6205_v52 = vpop.eup %6204 }
 0xa13   : > { %v6207_v15 = vpop.eup %6206  ;;  %v3880_v47 = vmul.f32 %v6205_v52, %v6203_v14 }
 0xa14   : > { %v3879_v43 = vmul.f32 %v6207_v15, %v8656_v16  ;;  %v3934_v10 = vpop.f32.mrb[84].mxu0  ;;  %v3975_v30 = vpop.f32.mrb[116].mxu1 }
 0xa15   : > { %v3982_v55 = vadd.f32 %v3934_v10, %v9720_v54  ;;  %v3984_v50 = vadd.f32 %v3975_v30, %v9721_v23  ;;  %v3936_v5 = vpop.f32.mrb[85].mxu0  ;;  %v3977_v42 = vpop.f32.mrb[117].mxu1 }
 0xa16   : > { %v8773_v46 = vadd.f32 %v3880_v47, %v3879_v43  ;;  %v3983_v8 = vadd.f32 %v3936_v5, %v9722_v17  ;;  %v3985_v11 = vadd.f32 %v3977_v42, %v9723_v9  ;;  %v3938_v58 = vpop.f32.mrb[86].mxu0  ;;  %v3979_v18 = vpop.f32.mrb[118].mxu1  ;;  %v4240_v9 = vld [vmem:[#allocation13 + $0xe0] sm:$0xff] }
 0xa17   : > { %v5539_v38 = vmul.f32 -1.442695, %v3982_v55  ;;  %v3939_v59 = vpop.f32.mrb[87].mxu0  ;;  %v3980_v16 = vpop.f32.mrb[119].mxu1  ;;  %v4241_v18 = vld [vmem:[#allocation13 + $0xe8] sm:$0xff] }
 0xa18   : > { %v5540_v1 = vmul.f32 -1.442695, %v3983_v8  ;;  %6210 = vtanh.f32 %v8773_v46  ;;  %v5541_v7 = vmul.f32 -1.442695, %v3985_v11  ;;  %v6209_v14 = vpop.eup %6208  ;;  %v4236_v8 = vld [vmem:[#allocation13 + $0xc0] sm:$0xff]  ;;  %v4237_v11 = vld [vmem:[#allocation13 + $0xc8] sm:$0xff] }
 0xa19   : > { %6212 = vpow2.f32 %v5539_v38  ;;  %v5570_v58 = vcombine.high %v4236_v8, %v4240_v9  ;;  %v5569_v38 = vcombine.low %v4236_v8, %v4240_v9  ;;  %v5571_v59 = vcombine.low %v4237_v11, %v4241_v18 }
 0xa1a   : > { %6214 = vpow2.f32 %v5540_v1  ;;  %v5572_v16 = vcombine.high %v4237_v11, %v4241_v18  ;;  %v4244_v1 = vld [vmem:[#allocation13 + $0x100] sm:$0xff] }
 0xa1b   : > { %6216 = vpow2.f32 %v5541_v7  ;;  %v4245_v7 = vld [vmem:[#allocation13 + $0x108] sm:$0xff] }
 0xa1c   : > { %6218 = vtanh.f32 %v3984_v50 }
 0xa22   : > { %v6211_v52 = vpop.eup %6210 }
 0xa23   : > { %v6213_v15 = vpop.eup %6212  ;;  %v3883_v47 = vmul.f32 %v6211_v52, %v6209_v14  ;;  %v5577_v14 = vcombine.low %v4244_v1, %v4248_v13  ;;  %v5578_v52 = vcombine.high %v4244_v1, %v4248_v13 }
 0xa24   : > { %v6215_v43 = vpop.eup %6214  ;;  %v3989_v10 = vadd.f32 1.0, %v6213_v15  ;;  %v4249_v15 = vld [vmem:[#allocation13 + $0x128] sm:$0xff] }
 0xa25   : > { %v3995_v30 = vadd.f32 1.0, %v6215_v43  ;;  %v8782_v54 = vpack.c.bf16 %v3883_v47, %v3883_v47  ;;  %v6217_v23 = vpop.eup %6216  ;;  %v5579_v47 = vcombine.low %v4245_v7, %v4249_v15  ;;  %v5580_v43 = vcombine.high %v4245_v7, %v4249_v15 }
 0xa26   : > { %6220 = vrcp.f32 %v3989_v10  ;;  %v4252_v10 = vld [vmem:[#allocation13 + $0x140] sm:$0xff] }
 0xa27   : > { %6222 = vrcp.f32 %v3995_v30  ;;  %v3892_v55 = vsel %vm8778_vm5, %v8782_v54, %v8666_v28  ;;  %4044 = vmatmul.mubr.bf16.vlgmr.msra.gmra.mrb[88].mxu0 %v8782_v54  ;;  %4085 = vmatmul.mubr.bf16.vlgmr.msra.gmra.mrb[120].mxu1 %v8782_v54  ;;  %v4256_v30 = vld [vmem:[#allocation13 + $0x160] sm:$0xff] }
 0xa28   : > { %4094 = vmatpush1.bf16.msra.mxu0 %v8395_v37  ;;  %4135 = vmatpush1.bf16.msra.mxu1 %v8398_v29  ;;  %v6219_v37 = vpop.eup %6218 }
 0xa29   : > { %4095 = vmatprep.subr.bf16.mxu0 %v8401_v60  ;;  %4136 = vmatprep.subr.bf16.mxu1 %v8404_v25  ;;  %v4002_v25 = vadd.f32 1.0, %v6217_v23  ;;  %v4253_v23 = vld [vmem:[#allocation13 + $0x148] sm:$0xff] }
 0xa2a   : > { %4125 = vmatprep.mubr.bf16.mxu0 %v9326_v39  ;;  %4166 = vmatprep.mubr.bf16.mxu1 %v9326_v39 }
 0xa2b   : > { %6224 = vrcp.f32 %v4002_v25 }
 0xa2c   : > { %4096 = vmatpush1.bf16.msra.mxu0 %v8409_v44  ;;  %4137 = vmatpush1.bf16.msra.mxu1 %v8412_v49 }
 0xa2d   : > { %4097 = vmatprep.subr.bf16.mxu0 %v8415_v61  ;;  %4138 = vmatprep.subr.bf16.mxu1 %v8418_v24 }
 0xa30   : > { %v6221_v50 = vpop.eup %6220  ;;  %4098 = vmatpush1.bf16.msra.mxu0 %v8421_v26  ;;  %4139 = vmatpush1.bf16.msra.mxu1 %v8424_v53 }
 0xa31   : > { %v6223_v29 = vpop.eup %6222  ;;  %v4006_v60 = vmul.f32 %v6221_v50, %v6219_v37  ;;  %4099 = vmatprep.subr.bf16.mxu0 %v8427_v48  ;;  %4140 = vmatprep.subr.bf16.mxu1 %v8430_v27  ;;  %v4212_v48 = vld [vmem:[#allocation13] sm:$0xff]  ;;  %v5586_v37 = vcombine.high %v4252_v10, %v4256_v30  ;;  %v4257_v50 = vld [vmem:[#allocation13 + $0x168] sm:$0xff] }
 0xa32   : > { %v4005_v44 = vmul.f32 %v6223_v29, %v8683_v36  ;;  %v4216_v27 = vld [vmem:[#allocation13 + $0x20] sm:$0xff]  ;;  %v5585_v29 = vcombine.low %v4252_v10, %v4256_v30  ;;  %v5588_v25 = vcombine.high %v4253_v23, %v4257_v50 }
 0xa33   : > { %v4228_v36 = vld [vmem:[#allocation13 + $0x80] sm:$0xff] }
 0xa34   : > { %v4007_v49 = vadd.f32 %v4006_v60, %v4005_v44  ;;  %4100 = vmatpush1.bf16.msra.mxu0 %v8436_v19  ;;  %4141 = vmatpush1.bf16.msra.mxu1 %v8439_v21  ;;  %v4213_v19 = vld [vmem:[#allocation13 + $0x8] sm:$0xff]  ;;  %v5546_v21 = vcombine.high %v4212_v48, %v4216_v27  ;;  %v5587_v60 = vcombine.low %v4253_v23, %v4257_v50  ;;  %v4260_v44 = vld [vmem:[#allocation13 + $0x180] sm:$0xff] }
 0xa35   : > { %4101 = vmatprep.subr.bf16.mxu0 %v8442_v6  ;;  %4142 = vmatprep.subr.bf16.mxu1 %v8445_v56  ;;  %v6225_v61 = vpop.eup %6224  ;;  %v4217_v6 = vld [vmem:[#allocation13 + $0x28] sm:$0xff]  ;;  %v5545_v56 = vcombine.low %v4212_v48, %v4216_v27 }
 0xa36   : > { %6226 = vtanh.f32 %v4007_v49  ;;  %v4264_v49 = vld [vmem:[#allocation13 + $0x1a0] sm:$0xff] }
 0xa38   : > { %4102 = vmatpush1.bf16.msra.mxu0 %v8449_v34  ;;  %4143 = vmatpush1.bf16.msra.mxu1 %v8452_v63  ;;  %v5547_v34 = vcombine.low %v4213_v19, %v4217_v6  ;;  %v4220_v63 = vld [vmem:[#allocation13 + $0x40] sm:$0xff] }
 0xa39   : > { %4103 = vmatprep.subr.bf16.mxu0 %v8455_v31  ;;  %4144 = vmatprep.subr.bf16.mxu1 %v8458_v0  ;;  %v4224_v31 = vld [vmem:[#allocation13 + $0x60] sm:$0xff]  ;;  %v4221_v0 = vld [vmem:[#allocation13 + $0x48] sm:$0xff] }
 0xa3c   : > { %4104 = vmatpush1.bf16.msra.mxu0 %v9665_v2  ;;  %4145 = vmatpush1.bf16.msra.mxu1 %v9666_v22  ;;  %v4232_v2 = vld [vmem:[#allocation13 + $0xa0] sm:$0xff]  ;;  %v4229_v22 = vld [vmem:[#allocation13 + $0x88] sm:$0xff] }
 0xa3d   : > { %4105 = vmatprep.subr.bf16.mxu0 %v9667_v35  ;;  %4146 = vmatprep.subr.bf16.mxu1 %v9668_v20  ;;  %v5562_v35 = vcombine.high %v4228_v36, %v4232_v2  ;;  %v4233_v20 = vld [vmem:[#allocation13 + $0xa8] sm:$0xff]  ;;  %v5561_v5 = vcombine.low %v4228_v36, %v4232_v2 }
 0xa3e   : > { %v5563_v42 = vcombine.low %v4229_v22, %v4233_v20  ;;  %v5564_v17 = vcombine.high %v4229_v22, %v4233_v20 }
 0xa40   : > { %v6227_v24 = vpop.eup %6226  ;;  %4106 = vmatpush1.bf16.msra.mxu0 %v8473_v41  ;;  %4147 = vmatpush1.bf16.msra.mxu1 %v8476_v33  ;;  %v5553_v41 = vcombine.low %v4220_v63, %v4224_v31 }
 0xa41   : > { %4107 = vmatprep.subr.bf16.mxu0 %v8479_v32  ;;  %4148 = vmatprep.subr.bf16.mxu1 %v8482_v57  ;;  %v4009_v26 = vmul.f32 %v6227_v24, %v6225_v61  ;;  %v5548_v57 = vcombine.high %v4213_v19, %v4217_v6  ;;  %v4261_v61 = vld [vmem:[#allocation13 + $0x188] sm:$0xff]  ;;  %v5594_v24 = vcombine.high %v4260_v44, %v4264_v49  ;;  %v4268_v19 = vld [vmem:[#allocation13 + $0x1c0] sm:$0xff] }
 0xa42   : > { %v4269_v6 = vld [vmem:[#allocation13 + $0x1c8] sm:$0xff] }
 0xa43   : > { %v4010_v53 = vpack.c.bf16 %v4009_v26, %v4009_v26  ;;  %v4265_v26 = vld [vmem:[#allocation13 + $0x1a8] sm:$0xff] }
 0xa44   : > { %4108 = vmatpush1.bf16.msra.mxu0 %v8485_v62  ;;  %4149 = vmatpush1.bf16.msra.mxu1 %v8488_v45  ;;  %v5554_v45 = vcombine.high %v4220_v63, %v4224_v31  ;;  %v4225_v62 = vld [vmem:[#allocation13 + $0x68] sm:$0xff]  ;;  %v5595_v48 = vcombine.low %v4261_v61, %v4265_v26  ;;  %v5596_v27 = vcombine.high %v4261_v61, %v4265_v26 }
 0xa45   : > { %4638 = vmatprep.subr.bf16.mxu0 %v5546_v21  ;;  %4679 = vmatprep.subr.bf16.mxu1 %v5548_v57  ;;  %v5555_v33 = vcombine.low %v4221_v0, %v4225_v62  ;;  %v5556_v32 = vcombine.high %v4221_v0, %v4225_v62  ;;  %v4272_v21 = vld [vmem:[#allocation13 + $0x1e0] sm:$0xff]  ;;  %v8825_v0 = vld [vmem:[#allocation13 + $0x10] sm:$0xff]  ;;  %v8829_v62 = vld [vmem:[#allocation13 + $0x18] sm:$0xff] }
 0xa46   : > { %v5601_v57 = vcombine.low %v4268_v19, %v4272_v21 }
 0xa47   : > { %4126 = vmatmul.mubr.bf16.vlgmr.msra.gmra.mrb[92].mxu0 %v4010_v53  ;;  %4167 = vmatmul.mubr.bf16.vlgmr.msra.gmra.mrb[124].mxu1 %v4010_v53  ;;  %v5593_v53 = vcombine.low %v4260_v44, %v4264_v49 }
 0xa48   : > { %4670 = vmatprep.mubr.bf16.mxu0 %v9326_v39  ;;  %4711 = vmatprep.mubr.bf16.mxu1 %v9326_v39 }
 0xa49   : > { %4639 = vmatpush1.bf16.msra.mxu0 %v5545_v56  ;;  %4680 = vmatpush1.bf16.msra.mxu1 %v5547_v34  ;;  %v5602_v56 = vcombine.high %v4268_v19, %v4272_v21  ;;  %v4273_v34 = vld [vmem:[#allocation13 + $0x1e8] sm:$0xff]  ;;  %v4222_v19 = vld [vmem:[#allocation13 + $0x50] sm:$0xff] }
 0xa4a   : > { %4640 = vmatprep.subr.bf16.mxu0 %v5554_v45  ;;  %4681 = vmatprep.subr.bf16.mxu1 %v5556_v32  ;;  %v5603_v63 = vcombine.low %v4269_v6, %v4273_v34  ;;  %v5604_v31 = vcombine.high %v4269_v6, %v4273_v34  ;;  %v8827_v45 = vld [vmem:[#allocation13 + $0x30] sm:$0xff]  ;;  %v4227_v34 = vld [vmem:[#allocation13 + $0x78] sm:$0xff] }
 0xa4b   : > { %v5549_v32 = vcombine.low %v8825_v0, %v8827_v45  ;;  %v4226_v6 = vld [vmem:[#allocation13 + $0x70] sm:$0xff] }
 0xa4c   : > { %v5557_v51 = vcombine.low %v4222_v19, %v4226_v6 }
 0xa4d   : > { %4641 = vmatpush1.bf16.msra.mxu0 %v5553_v41  ;;  %4682 = vmatpush1.bf16.msra.mxu1 %v5555_v33  ;;  %v5550_v41 = vcombine.high %v8825_v0, %v8827_v45  ;;  %v8833_v33 = vld [vmem:[#allocation13 + $0x38] sm:$0xff] }
 0xa4e   : > { %4642 = vmatprep.subr.bf16.mxu0 %v5562_v35  ;;  %4683 = vmatprep.subr.bf16.mxu1 %v5564_v17  ;;  %v5551_v36 = vcombine.low %v8829_v62, %v8833_v33  ;;  %v5552_v2 = vcombine.high %v8829_v62, %v8833_v33 }
 0xa51   : > { %4643 = vmatpush1.bf16.msra.mxu0 %v5561_v5  ;;  %4684 = vmatpush1.bf16.msra.mxu1 %v5563_v42 }
 0xa52   : > { %4644 = vmatprep.subr.bf16.mxu0 %v5570_v58  ;;  %4685 = vmatprep.subr.bf16.mxu1 %v5572_v16 }
 0xa55   : > { %4645 = vmatpush1.bf16.msra.mxu0 %v5569_v38  ;;  %4686 = vmatpush1.bf16.msra.mxu1 %v5571_v59 }
 0xa56   : > { %4646 = vmatprep.subr.bf16.mxu0 %v5578_v52  ;;  %4687 = vmatprep.subr.bf16.mxu1 %v5580_v43 }
 0xa59   : > { %4647 = vmatpush1.bf16.msra.mxu0 %v5577_v14  ;;  %4688 = vmatpush1.bf16.msra.mxu1 %v5579_v47 }
 0xa5a   : > { %4648 = vmatprep.subr.bf16.mxu0 %v5586_v37  ;;  %4689 = vmatprep.subr.bf16.mxu1 %v5588_v25 }
 0xa5d   : > { %4649 = vmatpush1.bf16.msra.mxu0 %v5585_v29  ;;  %4690 = vmatpush1.bf16.msra.mxu1 %v5587_v60 }
 0xa5e   : > { %4650 = vmatprep.subr.bf16.mxu0 %v5594_v24  ;;  %4691 = vmatprep.subr.bf16.mxu1 %v5596_v27 }
 0xa61   : > { %4651 = vmatpush1.bf16.msra.mxu0 %v5593_v53  ;;  %4692 = vmatpush1.bf16.msra.mxu1 %v5595_v48 }
 0xa62   : > { %4652 = vmatprep.subr.bf16.mxu0 %v5602_v56  ;;  %4693 = vmatprep.subr.bf16.mxu1 %v5604_v31  ;;  %v4223_v56 = vld [vmem:[#allocation13 + $0x58] sm:$0xff] }
 0xa63   : > { %v5560_v31 = vcombine.high %v4223_v56, %v4227_v34 }
 0xa65   : > { %4653 = vmatpush1.bf16.msra.mxu0 %v5601_v57  ;;  %4694 = vmatpush1.bf16.msra.mxu1 %v5603_v63  ;;  %v5558_v63 = vcombine.high %v4222_v19, %v4226_v6  ;;  %v5972_v19 = vld [vmem:[#allocation15 + $0x24] ss:$8 sps:$4 sm:$0xff]   ;;  %v5975_v6 = vld [vmem:[#allocation15 + $0x34] ss:$8 sps:$4 sm:$0xff]  }
 0xa66   : > { %4720 = vmatprep.subr.bf16.mxu0 %v5550_v41  ;;  %4761 = vmatprep.subr.bf16.mxu1 %v5552_v2  ;;  %v4230_v41 = vld [vmem:[#allocation13 + $0x90] sm:$0xff] }
 0xa67   : > { %v4234_v2 = vld [vmem:[#allocation13 + $0xb0] sm:$0xff] }
 0xa68   : > { %v5566_v28 = vcombine.high %v4230_v41, %v4234_v2  ;;  %v5565_v0 = vcombine.low %v4230_v41, %v4234_v2  ;;  %v5984_v41 = vld [vmem:[#allocation15 + $0x64] ss:$8 sps:$4 sm:$0xff]   ;;  %v5987_v2 = vld [vmem:[#allocation15 + $0x74] ss:$8 sps:$4 sm:$0xff]  }
 0xafa   : > { %v4045_v22 = vpop.f32.mrb[88].mxu0  ;;  %v4086_v35 = vpop.f32.mrb[120].mxu1 }
 0xafb   : > { %v4047_v20 = vpop.f32.mrb[89].mxu0  ;;  %v4088_v5 = vpop.f32.mrb[121].mxu1 }
 0xafc   : > { %v4049_v42 = vpop.f32.mrb[90].mxu0  ;;  %v4090_v17 = vpop.f32.mrb[122].mxu1 }
 0xafd   : > { %v4050_v8 = vpop.f32.mrb[91].mxu0  ;;  %v4091_v9 = vpop.f32.mrb[123].mxu1  ;;  %v4239_v42 = vld [vmem:[#allocation13 + $0xd8] sm:$0xff] }
 0xafe   : > { %v4243_v17 = vld [vmem:[#allocation13 + $0xf8] sm:$0xff] }
 0xaff   : > { %v5576_v33 = vcombine.high %v4239_v42, %v4243_v17  ;;  %v4247_v8 = vld [vmem:[#allocation13 + $0x118] sm:$0xff] }
 0xb00   : > { %v4251_v9 = vld [vmem:[#allocation13 + $0x138] sm:$0xff] }
 0xb1a   : > { %v4127_v11 = vpop.f32.mrb[92].mxu0  ;;  %v4168_v58 = vpop.f32.mrb[124].mxu1 }
 0xb1b   : > { %v4128_v18 = vadd.f32 %v4127_v11, %v4045_v22  ;;  %v4169_v38 = vadd.f32 %v4168_v58, %v4086_v35  ;;  %v4129_v59 = vpop.f32.mrb[93].mxu0  ;;  %v4170_v16 = vpop.f32.mrb[125].mxu1  ;;  %v4231_v22 = vld [vmem:[#allocation13 + $0x98] sm:$0xff]  ;;  %v5575_v58 = vcombine.low %v4239_v42, %v4243_v17  ;;  %v9730_v42 = vld [vmem:[#allocation91_spill] sm:$0xff] }
 0xb1c   : > { %v4130_v1 = vadd.f32 %v4129_v59, %v4047_v20  ;;  %v4171_v13 = vadd.f32 %v4170_v16, %v4088_v5  ;;  %v4131_v7 = vpop.f32.mrb[94].mxu0  ;;  %v4172_v14 = vpop.f32.mrb[126].mxu1  ;;  %v4235_v35 = vld [vmem:[#allocation13 + $0xb8] sm:$0xff]  ;;  %v5559_v20 = vcombine.low %v4223_v56, %v4227_v34  ;;  %v4242_v5 = vld [vmem:[#allocation13 + $0xf0] sm:$0xff]  ;;  %v5978_v34 = vld [vmem:[#allocation15 + $0x44] ss:$8 sps:$4 sm:$0xff]  }
 0xb1d   : > { %v4175_v52 = vadd.f32 %v4128_v18, %v7637_v3  ;;  %v4132_v15 = vpop.f32.mrb[95].mxu0  ;;  %v4173_v47 = vpop.f32.mrb[127].mxu1  ;;  %v4177_v50 = vadd.f32 %v4169_v38, %v9719_v12  ;;  %v5568_v54 = vcombine.high %v4231_v22, %v4235_v35  ;;  %v5567_v45 = vcombine.low %v4231_v22, %v4235_v35  ;;  %v4254_v59 = vld [vmem:[#allocation13 + $0x150] sm:$0xff]  ;;  %v4276_v35 = vld [vmem:[%s9726_s28] sm:$0xff]  ;;  %s6799_s28 = smov 125  }
 0xb1e   : > { %v4176_v43 = vadd.f32 %v4130_v1, %v7640_v40  ;;  %v4178_v23 = vadd.f32 %v4171_v13, %v9605_v4  ;;  %v4208_v12 = vpop.permute.xlu1 %4207  ;;  %v5584_v38 = vcombine.high %v4247_v8, %v4251_v9  ;;  %v4258_v16 = vld [vmem:[#allocation13 + $0x170] sm:$0xff]  ;;  %v4255_v1 = vld [vmem:[#allocation13 + $0x158] sm:$0xff]  ;;  %v5583_v14 = vcombine.low %v4247_v8, %v4251_v9 }
 0xb1f   : > { %v5542_v10 = vmul.f32 -1.442695, %v4175_v52  ;;  %vm4209_vm6 = vcmp.eq.s32.totalorder %v4208_v12, 1  ;;  %v4259_v13 = vld [vmem:[#allocation13 + $0x178] sm:$0xff]  ;;  %v5590_v52 = vcombine.high %v4254_v59, %v4258_v16  ;;  %v4262_v47 = vld [vmem:[#allocation13 + $0x190] sm:$0xff]  ;;  %v4293_v17 = vrot.slane %v4276_v35, %v9730_v42 }
 0xb20   : > { %v5543_v30 = vmul.f32 -1.442695, %v4176_v43  ;;  %v5544_v37 = vmul.f32 -1.442695, %v4178_v23  ;;  %vm4210_vm7 = vmpackc.low %vm4209_vm6, %vm4209_vm6  ;;  %v5592_v15 = vcombine.high %v4255_v1, %v4259_v13  ;;  %v4266_v43 = vld [vmem:[#allocation13 + $0x1b0] sm:$0xff]  ;;  %v5589_v23 = vcombine.low %v4254_v59, %v4258_v16 }
 0xb21   : > { %6228 = vpow2.f32 %v5542_v10  ;;  %v4263_v10 = vld [vmem:[#allocation13 + $0x198] sm:$0xff]  ;;  %v5964_v12 = vld [vmem:[#allocation15] ss:$8 sps:$4 sm:$0xff]  }
 0xb22   : > { %6230 = vpow2.f32 %v5543_v30  ;;  %v4267_v30 = vld [vmem:[#allocation13 + $0x1b8] sm:$0xff] }
 0xb23   : > { %6232 = vpow2.f32 %v5544_v37  ;;  %v5591_v37 = vcombine.low %v4255_v1, %v4259_v13  ;;  %v5973_v56 = vld [vmem:[#allocation15 + $0x30] ss:$8 sps:$4 sm:$0xff]  }
 0xb24   : > { %6234 = vtanh.f32 %v4177_v50  ;;  %v5598_v50 = vcombine.high %v4262_v47, %v4266_v43  ;;  %v5985_v22 = vld [vmem:[#allocation15 + $0x70] ss:$8 sps:$4 sm:$0xff]  }
 0xb2b   : > { %v6229_v29 = vpop.eup %6228 }
 0xb2c   : > { %v6231_v60 = vpop.eup %6230  ;;  %v4182_v25 = vadd.f32 1.0, %v6229_v29  ;;  %v5600_v29 = vcombine.high %v4263_v10, %v4267_v30 }
 0xb2d   : > { %v4188_v44 = vadd.f32 1.0, %v6231_v60  ;;  %v6233_v3 = vpop.eup %6232  ;;  %v4270_v60 = vld [vmem:[#allocation13 + $0x1d0] sm:$0xff] }
 0xb2e   : > { %6236 = vrcp.f32 %v4182_v25  ;;  %v6235_v49 = vpop.eup %6234  ;;  %v4195_v26 = vadd.f32 1.0, %v6233_v3  ;;  %v4274_v25 = vld [vmem:[#allocation13 + $0x1f0] sm:$0xff]  ;;  %v4275_v3 = vld [vmem:[#allocation13 + $0x1f8] sm:$0xff] }
 0xb2f   : > { %6238 = vrcp.f32 %v4188_v44  ;;  %v4271_v44 = vld [vmem:[#allocation13 + $0x1d8] sm:$0xff] }
 0xb30   : > { %6240 = vrcp.f32 %v4195_v26  ;;  %v5605_v26 = vcombine.low %v4270_v60, %v4274_v25 }
 0xb38   : > { %v6237_v40 = vpop.eup %6236 }
 0xb39   : > { %v6239_v61 = vpop.eup %6238  ;;  %v4199_v24 = vmul.f32 %v6237_v40, %v6235_v49  ;;  %v5597_v49 = vcombine.low %v4262_v47, %v4266_v43  ;;  %v5599_v40 = vcombine.low %v4263_v10, %v4267_v30 }
 0xb3a   : > { %v4198_v53 = vmul.f32 %v6239_v61, %v8773_v46  ;;  %v6241_v48 = vpop.eup %6240  ;;  %v5606_v61 = vcombine.high %v4270_v60, %v4274_v25 }
 0xb3c   : > { %v4200_v4 = vadd.f32 %v4199_v24, %v4198_v53  ;;  %v5608_v24 = vcombine.high %v4271_v44, %v4275_v3  ;;  %v5607_v53 = vcombine.low %v4271_v44, %v4275_v3 }
 0xb3e   : > { %6242 = vtanh.f32 %v4200_v4  ;;  %v5966_v4 = vld [vmem:[#allocation15 + $0x4] ss:$8 sps:$4 sm:$0xff]  }
 0xb48   : > { %v6243_v27 = vpop.eup %6242 }
 0xb49   : > { %v4202_v21 = vmul.f32 %v6243_v27, %v6241_v48  ;;  %v5969_v48 = vld [vmem:[#allocation15 + $0x14] ss:$8 sps:$4 sm:$0xff]   ;;  %v5967_v27 = vld [vmem:[#allocation15 + $0x10] ss:$8 sps:$4 sm:$0xff]  }
 0xb4b   : > { %v4203_v57 = vpack.c.bf16 %v4202_v21, %v4202_v21  ;;  %v5970_v21 = vld [vmem:[#allocation15 + $0x20] ss:$8 sps:$4 sm:$0xff]  }
 0xb4d   : > { %v8851_v46 = vsel %vm4210_vm7, %v4203_v57, %v3892_v55  ;;  %v4238_v55 = vld [vmem:[#allocation13 + $0xd0] sm:$0xff]  ;;  %v5976_v57 = vld [vmem:[#allocation15 + $0x40] ss:$8 sps:$4 sm:$0xff]  }
 0xb4e   : > { %4671 = vmatmul.mubr.bf16.vlgmr.msra.gmra.mrb[96].mxu0 %v8851_v46  ;;  %4712 = vmatmul.mubr.bf16.vlgmr.msra.gmra.mrb[128].mxu1 %v8851_v46  ;;  %v5574_v62 = vcombine.high %v4238_v55, %v4242_v5  ;;  %v5573_v11 = vcombine.low %v4238_v55, %v4242_v5  ;;  %v9729_v55 = vld [vmem:[#allocation74_spill] sm:$0xff] }
 0xb4f   : > { %4721 = vmatpush1.bf16.msra.mxu0 %v5549_v32  ;;  %4762 = vmatpush1.bf16.msra.mxu1 %v5551_v36  ;;  %v4246_v32 = vld [vmem:[#allocation13 + $0x110] sm:$0xff]  ;;  %v4285_v5 = vrot.slane %v4276_v35, %v9729_v55 }
 0xb50   : > { %4722 = vmatprep.subr.bf16.mxu0 %v5558_v63  ;;  %4763 = vmatprep.subr.bf16.mxu1 %v5560_v31  ;;  %v4250_v36 = vld [vmem:[#allocation13 + $0x130] sm:$0xff] }
 0xb51   : > { %4752 = vmatprep.mubr.bf16.mxu0 %v9326_v39  ;;  %4793 = vmatprep.mubr.bf16.mxu1 %v9326_v39  ;;  %v5582_v18 = vcombine.high %v4246_v32, %v4250_v36  ;;  %v5581_v7 = vcombine.low %v4246_v32, %v4250_v36  ;;  %v5981_v63 = vld [vmem:[#allocation15 + $0x54] ss:$8 sps:$4 sm:$0xff]   ;;  %v5979_v31 = vld [vmem:[#allocation15 + $0x50] ss:$8 sps:$4 sm:$0xff]  }
 0xb53   : > { %4723 = vmatpush1.bf16.msra.mxu0 %v5557_v51  ;;  %4764 = vmatpush1.bf16.msra.mxu1 %v5559_v20  ;;  %v9727_v51 = vld [vmem:[#allocation73_spill] sm:$0xff] }
 0xb54   : > { %4724 = vmatprep.subr.bf16.mxu0 %v5566_v28  ;;  %4765 = vmatprep.subr.bf16.mxu1 %v5568_v54  ;;  %v4281_v20 = vrot.slane %v4276_v35, %v9727_v51  ;;  %v9728_v28 = vld [vmem:[#allocation90_spill] sm:$0xff] }
 0xb55   : > { %v4289_v54 = vrot.slane %v4276_v35, %v9728_v28 }
 0xb57   : > { %4725 = vmatpush1.bf16.msra.mxu0 %v5565_v0  ;;  %4766 = vmatpush1.bf16.msra.mxu1 %v5567_v45 }
 0xb58   : > { %4726 = vmatprep.subr.bf16.mxu0 %v5574_v62  ;;  %4767 = vmatprep.subr.bf16.mxu1 %v5576_v33 }
 0xb5b   : > { %4727 = vmatpush1.bf16.msra.mxu0 %v5573_v11  ;;  %4768 = vmatpush1.bf16.msra.mxu1 %v5575_v58 }
 0xb5c   : > { %4728 = vmatprep.subr.bf16.mxu0 %v5582_v18  ;;  %4769 = vmatprep.subr.bf16.mxu1 %v5584_v38 }
 0xb5f   : > { %4729 = vmatpush1.bf16.msra.mxu0 %v5581_v7  ;;  %4770 = vmatpush1.bf16.msra.mxu1 %v5583_v14 }
 0xb60   : > { %4730 = vmatprep.subr.bf16.mxu0 %v5590_v52  ;;  %4771 = vmatprep.subr.bf16.mxu1 %v5592_v15  ;;  %v9731_v52 = vld [vmem:[#allocation72_spill] sm:$0xff] }
 0xb61   : > { %v4296_v15 = vsub.s32 4, %v9731_v52  ;;  %v4304_v47 = vsub.s32 6, %v9731_v52  ;;  %v4300_v43 = vsub.s32 5, %v9731_v52  ;;  %v4308_v10 = vsub.s32 7, %v9731_v52 }
 0xb63   : > { %4731 = vmatpush1.bf16.msra.mxu0 %v5589_v23  ;;  %4772 = vmatpush1.bf16.msra.mxu1 %v5591_v37  ;;  %v4297_v30 = vrot.slane %v4276_v35, %v4296_v15  ;;  %v4305_v23 = vrot.slane %v4276_v35, %v4304_v47  ;;  %v4301_v37 = vrot.slane %v4276_v35, %v4300_v43 }
 0xb64   : > { %4732 = vmatprep.subr.bf16.mxu0 %v5598_v50  ;;  %4773 = vmatprep.subr.bf16.mxu1 %v5600_v29  ;;  %v4309_v50 = vrot.slane %v4276_v35, %v4308_v10 }
 0xb67   : > { %4733 = vmatpush1.bf16.msra.mxu0 %v5597_v49  ;;  %4774 = vmatpush1.bf16.msra.mxu1 %v5599_v40 }
 0xb68   : > { %4734 = vmatprep.subr.bf16.mxu0 %v5606_v61  ;;  %4775 = vmatprep.subr.bf16.mxu1 %v5608_v24 }
 0xb6b   : > { %4735 = vmatpush1.bf16.msra.mxu0 %v5605_v26  ;;  %4776 = vmatpush1.bf16.msra.mxu1 %v5607_v53 }
 0xb6c   : > { %4926 = vmatprep.subr.bf16.mxu0 %v5966_v4 }
 0xb6e   : > { %4753 = vmatmul.mubr.bf16.vlgmr.msra.gmra.mrb[100].mxu0 %v8851_v46  ;;  %4794 = vmatmul.mubr.bf16.vlgmr.msra.gmra.mrb[132].mxu1 %v8851_v46  ;;  %v5982_v46 = vld [vmem:[#allocation15 + $0x60] ss:$8 sps:$4 sm:$0xff]  }
 0xb6f   : > { %4927 = vmatpush1.bf16.msra.mxu0 %v5964_v12  ;;  %4958 = vmatprep.mubr.bf16.mxu0 %v9326_v39 }
 0xb70   : > { %4928 = vmatprep.subr.bf16.mxu0 %v5969_v48 }
 0xb73   : > { %4929 = vmatpush1.bf16.msra.mxu0 %v5967_v27 }
 0xb74   : > { %4930 = vmatprep.subr.bf16.mxu0 %v5972_v19 }
 0xb77   : > { %4931 = vmatpush1.bf16.msra.mxu0 %v5970_v21 }
 0xb78   : > { %4932 = vmatprep.subr.bf16.mxu0 %v5975_v6 }
 0xb7b   : > { %4933 = vmatpush1.bf16.msra.mxu0 %v5973_v56  ;;  %v6794_v56 = vmov 2  }
 0xb7c   : > { %4934 = vmatprep.subr.bf16.mxu0 %v5978_v34  ;;  %5764 = vset.pattern.permute.xlu1 %v6794_v56  ;;  %v5031_v34 = vld [vmem:[%s630_s26] sm:$0xff]  ;;  %s8900_s26 = scalar_lea.hbm %s9735_s2, %s5633_s13 }
 0xb7d   : > { %5065 = vperm.xlu1 %5764, %v5031_v34  }
 0xb7f   : > { %4935 = vmatpush1.bf16.msra.mxu0 %v5976_v57 }
 0xb80   : > { %4936 = vmatprep.subr.bf16.mxu0 %v5981_v63 }
 0xb83   : > { %4937 = vmatpush1.bf16.msra.mxu0 %v5979_v31 }
 0xb84   : > { %4938 = vmatprep.subr.bf16.mxu0 %v5984_v41 }
 0xb87   : > { %4939 = vmatpush1.bf16.msra.mxu0 %v5982_v46 }
 0xb88   : > { %4940 = vmatprep.subr.bf16.mxu0 %v5987_v2 }
 0xb8b   : > { %4941 = vmatpush1.bf16.msra.mxu0 %v5985_v22 }
 0xc21   : > { %v4672_v0 = vpop.f32.mrb[96].mxu0  ;;  %v4713_v45 = vpop.f32.mrb[128].mxu1 }
 0xc22   : > { %v4673_v62 = vadd.f32 %v4672_v0, %v4281_v20  ;;  %v4714_v33 = vadd.f32 %v4713_v45, %v4289_v54  ;;  %v4674_v32 = vpop.f32.mrb[97].mxu0  ;;  %v4715_v36 = vpop.f32.mrb[129].mxu1 }
 0xc23   : > { %v4675_v8 = vadd.f32 %v4674_v32, %v4285_v5  ;;  %v4716_v9 = vadd.f32 %v4715_v36, %v4293_v17  ;;  %v4676_v11 = vpop.f32.mrb[98].mxu0  ;;  %v4717_v58 = vpop.f32.mrb[130].mxu1 }
 0xc24   : > { %6244 = vtanh.f32 %v4673_v62  ;;  %v4677_v18 = vpop.f32.mrb[99].mxu0  ;;  %v4718_v38 = vpop.f32.mrb[131].mxu1 }
 0xc25   : > { %6246 = vtanh.f32 %v4714_v33 }
 0xc26   : > { %6248 = vtanh.f32 %v4675_v8 }
 0xc27   : > { %6250 = vtanh.f32 %v4716_v9 }
 0xc2e   : > { %v6245_v59 = vpop.eup %6244 }
 0xc2f   : > { %v6247_v16 = vpop.eup %6246 }
 0xc30   : > { %v6249_v1 = vpop.eup %6248 }
 0xc31   : > { %v6251_v13 = vpop.eup %6250  ;;  %v4826_v7 = vpack.c.bf16 %v6249_v1, %v6245_v59 }
 0xc32   : > { %v4827_v14 = vpack.c.bf16 %v6251_v13, %v6247_v16  ;;  %v6795_v13 = vmov 3  }
 0xc33   : > { %4959 = vmatmul.mubr.bf16.vlgmr.msra.gmra.mrb[104].mxu0 %v4826_v7  ;;  %5765 = vset.pattern.permute.xlu1 %v6795_v13  ;;  %v6796_v7 = vmov 1  }
 0xc34   : > { %4968 = vmatprep.mubr.bf16.mxu0 %v9326_v39  ;;  %5763 = vset.pattern.permute.xlu0 %v6796_v7 }
 0xc3b   : > { %4969 = vmatmul.mubr.bf16.gmra.mrb[108].mxu0 %v4827_v14 }
 0xc3c   : > { %4978 = vmatprep.mubr.bf16.mxu0 %v9326_v39 }
 0xc41   : > { %v4754_v29 = vpop.f32.mrb[100].mxu0  ;;  %v4795_v60 = vpop.f32.mrb[132].mxu1 }
 0xc42   : > { %v4755_v25 = vadd.f32 %v4754_v29, %v4297_v30  ;;  %v4796_v44 = vadd.f32 %v4795_v60, %v4305_v23  ;;  %v4756_v3 = vpop.f32.mrb[101].mxu0  ;;  %v4797_v49 = vpop.f32.mrb[133].mxu1  ;;  %v9733_v29 = vlaneseq }
 0xc43   : > { %v4757_v40 = vadd.f32 %v4756_v3, %v4301_v37  ;;  %v4798_v61 = vadd.f32 %v4797_v49, %v4309_v50  ;;  %v4758_v24 = vpop.f32.mrb[102].mxu0  ;;  %v4799_v26 = vpop.f32.mrb[134].mxu1 }
 0xc44   : > { %6252 = vtanh.f32 %v4755_v25  ;;  %v4759_v53 = vpop.f32.mrb[103].mxu0  ;;  %v4800_v4 = vpop.f32.mrb[135].mxu1  ;;  %v5034_v60 = vand.u32 127, %v9733_v29 }
 0xc45   : > { %6254 = vtanh.f32 %v4796_v44  ;;  %v5066_v37 = vpop.permute.xlu1 %5065 }
 0xc46   : > { %6256 = vtanh.f32 %v4757_v40  ;;  %v5035_v49 = vadd.s32 128, %v5034_v60  ;;  %vm5067_vm10 = vcmp.eq.s32.totalorder %v5034_v60, %v5066_v37 }
 0xc47   : > { %6258 = vtanh.f32 %v4798_v61 }
 0xc48   : > { %vm5068_vm11 = vcmp.eq.s32.totalorder %v5035_v49, %v5066_v37 }
 0xc4e   : > { %v6253_v12 = vpop.eup %6252 }
 0xc4f   : > { %v6255_v48 = vpop.eup %6254 }
 0xc50   : > { %v6257_v27 = vpop.eup %6256 }
 0xc51   : > { %v6259_v19 = vpop.eup %6258  ;;  %v4828_v21 = vpack.c.bf16 %v6257_v27, %v6253_v12 }
 0xc52   : > { %v4829_v6 = vpack.c.bf16 %v6259_v19, %v6255_v48 }
 0xc53   : > { %4979 = vmatmul.mubr.bf16.gmra.mrb[112].mxu0 %v4828_v21 }
 0xc54   : > { %4988 = vmatprep.mubr.bf16.mxu0 %v9326_v39 }
 0xc5b   : > { %4989 = vmatmul.mubr.bf16.gmra.mrb[116].mxu0 %v4829_v6 }
 0xd06   : > { %v4960_v57 = vpop.f32.mrb[104].mxu0 }
 0xd07   : > { %v4962_v63 = vpop.f32.mrb[105].mxu0 }
 0xd08   : > { %v4964_v31 = vpop.f32.mrb[106].mxu0 }
 0xd09   : > { %v4999_v41 = vmax.f32 %v4960_v57, %v4964_v31  ;;  %v4966_v46 = vpop.f32.mrb[107].mxu0 }
 0xd0a   : > { %v5000_v2 = vmax.f32 %v4962_v63, %v4966_v46  ;;  %v5032_v63 = vld [vmem:[%s634_s22] sm:$0xff]  ;;  %s6670_s22 = sshll.u32 %s6800_s25, 4  ;;  %s6671_s22 = int_to_ptr.vmem [resolvable:$false] %s6670_s22 }
 0xd0b   : > { %p6673_p0 = scmp.lt.s32.totalorder %s5125_s24, %s6671_s22 }
 0xd0e   : > { %v4970_v22 = vpop.f32.mrb[108].mxu0 }
 0xd0f   : > { %v5001_v35 = vmax.f32 %v4999_v41, %v4970_v22  ;;  %v4972_v51 = vpop.f32.mrb[109].mxu0 }
 0xd10   : > { %v5002_v20 = vmax.f32 %v5000_v2, %v4972_v51  ;;  %v4974_v28 = vpop.f32.mrb[110].mxu0 }
 0xd11   : > { %v5003_v54 = vmax.f32 %v5001_v35, %v4974_v28  ;;  %v4976_v55 = vpop.f32.mrb[111].mxu0 }
 0xd12   : > { %v5004_v5 = vmax.f32 %v5002_v20, %v4976_v55 }
 0xd26   : > { %v4980_v42 = vpop.f32.mrb[112].mxu0 }
 0xd27   : > { %v5005_v17 = vmax.f32 %v5003_v54, %v4980_v42  ;;  %v4982_v0 = vpop.f32.mrb[113].mxu0 }
 0xd28   : > { %v5006_v45 = vmax.f32 %v5004_v5, %v4982_v0  ;;  %v4984_v62 = vpop.f32.mrb[114].mxu0 }
 0xd29   : > { %v5007_v33 = vmax.f32 %v5005_v17, %v4984_v62  ;;  %v4986_v32 = vpop.f32.mrb[115].mxu0 }
 0xd2a   : > { %v5008_v36 = vmax.f32 %v5006_v45, %v4986_v32 }
 0xd2e   : > { %v4990_v8 = vpop.f32.mrb[116].mxu0 }
 0xd2f   : > { %v5009_v9 = vmax.f32 %v5007_v33, %v4990_v8  ;;  %v4992_v11 = vpop.f32.mrb[117].mxu0 }
 0xd30   : > { %v5010_v58 = vmax.f32 %v5008_v36, %v4992_v11  ;;  %v4994_v18 = vpop.f32.mrb[118].mxu0 }
 0xd31   : > { %v5011_v38 = vmax.f32 %v5009_v9, %v4994_v18  ;;  %v4996_v59 = vpop.f32.mrb[119].mxu0 }
 0xd32   : > { %v5012_v16 = vmax.f32 %v5010_v58, %v4996_v59 }
 0xd33   : > { %5013 = vst [vmem:[%s8885_s14] sm:$0xff] %v5011_v38 }
 0xd34   : > { %5014 = vst [vmem:[%s8885_s14 + $0x8] sm:$0xff] %v5012_v16  ;;  %v5015_v1 = vmax.f32 %v5011_v38, %v5012_v16 }
 0xd36   : > { %5016 = vmax.xlane.f32.xlu0 %v5015_v1 }
 0xd4c   : > { %5049 = vperm.xlu0 %5763, %v5031_v34  }
 0xd50   : > { %5767 = vset.pattern.permute.xlu0 %v9326_v39 }
 0xdc3   : > { %v5017_v14 = vpop.xlane.xlu0 %5016 }
 0xdc4   : > { %v5018_v52 = vsub.f32 %v5011_v38, %v5017_v14  ;;  %v5019_v15 = vsub.f32 %v5012_v16, %v5017_v14 }
 0xdc6   : > { %v5020_v47 = vmul.f32 1.442695, %v5018_v52  ;;  %v5022_v43 = vmul.f32 1.442695, %v5019_v15 }
 0xdc8   : > { %6260 = vpow2.f32 %v5020_v47 }
 0xdc9   : > { %6262 = vpow2.f32 %v5022_v43 }
 0xdcb   : > { %v5050_v44 = vpop.permute.xlu0 %5049 }
 0xdcc   : > { %vm5051_vm8 = vcmp.eq.s32.totalorder %v5034_v60, %v5050_v44  ;;  %vm5052_vm9 = vcmp.eq.s32.totalorder %v5035_v49, %v5050_v44 }
 0xdd2   : > { %v6261_v10 = vpop.eup %6260 }
 0xdd3   : > { %v6263_v30 = vpop.eup %6262 }
 0xdd4   : > { %v5024_v23 = vadd.f32 %v6263_v30, %v6261_v10 }
 0xdd6   : > { %5025 = vadd.xlane.f32.xlu1 %v5024_v23 }
 0xde7   : > { %5081 = vperm.xlu1 %5765, %v5031_v34  }
 0xdeb   : > { %5766 = vset.pattern.permute.xlu1 %v9326_v39 }
 0xdec   : > { %5037 = vperm.xlu1 %5766, %v5031_v34  }
 0xe63   : > { %v5026_v50 = vpop.xlane.xlu1 %5025 }
 0xe64   : > { %6264 = vlog2.f32 %v5026_v50 }
 0xe67   : > { %v5082_v25 = vpop.permute.xlu1 %5081 }
 0xe68   : > { %vm5083_vm12 = vcmp.eq.s32.totalorder %v5034_v60, %v5082_v25  ;;  %vm5084_vm13 = vcmp.eq.s32.totalorder %v5035_v49, %v5082_v25 }
 0xe6b   : > { %v5038_v39 = vpop.permute.xlu1 %5037 }
 0xe6c   : > { %vm5039_vm14 = vcmp.eq.s32.totalorder %v5034_v60, %v5038_v39  ;;  %vm5040_vm15 = vcmp.eq.s32.totalorder %v5035_v49, %v5038_v39 }
 0xe6e   : > { %v6265_v3 = vpop.eup %6264 }
 0xe6f   : > { %v5028_v40 = vmul.f32 0.6931472, %v6265_v3 }
 0xe71   : > { %v5029_v61 = vsub.f32 %v5018_v52, %v5028_v40  ;;  %v5030_v24 = vsub.f32 %v5019_v15, %v5028_v40 }
 0xe73   : > { %v5069_v26 = vsel %vm5067_vm10, %v5029_v61, 0.0  ;;  %v5070_v53 = vsel %vm5068_vm11, %v5030_v24, 0.0  ;;  %v5053_v4 = vsel %vm5051_vm8, %v5029_v61, 0.0  ;;  %v5054_v12 = vsel %vm5052_vm9, %v5030_v24, 0.0 }
 0xe74   : > { %v5071_v48 = vadd.f32 %v5070_v53, %v5069_v26  ;;  %v5055_v27 = vadd.f32 %v5054_v12, %v5053_v4  ;;  %v5085_v19 = vsel %vm5083_vm12, %v5029_v61, 0.0  ;;  %v5086_v21 = vsel %vm5084_vm13, %v5030_v24, 0.0 }
 0xe75   : > { %v5087_v6 = vadd.f32 %v5086_v21, %v5085_v19  ;;  %v5041_v56 = vsel %vm5039_vm14, %v5029_v61, 0.0  ;;  %v5042_v34 = vsel %vm5040_vm15, %v5030_v24, 0.0 }
 0xe76   : > { %5072 = vadd.xlane.f32.xlu0 %v5071_v48  ;;  %5056 = vadd.xlane.f32.xlu1 %v5055_v27  ;;  %v5043_v57 = vadd.f32 %v5042_v34, %v5041_v56 }
 0xe7a   : > { %5088 = vadd.xlane.f32.xlu1 %v5087_v6 }
 0xe7e   : > { %5044 = vadd.xlane.f32.xlu1 %v5043_v57 }
 0xf03   : > { %v5057_v31 = vpop.xlane.xlu1 %5056  ;;  %v5073_v41 = vpop.xlane.xlu0 %5072 }
 0xf04   : > { %v5058_v46 = vmul.f32 %v5057_v31, %v5032_v63  ;;  %v5074_v2 = vmul.f32 %v5073_v41, %v5032_v63 }
 0xf06   : > { %5060 = vrot.lane.b32.xlu1 %v5058_v46, %s6797_s11  ;;  %5076 = vrot.lane.b32.xlu0 %v5074_v2, %s6798_s12  ;;  %s6672_s11 = scalar_lea.vmem %s6671_s22, 512 }
 0xf07   : > { %v5089_v22 = vpop.xlane.xlu1 %5088  ;;  %p6674_p2 = scmp.lt.s32.totalorder %s6672_s11, %s6666_s21 }
 0xf08   : > { %v5090_v35 = vmul.f32 %v5089_v22, %v5032_v63 }
 0xf09   : > { %p6675_p8 = por %p6674_p2, %p6673_p0 }
 0xf0a   : > { %5092 = vrot.lane.b32.xlu1 %v5090_v35, %s6799_s28 }
 0xf0b   : > { %v5045_v51 = vpop.xlane.xlu1 %5044  ;;  %p6676_p4 = pnand %p6675_p8, %p6669_p13 }
 0xf0c   : > { %v5046_v20 = vmul.f32 %v5045_v51, %v5032_v63 }
 0xf78   : > { %v5061_v28 = vpop.permute.xlu1 %5060  ;;  %v5077_v55 = vpop.permute.xlu0 %5076 }
 0xf79   : > { %v5063_v54 = vadd.f32 %v5061_v28, %v5046_v20 }
 0xf7b   : > { %v5079_v5 = vadd.f32 %v5077_v55, %v5063_v54 }
 0xf7c   : > { %v5093_v42 = vpop.permute.xlu1 %5092 }
 0xf7d   : > { %v5095_v17 = vadd.f32 %v5093_v42, %v5079_v5 }
 0xf7f   : > { %v5096_v0 = vmul.f32 0.25, %v5095_v17 }
 0xf81   : > { %v5097_v45 = vmul.f32 -0.5, %v5096_v0 }
 0xf83   : > { %5100 = vperm.xlu1 %5766, %v5097_v45  }
 0xf84   : > { %6679 = shalt.err (!%p6676_p4)
}
 0xf85   : > { %s6680_s14 = scalar_lea.hbm %s8900_s26, 256  ;;  %s6684_s13 = scalar_lea.hbm %s9735_s2, 512 }
 0xf86   : > { %p6681_p10 = scmp.ne.s32.totalorder %s8900_s26, %s6680_s14  ;;  %p6685_p5 = scmp.lt.u32.totalorder %s8900_s26, %s9735_s2 }
 0xf87   : > { %p6686_p7 = scmp.lt.u32.totalorder %s6684_s13, %s6680_s14  ;;  %p6688_p9 = scmp.lt.u32.totalorder %s6680_s14, %s8900_s26 }
 0xf88   : > { %p6682_p11 = pnand %p6681_p10, %p9736_p12 }
 0xf89   : > { %p6687_p6 = por %p6686_p7, %p6685_p5 }
 0xf8a   : > { %p6683_p3 = pneg %p6682_p11 }
 0xf8b   : > { %p6689_p1 = por %p6688_p9, %p6687_p6 }
 0xf8d   : > { %p6690_p13 = pnand %p6689_p1, %p6683_p3 }
 0xf8f   : > { %6693 = shalt.err (!%p6690_p13)
}
 0xf90   : > { %5660 = dma.vmem_to_hbm [thread:$0]  (%p9736_p12), %s5125_s24, 256, %s8900_s26, %s5105_s17  }
 0xf91   : > { %s5360_s21 = sshll.u32 %s7144_s23, 3  ;;  %s5629_s11 = sshll.u32 %s6898_s19, 7 }
 0xf92   : > { %s622_s25 = scalar_lea.vmem [#allocation17], %s5360_s21  ;;  %s9737_s14 = sld [smem:[#allocation115_spill]] }
 0xf93   : > { %s5137_s22 = sshll.u32 %s622_s25, 4  ;;  %s5110_s18 = scalar_lea.sflag [#allocation18], %s7144_s23  ;;  %s8923_s22 = int_to_ptr.vmem [resolvable:$true] %s5137_s22 }
 0xf94   : > { %s6694_s20 = scalar_lea.vmem %s8923_s22, 128  ;;  %s6801_s26 = smov [#allocation17]  }
 0xf95   : > { %p6695_p0 = scmp.ne.s32.totalorder %s8923_s22, %s6694_s20  ;;  %s6698_s19 = sshll.u32 %s6801_s26, 4  ;;  %s6699_s19 = int_to_ptr.vmem [resolvable:$false] %s6698_s19 }
 0xf96   : > { %s6700_s24 = scalar_lea.vmem %s6699_s19, 256  ;;  %p6701_p4 = scmp.lt.s32.totalorder %s8923_s22, %s6699_s19 }
 0xf97   : > { %p6696_p2 = pnand %p6695_p0, %p9736_p12  ;;  %p6702_p10 = scmp.lt.s32.totalorder %s6700_s24, %s6694_s20 }
 0xf98   : > { %s8928_s13 = scalar_lea.hbm %s9737_s14, %s5629_s11 }
 0xf99   : > { %p6697_p8 = pneg %p6696_p2  ;;  %p6703_p11 = por %p6702_p10, %p6701_p4 }
 0xf9b   : > { %p6704_p3 = pnand %p6703_p11, %p6697_p8 }
0x1002   : > { %v5101_v62 = vpop.permute.xlu1 %5100 }
0x1003   : > { %5103 = vst [vmem:[%s622_s25] sm:$0xff] %v5101_v62 }
0x1004   : > { %6707 = shalt.err (!%p6704_p3)
}
0x1005   : > { %s6708_s23 = scalar_lea.hbm %s8928_s13, 128  ;;  %s6712_s25 = scalar_lea.hbm %s9737_s14, 256 }
0x1006   : > { %p6709_p5 = scmp.ne.s32.totalorder %s8928_s13, %s6708_s23  ;;  %p6713_p9 = scmp.lt.u32.totalorder %s8928_s13, %s9737_s14 }
0x1007   : > { %p6714_p1 = scmp.lt.u32.totalorder %s6712_s25, %s6708_s23  ;;  %p6716_p0 = scmp.lt.u32.totalorder %s6708_s23, %s8928_s13 }
0x1008   : > { %p6710_p7 = pnand %p6709_p5, %p9736_p12 }
0x1009   : > { %p6715_p13 = por %p6714_p1, %p6713_p9 }
0x100a   : > { %p6711_p6 = pneg %p6710_p7 }
0x100b   : > { %p6717_p2 = por %p6716_p0, %p6715_p13 }
0x100d   : > { %p6718_p8 = pnand %p6717_p2, %p6711_p6 }
0x100f   : > { %6721 = shalt.err (!%p6718_p8)
}
0x1010   : > { %5661 = dma.vmem_to_hbm [thread:$0]  (%p9736_p12), %s8923_s22, 128, %s8928_s13, %s5110_s18  }
0x1011 PF: > { %s5149_s28 = sand.u32 1, %s6764_s29   ;;  %p9738_p4 = scmp.ne.s32.totalorder %s9260_s9, 0 }
0x1012   : > { %p9739_p10 = scmp.ge.s32.totalorder %s6776_s16, 2  ;;  %s5150_s20 = scalar_lea.sflag [#allocation6], %s5149_s28 }
0x1014   : > { %p5688_p11 = pnand %p9739_p10, %p9738_p4 }
0x1016   : > { %6755 = dma.done.wait (!%p5688_p11), %s5150_s20, 256  }
0x1017   : > { %6757 = vsyncadd (!%p5688_p11), %s5150_s20, 4294967040  ;;  %s5159_s26 = scalar_lea.sflag [#allocation18], %s5149_s28 }
0x1018   : > { %6759 = dma.done.wait (!%p5688_p11), %s5159_s26, 128  }
0x1019   : > { %6761 = vsyncadd (!%p5688_p11), %s5159_s26, 4294967168  ;;  %p34_p12 = scmp.ge.s32.totalorder %s7065_s27, 4   ;;  %s9740_s29 = smov %s6768_s30 }
0x101a   : > { %s9741_s30 = smov %s6772_s15  ;;  %s9742_s15 = smov %s7076_s5 }
0x101b   : > { %s9743_s16 = smov %s7065_s27  ;;  %36 = sbr.rel (!%p34_p12) target bundleno = 19 (0x13), region = 175 }
0x1022   :  { %5164 = vsyncpa [#allocation5], 1 }
0x1023   :  { %5166 = vsyncpa [#allocation5 + $0x1], 1 }
0x1024   :  { %5167 = vsyncpa [#allocation8], 1 }
0x1025   :  { %5168 = vsyncpa [#allocation11], 1 }
0x1026   :  { %5169 = vsyncpa [#allocation14], 1 }
0x1027   :  { %5170 = vsyncpa [#allocation6], 1 }
0x1028   :  { %5172 = vsyncpa [#allocation6 + $0x1], 1 }
0x1029   :  { %5173 = vsyncpa [#allocation18], 1 }
0x102a   :  { %5175 = vsyncpa [#allocation18 + $0x1], 1 }

</bundles_post_ra>
